<compile_context>
chip_gen: v5e
topology: v5e:2x2
jax: 0.10.0
libtpu: 0.0.40
codegen_flags: <defaults>
</compile_context>

<pallas_src>
import jax
import jax.numpy as jnp
from jax.experimental import pallas as pl
from jax.experimental.pallas import tpu as pltpu

NEG_SLOPE = 0.1
BN_EPS = 1e-5


def _lrelu(v):
    return jnp.where(v > 0, v, NEG_SLOPE * v)


def bn_fold(p):
    # eval-mode BatchNorm folded into per-channel scale/bias (f32)
    scale = p["gamma"] / jnp.sqrt(p["var"] + BN_EPS)
    bias = p["beta"] - p["mean"] * scale
    return scale, bias


# ----------------------------- fused Pallas kernel -----------------------------

def _fused_stage_kernel(p0_ref, psc_ref, w10_ref, wsc_ref, w3_ref, bn_ref,
                        o_ref, pad_ref):
    """Whole NetworkBlock(4, 64->128, stride 2) + BN/LReLU/global-pool head.

    p0_ref : (M, 9*Cin)  bf16  im2col patches of lrelu(bn1(x)) for block-0 conv1 (stride 2)
    psc_ref: (M, Cin)    bf16  stride-2 downsample of lrelu(bn1(x)) for the 1x1 shortcut
    w10_ref: (9*Cin, C)  bf16  block-0 conv1 weights
    wsc_ref: (Cin, C)    bf16  block-0 shortcut 1x1 weights
    w3_ref : (7, 9, C, C) bf16 remaining 3x3 conv weights [b0.w2, b1.w1, b1.w2, ...]
    bn_ref : (16, 1, C)  f32   folded BN scale/bias rows
    o_ref  : (N, C)      f32   pooled head output
    pad_ref: (N, 10, 10, C) f32 VMEM scratch, zero border, reused by all 3x3 convs
    """
    N, C = o_ref.shape
    H = W = 8
    M = N * H * W

    # zero the padded scratch once; every conv only rewrites the interior.
    pad_ref[...] = jnp.zeros(pad_ref.shape, pad_ref.dtype)

    def conv3x3(x2d, widx):
        """3x3 stride-1 'same' conv: 9 accumulating MXU matmuls on VMEM windows."""
        pad_ref[:, 1:H + 1, 1:W + 1, :] = x2d.reshape(N, H, W, C)
        acc = jnp.zeros((M, C), jnp.float32)
        for kh in range(3):
            for kw in range(3):
                lhs = pad_ref[:, kh:kh + H, kw:kw + W, :]
                lhs = lhs.reshape(M, C).astype(jnp.bfloat16)
                acc = acc + jnp.dot(lhs, w3_ref[widx, kh * 3 + kw],
                                    preferred_element_type=jnp.float32)
        return acc

    # ---- block 0: stride 2, 64 -> 128, 1x1-conv shortcut (not equal in/out) ----
    h = jnp.dot(p0_ref[...], w10_ref[...], preferred_element_type=jnp.float32)   # conv1
    b = _lrelu(h * bn_ref[0] + bn_ref[1])                                         # relu2(bn2)
    # TODO(synk): F.dropout(p=0.3) between relu2 and conv2 is identity in eval mode.
    sc = jnp.dot(psc_ref[...], wsc_ref[...], preferred_element_type=jnp.float32)  # shortcut
    x = sc + conv3x3(b, 0)                                                         # conv2 + add

    # ---- blocks 1..3: stride 1, equal in/out, identity shortcut ----
    n_rest = (w3_ref.shape[0] - 1) // 2
    for i in range(n_rest):
        base = 2 + 4 * i
        a = _lrelu(x * bn_ref[base] + bn_ref[base + 1])
        hh = conv3x3(a, 1 + 2 * i)
        bb = _lrelu(hh * bn_ref[base + 2] + bn_ref[base + 3])
        x = x + conv3x3(bb, 2 + 2 * i)

    # ---- head: lrelu(bn1(feat)) -> global 8x8 average pool -> (N, C) ----
    hidx = 2 + 4 * n_rest
    y = _lrelu(x * bn_ref[hidx] + bn_ref[hidx + 1])
    o_ref[...] = jnp.mean(y.reshape(N, H * W, C), axis=1)


def _fused_forward(p0, psc, w10, wsc, w3, bn_all, batch):
    c = w3.shape[-1]
    return pl.pallas_call(
        _fused_stage_kernel,
        out_shape=jax.ShapeDtypeStruct((batch, c), jnp.float32),
        in_specs=[pl.BlockSpec(memory_space=pltpu.MemorySpace.VMEM)] * 6,
        out_specs=pl.BlockSpec(memory_space=pltpu.MemorySpace.VMEM),
        scratch_shapes=[pltpu.VMEM((batch, 10, 10, c), jnp.float32)],
        compiler_params=pltpu.CompilerParams(vmem_limit_bytes=32 * 1024 * 1024),
    )(p0, psc, w10, wsc, w3, bn_all)


# ----------------------------- JAX glue (runs once, on the raw input) -----------------------------

def _im2col(x, k, stride):
    """x: (N, H, W, C), already padded. -> (N, Ho*Wo, k*k*C), Ho, Wo (tap-major columns)."""
    n, h, w, c = x.shape
    ho = (h - k) // stride + 1
    wo = (w - k) // stride + 1
    cols = []
    for kh in range(k):
        for kw in range(k):
            patch = x[:, kh:kh + stride * (ho - 1) + 1:stride,
                         kw:kw + stride * (wo - 1) + 1:stride, :]
            cols.append(patch.reshape(n, ho * wo, c))
    return jnp.concatenate(cols, axis=-1), ho, wo


def wide_resnet_aet_share_forward(x_nchw, params):
    """x_nchw: (N, 64, 16, 16) float32, NCHW like the PyTorch module."""
    x = jnp.transpose(x_nchw, (0, 2, 3, 1)).astype(jnp.float32)      # NCHW -> NHWC
    N, H, W, Cin = x.shape
    blocks = params["blocks"]
    Cout = blocks[0]["w1"].shape[-1]
    if H != 16 or W != 16:
        raise ValueError("run_type=0 stage expects 16x16 input so that the stride-2 "
                         "block yields 8x8 maps and avg_pool2d(8) is a global pool.")

    # block-0 first activation + stride-2 im2col done in XLA (raw input read once).
    s1, b1 = bn_fold(blocks[0]["bn1"])
    a0 = _lrelu(x * s1 + b1)
    a0p = jnp.pad(a0, ((0, 0), (1, 1), (1, 1), (0, 0)))
    p0, ho, wo = _im2col(a0p, 3, 2)                                  # (N, 64, 9*Cin)
    m = N * ho * wo
    p0 = p0.reshape(m, 9 * Cin).astype(jnp.bfloat16)
    psc = a0[:, ::2, ::2, :].reshape(m, Cin).astype(jnp.bfloat16)

    # fold weights / BN params into MXU-friendly bf16 / f32 tables.
    w10 = blocks[0]["w1"].reshape(9 * Cin, Cout).astype(jnp.bfloat16)
    wsc = blocks[0]["w_short"].reshape(Cin, Cout).astype(jnp.bfloat16)
    w3_list = [blocks[0]["w2"]]
    for blk in blocks[1:]:
        w3_list += [blk["w1"], blk["w2"]]
    w3 = jnp.stack([w.reshape(9, Cout, Cout) for w in w3_list]).astype(jnp.bfloat16)

    bn_rows = list(bn_fold(blocks[0]["bn2"]))
    for blk in blocks[1:]:
        bn_rows += list(bn_fold(blk["bn1"])) + list(bn_fold(blk["bn2"]))
    bn_rows += list(bn_fold(params["head_bn"]))
    bn_all = jnp.stack(bn_rows)[:, None, :]                          # (16, 1, Cout) f32

    return _fused_forward(p0, psc, w10, wsc, w3, bn_all, N)


# ----------------------------- pure-JAX reference (correctness check) -----------------------------

def reference_forward(x_nchw, params):
    x = jnp.transpose(x_nchw, (0, 2, 3, 1)).astype(jnp.float32)
    blocks = params["blocks"]

    def conv(v, w_hwio, stride, pad):
        return jax.lax.conv_general_dilated(
            v.astype(jnp.bfloat16), w_hwio.astype(jnp.bfloat16),
            window_strides=(stride, stride), padding=((pad, pad), (pad, pad)),
            dimension_numbers=("NHWC", "HWIO", "NHWC"),
            preferred_element_type=jnp.float32)

    for i, blk in enumerate(blocks):
        stride = 2 if i == 0 else 1
        s1, b1 = bn_fold(blk["bn1"])
        a = _lrelu(x * s1 + b1)
        h = conv(a, blk["w1"], stride, 1)
        s2, b2 = bn_fold(blk["bn2"])
        bb = _lrelu(h * s2 + b2)
        o = conv(bb, blk["w2"], 1, 1)
        sc = x if i > 0 else conv(a, blk["w_short"], stride, 0)
        x = sc + o
    sh, bh = bn_fold(params["head_bn"])
    y = _lrelu(x * sh + bh)
    return jnp.mean(y, axis=(1, 2))


# ----------------------------- parameter construction -----------------------------

def init_bn(key, c):
    k1, k2, k3, k4 = jax.random.split(key, 4)
    return dict(gamma=jax.random.uniform(k1, (c,), minval=0.5, maxval=1.5),
                beta=0.1 * jax.random.normal(k2, (c,)),
                mean=0.1 * jax.random.normal(k3, (c,)),
                var=jax.random.uniform(k4, (c,), minval=0.5, maxval=1.5))


def init_conv(key, k, cin, cout):
    fan_in = k * k * cin
    return (jax.random.normal(key, (k, k, cin, cout), dtype=jnp.float32)
            * jnp.sqrt(2.0 / fan_in))


def build_params(key, num_layer_in_block=4, widen_factor=2):
    # run_type == 0: NetworkBlock(4, nChannels[2]=64, nChannels[3]=128, stride=2)
    nC = [16, 16 * widen_factor, 32 * widen_factor, 64 * widen_factor, 128 * widen_factor]
    cin, cout = nC[2], nC[3]
    blocks = []
    for i in range(num_layer_in_block):
        key, k1, k2, k3, k4, k5 = jax.random.split(key, 6)
        ci = cin if i == 0 else cout
        blk = dict(bn1=init_bn(k1, ci),
                   w1=init_conv(k2, 3, ci, cout),
                   bn2=init_bn(k3, cout),
                   w2=init_conv(k4, 3, cout, cout))
        if i == 0:
            blk["w_short"] = init_conv(k5, 1, ci, cout)
        blocks.append(blk)
    key, kh = jax.random.split(key)
    return dict(blocks=blocks, head_bn=init_bn(kh, cout)), cout


if __name__ == "__main__":
    key = jax.random.PRNGKey(0)
    kx, kp = jax.random.split(key)
    params, n_channels = build_params(kp, num_layer_in_block=4, widen_factor=2)
    # run_type=0 expects nChannels[2]=64 input channels; 16x16 spatial so the stride-2
    # stage yields 8x8 maps and avg_pool2d(8) is a global pool.
    x = jax.random.normal(kx, (2, 64, 16, 16), dtype=jnp.float32)     # NCHW, like PyTorch

    fwd = jax.jit(wide_resnet_aet_share_forward)
    out = jax.block_until_ready(fwd(x, params))
    assert out.shape == (2, n_channels), out.shape
    assert bool(jnp.all(jnp.isfinite(out)))

    ref = jax.block_until_ready(jax.jit(reference_forward)(x, params))
    err = float(jnp.max(jnp.abs(out - ref)))
    assert err < 3e-2, f"max abs error vs reference = {err}"
    print("KERNEL_OK")
</pallas_src>

<mosaic_0001>
module attributes {stable_mosaic.version = 11 : i64} {
  func.func @_fused_stage_kernel(%arg0: memref<128x576xbf16, #tpu.memory_space<vmem>>, %arg1: memref<128x64xbf16, #tpu.memory_space<vmem>>, %arg2: memref<576x128xbf16, #tpu.memory_space<vmem>>, %arg3: memref<64x128xbf16, #tpu.memory_space<vmem>>, %arg4: memref<7x9x128x128xbf16, #tpu.memory_space<vmem>>, %arg5: memref<16x1x128xf32, #tpu.memory_space<vmem>>, %arg6: memref<2x128xf32, #tpu.memory_space<vmem>>, %arg7: memref<2x10x10x128xf32, #tpu.memory_space<vmem>>) attributes {dimension_semantics = [], scalar_prefetch = 0 : i64, scratch_operands = 1 : i64, tpu.core_type = #tpu.core_type<tc>} {
    %cst = arith.constant 0.000000e+00 : f32
    %0 = vector.broadcast %cst : f32 to vector<2x10x10x128xf32>
    %c0 = arith.constant 0 : index
    %c0_0 = arith.constant 0 : index
    %c0_1 = arith.constant 0 : index
    %c0_2 = arith.constant 0 : index
    %1 = vector.load %arg7[%c0, %c0_0, %c0_1, %c0_2] : memref<2x10x10x128xf32, #tpu.memory_space<vmem>>, vector<2x10x10x128xf32>
    tpu.vector_store %arg7[%c0, %c0_0, %c0_1, %c0_2], %0 {strides = array<i32>} : memref<2x10x10x128xf32, #tpu.memory_space<vmem>>, vector<2x10x10x128xf32>,
    %c0_3 = arith.constant 0 : index
    %c0_4 = arith.constant 0 : index
    %2 = vector.load %arg0[%c0_3, %c0_4] : memref<128x576xbf16, #tpu.memory_space<vmem>>, vector<128x576xbf16>
    %c0_5 = arith.constant 0 : index
    %c0_6 = arith.constant 0 : index
    %3 = vector.load %arg2[%c0_5, %c0_6] : memref<576x128xbf16, #tpu.memory_space<vmem>>, vector<576x128xbf16>
    %cst_7 = arith.constant dense<0.000000e+00> : vector<128x128xf32>
    %4 = tpu.matmul %2, %3, %cst_7 {dimension_numbers = #tpu.dot_dimension_numbers<[1], [0], [0], [1], [0, 0, 1, 1], [], []>} : vector<128x576xbf16>, vector<576x128xbf16>, vector<128x128xf32> -> vector<128x128xf32>
    %c0_8 = arith.constant 0 : index
    %c0_9 = arith.constant 0 : index
    %c0_10 = arith.constant 0 : index
    %5 = vector.load %arg5[%c0_8, %c0_9, %c0_10] : memref<16x1x128xf32, #tpu.memory_space<vmem>>, vector<1x1x128xf32>
    %6 = vector.shape_cast %5 : vector<1x1x128xf32> to vector<1x128xf32>
    %7 = vector.broadcast %6 : vector<1x128xf32> to vector<128x128xf32>
    %8 = arith.mulf %4, %7 : vector<128x128xf32>
    %c1 = arith.constant 1 : index
    %c0_11 = arith.constant 0 : index
    %c0_12 = arith.constant 0 : index
    %9 = vector.load %arg5[%c1, %c0_11, %c0_12] : memref<16x1x128xf32, #tpu.memory_space<vmem>>, vector<1x1x128xf32>
    %10 = vector.shape_cast %9 : vector<1x1x128xf32> to vector<1x128xf32>
    %11 = vector.broadcast %10 : vector<1x128xf32> to vector<128x128xf32>
    %12 = arith.addf %8, %11 : vector<128x128xf32>
    %cst_13 = arith.constant 0.000000e+00 : f32
    %13 = vector.broadcast %cst_13 : f32 to vector<128x128xf32>
    %14 = arith.cmpf ogt, %12, %13 : vector<128x128xf32>
    %cst_14 = arith.constant 1.000000e-01 : f32
    %15 = vector.broadcast %cst_14 : f32 to vector<128x128xf32>
    %16 = arith.mulf %15, %12 : vector<128x128xf32>
    %17 = arith.select %14, %12, %16 : vector<128x128xi1>, vector<128x128xf32>
    %c0_15 = arith.constant 0 : index
    %c0_16 = arith.constant 0 : index
    %18 = vector.load %arg1[%c0_15, %c0_16] : memref<128x64xbf16, #tpu.memory_space<vmem>>, vector<128x64xbf16>
    %c0_17 = arith.constant 0 : index
    %c0_18 = arith.constant 0 : index
    %19 = vector.load %arg3[%c0_17, %c0_18] : memref<64x128xbf16, #tpu.memory_space<vmem>>, vector<64x128xbf16>
    %cst_19 = arith.constant dense<0.000000e+00> : vector<128x128xf32>
    %20 = tpu.matmul %18, %19, %cst_19 {dimension_numbers = #tpu.dot_dimension_numbers<[1], [0], [0], [1], [0, 0, 1, 1], [], []>} : vector<128x64xbf16>, vector<64x128xbf16>, vector<128x128xf32> -> vector<128x128xf32>
    %21 = vector.shape_cast %17 : vector<128x128xf32> to vector<2x8x8x128xf32>
    %c0_20 = arith.constant 0 : index
    %c1_21 = arith.constant 1 : index
    %c1_22 = arith.constant 1 : index
    %c0_23 = arith.constant 0 : index
    %22 = vector.load %arg7[%c0_20, %c1_21, %c1_22, %c0_23] : memref<2x10x10x128xf32, #tpu.memory_space<vmem>>, vector<2x8x8x128xf32>
    tpu.vector_store %arg7[%c0_20, %c1_21, %c1_22, %c0_23], %21 {strides = array<i32>} : memref<2x10x10x128xf32, #tpu.memory_space<vmem>>, vector<2x8x8x128xf32>,
    %cst_24 = arith.constant 0.000000e+00 : f32
    %23 = vector.broadcast %cst_24 : f32 to vector<128x128xf32>
    %c0_25 = arith.constant 0 : index
    %c0_26 = arith.constant 0 : index
    %c0_27 = arith.constant 0 : index
    %c0_28 = arith.constant 0 : index
    %24 = vector.load %arg7[%c0_25, %c0_26, %c0_27, %c0_28] : memref<2x10x10x128xf32, #tpu.memory_space<vmem>>, vector<2x8x8x128xf32>
    %25 = vector.shape_cast %24 : vector<2x8x8x128xf32> to vector<128x128xf32>
    %26 = arith.truncf %25 : vector<128x128xf32> to vector<128x128xbf16>
    %c0_29 = arith.constant 0 : index
    %c0_30 = arith.constant 0 : index
    %c0_31 = arith.constant 0 : index
    %c0_32 = arith.constant 0 : index
    %27 = vector.load %arg4[%c0_29, %c0_30, %c0_31, %c0_32] : memref<7x9x128x128xbf16, #tpu.memory_space<vmem>>, vector<1x1x128x128xbf16>
    %28 = vector.shape_cast %27 : vector<1x1x128x128xbf16> to vector<128x128xbf16>
    %cst_33 = arith.constant dense<0.000000e+00> : vector<128x128xf32>
    %29 = tpu.matmul %26, %28, %cst_33 {dimension_numbers = #tpu.dot_dimension_numbers<[1], [0], [0], [1], [0, 0, 1, 1], [], []>} : vector<128x128xbf16>, vector<128x128xbf16>, vector<128x128xf32> -> vector<128x128xf32>
    %30 = arith.addf %23, %29 : vector<128x128xf32>
    %c0_34 = arith.constant 0 : index
    %c0_35 = arith.constant 0 : index
    %c1_36 = arith.constant 1 : index
    %c0_37 = arith.constant 0 : index
    %31 = vector.load %arg7[%c0_34, %c0_35, %c1_36, %c0_37] : memref<2x10x10x128xf32, #tpu.memory_space<vmem>>, vector<2x8x8x128xf32>
    %32 = vector.shape_cast %31 : vector<2x8x8x128xf32> to vector<128x128xf32>
    %33 = arith.truncf %32 : vector<128x128xf32> to vector<128x128xbf16>
    %c0_38 = arith.constant 0 : index
    %c1_39 = arith.constant 1 : index
    %c0_40 = arith.constant 0 : index
    %c0_41 = arith.constant 0 : index
    %34 = vector.load %arg4[%c0_38, %c1_39, %c0_40, %c0_41] : memref<7x9x128x128xbf16, #tpu.memory_space<vmem>>, vector<1x1x128x128xbf16>
    %35 = vector.shape_cast %34 : vector<1x1x128x128xbf16> to vector<128x128xbf16>
    %cst_42 = arith.constant dense<0.000000e+00> : vector<128x128xf32>
    %36 = tpu.matmul %33, %35, %cst_42 {dimension_numbers = #tpu.dot_dimension_numbers<[1], [0], [0], [1], [0, 0, 1, 1], [], []>} : vector<128x128xbf16>, vector<128x128xbf16>, vector<128x128xf32> -> vector<128x128xf32>
    %37 = arith.addf %30, %36 : vector<128x128xf32>
    %c0_43 = arith.constant 0 : index
    %c0_44 = arith.constant 0 : index
    %c2 = arith.constant 2 : index
    %c0_45 = arith.constant 0 : index
    %38 = vector.load %arg7[%c0_43, %c0_44, %c2, %c0_45] : memref<2x10x10x128xf32, #tpu.memory_space<vmem>>, vector<2x8x8x128xf32>
    %39 = vector.shape_cast %38 : vector<2x8x8x128xf32> to vector<128x128xf32>
    %40 = arith.truncf %39 : vector<128x128xf32> to vector<128x128xbf16>
    %c0_46 = arith.constant 0 : index
    %c2_47 = arith.constant 2 : index
    %c0_48 = arith.constant 0 : index
    %c0_49 = arith.constant 0 : index
    %41 = vector.load %arg4[%c0_46, %c2_47, %c0_48, %c0_49] : memref<7x9x128x128xbf16, #tpu.memory_space<vmem>>, vector<1x1x128x128xbf16>
    %42 = vector.shape_cast %41 : vector<1x1x128x128xbf16> to vector<128x128xbf16>
    %cst_50 = arith.constant dense<0.000000e+00> : vector<128x128xf32>
    %43 = tpu.matmul %40, %42, %cst_50 {dimension_numbers = #tpu.dot_dimension_numbers<[1], [0], [0], [1], [0, 0, 1, 1], [], []>} : vector<128x128xbf16>, vector<128x128xbf16>, vector<128x128xf32> -> vector<128x128xf32>
    %44 = arith.addf %37, %43 : vector<128x128xf32>
    %c0_51 = arith.constant 0 : index
    %c1_52 = arith.constant 1 : index
    %c0_53 = arith.constant 0 : index
    %c0_54 = arith.constant 0 : index
    %45 = vector.load %arg7[%c0_51, %c1_52, %c0_53, %c0_54] : memref<2x10x10x128xf32, #tpu.memory_space<vmem>>, vector<2x8x8x128xf32>
    %46 = vector.shape_cast %45 : vector<2x8x8x128xf32> to vector<128x128xf32>
    %47 = arith.truncf %46 : vector<128x128xf32> to vector<128x128xbf16>
    %c0_55 = arith.constant 0 : index
    %c3 = arith.constant 3 : index
    %c0_56 = arith.constant 0 : index
    %c0_57 = arith.constant 0 : index
    %48 = vector.load %arg4[%c0_55, %c3, %c0_56, %c0_57] : memref<7x9x128x128xbf16, #tpu.memory_space<vmem>>, vector<1x1x128x128xbf16>
    %49 = vector.shape_cast %48 : vector<1x1x128x128xbf16> to vector<128x128xbf16>
    %cst_58 = arith.constant dense<0.000000e+00> : vector<128x128xf32>
    %50 = tpu.matmul %47, %49, %cst_58 {dimension_numbers = #tpu.dot_dimension_numbers<[1], [0], [0], [1], [0, 0, 1, 1], [], []>} : vector<128x128xbf16>, vector<128x128xbf16>, vector<128x128xf32> -> vector<128x128xf32>
    %51 = arith.addf %44, %50 : vector<128x128xf32>
    %c0_59 = arith.constant 0 : index
    %c1_60 = arith.constant 1 : index
    %c1_61 = arith.constant 1 : index
    %c0_62 = arith.constant 0 : index
    %52 = vector.load %arg7[%c0_59, %c1_60, %c1_61, %c0_62] : memref<2x10x10x128xf32, #tpu.memory_space<vmem>>, vector<2x8x8x128xf32>
    %53 = vector.shape_cast %52 : vector<2x8x8x128xf32> to vector<128x128xf32>
    %54 = arith.truncf %53 : vector<128x128xf32> to vector<128x128xbf16>
    %c0_63 = arith.constant 0 : index
    %c4 = arith.constant 4 : index
    %c0_64 = arith.constant 0 : index
    %c0_65 = arith.constant 0 : index
    %55 = vector.load %arg4[%c0_63, %c4, %c0_64, %c0_65] : memref<7x9x128x128xbf16, #tpu.memory_space<vmem>>, vector<1x1x128x128xbf16>
    %56 = vector.shape_cast %55 : vector<1x1x128x128xbf16> to vector<128x128xbf16>
    %cst_66 = arith.constant dense<0.000000e+00> : vector<128x128xf32>
    %57 = tpu.matmul %54, %56, %cst_66 {dimension_numbers = #tpu.dot_dimension_numbers<[1], [0], [0], [1], [0, 0, 1, 1], [], []>} : vector<128x128xbf16>, vector<128x128xbf16>, vector<128x128xf32> -> vector<128x128xf32>
    %58 = arith.addf %51, %57 : vector<128x128xf32>
    %c0_67 = arith.constant 0 : index
    %c1_68 = arith.constant 1 : index
    %c2_69 = arith.constant 2 : index
    %c0_70 = arith.constant 0 : index
    %59 = vector.load %arg7[%c0_67, %c1_68, %c2_69, %c0_70] : memref<2x10x10x128xf32, #tpu.memory_space<vmem>>, vector<2x8x8x128xf32>
    %60 = vector.shape_cast %59 : vector<2x8x8x128xf32> to vector<128x128xf32>
    %61 = arith.truncf %60 : vector<128x128xf32> to vector<128x128xbf16>
    %c0_71 = arith.constant 0 : index
    %c5 = arith.constant 5 : index
    %c0_72 = arith.constant 0 : index
    %c0_73 = arith.constant 0 : index
    %62 = vector.load %arg4[%c0_71, %c5, %c0_72, %c0_73] : memref<7x9x128x128xbf16, #tpu.memory_space<vmem>>, vector<1x1x128x128xbf16>
    %63 = vector.shape_cast %62 : vector<1x1x128x128xbf16> to vector<128x128xbf16>
    %cst_74 = arith.constant dense<0.000000e+00> : vector<128x128xf32>
    %64 = tpu.matmul %61, %63, %cst_74 {dimension_numbers = #tpu.dot_dimension_numbers<[1], [0], [0], [1], [0, 0, 1, 1], [], []>} : vector<128x128xbf16>, vector<128x128xbf16>, vector<128x128xf32> -> vector<128x128xf32>
    %65 = arith.addf %58, %64 : vector<128x128xf32>
    %c0_75 = arith.constant 0 : index
    %c2_76 = arith.constant 2 : index
    %c0_77 = arith.constant 0 : index
    %c0_78 = arith.constant 0 : index
    %66 = vector.load %arg7[%c0_75, %c2_76, %c0_77, %c0_78] : memref<2x10x10x128xf32, #tpu.memory_space<vmem>>, vector<2x8x8x128xf32>
    %67 = vector.shape_cast %66 : vector<2x8x8x128xf32> to vector<128x128xf32>
    %68 = arith.truncf %67 : vector<128x128xf32> to vector<128x128xbf16>
    %c0_79 = arith.constant 0 : index
    %c6 = arith.constant 6 : index
    %c0_80 = arith.constant 0 : index
    %c0_81 = arith.constant 0 : index
    %69 = vector.load %arg4[%c0_79, %c6, %c0_80, %c0_81] : memref<7x9x128x128xbf16, #tpu.memory_space<vmem>>, vector<1x1x128x128xbf16>
    %70 = vector.shape_cast %69 : vector<1x1x128x128xbf16> to vector<128x128xbf16>
    %cst_82 = arith.constant dense<0.000000e+00> : vector<128x128xf32>
    %71 = tpu.matmul %68, %70, %cst_82 {dimension_numbers = #tpu.dot_dimension_numbers<[1], [0], [0], [1], [0, 0, 1, 1], [], []>} : vector<128x128xbf16>, vector<128x128xbf16>, vector<128x128xf32> -> vector<128x128xf32>
    %72 = arith.addf %65, %71 : vector<128x128xf32>
    %c0_83 = arith.constant 0 : index
    %c2_84 = arith.constant 2 : index
    %c1_85 = arith.constant 1 : index
    %c0_86 = arith.constant 0 : index
    %73 = vector.load %arg7[%c0_83, %c2_84, %c1_85, %c0_86] : memref<2x10x10x128xf32, #tpu.memory_space<vmem>>, vector<2x8x8x128xf32>
    %74 = vector.shape_cast %73 : vector<2x8x8x128xf32> to vector<128x128xf32>
    %75 = arith.truncf %74 : vector<128x128xf32> to vector<128x128xbf16>
    %c0_87 = arith.constant 0 : index
    %c7 = arith.constant 7 : index
    %c0_88 = arith.constant 0 : index
    %c0_89 = arith.constant 0 : index
    %76 = vector.load %arg4[%c0_87, %c7, %c0_88, %c0_89] : memref<7x9x128x128xbf16, #tpu.memory_space<vmem>>, vector<1x1x128x128xbf16>
    %77 = vector.shape_cast %76 : vector<1x1x128x128xbf16> to vector<128x128xbf16>
    %cst_90 = arith.constant dense<0.000000e+00> : vector<128x128xf32>
    %78 = tpu.matmul %75, %77, %cst_90 {dimension_numbers = #tpu.dot_dimension_numbers<[1], [0], [0], [1], [0, 0, 1, 1], [], []>} : vector<128x128xbf16>, vector<128x128xbf16>, vector<128x128xf32> -> vector<128x128xf32>
    %79 = arith.addf %72, %78 : vector<128x128xf32>
    %c0_91 = arith.constant 0 : index
    %c2_92 = arith.constant 2 : index
    %c2_93 = arith.constant 2 : index
    %c0_94 = arith.constant 0 : index
    %80 = vector.load %arg7[%c0_91, %c2_92, %c2_93, %c0_94] : memref<2x10x10x128xf32, #tpu.memory_space<vmem>>, vector<2x8x8x128xf32>
    %81 = vector.shape_cast %80 : vector<2x8x8x128xf32> to vector<128x128xf32>
    %82 = arith.truncf %81 : vector<128x128xf32> to vector<128x128xbf16>
    %c0_95 = arith.constant 0 : index
    %c8 = arith.constant 8 : index
    %c0_96 = arith.constant 0 : index
    %c0_97 = arith.constant 0 : index
    %83 = vector.load %arg4[%c0_95, %c8, %c0_96, %c0_97] : memref<7x9x128x128xbf16, #tpu.memory_space<vmem>>, vector<1x1x128x128xbf16>
    %84 = vector.shape_cast %83 : vector<1x1x128x128xbf16> to vector<128x128xbf16>
    %cst_98 = arith.constant dense<0.000000e+00> : vector<128x128xf32>
    %85 = tpu.matmul %82, %84, %cst_98 {dimension_numbers = #tpu.dot_dimension_numbers<[1], [0], [0], [1], [0, 0, 1, 1], [], []>} : vector<128x128xbf16>, vector<128x128xbf16>, vector<128x128xf32> -> vector<128x128xf32>
    %86 = arith.addf %79, %85 : vector<128x128xf32>
    %87 = arith.addf %20, %86 : vector<128x128xf32>
    %c2_99 = arith.constant 2 : index
    %c0_100 = arith.constant 0 : index
    %c0_101 = arith.constant 0 : index
    %88 = vector.load %arg5[%c2_99, %c0_100, %c0_101] : memref<16x1x128xf32, #tpu.memory_space<vmem>>, vector<1x1x128xf32>
    %89 = vector.shape_cast %88 : vector<1x1x128xf32> to vector<1x128xf32>
    %90 = vector.broadcast %89 : vector<1x128xf32> to vector<128x128xf32>
    %91 = arith.mulf %87, %90 : vector<128x128xf32>
    %c3_102 = arith.constant 3 : index
    %c0_103 = arith.constant 0 : index
    %c0_104 = arith.constant 0 : index
    %92 = vector.load %arg5[%c3_102, %c0_103, %c0_104] : memref<16x1x128xf32, #tpu.memory_space<vmem>>, vector<1x1x128xf32>
    %93 = vector.shape_cast %92 : vector<1x1x128xf32> to vector<1x128xf32>
    %94 = vector.broadcast %93 : vector<1x128xf32> to vector<128x128xf32>
    %95 = arith.addf %91, %94 : vector<128x128xf32>
    %cst_105 = arith.constant 0.000000e+00 : f32
    %96 = vector.broadcast %cst_105 : f32 to vector<128x128xf32>
    %97 = arith.cmpf ogt, %95, %96 : vector<128x128xf32>
    %cst_106 = arith.constant 1.000000e-01 : f32
    %98 = vector.broadcast %cst_106 : f32 to vector<128x128xf32>
    %99 = arith.mulf %98, %95 : vector<128x128xf32>
    %100 = arith.select %97, %95, %99 : vector<128x128xi1>, vector<128x128xf32>
    %101 = vector.shape_cast %100 : vector<128x128xf32> to vector<2x8x8x128xf32>
    %c0_107 = arith.constant 0 : index
    %c1_108 = arith.constant 1 : index
    %c1_109 = arith.constant 1 : index
    %c0_110 = arith.constant 0 : index
    %102 = vector.load %arg7[%c0_107, %c1_108, %c1_109, %c0_110] : memref<2x10x10x128xf32, #tpu.memory_space<vmem>>, vector<2x8x8x128xf32>
    tpu.vector_store %arg7[%c0_107, %c1_108, %c1_109, %c0_110], %101 {strides = array<i32>} : memref<2x10x10x128xf32, #tpu.memory_space<vmem>>, vector<2x8x8x128xf32>,
    %cst_111 = arith.constant 0.000000e+00 : f32
    %103 = vector.broadcast %cst_111 : f32 to vector<128x128xf32>
    %c0_112 = arith.constant 0 : index
    %c0_113 = arith.constant 0 : index
    %c0_114 = arith.constant 0 : index
    %c0_115 = arith.constant 0 : index
    %104 = vector.load %arg7[%c0_112, %c0_113, %c0_114, %c0_115] : memref<2x10x10x128xf32, #tpu.memory_space<vmem>>, vector<2x8x8x128xf32>
    %105 = vector.shape_cast %104 : vector<2x8x8x128xf32> to vector<128x128xf32>
    %106 = arith.truncf %105 : vector<128x128xf32> to vector<128x128xbf16>
    %c1_116 = arith.constant 1 : index
    %c0_117 = arith.constant 0 : index
    %c0_118 = arith.constant 0 : index
    %c0_119 = arith.constant 0 : index
    %107 = vector.load %arg4[%c1_116, %c0_117, %c0_118, %c0_119] : memref<7x9x128x128xbf16, #tpu.memory_space<vmem>>, vector<1x1x128x128xbf16>
    %108 = vector.shape_cast %107 : vector<1x1x128x128xbf16> to vector<128x128xbf16>
    %cst_120 = arith.constant dense<0.000000e+00> : vector<128x128xf32>
    %109 = tpu.matmul %106, %108, %cst_120 {dimension_numbers = #tpu.dot_dimension_numbers<[1], [0], [0], [1], [0, 0, 1, 1], [], []>} : vector<128x128xbf16>, vector<128x128xbf16>, vector<128x128xf32> -> vector<128x128xf32>
    %110 = arith.addf %103, %109 : vector<128x128xf32>
    %c0_121 = arith.constant 0 : index
    %c0_122 = arith.constant 0 : index
    %c1_123 = arith.constant 1 : index
    %c0_124 = arith.constant 0 : index
    %111 = vector.load %arg7[%c0_121, %c0_122, %c1_123, %c0_124] : memref<2x10x10x128xf32, #tpu.memory_space<vmem>>, vector<2x8x8x128xf32>
    %112 = vector.shape_cast %111 : vector<2x8x8x128xf32> to vector<128x128xf32>
    %113 = arith.truncf %112 : vector<128x128xf32> to vector<128x128xbf16>
    %c1_125 = arith.constant 1 : index
    %c1_126 = arith.constant 1 : index
    %c0_127 = arith.constant 0 : index
    %c0_128 = arith.constant 0 : index
    %114 = vector.load %arg4[%c1_125, %c1_126, %c0_127, %c0_128] : memref<7x9x128x128xbf16, #tpu.memory_space<vmem>>, vector<1x1x128x128xbf16>
    %115 = vector.shape_cast %114 : vector<1x1x128x128xbf16> to vector<128x128xbf16>
    %cst_129 = arith.constant dense<0.000000e+00> : vector<128x128xf32>
    %116 = tpu.matmul %113, %115, %cst_129 {dimension_numbers = #tpu.dot_dimension_numbers<[1], [0], [0], [1], [0, 0, 1, 1], [], []>} : vector<128x128xbf16>, vector<128x128xbf16>, vector<128x128xf32> -> vector<128x128xf32>
    %117 = arith.addf %110, %116 : vector<128x128xf32>
    %c0_130 = arith.constant 0 : index
    %c0_131 = arith.constant 0 : index
    %c2_132 = arith.constant 2 : index
    %c0_133 = arith.constant 0 : index
    %118 = vector.load %arg7[%c0_130, %c0_131, %c2_132, %c0_133] : memref<2x10x10x128xf32, #tpu.memory_space<vmem>>, vector<2x8x8x128xf32>
    %119 = vector.shape_cast %118 : vector<2x8x8x128xf32> to vector<128x128xf32>
    %120 = arith.truncf %119 : vector<128x128xf32> to vector<128x128xbf16>
    %c1_134 = arith.constant 1 : index
    %c2_135 = arith.constant 2 : index
    %c0_136 = arith.constant 0 : index
    %c0_137 = arith.constant 0 : index
    %121 = vector.load %arg4[%c1_134, %c2_135, %c0_136, %c0_137] : memref<7x9x128x128xbf16, #tpu.memory_space<vmem>>, vector<1x1x128x128xbf16>
    %122 = vector.shape_cast %121 : vector<1x1x128x128xbf16> to vector<128x128xbf16>
    %cst_138 = arith.constant dense<0.000000e+00> : vector<128x128xf32>
    %123 = tpu.matmul %120, %122, %cst_138 {dimension_numbers = #tpu.dot_dimension_numbers<[1], [0], [0], [1], [0, 0, 1, 1], [], []>} : vector<128x128xbf16>, vector<128x128xbf16>, vector<128x128xf32> -> vector<128x128xf32>
    %124 = arith.addf %117, %123 : vector<128x128xf32>
    %c0_139 = arith.constant 0 : index
    %c1_140 = arith.constant 1 : index
    %c0_141 = arith.constant 0 : index
    %c0_142 = arith.constant 0 : index
    %125 = vector.load %arg7[%c0_139, %c1_140, %c0_141, %c0_142] : memref<2x10x10x128xf32, #tpu.memory_space<vmem>>, vector<2x8x8x128xf32>
    %126 = vector.shape_cast %125 : vector<2x8x8x128xf32> to vector<128x128xf32>
    %127 = arith.truncf %126 : vector<128x128xf32> to vector<128x128xbf16>
    %c1_143 = arith.constant 1 : index
    %c3_144 = arith.constant 3 : index
    %c0_145 = arith.constant 0 : index
    %c0_146 = arith.constant 0 : index
    %128 = vector.load %arg4[%c1_143, %c3_144, %c0_145, %c0_146] : memref<7x9x128x128xbf16, #tpu.memory_space<vmem>>, vector<1x1x128x128xbf16>
    %129 = vector.shape_cast %128 : vector<1x1x128x128xbf16> to vector<128x128xbf16>
    %cst_147 = arith.constant dense<0.000000e+00> : vector<128x128xf32>
    %130 = tpu.matmul %127, %129, %cst_147 {dimension_numbers = #tpu.dot_dimension_numbers<[1], [0], [0], [1], [0, 0, 1, 1], [], []>} : vector<128x128xbf16>, vector<128x128xbf16>, vector<128x128xf32> -> vector<128x128xf32>
    %131 = arith.addf %124, %130 : vector<128x128xf32>
    %c0_148 = arith.constant 0 : index
    %c1_149 = arith.constant 1 : index
    %c1_150 = arith.constant 1 : index
    %c0_151 = arith.constant 0 : index
    %132 = vector.load %arg7[%c0_148, %c1_149, %c1_150, %c0_151] : memref<2x10x10x128xf32, #tpu.memory_space<vmem>>, vector<2x8x8x128xf32>
    %133 = vector.shape_cast %132 : vector<2x8x8x128xf32> to vector<128x128xf32>
    %134 = arith.truncf %133 : vector<128x128xf32> to vector<128x128xbf16>
    %c1_152 = arith.constant 1 : index
    %c4_153 = arith.constant 4 : index
    %c0_154 = arith.constant 0 : index
    %c0_155 = arith.constant 0 : index
    %135 = vector.load %arg4[%c1_152, %c4_153, %c0_154, %c0_155] : memref<7x9x128x128xbf16, #tpu.memory_space<vmem>>, vector<1x1x128x128xbf16>
    %136 = vector.shape_cast %135 : vector<1x1x128x128xbf16> to vector<128x128xbf16>
    %cst_156 = arith.constant dense<0.000000e+00> : vector<128x128xf32>
    %137 = tpu.matmul %134, %136, %cst_156 {dimension_numbers = #tpu.dot_dimension_numbers<[1], [0], [0], [1], [0, 0, 1, 1], [], []>} : vector<128x128xbf16>, vector<128x128xbf16>, vector<128x128xf32> -> vector<128x128xf32>
    %138 = arith.addf %131, %137 : vector<128x128xf32>
    %c0_157 = arith.constant 0 : index
    %c1_158 = arith.constant 1 : index
    %c2_159 = arith.constant 2 : index
    %c0_160 = arith.constant 0 : index
    %139 = vector.load %arg7[%c0_157, %c1_158, %c2_159, %c0_160] : memref<2x10x10x128xf32, #tpu.memory_space<vmem>>, vector<2x8x8x128xf32>
    %140 = vector.shape_cast %139 : vector<2x8x8x128xf32> to vector<128x128xf32>
    %141 = arith.truncf %140 : vector<128x128xf32> to vector<128x128xbf16>
    %c1_161 = arith.constant 1 : index
    %c5_162 = arith.constant 5 : index
    %c0_163 = arith.constant 0 : index
    %c0_164 = arith.constant 0 : index
    %142 = vector.load %arg4[%c1_161, %c5_162, %c0_163, %c0_164] : memref<7x9x128x128xbf16, #tpu.memory_space<vmem>>, vector<1x1x128x128xbf16>
    %143 = vector.shape_cast %142 : vector<1x1x128x128xbf16> to vector<128x128xbf16>
    %cst_165 = arith.constant dense<0.000000e+00> : vector<128x128xf32>
    %144 = tpu.matmul %141, %143, %cst_165 {dimension_numbers = #tpu.dot_dimension_numbers<[1], [0], [0], [1], [0, 0, 1, 1], [], []>} : vector<128x128xbf16>, vector<128x128xbf16>, vector<128x128xf32> -> vector<128x128xf32>
    %145 = arith.addf %138, %144 : vector<128x128xf32>
    %c0_166 = arith.constant 0 : index
    %c2_167 = arith.constant 2 : index
    %c0_168 = arith.constant 0 : index
    %c0_169 = arith.constant 0 : index
    %146 = vector.load %arg7[%c0_166, %c2_167, %c0_168, %c0_169] : memref<2x10x10x128xf32, #tpu.memory_space<vmem>>, vector<2x8x8x128xf32>
    %147 = vector.shape_cast %146 : vector<2x8x8x128xf32> to vector<128x128xf32>
    %148 = arith.truncf %147 : vector<128x128xf32> to vector<128x128xbf16>
    %c1_170 = arith.constant 1 : index
    %c6_171 = arith.constant 6 : index
    %c0_172 = arith.constant 0 : index
    %c0_173 = arith.constant 0 : index
    %149 = vector.load %arg4[%c1_170, %c6_171, %c0_172, %c0_173] : memref<7x9x128x128xbf16, #tpu.memory_space<vmem>>, vector<1x1x128x128xbf16>
    %150 = vector.shape_cast %149 : vector<1x1x128x128xbf16> to vector<128x128xbf16>
    %cst_174 = arith.constant dense<0.000000e+00> : vector<128x128xf32>
    %151 = tpu.matmul %148, %150, %cst_174 {dimension_numbers = #tpu.dot_dimension_numbers<[1], [0], [0], [1], [0, 0, 1, 1], [], []>} : vector<128x128xbf16>, vector<128x128xbf16>, vector<128x128xf32> -> vector<128x128xf32>
    %152 = arith.addf %145, %151 : vector<128x128xf32>
    %c0_175 = arith.constant 0 : index
    %c2_176 = arith.constant 2 : index
    %c1_177 = arith.constant 1 : index
    %c0_178 = arith.constant 0 : index
    %153 = vector.load %arg7[%c0_175, %c2_176, %c1_177, %c0_178] : memref<2x10x10x128xf32, #tpu.memory_space<vmem>>, vector<2x8x8x128xf32>
    %154 = vector.shape_cast %153 : vector<2x8x8x128xf32> to vector<128x128xf32>
    %155 = arith.truncf %154 : vector<128x128xf32> to vector<128x128xbf16>
    %c1_179 = arith.constant 1 : index
    %c7_180 = arith.constant 7 : index
    %c0_181 = arith.constant 0 : index
    %c0_182 = arith.constant 0 : index
    %156 = vector.load %arg4[%c1_179, %c7_180, %c0_181, %c0_182] : memref<7x9x128x128xbf16, #tpu.memory_space<vmem>>, vector<1x1x128x128xbf16>
    %157 = vector.shape_cast %156 : vector<1x1x128x128xbf16> to vector<128x128xbf16>
    %cst_183 = arith.constant dense<0.000000e+00> : vector<128x128xf32>
    %158 = tpu.matmul %155, %157, %cst_183 {dimension_numbers = #tpu.dot_dimension_numbers<[1], [0], [0], [1], [0, 0, 1, 1], [], []>} : vector<128x128xbf16>, vector<128x128xbf16>, vector<128x128xf32> -> vector<128x128xf32>
    %159 = arith.addf %152, %158 : vector<128x128xf32>
    %c0_184 = arith.constant 0 : index
    %c2_185 = arith.constant 2 : index
    %c2_186 = arith.constant 2 : index
    %c0_187 = arith.constant 0 : index
    %160 = vector.load %arg7[%c0_184, %c2_185, %c2_186, %c0_187] : memref<2x10x10x128xf32, #tpu.memory_space<vmem>>, vector<2x8x8x128xf32>
    %161 = vector.shape_cast %160 : vector<2x8x8x128xf32> to vector<128x128xf32>
    %162 = arith.truncf %161 : vector<128x128xf32> to vector<128x128xbf16>
    %c1_188 = arith.constant 1 : index
    %c8_189 = arith.constant 8 : index
    %c0_190 = arith.constant 0 : index
    %c0_191 = arith.constant 0 : index
    %163 = vector.load %arg4[%c1_188, %c8_189, %c0_190, %c0_191] : memref<7x9x128x128xbf16, #tpu.memory_space<vmem>>, vector<1x1x128x128xbf16>
    %164 = vector.shape_cast %163 : vector<1x1x128x128xbf16> to vector<128x128xbf16>
    %cst_192 = arith.constant dense<0.000000e+00> : vector<128x128xf32>
    %165 = tpu.matmul %162, %164, %cst_192 {dimension_numbers = #tpu.dot_dimension_numbers<[1], [0], [0], [1], [0, 0, 1, 1], [], []>} : vector<128x128xbf16>, vector<128x128xbf16>, vector<128x128xf32> -> vector<128x128xf32>
    %166 = arith.addf %159, %165 : vector<128x128xf32>
    %c4_193 = arith.constant 4 : index
    %c0_194 = arith.constant 0 : index
    %c0_195 = arith.constant 0 : index
    %167 = vector.load %arg5[%c4_193, %c0_194, %c0_195] : memref<16x1x128xf32, #tpu.memory_space<vmem>>, vector<1x1x128xf32>
    %168 = vector.shape_cast %167 : vector<1x1x128xf32> to vector<1x128xf32>
    %169 = vector.broadcast %168 : vector<1x128xf32> to vector<128x128xf32>
    %170 = arith.mulf %166, %169 : vector<128x128xf32>
    %c5_196 = arith.constant 5 : index
    %c0_197 = arith.constant 0 : index
    %c0_198 = arith.constant 0 : index
    %171 = vector.load %arg5[%c5_196, %c0_197, %c0_198] : memref<16x1x128xf32, #tpu.memory_space<vmem>>, vector<1x1x128xf32>
    %172 = vector.shape_cast %171 : vector<1x1x128xf32> to vector<1x128xf32>
    %173 = vector.broadcast %172 : vector<1x128xf32> to vector<128x128xf32>
    %174 = arith.addf %170, %173 : vector<128x128xf32>
    %cst_199 = arith.constant 0.000000e+00 : f32
    %175 = vector.broadcast %cst_199 : f32 to vector<128x128xf32>
    %176 = arith.cmpf ogt, %174, %175 : vector<128x128xf32>
    %cst_200 = arith.constant 1.000000e-01 : f32
    %177 = vector.broadcast %cst_200 : f32 to vector<128x128xf32>
    %178 = arith.mulf %177, %174 : vector<128x128xf32>
    %179 = arith.select %176, %174, %178 : vector<128x128xi1>, vector<128x128xf32>
    %180 = vector.shape_cast %179 : vector<128x128xf32> to vector<2x8x8x128xf32>
    %c0_201 = arith.constant 0 : index
    %c1_202 = arith.constant 1 : index
    %c1_203 = arith.constant 1 : index
    %c0_204 = arith.constant 0 : index
    %181 = vector.load %arg7[%c0_201, %c1_202, %c1_203, %c0_204] : memref<2x10x10x128xf32, #tpu.memory_space<vmem>>, vector<2x8x8x128xf32>
    tpu.vector_store %arg7[%c0_201, %c1_202, %c1_203, %c0_204], %180 {strides = array<i32>} : memref<2x10x10x128xf32, #tpu.memory_space<vmem>>, vector<2x8x8x128xf32>,
    %cst_205 = arith.constant 0.000000e+00 : f32
    %182 = vector.broadcast %cst_205 : f32 to vector<128x128xf32>
    %c0_206 = arith.constant 0 : index
    %c0_207 = arith.constant 0 : index
    %c0_208 = arith.constant 0 : index
    %c0_209 = arith.constant 0 : index
    %183 = vector.load %arg7[%c0_206, %c0_207, %c0_208, %c0_209] : memref<2x10x10x128xf32, #tpu.memory_space<vmem>>, vector<2x8x8x128xf32>
    %184 = vector.shape_cast %183 : vector<2x8x8x128xf32> to vector<128x128xf32>
    %185 = arith.truncf %184 : vector<128x128xf32> to vector<128x128xbf16>
    %c2_210 = arith.constant 2 : index
    %c0_211 = arith.constant 0 : index
    %c0_212 = arith.constant 0 : index
    %c0_213 = arith.constant 0 : index
    %186 = vector.load %arg4[%c2_210, %c0_211, %c0_212, %c0_213] : memref<7x9x128x128xbf16, #tpu.memory_space<vmem>>, vector<1x1x128x128xbf16>
    %187 = vector.shape_cast %186 : vector<1x1x128x128xbf16> to vector<128x128xbf16>
    %cst_214 = arith.constant dense<0.000000e+00> : vector<128x128xf32>
    %188 = tpu.matmul %185, %187, %cst_214 {dimension_numbers = #tpu.dot_dimension_numbers<[1], [0], [0], [1], [0, 0, 1, 1], [], []>} : vector<128x128xbf16>, vector<128x128xbf16>, vector<128x128xf32> -> vector<128x128xf32>
    %189 = arith.addf %182, %188 : vector<128x128xf32>
    %c0_215 = arith.constant 0 : index
    %c0_216 = arith.constant 0 : index
    %c1_217 = arith.constant 1 : index
    %c0_218 = arith.constant 0 : index
    %190 = vector.load %arg7[%c0_215, %c0_216, %c1_217, %c0_218] : memref<2x10x10x128xf32, #tpu.memory_space<vmem>>, vector<2x8x8x128xf32>
    %191 = vector.shape_cast %190 : vector<2x8x8x128xf32> to vector<128x128xf32>
    %192 = arith.truncf %191 : vector<128x128xf32> to vector<128x128xbf16>
    %c2_219 = arith.constant 2 : index
    %c1_220 = arith.constant 1 : index
    %c0_221 = arith.constant 0 : index
    %c0_222 = arith.constant 0 : index
    %193 = vector.load %arg4[%c2_219, %c1_220, %c0_221, %c0_222] : memref<7x9x128x128xbf16, #tpu.memory_space<vmem>>, vector<1x1x128x128xbf16>
    %194 = vector.shape_cast %193 : vector<1x1x128x128xbf16> to vector<128x128xbf16>
    %cst_223 = arith.constant dense<0.000000e+00> : vector<128x128xf32>
    %195 = tpu.matmul %192, %194, %cst_223 {dimension_numbers = #tpu.dot_dimension_numbers<[1], [0], [0], [1], [0, 0, 1, 1], [], []>} : vector<128x128xbf16>, vector<128x128xbf16>, vector<128x128xf32> -> vector<128x128xf32>
    %196 = arith.addf %189, %195 : vector<128x128xf32>
    %c0_224 = arith.constant 0 : index
    %c0_225 = arith.constant 0 : index
    %c2_226 = arith.constant 2 : index
    %c0_227 = arith.constant 0 : index
    %197 = vector.load %arg7[%c0_224, %c0_225, %c2_226, %c0_227] : memref<2x10x10x128xf32, #tpu.memory_space<vmem>>, vector<2x8x8x128xf32>
    %198 = vector.shape_cast %197 : vector<2x8x8x128xf32> to vector<128x128xf32>
    %199 = arith.truncf %198 : vector<128x128xf32> to vector<128x128xbf16>
    %c2_228 = arith.constant 2 : index
    %c2_229 = arith.constant 2 : index
    %c0_230 = arith.constant 0 : index
    %c0_231 = arith.constant 0 : index
    %200 = vector.load %arg4[%c2_228, %c2_229, %c0_230, %c0_231] : memref<7x9x128x128xbf16, #tpu.memory_space<vmem>>, vector<1x1x128x128xbf16>
    %201 = vector.shape_cast %200 : vector<1x1x128x128xbf16> to vector<128x128xbf16>
    %cst_232 = arith.constant dense<0.000000e+00> : vector<128x128xf32>
    %202 = tpu.matmul %199, %201, %cst_232 {dimension_numbers = #tpu.dot_dimension_numbers<[1], [0], [0], [1], [0, 0, 1, 1], [], []>} : vector<128x128xbf16>, vector<128x128xbf16>, vector<128x128xf32> -> vector<128x128xf32>
    %203 = arith.addf %196, %202 : vector<128x128xf32>
    %c0_233 = arith.constant 0 : index
    %c1_234 = arith.constant 1 : index
    %c0_235 = arith.constant 0 : index
    %c0_236 = arith.constant 0 : index
    %204 = vector.load %arg7[%c0_233, %c1_234, %c0_235, %c0_236] : memref<2x10x10x128xf32, #tpu.memory_space<vmem>>, vector<2x8x8x128xf32>
    %205 = vector.shape_cast %204 : vector<2x8x8x128xf32> to vector<128x128xf32>
    %206 = arith.truncf %205 : vector<128x128xf32> to vector<128x128xbf16>
    %c2_237 = arith.constant 2 : index
    %c3_238 = arith.constant 3 : index
    %c0_239 = arith.constant 0 : index
    %c0_240 = arith.constant 0 : index
    %207 = vector.load %arg4[%c2_237, %c3_238, %c0_239, %c0_240] : memref<7x9x128x128xbf16, #tpu.memory_space<vmem>>, vector<1x1x128x128xbf16>
    %208 = vector.shape_cast %207 : vector<1x1x128x128xbf16> to vector<128x128xbf16>
    %cst_241 = arith.constant dense<0.000000e+00> : vector<128x128xf32>
    %209 = tpu.matmul %206, %208, %cst_241 {dimension_numbers = #tpu.dot_dimension_numbers<[1], [0], [0], [1], [0, 0, 1, 1], [], []>} : vector<128x128xbf16>, vector<128x128xbf16>, vector<128x128xf32> -> vector<128x128xf32>
    %210 = arith.addf %203, %209 : vector<128x128xf32>
    %c0_242 = arith.constant 0 : index
    %c1_243 = arith.constant 1 : index
    %c1_244 = arith.constant 1 : index
    %c0_245 = arith.constant 0 : index
    %211 = vector.load %arg7[%c0_242, %c1_243, %c1_244, %c0_245] : memref<2x10x10x128xf32, #tpu.memory_space<vmem>>, vector<2x8x8x128xf32>
    %212 = vector.shape_cast %211 : vector<2x8x8x128xf32> to vector<128x128xf32>
    %213 = arith.truncf %212 : vector<128x128xf32> to vector<128x128xbf16>
    %c2_246 = arith.constant 2 : index
    %c4_247 = arith.constant 4 : index
    %c0_248 = arith.constant 0 : index
    %c0_249 = arith.constant 0 : index
    %214 = vector.load %arg4[%c2_246, %c4_247, %c0_248, %c0_249] : memref<7x9x128x128xbf16, #tpu.memory_space<vmem>>, vector<1x1x128x128xbf16>
    %215 = vector.shape_cast %214 : vector<1x1x128x128xbf16> to vector<128x128xbf16>
    %cst_250 = arith.constant dense<0.000000e+00> : vector<128x128xf32>
    %216 = tpu.matmul %213, %215, %cst_250 {dimension_numbers = #tpu.dot_dimension_numbers<[1], [0], [0], [1], [0, 0, 1, 1], [], []>} : vector<128x128xbf16>, vector<128x128xbf16>, vector<128x128xf32> -> vector<128x128xf32>
    %217 = arith.addf %210, %216 : vector<128x128xf32>
    %c0_251 = arith.constant 0 : index
    %c1_252 = arith.constant 1 : index
    %c2_253 = arith.constant 2 : index
    %c0_254 = arith.constant 0 : index
    %218 = vector.load %arg7[%c0_251, %c1_252, %c2_253, %c0_254] : memref<2x10x10x128xf32, #tpu.memory_space<vmem>>, vector<2x8x8x128xf32>
    %219 = vector.shape_cast %218 : vector<2x8x8x128xf32> to vector<128x128xf32>
    %220 = arith.truncf %219 : vector<128x128xf32> to vector<128x128xbf16>
    %c2_255 = arith.constant 2 : index
    %c5_256 = arith.constant 5 : index
    %c0_257 = arith.constant 0 : index
    %c0_258 = arith.constant 0 : index
    %221 = vector.load %arg4[%c2_255, %c5_256, %c0_257, %c0_258] : memref<7x9x128x128xbf16, #tpu.memory_space<vmem>>, vector<1x1x128x128xbf16>
    %222 = vector.shape_cast %221 : vector<1x1x128x128xbf16> to vector<128x128xbf16>
    %cst_259 = arith.constant dense<0.000000e+00> : vector<128x128xf32>
    %223 = tpu.matmul %220, %222, %cst_259 {dimension_numbers = #tpu.dot_dimension_numbers<[1], [0], [0], [1], [0, 0, 1, 1], [], []>} : vector<128x128xbf16>, vector<128x128xbf16>, vector<128x128xf32> -> vector<128x128xf32>
    %224 = arith.addf %217, %223 : vector<128x128xf32>
    %c0_260 = arith.constant 0 : index
    %c2_261 = arith.constant 2 : index
    %c0_262 = arith.constant 0 : index
    %c0_263 = arith.constant 0 : index
    %225 = vector.load %arg7[%c0_260, %c2_261, %c0_262, %c0_263] : memref<2x10x10x128xf32, #tpu.memory_space<vmem>>, vector<2x8x8x128xf32>
    %226 = vector.shape_cast %225 : vector<2x8x8x128xf32> to vector<128x128xf32>
    %227 = arith.truncf %226 : vector<128x128xf32> to vector<128x128xbf16>
    %c2_264 = arith.constant 2 : index
    %c6_265 = arith.constant 6 : index
    %c0_266 = arith.constant 0 : index
    %c0_267 = arith.constant 0 : index
    %228 = vector.load %arg4[%c2_264, %c6_265, %c0_266, %c0_267] : memref<7x9x128x128xbf16, #tpu.memory_space<vmem>>, vector<1x1x128x128xbf16>
    %229 = vector.shape_cast %228 : vector<1x1x128x128xbf16> to vector<128x128xbf16>
    %cst_268 = arith.constant dense<0.000000e+00> : vector<128x128xf32>
    %230 = tpu.matmul %227, %229, %cst_268 {dimension_numbers = #tpu.dot_dimension_numbers<[1], [0], [0], [1], [0, 0, 1, 1], [], []>} : vector<128x128xbf16>, vector<128x128xbf16>, vector<128x128xf32> -> vector<128x128xf32>
    %231 = arith.addf %224, %230 : vector<128x128xf32>
    %c0_269 = arith.constant 0 : index
    %c2_270 = arith.constant 2 : index
    %c1_271 = arith.constant 1 : index
    %c0_272 = arith.constant 0 : index
    %232 = vector.load %arg7[%c0_269, %c2_270, %c1_271, %c0_272] : memref<2x10x10x128xf32, #tpu.memory_space<vmem>>, vector<2x8x8x128xf32>
    %233 = vector.shape_cast %232 : vector<2x8x8x128xf32> to vector<128x128xf32>
    %234 = arith.truncf %233 : vector<128x128xf32> to vector<128x128xbf16>
    %c2_273 = arith.constant 2 : index
    %c7_274 = arith.constant 7 : index
    %c0_275 = arith.constant 0 : index
    %c0_276 = arith.constant 0 : index
    %235 = vector.load %arg4[%c2_273, %c7_274, %c0_275, %c0_276] : memref<7x9x128x128xbf16, #tpu.memory_space<vmem>>, vector<1x1x128x128xbf16>
    %236 = vector.shape_cast %235 : vector<1x1x128x128xbf16> to vector<128x128xbf16>
    %cst_277 = arith.constant dense<0.000000e+00> : vector<128x128xf32>
    %237 = tpu.matmul %234, %236, %cst_277 {dimension_numbers = #tpu.dot_dimension_numbers<[1], [0], [0], [1], [0, 0, 1, 1], [], []>} : vector<128x128xbf16>, vector<128x128xbf16>, vector<128x128xf32> -> vector<128x128xf32>
    %238 = arith.addf %231, %237 : vector<128x128xf32>
    %c0_278 = arith.constant 0 : index
    %c2_279 = arith.constant 2 : index
    %c2_280 = arith.constant 2 : index
    %c0_281 = arith.constant 0 : index
    %239 = vector.load %arg7[%c0_278, %c2_279, %c2_280, %c0_281] : memref<2x10x10x128xf32, #tpu.memory_space<vmem>>, vector<2x8x8x128xf32>
    %240 = vector.shape_cast %239 : vector<2x8x8x128xf32> to vector<128x128xf32>
    %241 = arith.truncf %240 : vector<128x128xf32> to vector<128x128xbf16>
    %c2_282 = arith.constant 2 : index
    %c8_283 = arith.constant 8 : index
    %c0_284 = arith.constant 0 : index
    %c0_285 = arith.constant 0 : index
    %242 = vector.load %arg4[%c2_282, %c8_283, %c0_284, %c0_285] : memref<7x9x128x128xbf16, #tpu.memory_space<vmem>>, vector<1x1x128x128xbf16>
    %243 = vector.shape_cast %242 : vector<1x1x128x128xbf16> to vector<128x128xbf16>
    %cst_286 = arith.constant dense<0.000000e+00> : vector<128x128xf32>
    %244 = tpu.matmul %241, %243, %cst_286 {dimension_numbers = #tpu.dot_dimension_numbers<[1], [0], [0], [1], [0, 0, 1, 1], [], []>} : vector<128x128xbf16>, vector<128x128xbf16>, vector<128x128xf32> -> vector<128x128xf32>
    %245 = arith.addf %238, %244 : vector<128x128xf32>
    %246 = arith.addf %87, %245 : vector<128x128xf32>
    %c6_287 = arith.constant 6 : index
    %c0_288 = arith.constant 0 : index
    %c0_289 = arith.constant 0 : index
    %247 = vector.load %arg5[%c6_287, %c0_288, %c0_289] : memref<16x1x128xf32, #tpu.memory_space<vmem>>, vector<1x1x128xf32>
    %248 = vector.shape_cast %247 : vector<1x1x128xf32> to vector<1x128xf32>
    %249 = vector.broadcast %248 : vector<1x128xf32> to vector<128x128xf32>
    %250 = arith.mulf %246, %249 : vector<128x128xf32>
    %c7_290 = arith.constant 7 : index
    %c0_291 = arith.constant 0 : index
    %c0_292 = arith.constant 0 : index
    %251 = vector.load %arg5[%c7_290, %c0_291, %c0_292] : memref<16x1x128xf32, #tpu.memory_space<vmem>>, vector<1x1x128xf32>
    %252 = vector.shape_cast %251 : vector<1x1x128xf32> to vector<1x128xf32>
    %253 = vector.broadcast %252 : vector<1x128xf32> to vector<128x128xf32>
    %254 = arith.addf %250, %253 : vector<128x128xf32>
    %cst_293 = arith.constant 0.000000e+00 : f32
    %255 = vector.broadcast %cst_293 : f32 to vector<128x128xf32>
    %256 = arith.cmpf ogt, %254, %255 : vector<128x128xf32>
    %cst_294 = arith.constant 1.000000e-01 : f32
    %257 = vector.broadcast %cst_294 : f32 to vector<128x128xf32>
    %258 = arith.mulf %257, %254 : vector<128x128xf32>
    %259 = arith.select %256, %254, %258 : vector<128x128xi1>, vector<128x128xf32>
    %260 = vector.shape_cast %259 : vector<128x128xf32> to vector<2x8x8x128xf32>
    %c0_295 = arith.constant 0 : index
    %c1_296 = arith.constant 1 : index
    %c1_297 = arith.constant 1 : index
    %c0_298 = arith.constant 0 : index
    %261 = vector.load %arg7[%c0_295, %c1_296, %c1_297, %c0_298] : memref<2x10x10x128xf32, #tpu.memory_space<vmem>>, vector<2x8x8x128xf32>
    tpu.vector_store %arg7[%c0_295, %c1_296, %c1_297, %c0_298], %260 {strides = array<i32>} : memref<2x10x10x128xf32, #tpu.memory_space<vmem>>, vector<2x8x8x128xf32>,
    %cst_299 = arith.constant 0.000000e+00 : f32
    %262 = vector.broadcast %cst_299 : f32 to vector<128x128xf32>
    %c0_300 = arith.constant 0 : index
    %c0_301 = arith.constant 0 : index
    %c0_302 = arith.constant 0 : index
    %c0_303 = arith.constant 0 : index
    %263 = vector.load %arg7[%c0_300, %c0_301, %c0_302, %c0_303] : memref<2x10x10x128xf32, #tpu.memory_space<vmem>>, vector<2x8x8x128xf32>
    %264 = vector.shape_cast %263 : vector<2x8x8x128xf32> to vector<128x128xf32>
    %265 = arith.truncf %264 : vector<128x128xf32> to vector<128x128xbf16>
    %c3_304 = arith.constant 3 : index
    %c0_305 = arith.constant 0 : index
    %c0_306 = arith.constant 0 : index
    %c0_307 = arith.constant 0 : index
    %266 = vector.load %arg4[%c3_304, %c0_305, %c0_306, %c0_307] : memref<7x9x128x128xbf16, #tpu.memory_space<vmem>>, vector<1x1x128x128xbf16>
    %267 = vector.shape_cast %266 : vector<1x1x128x128xbf16> to vector<128x128xbf16>
    %cst_308 = arith.constant dense<0.000000e+00> : vector<128x128xf32>
    %268 = tpu.matmul %265, %267, %cst_308 {dimension_numbers = #tpu.dot_dimension_numbers<[1], [0], [0], [1], [0, 0, 1, 1], [], []>} : vector<128x128xbf16>, vector<128x128xbf16>, vector<128x128xf32> -> vector<128x128xf32>
    %269 = arith.addf %262, %268 : vector<128x128xf32>
    %c0_309 = arith.constant 0 : index
    %c0_310 = arith.constant 0 : index
    %c1_311 = arith.constant 1 : index
    %c0_312 = arith.constant 0 : index
    %270 = vector.load %arg7[%c0_309, %c0_310, %c1_311, %c0_312] : memref<2x10x10x128xf32, #tpu.memory_space<vmem>>, vector<2x8x8x128xf32>
    %271 = vector.shape_cast %270 : vector<2x8x8x128xf32> to vector<128x128xf32>
    %272 = arith.truncf %271 : vector<128x128xf32> to vector<128x128xbf16>
    %c3_313 = arith.constant 3 : index
    %c1_314 = arith.constant 1 : index
    %c0_315 = arith.constant 0 : index
    %c0_316 = arith.constant 0 : index
    %273 = vector.load %arg4[%c3_313, %c1_314, %c0_315, %c0_316] : memref<7x9x128x128xbf16, #tpu.memory_space<vmem>>, vector<1x1x128x128xbf16>
    %274 = vector.shape_cast %273 : vector<1x1x128x128xbf16> to vector<128x128xbf16>
    %cst_317 = arith.constant dense<0.000000e+00> : vector<128x128xf32>
    %275 = tpu.matmul %272, %274, %cst_317 {dimension_numbers = #tpu.dot_dimension_numbers<[1], [0], [0], [1], [0, 0, 1, 1], [], []>} : vector<128x128xbf16>, vector<128x128xbf16>, vector<128x128xf32> -> vector<128x128xf32>
    %276 = arith.addf %269, %275 : vector<128x128xf32>
    %c0_318 = arith.constant 0 : index
    %c0_319 = arith.constant 0 : index
    %c2_320 = arith.constant 2 : index
    %c0_321 = arith.constant 0 : index
    %277 = vector.load %arg7[%c0_318, %c0_319, %c2_320, %c0_321] : memref<2x10x10x128xf32, #tpu.memory_space<vmem>>, vector<2x8x8x128xf32>
    %278 = vector.shape_cast %277 : vector<2x8x8x128xf32> to vector<128x128xf32>
    %279 = arith.truncf %278 : vector<128x128xf32> to vector<128x128xbf16>
    %c3_322 = arith.constant 3 : index
    %c2_323 = arith.constant 2 : index
    %c0_324 = arith.constant 0 : index
    %c0_325 = arith.constant 0 : index
    %280 = vector.load %arg4[%c3_322, %c2_323, %c0_324, %c0_325] : memref<7x9x128x128xbf16, #tpu.memory_space<vmem>>, vector<1x1x128x128xbf16>
    %281 = vector.shape_cast %280 : vector<1x1x128x128xbf16> to vector<128x128xbf16>
    %cst_326 = arith.constant dense<0.000000e+00> : vector<128x128xf32>
    %282 = tpu.matmul %279, %281, %cst_326 {dimension_numbers = #tpu.dot_dimension_numbers<[1], [0], [0], [1], [0, 0, 1, 1], [], []>} : vector<128x128xbf16>, vector<128x128xbf16>, vector<128x128xf32> -> vector<128x128xf32>
    %283 = arith.addf %276, %282 : vector<128x128xf32>
    %c0_327 = arith.constant 0 : index
    %c1_328 = arith.constant 1 : index
    %c0_329 = arith.constant 0 : index
    %c0_330 = arith.constant 0 : index
    %284 = vector.load %arg7[%c0_327, %c1_328, %c0_329, %c0_330] : memref<2x10x10x128xf32, #tpu.memory_space<vmem>>, vector<2x8x8x128xf32>
    %285 = vector.shape_cast %284 : vector<2x8x8x128xf32> to vector<128x128xf32>
    %286 = arith.truncf %285 : vector<128x128xf32> to vector<128x128xbf16>
    %c3_331 = arith.constant 3 : index
    %c3_332 = arith.constant 3 : index
    %c0_333 = arith.constant 0 : index
    %c0_334 = arith.constant 0 : index
    %287 = vector.load %arg4[%c3_331, %c3_332, %c0_333, %c0_334] : memref<7x9x128x128xbf16, #tpu.memory_space<vmem>>, vector<1x1x128x128xbf16>
    %288 = vector.shape_cast %287 : vector<1x1x128x128xbf16> to vector<128x128xbf16>
    %cst_335 = arith.constant dense<0.000000e+00> : vector<128x128xf32>
    %289 = tpu.matmul %286, %288, %cst_335 {dimension_numbers = #tpu.dot_dimension_numbers<[1], [0], [0], [1], [0, 0, 1, 1], [], []>} : vector<128x128xbf16>, vector<128x128xbf16>, vector<128x128xf32> -> vector<128x128xf32>
    %290 = arith.addf %283, %289 : vector<128x128xf32>
    %c0_336 = arith.constant 0 : index
    %c1_337 = arith.constant 1 : index
    %c1_338 = arith.constant 1 : index
    %c0_339 = arith.constant 0 : index
    %291 = vector.load %arg7[%c0_336, %c1_337, %c1_338, %c0_339] : memref<2x10x10x128xf32, #tpu.memory_space<vmem>>, vector<2x8x8x128xf32>
    %292 = vector.shape_cast %291 : vector<2x8x8x128xf32> to vector<128x128xf32>
    %293 = arith.truncf %292 : vector<128x128xf32> to vector<128x128xbf16>
    %c3_340 = arith.constant 3 : index
    %c4_341 = arith.constant 4 : index
    %c0_342 = arith.constant 0 : index
    %c0_343 = arith.constant 0 : index
    %294 = vector.load %arg4[%c3_340, %c4_341, %c0_342, %c0_343] : memref<7x9x128x128xbf16, #tpu.memory_space<vmem>>, vector<1x1x128x128xbf16>
    %295 = vector.shape_cast %294 : vector<1x1x128x128xbf16> to vector<128x128xbf16>
    %cst_344 = arith.constant dense<0.000000e+00> : vector<128x128xf32>
    %296 = tpu.matmul %293, %295, %cst_344 {dimension_numbers = #tpu.dot_dimension_numbers<[1], [0], [0], [1], [0, 0, 1, 1], [], []>} : vector<128x128xbf16>, vector<128x128xbf16>, vector<128x128xf32> -> vector<128x128xf32>
    %297 = arith.addf %290, %296 : vector<128x128xf32>
    %c0_345 = arith.constant 0 : index
    %c1_346 = arith.constant 1 : index
    %c2_347 = arith.constant 2 : index
    %c0_348 = arith.constant 0 : index
    %298 = vector.load %arg7[%c0_345, %c1_346, %c2_347, %c0_348] : memref<2x10x10x128xf32, #tpu.memory_space<vmem>>, vector<2x8x8x128xf32>
    %299 = vector.shape_cast %298 : vector<2x8x8x128xf32> to vector<128x128xf32>
    %300 = arith.truncf %299 : vector<128x128xf32> to vector<128x128xbf16>
    %c3_349 = arith.constant 3 : index
    %c5_350 = arith.constant 5 : index
    %c0_351 = arith.constant 0 : index
    %c0_352 = arith.constant 0 : index
    %301 = vector.load %arg4[%c3_349, %c5_350, %c0_351, %c0_352] : memref<7x9x128x128xbf16, #tpu.memory_space<vmem>>, vector<1x1x128x128xbf16>
    %302 = vector.shape_cast %301 : vector<1x1x128x128xbf16> to vector<128x128xbf16>
    %cst_353 = arith.constant dense<0.000000e+00> : vector<128x128xf32>
    %303 = tpu.matmul %300, %302, %cst_353 {dimension_numbers = #tpu.dot_dimension_numbers<[1], [0], [0], [1], [0, 0, 1, 1], [], []>} : vector<128x128xbf16>, vector<128x128xbf16>, vector<128x128xf32> -> vector<128x128xf32>
    %304 = arith.addf %297, %303 : vector<128x128xf32>
    %c0_354 = arith.constant 0 : index
    %c2_355 = arith.constant 2 : index
    %c0_356 = arith.constant 0 : index
    %c0_357 = arith.constant 0 : index
    %305 = vector.load %arg7[%c0_354, %c2_355, %c0_356, %c0_357] : memref<2x10x10x128xf32, #tpu.memory_space<vmem>>, vector<2x8x8x128xf32>
    %306 = vector.shape_cast %305 : vector<2x8x8x128xf32> to vector<128x128xf32>
    %307 = arith.truncf %306 : vector<128x128xf32> to vector<128x128xbf16>
    %c3_358 = arith.constant 3 : index
    %c6_359 = arith.constant 6 : index
    %c0_360 = arith.constant 0 : index
    %c0_361 = arith.constant 0 : index
    %308 = vector.load %arg4[%c3_358, %c6_359, %c0_360, %c0_361] : memref<7x9x128x128xbf16, #tpu.memory_space<vmem>>, vector<1x1x128x128xbf16>
    %309 = vector.shape_cast %308 : vector<1x1x128x128xbf16> to vector<128x128xbf16>
    %cst_362 = arith.constant dense<0.000000e+00> : vector<128x128xf32>
    %310 = tpu.matmul %307, %309, %cst_362 {dimension_numbers = #tpu.dot_dimension_numbers<[1], [0], [0], [1], [0, 0, 1, 1], [], []>} : vector<128x128xbf16>, vector<128x128xbf16>, vector<128x128xf32> -> vector<128x128xf32>
    %311 = arith.addf %304, %310 : vector<128x128xf32>
    %c0_363 = arith.constant 0 : index
    %c2_364 = arith.constant 2 : index
    %c1_365 = arith.constant 1 : index
    %c0_366 = arith.constant 0 : index
    %312 = vector.load %arg7[%c0_363, %c2_364, %c1_365, %c0_366] : memref<2x10x10x128xf32, #tpu.memory_space<vmem>>, vector<2x8x8x128xf32>
    %313 = vector.shape_cast %312 : vector<2x8x8x128xf32> to vector<128x128xf32>
    %314 = arith.truncf %313 : vector<128x128xf32> to vector<128x128xbf16>
    %c3_367 = arith.constant 3 : index
    %c7_368 = arith.constant 7 : index
    %c0_369 = arith.constant 0 : index
    %c0_370 = arith.constant 0 : index
    %315 = vector.load %arg4[%c3_367, %c7_368, %c0_369, %c0_370] : memref<7x9x128x128xbf16, #tpu.memory_space<vmem>>, vector<1x1x128x128xbf16>
    %316 = vector.shape_cast %315 : vector<1x1x128x128xbf16> to vector<128x128xbf16>
    %cst_371 = arith.constant dense<0.000000e+00> : vector<128x128xf32>
    %317 = tpu.matmul %314, %316, %cst_371 {dimension_numbers = #tpu.dot_dimension_numbers<[1], [0], [0], [1], [0, 0, 1, 1], [], []>} : vector<128x128xbf16>, vector<128x128xbf16>, vector<128x128xf32> -> vector<128x128xf32>
    %318 = arith.addf %311, %317 : vector<128x128xf32>
    %c0_372 = arith.constant 0 : index
    %c2_373 = arith.constant 2 : index
    %c2_374 = arith.constant 2 : index
    %c0_375 = arith.constant 0 : index
    %319 = vector.load %arg7[%c0_372, %c2_373, %c2_374, %c0_375] : memref<2x10x10x128xf32, #tpu.memory_space<vmem>>, vector<2x8x8x128xf32>
    %320 = vector.shape_cast %319 : vector<2x8x8x128xf32> to vector<128x128xf32>
    %321 = arith.truncf %320 : vector<128x128xf32> to vector<128x128xbf16>
    %c3_376 = arith.constant 3 : index
    %c8_377 = arith.constant 8 : index
    %c0_378 = arith.constant 0 : index
    %c0_379 = arith.constant 0 : index
    %322 = vector.load %arg4[%c3_376, %c8_377, %c0_378, %c0_379] : memref<7x9x128x128xbf16, #tpu.memory_space<vmem>>, vector<1x1x128x128xbf16>
    %323 = vector.shape_cast %322 : vector<1x1x128x128xbf16> to vector<128x128xbf16>
    %cst_380 = arith.constant dense<0.000000e+00> : vector<128x128xf32>
    %324 = tpu.matmul %321, %323, %cst_380 {dimension_numbers = #tpu.dot_dimension_numbers<[1], [0], [0], [1], [0, 0, 1, 1], [], []>} : vector<128x128xbf16>, vector<128x128xbf16>, vector<128x128xf32> -> vector<128x128xf32>
    %325 = arith.addf %318, %324 : vector<128x128xf32>
    %c8_381 = arith.constant 8 : index
    %c0_382 = arith.constant 0 : index
    %c0_383 = arith.constant 0 : index
    %326 = vector.load %arg5[%c8_381, %c0_382, %c0_383] : memref<16x1x128xf32, #tpu.memory_space<vmem>>, vector<1x1x128xf32>
    %327 = vector.shape_cast %326 : vector<1x1x128xf32> to vector<1x128xf32>
    %328 = vector.broadcast %327 : vector<1x128xf32> to vector<128x128xf32>
    %329 = arith.mulf %325, %328 : vector<128x128xf32>
    %c9 = arith.constant 9 : index
    %c0_384 = arith.constant 0 : index
    %c0_385 = arith.constant 0 : index
    %330 = vector.load %arg5[%c9, %c0_384, %c0_385] : memref<16x1x128xf32, #tpu.memory_space<vmem>>, vector<1x1x128xf32>
    %331 = vector.shape_cast %330 : vector<1x1x128xf32> to vector<1x128xf32>
    %332 = vector.broadcast %331 : vector<1x128xf32> to vector<128x128xf32>
    %333 = arith.addf %329, %332 : vector<128x128xf32>
    %cst_386 = arith.constant 0.000000e+00 : f32
    %334 = vector.broadcast %cst_386 : f32 to vector<128x128xf32>
    %335 = arith.cmpf ogt, %333, %334 : vector<128x128xf32>
    %cst_387 = arith.constant 1.000000e-01 : f32
    %336 = vector.broadcast %cst_387 : f32 to vector<128x128xf32>
    %337 = arith.mulf %336, %333 : vector<128x128xf32>
    %338 = arith.select %335, %333, %337 : vector<128x128xi1>, vector<128x128xf32>
    %339 = vector.shape_cast %338 : vector<128x128xf32> to vector<2x8x8x128xf32>
    %c0_388 = arith.constant 0 : index
    %c1_389 = arith.constant 1 : index
    %c1_390 = arith.constant 1 : index
    %c0_391 = arith.constant 0 : index
    %340 = vector.load %arg7[%c0_388, %c1_389, %c1_390, %c0_391] : memref<2x10x10x128xf32, #tpu.memory_space<vmem>>, vector<2x8x8x128xf32>
    tpu.vector_store %arg7[%c0_388, %c1_389, %c1_390, %c0_391], %339 {strides = array<i32>} : memref<2x10x10x128xf32, #tpu.memory_space<vmem>>, vector<2x8x8x128xf32>,
    %cst_392 = arith.constant 0.000000e+00 : f32
    %341 = vector.broadcast %cst_392 : f32 to vector<128x128xf32>
    %c0_393 = arith.constant 0 : index
    %c0_394 = arith.constant 0 : index
    %c0_395 = arith.constant 0 : index
    %c0_396 = arith.constant 0 : index
    %342 = vector.load %arg7[%c0_393, %c0_394, %c0_395, %c0_396] : memref<2x10x10x128xf32, #tpu.memory_space<vmem>>, vector<2x8x8x128xf32>
    %343 = vector.shape_cast %342 : vector<2x8x8x128xf32> to vector<128x128xf32>
    %344 = arith.truncf %343 : vector<128x128xf32> to vector<128x128xbf16>
    %c4_397 = arith.constant 4 : index
    %c0_398 = arith.constant 0 : index
    %c0_399 = arith.constant 0 : index
    %c0_400 = arith.constant 0 : index
    %345 = vector.load %arg4[%c4_397, %c0_398, %c0_399, %c0_400] : memref<7x9x128x128xbf16, #tpu.memory_space<vmem>>, vector<1x1x128x128xbf16>
    %346 = vector.shape_cast %345 : vector<1x1x128x128xbf16> to vector<128x128xbf16>
    %cst_401 = arith.constant dense<0.000000e+00> : vector<128x128xf32>
    %347 = tpu.matmul %344, %346, %cst_401 {dimension_numbers = #tpu.dot_dimension_numbers<[1], [0], [0], [1], [0, 0, 1, 1], [], []>} : vector<128x128xbf16>, vector<128x128xbf16>, vector<128x128xf32> -> vector<128x128xf32>
    %348 = arith.addf %341, %347 : vector<128x128xf32>
    %c0_402 = arith.constant 0 : index
    %c0_403 = arith.constant 0 : index
    %c1_404 = arith.constant 1 : index
    %c0_405 = arith.constant 0 : index
    %349 = vector.load %arg7[%c0_402, %c0_403, %c1_404, %c0_405] : memref<2x10x10x128xf32, #tpu.memory_space<vmem>>, vector<2x8x8x128xf32>
    %350 = vector.shape_cast %349 : vector<2x8x8x128xf32> to vector<128x128xf32>
    %351 = arith.truncf %350 : vector<128x128xf32> to vector<128x128xbf16>
    %c4_406 = arith.constant 4 : index
    %c1_407 = arith.constant 1 : index
    %c0_408 = arith.constant 0 : index
    %c0_409 = arith.constant 0 : index
    %352 = vector.load %arg4[%c4_406, %c1_407, %c0_408, %c0_409] : memref<7x9x128x128xbf16, #tpu.memory_space<vmem>>, vector<1x1x128x128xbf16>
    %353 = vector.shape_cast %352 : vector<1x1x128x128xbf16> to vector<128x128xbf16>
    %cst_410 = arith.constant dense<0.000000e+00> : vector<128x128xf32>
    %354 = tpu.matmul %351, %353, %cst_410 {dimension_numbers = #tpu.dot_dimension_numbers<[1], [0], [0], [1], [0, 0, 1, 1], [], []>} : vector<128x128xbf16>, vector<128x128xbf16>, vector<128x128xf32> -> vector<128x128xf32>
    %355 = arith.addf %348, %354 : vector<128x128xf32>
    %c0_411 = arith.constant 0 : index
    %c0_412 = arith.constant 0 : index
    %c2_413 = arith.constant 2 : index
    %c0_414 = arith.constant 0 : index
    %356 = vector.load %arg7[%c0_411, %c0_412, %c2_413, %c0_414] : memref<2x10x10x128xf32, #tpu.memory_space<vmem>>, vector<2x8x8x128xf32>
    %357 = vector.shape_cast %356 : vector<2x8x8x128xf32> to vector<128x128xf32>
    %358 = arith.truncf %357 : vector<128x128xf32> to vector<128x128xbf16>
    %c4_415 = arith.constant 4 : index
    %c2_416 = arith.constant 2 : index
    %c0_417 = arith.constant 0 : index
    %c0_418 = arith.constant 0 : index
    %359 = vector.load %arg4[%c4_415, %c2_416, %c0_417, %c0_418] : memref<7x9x128x128xbf16, #tpu.memory_space<vmem>>, vector<1x1x128x128xbf16>
    %360 = vector.shape_cast %359 : vector<1x1x128x128xbf16> to vector<128x128xbf16>
    %cst_419 = arith.constant dense<0.000000e+00> : vector<128x128xf32>
    %361 = tpu.matmul %358, %360, %cst_419 {dimension_numbers = #tpu.dot_dimension_numbers<[1], [0], [0], [1], [0, 0, 1, 1], [], []>} : vector<128x128xbf16>, vector<128x128xbf16>, vector<128x128xf32> -> vector<128x128xf32>
    %362 = arith.addf %355, %361 : vector<128x128xf32>
    %c0_420 = arith.constant 0 : index
    %c1_421 = arith.constant 1 : index
    %c0_422 = arith.constant 0 : index
    %c0_423 = arith.constant 0 : index
    %363 = vector.load %arg7[%c0_420, %c1_421, %c0_422, %c0_423] : memref<2x10x10x128xf32, #tpu.memory_space<vmem>>, vector<2x8x8x128xf32>
    %364 = vector.shape_cast %363 : vector<2x8x8x128xf32> to vector<128x128xf32>
    %365 = arith.truncf %364 : vector<128x128xf32> to vector<128x128xbf16>
    %c4_424 = arith.constant 4 : index
    %c3_425 = arith.constant 3 : index
    %c0_426 = arith.constant 0 : index
    %c0_427 = arith.constant 0 : index
    %366 = vector.load %arg4[%c4_424, %c3_425, %c0_426, %c0_427] : memref<7x9x128x128xbf16, #tpu.memory_space<vmem>>, vector<1x1x128x128xbf16>
    %367 = vector.shape_cast %366 : vector<1x1x128x128xbf16> to vector<128x128xbf16>
    %cst_428 = arith.constant dense<0.000000e+00> : vector<128x128xf32>
    %368 = tpu.matmul %365, %367, %cst_428 {dimension_numbers = #tpu.dot_dimension_numbers<[1], [0], [0], [1], [0, 0, 1, 1], [], []>} : vector<128x128xbf16>, vector<128x128xbf16>, vector<128x128xf32> -> vector<128x128xf32>
    %369 = arith.addf %362, %368 : vector<128x128xf32>
    %c0_429 = arith.constant 0 : index
    %c1_430 = arith.constant 1 : index
    %c1_431 = arith.constant 1 : index
    %c0_432 = arith.constant 0 : index
    %370 = vector.load %arg7[%c0_429, %c1_430, %c1_431, %c0_432] : memref<2x10x10x128xf32, #tpu.memory_space<vmem>>, vector<2x8x8x128xf32>
    %371 = vector.shape_cast %370 : vector<2x8x8x128xf32> to vector<128x128xf32>
    %372 = arith.truncf %371 : vector<128x128xf32> to vector<128x128xbf16>
    %c4_433 = arith.constant 4 : index
    %c4_434 = arith.constant 4 : index
    %c0_435 = arith.constant 0 : index
    %c0_436 = arith.constant 0 : index
    %373 = vector.load %arg4[%c4_433, %c4_434, %c0_435, %c0_436] : memref<7x9x128x128xbf16, #tpu.memory_space<vmem>>, vector<1x1x128x128xbf16>
    %374 = vector.shape_cast %373 : vector<1x1x128x128xbf16> to vector<128x128xbf16>
    %cst_437 = arith.constant dense<0.000000e+00> : vector<128x128xf32>
    %375 = tpu.matmul %372, %374, %cst_437 {dimension_numbers = #tpu.dot_dimension_numbers<[1], [0], [0], [1], [0, 0, 1, 1], [], []>} : vector<128x128xbf16>, vector<128x128xbf16>, vector<128x128xf32> -> vector<128x128xf32>
    %376 = arith.addf %369, %375 : vector<128x128xf32>
    %c0_438 = arith.constant 0 : index
    %c1_439 = arith.constant 1 : index
    %c2_440 = arith.constant 2 : index
    %c0_441 = arith.constant 0 : index
    %377 = vector.load %arg7[%c0_438, %c1_439, %c2_440, %c0_441] : memref<2x10x10x128xf32, #tpu.memory_space<vmem>>, vector<2x8x8x128xf32>
    %378 = vector.shape_cast %377 : vector<2x8x8x128xf32> to vector<128x128xf32>
    %379 = arith.truncf %378 : vector<128x128xf32> to vector<128x128xbf16>
    %c4_442 = arith.constant 4 : index
    %c5_443 = arith.constant 5 : index
    %c0_444 = arith.constant 0 : index
    %c0_445 = arith.constant 0 : index
    %380 = vector.load %arg4[%c4_442, %c5_443, %c0_444, %c0_445] : memref<7x9x128x128xbf16, #tpu.memory_space<vmem>>, vector<1x1x128x128xbf16>
    %381 = vector.shape_cast %380 : vector<1x1x128x128xbf16> to vector<128x128xbf16>
    %cst_446 = arith.constant dense<0.000000e+00> : vector<128x128xf32>
    %382 = tpu.matmul %379, %381, %cst_446 {dimension_numbers = #tpu.dot_dimension_numbers<[1], [0], [0], [1], [0, 0, 1, 1], [], []>} : vector<128x128xbf16>, vector<128x128xbf16>, vector<128x128xf32> -> vector<128x128xf32>
    %383 = arith.addf %376, %382 : vector<128x128xf32>
    %c0_447 = arith.constant 0 : index
    %c2_448 = arith.constant 2 : index
    %c0_449 = arith.constant 0 : index
    %c0_450 = arith.constant 0 : index
    %384 = vector.load %arg7[%c0_447, %c2_448, %c0_449, %c0_450] : memref<2x10x10x128xf32, #tpu.memory_space<vmem>>, vector<2x8x8x128xf32>
    %385 = vector.shape_cast %384 : vector<2x8x8x128xf32> to vector<128x128xf32>
    %386 = arith.truncf %385 : vector<128x128xf32> to vector<128x128xbf16>
    %c4_451 = arith.constant 4 : index
    %c6_452 = arith.constant 6 : index
    %c0_453 = arith.constant 0 : index
    %c0_454 = arith.constant 0 : index
    %387 = vector.load %arg4[%c4_451, %c6_452, %c0_453, %c0_454] : memref<7x9x128x128xbf16, #tpu.memory_space<vmem>>, vector<1x1x128x128xbf16>
    %388 = vector.shape_cast %387 : vector<1x1x128x128xbf16> to vector<128x128xbf16>
    %cst_455 = arith.constant dense<0.000000e+00> : vector<128x128xf32>
    %389 = tpu.matmul %386, %388, %cst_455 {dimension_numbers = #tpu.dot_dimension_numbers<[1], [0], [0], [1], [0, 0, 1, 1], [], []>} : vector<128x128xbf16>, vector<128x128xbf16>, vector<128x128xf32> -> vector<128x128xf32>
    %390 = arith.addf %383, %389 : vector<128x128xf32>
    %c0_456 = arith.constant 0 : index
    %c2_457 = arith.constant 2 : index
    %c1_458 = arith.constant 1 : index
    %c0_459 = arith.constant 0 : index
    %391 = vector.load %arg7[%c0_456, %c2_457, %c1_458, %c0_459] : memref<2x10x10x128xf32, #tpu.memory_space<vmem>>, vector<2x8x8x128xf32>
    %392 = vector.shape_cast %391 : vector<2x8x8x128xf32> to vector<128x128xf32>
    %393 = arith.truncf %392 : vector<128x128xf32> to vector<128x128xbf16>
    %c4_460 = arith.constant 4 : index
    %c7_461 = arith.constant 7 : index
    %c0_462 = arith.constant 0 : index
    %c0_463 = arith.constant 0 : index
    %394 = vector.load %arg4[%c4_460, %c7_461, %c0_462, %c0_463] : memref<7x9x128x128xbf16, #tpu.memory_space<vmem>>, vector<1x1x128x128xbf16>
    %395 = vector.shape_cast %394 : vector<1x1x128x128xbf16> to vector<128x128xbf16>
    %cst_464 = arith.constant dense<0.000000e+00> : vector<128x128xf32>
    %396 = tpu.matmul %393, %395, %cst_464 {dimension_numbers = #tpu.dot_dimension_numbers<[1], [0], [0], [1], [0, 0, 1, 1], [], []>} : vector<128x128xbf16>, vector<128x128xbf16>, vector<128x128xf32> -> vector<128x128xf32>
    %397 = arith.addf %390, %396 : vector<128x128xf32>
    %c0_465 = arith.constant 0 : index
    %c2_466 = arith.constant 2 : index
    %c2_467 = arith.constant 2 : index
    %c0_468 = arith.constant 0 : index
    %398 = vector.load %arg7[%c0_465, %c2_466, %c2_467, %c0_468] : memref<2x10x10x128xf32, #tpu.memory_space<vmem>>, vector<2x8x8x128xf32>
    %399 = vector.shape_cast %398 : vector<2x8x8x128xf32> to vector<128x128xf32>
    %400 = arith.truncf %399 : vector<128x128xf32> to vector<128x128xbf16>
    %c4_469 = arith.constant 4 : index
    %c8_470 = arith.constant 8 : index
    %c0_471 = arith.constant 0 : index
    %c0_472 = arith.constant 0 : index
    %401 = vector.load %arg4[%c4_469, %c8_470, %c0_471, %c0_472] : memref<7x9x128x128xbf16, #tpu.memory_space<vmem>>, vector<1x1x128x128xbf16>
    %402 = vector.shape_cast %401 : vector<1x1x128x128xbf16> to vector<128x128xbf16>
    %cst_473 = arith.constant dense<0.000000e+00> : vector<128x128xf32>
    %403 = tpu.matmul %400, %402, %cst_473 {dimension_numbers = #tpu.dot_dimension_numbers<[1], [0], [0], [1], [0, 0, 1, 1], [], []>} : vector<128x128xbf16>, vector<128x128xbf16>, vector<128x128xf32> -> vector<128x128xf32>
    %404 = arith.addf %397, %403 : vector<128x128xf32>
    %405 = arith.addf %246, %404 : vector<128x128xf32>
    %c10 = arith.constant 10 : index
    %c0_474 = arith.constant 0 : index
    %c0_475 = arith.constant 0 : index
    %406 = vector.load %arg5[%c10, %c0_474, %c0_475] : memref<16x1x128xf32, #tpu.memory_space<vmem>>, vector<1x1x128xf32>
    %407 = vector.shape_cast %406 : vector<1x1x128xf32> to vector<1x128xf32>
    %408 = vector.broadcast %407 : vector<1x128xf32> to vector<128x128xf32>
    %409 = arith.mulf %405, %408 : vector<128x128xf32>
    %c11 = arith.constant 11 : index
    %c0_476 = arith.constant 0 : index
    %c0_477 = arith.constant 0 : index
    %410 = vector.load %arg5[%c11, %c0_476, %c0_477] : memref<16x1x128xf32, #tpu.memory_space<vmem>>, vector<1x1x128xf32>
    %411 = vector.shape_cast %410 : vector<1x1x128xf32> to vector<1x128xf32>
    %412 = vector.broadcast %411 : vector<1x128xf32> to vector<128x128xf32>
    %413 = arith.addf %409, %412 : vector<128x128xf32>
    %cst_478 = arith.constant 0.000000e+00 : f32
    %414 = vector.broadcast %cst_478 : f32 to vector<128x128xf32>
    %415 = arith.cmpf ogt, %413, %414 : vector<128x128xf32>
    %cst_479 = arith.constant 1.000000e-01 : f32
    %416 = vector.broadcast %cst_479 : f32 to vector<128x128xf32>
    %417 = arith.mulf %416, %413 : vector<128x128xf32>
    %418 = arith.select %415, %413, %417 : vector<128x128xi1>, vector<128x128xf32>
    %419 = vector.shape_cast %418 : vector<128x128xf32> to vector<2x8x8x128xf32>
    %c0_480 = arith.constant 0 : index
    %c1_481 = arith.constant 1 : index
    %c1_482 = arith.constant 1 : index
    %c0_483 = arith.constant 0 : index
    %420 = vector.load %arg7[%c0_480, %c1_481, %c1_482, %c0_483] : memref<2x10x10x128xf32, #tpu.memory_space<vmem>>, vector<2x8x8x128xf32>
    tpu.vector_store %arg7[%c0_480, %c1_481, %c1_482, %c0_483], %419 {strides = array<i32>} : memref<2x10x10x128xf32, #tpu.memory_space<vmem>>, vector<2x8x8x128xf32>,
    %cst_484 = arith.constant 0.000000e+00 : f32
    %421 = vector.broadcast %cst_484 : f32 to vector<128x128xf32>
    %c0_485 = arith.constant 0 : index
    %c0_486 = arith.constant 0 : index
    %c0_487 = arith.constant 0 : index
    %c0_488 = arith.constant 0 : index
    %422 = vector.load %arg7[%c0_485, %c0_486, %c0_487, %c0_488] : memref<2x10x10x128xf32, #tpu.memory_space<vmem>>, vector<2x8x8x128xf32>
    %423 = vector.shape_cast %422 : vector<2x8x8x128xf32> to vector<128x128xf32>
    %424 = arith.truncf %423 : vector<128x128xf32> to vector<128x128xbf16>
    %c5_489 = arith.constant 5 : index
    %c0_490 = arith.constant 0 : index
    %c0_491 = arith.constant 0 : index
    %c0_492 = arith.constant 0 : index
    %425 = vector.load %arg4[%c5_489, %c0_490, %c0_491, %c0_492] : memref<7x9x128x128xbf16, #tpu.memory_space<vmem>>, vector<1x1x128x128xbf16>
    %426 = vector.shape_cast %425 : vector<1x1x128x128xbf16> to vector<128x128xbf16>
    %cst_493 = arith.constant dense<0.000000e+00> : vector<128x128xf32>
    %427 = tpu.matmul %424, %426, %cst_493 {dimension_numbers = #tpu.dot_dimension_numbers<[1], [0], [0], [1], [0, 0, 1, 1], [], []>} : vector<128x128xbf16>, vector<128x128xbf16>, vector<128x128xf32> -> vector<128x128xf32>
    %428 = arith.addf %421, %427 : vector<128x128xf32>
    %c0_494 = arith.constant 0 : index
    %c0_495 = arith.constant 0 : index
    %c1_496 = arith.constant 1 : index
    %c0_497 = arith.constant 0 : index
    %429 = vector.load %arg7[%c0_494, %c0_495, %c1_496, %c0_497] : memref<2x10x10x128xf32, #tpu.memory_space<vmem>>, vector<2x8x8x128xf32>
    %430 = vector.shape_cast %429 : vector<2x8x8x128xf32> to vector<128x128xf32>
    %431 = arith.truncf %430 : vector<128x128xf32> to vector<128x128xbf16>
    %c5_498 = arith.constant 5 : index
    %c1_499 = arith.constant 1 : index
    %c0_500 = arith.constant 0 : index
    %c0_501 = arith.constant 0 : index
    %432 = vector.load %arg4[%c5_498, %c1_499, %c0_500, %c0_501] : memref<7x9x128x128xbf16, #tpu.memory_space<vmem>>, vector<1x1x128x128xbf16>
    %433 = vector.shape_cast %432 : vector<1x1x128x128xbf16> to vector<128x128xbf16>
    %cst_502 = arith.constant dense<0.000000e+00> : vector<128x128xf32>
    %434 = tpu.matmul %431, %433, %cst_502 {dimension_numbers = #tpu.dot_dimension_numbers<[1], [0], [0], [1], [0, 0, 1, 1], [], []>} : vector<128x128xbf16>, vector<128x128xbf16>, vector<128x128xf32> -> vector<128x128xf32>
    %435 = arith.addf %428, %434 : vector<128x128xf32>
    %c0_503 = arith.constant 0 : index
    %c0_504 = arith.constant 0 : index
    %c2_505 = arith.constant 2 : index
    %c0_506 = arith.constant 0 : index
    %436 = vector.load %arg7[%c0_503, %c0_504, %c2_505, %c0_506] : memref<2x10x10x128xf32, #tpu.memory_space<vmem>>, vector<2x8x8x128xf32>
    %437 = vector.shape_cast %436 : vector<2x8x8x128xf32> to vector<128x128xf32>
    %438 = arith.truncf %437 : vector<128x128xf32> to vector<128x128xbf16>
    %c5_507 = arith.constant 5 : index
    %c2_508 = arith.constant 2 : index
    %c0_509 = arith.constant 0 : index
    %c0_510 = arith.constant 0 : index
    %439 = vector.load %arg4[%c5_507, %c2_508, %c0_509, %c0_510] : memref<7x9x128x128xbf16, #tpu.memory_space<vmem>>, vector<1x1x128x128xbf16>
    %440 = vector.shape_cast %439 : vector<1x1x128x128xbf16> to vector<128x128xbf16>
    %cst_511 = arith.constant dense<0.000000e+00> : vector<128x128xf32>
    %441 = tpu.matmul %438, %440, %cst_511 {dimension_numbers = #tpu.dot_dimension_numbers<[1], [0], [0], [1], [0, 0, 1, 1], [], []>} : vector<128x128xbf16>, vector<128x128xbf16>, vector<128x128xf32> -> vector<128x128xf32>
    %442 = arith.addf %435, %441 : vector<128x128xf32>
    %c0_512 = arith.constant 0 : index
    %c1_513 = arith.constant 1 : index
    %c0_514 = arith.constant 0 : index
    %c0_515 = arith.constant 0 : index
    %443 = vector.load %arg7[%c0_512, %c1_513, %c0_514, %c0_515] : memref<2x10x10x128xf32, #tpu.memory_space<vmem>>, vector<2x8x8x128xf32>
    %444 = vector.shape_cast %443 : vector<2x8x8x128xf32> to vector<128x128xf32>
    %445 = arith.truncf %444 : vector<128x128xf32> to vector<128x128xbf16>
    %c5_516 = arith.constant 5 : index
    %c3_517 = arith.constant 3 : index
    %c0_518 = arith.constant 0 : index
    %c0_519 = arith.constant 0 : index
    %446 = vector.load %arg4[%c5_516, %c3_517, %c0_518, %c0_519] : memref<7x9x128x128xbf16, #tpu.memory_space<vmem>>, vector<1x1x128x128xbf16>
    %447 = vector.shape_cast %446 : vector<1x1x128x128xbf16> to vector<128x128xbf16>
    %cst_520 = arith.constant dense<0.000000e+00> : vector<128x128xf32>
    %448 = tpu.matmul %445, %447, %cst_520 {dimension_numbers = #tpu.dot_dimension_numbers<[1], [0], [0], [1], [0, 0, 1, 1], [], []>} : vector<128x128xbf16>, vector<128x128xbf16>, vector<128x128xf32> -> vector<128x128xf32>
    %449 = arith.addf %442, %448 : vector<128x128xf32>
    %c0_521 = arith.constant 0 : index
    %c1_522 = arith.constant 1 : index
    %c1_523 = arith.constant 1 : index
    %c0_524 = arith.constant 0 : index
    %450 = vector.load %arg7[%c0_521, %c1_522, %c1_523, %c0_524] : memref<2x10x10x128xf32, #tpu.memory_space<vmem>>, vector<2x8x8x128xf32>
    %451 = vector.shape_cast %450 : vector<2x8x8x128xf32> to vector<128x128xf32>
    %452 = arith.truncf %451 : vector<128x128xf32> to vector<128x128xbf16>
    %c5_525 = arith.constant 5 : index
    %c4_526 = arith.constant 4 : index
    %c0_527 = arith.constant 0 : index
    %c0_528 = arith.constant 0 : index
    %453 = vector.load %arg4[%c5_525, %c4_526, %c0_527, %c0_528] : memref<7x9x128x128xbf16, #tpu.memory_space<vmem>>, vector<1x1x128x128xbf16>
    %454 = vector.shape_cast %453 : vector<1x1x128x128xbf16> to vector<128x128xbf16>
    %cst_529 = arith.constant dense<0.000000e+00> : vector<128x128xf32>
    %455 = tpu.matmul %452, %454, %cst_529 {dimension_numbers = #tpu.dot_dimension_numbers<[1], [0], [0], [1], [0, 0, 1, 1], [], []>} : vector<128x128xbf16>, vector<128x128xbf16>, vector<128x128xf32> -> vector<128x128xf32>
    %456 = arith.addf %449, %455 : vector<128x128xf32>
    %c0_530 = arith.constant 0 : index
    %c1_531 = arith.constant 1 : index
    %c2_532 = arith.constant 2 : index
    %c0_533 = arith.constant 0 : index
    %457 = vector.load %arg7[%c0_530, %c1_531, %c2_532, %c0_533] : memref<2x10x10x128xf32, #tpu.memory_space<vmem>>, vector<2x8x8x128xf32>
    %458 = vector.shape_cast %457 : vector<2x8x8x128xf32> to vector<128x128xf32>
    %459 = arith.truncf %458 : vector<128x128xf32> to vector<128x128xbf16>
    %c5_534 = arith.constant 5 : index
    %c5_535 = arith.constant 5 : index
    %c0_536 = arith.constant 0 : index
    %c0_537 = arith.constant 0 : index
    %460 = vector.load %arg4[%c5_534, %c5_535, %c0_536, %c0_537] : memref<7x9x128x128xbf16, #tpu.memory_space<vmem>>, vector<1x1x128x128xbf16>
    %461 = vector.shape_cast %460 : vector<1x1x128x128xbf16> to vector<128x128xbf16>
    %cst_538 = arith.constant dense<0.000000e+00> : vector<128x128xf32>
    %462 = tpu.matmul %459, %461, %cst_538 {dimension_numbers = #tpu.dot_dimension_numbers<[1], [0], [0], [1], [0, 0, 1, 1], [], []>} : vector<128x128xbf16>, vector<128x128xbf16>, vector<128x128xf32> -> vector<128x128xf32>
    %463 = arith.addf %456, %462 : vector<128x128xf32>
    %c0_539 = arith.constant 0 : index
    %c2_540 = arith.constant 2 : index
    %c0_541 = arith.constant 0 : index
    %c0_542 = arith.constant 0 : index
    %464 = vector.load %arg7[%c0_539, %c2_540, %c0_541, %c0_542] : memref<2x10x10x128xf32, #tpu.memory_space<vmem>>, vector<2x8x8x128xf32>
    %465 = vector.shape_cast %464 : vector<2x8x8x128xf32> to vector<128x128xf32>
    %466 = arith.truncf %465 : vector<128x128xf32> to vector<128x128xbf16>
    %c5_543 = arith.constant 5 : index
    %c6_544 = arith.constant 6 : index
    %c0_545 = arith.constant 0 : index
    %c0_546 = arith.constant 0 : index
    %467 = vector.load %arg4[%c5_543, %c6_544, %c0_545, %c0_546] : memref<7x9x128x128xbf16, #tpu.memory_space<vmem>>, vector<1x1x128x128xbf16>
    %468 = vector.shape_cast %467 : vector<1x1x128x128xbf16> to vector<128x128xbf16>
    %cst_547 = arith.constant dense<0.000000e+00> : vector<128x128xf32>
    %469 = tpu.matmul %466, %468, %cst_547 {dimension_numbers = #tpu.dot_dimension_numbers<[1], [0], [0], [1], [0, 0, 1, 1], [], []>} : vector<128x128xbf16>, vector<128x128xbf16>, vector<128x128xf32> -> vector<128x128xf32>
    %470 = arith.addf %463, %469 : vector<128x128xf32>
    %c0_548 = arith.constant 0 : index
    %c2_549 = arith.constant 2 : index
    %c1_550 = arith.constant 1 : index
    %c0_551 = arith.constant 0 : index
    %471 = vector.load %arg7[%c0_548, %c2_549, %c1_550, %c0_551] : memref<2x10x10x128xf32, #tpu.memory_space<vmem>>, vector<2x8x8x128xf32>
    %472 = vector.shape_cast %471 : vector<2x8x8x128xf32> to vector<128x128xf32>
    %473 = arith.truncf %472 : vector<128x128xf32> to vector<128x128xbf16>
    %c5_552 = arith.constant 5 : index
    %c7_553 = arith.constant 7 : index
    %c0_554 = arith.constant 0 : index
    %c0_555 = arith.constant 0 : index
    %474 = vector.load %arg4[%c5_552, %c7_553, %c0_554, %c0_555] : memref<7x9x128x128xbf16, #tpu.memory_space<vmem>>, vector<1x1x128x128xbf16>
    %475 = vector.shape_cast %474 : vector<1x1x128x128xbf16> to vector<128x128xbf16>
    %cst_556 = arith.constant dense<0.000000e+00> : vector<128x128xf32>
    %476 = tpu.matmul %473, %475, %cst_556 {dimension_numbers = #tpu.dot_dimension_numbers<[1], [0], [0], [1], [0, 0, 1, 1], [], []>} : vector<128x128xbf16>, vector<128x128xbf16>, vector<128x128xf32> -> vector<128x128xf32>
    %477 = arith.addf %470, %476 : vector<128x128xf32>
    %c0_557 = arith.constant 0 : index
    %c2_558 = arith.constant 2 : index
    %c2_559 = arith.constant 2 : index
    %c0_560 = arith.constant 0 : index
    %478 = vector.load %arg7[%c0_557, %c2_558, %c2_559, %c0_560] : memref<2x10x10x128xf32, #tpu.memory_space<vmem>>, vector<2x8x8x128xf32>
    %479 = vector.shape_cast %478 : vector<2x8x8x128xf32> to vector<128x128xf32>
    %480 = arith.truncf %479 : vector<128x128xf32> to vector<128x128xbf16>
    %c5_561 = arith.constant 5 : index
    %c8_562 = arith.constant 8 : index
    %c0_563 = arith.constant 0 : index
    %c0_564 = arith.constant 0 : index
    %481 = vector.load %arg4[%c5_561, %c8_562, %c0_563, %c0_564] : memref<7x9x128x128xbf16, #tpu.memory_space<vmem>>, vector<1x1x128x128xbf16>
    %482 = vector.shape_cast %481 : vector<1x1x128x128xbf16> to vector<128x128xbf16>
    %cst_565 = arith.constant dense<0.000000e+00> : vector<128x128xf32>
    %483 = tpu.matmul %480, %482, %cst_565 {dimension_numbers = #tpu.dot_dimension_numbers<[1], [0], [0], [1], [0, 0, 1, 1], [], []>} : vector<128x128xbf16>, vector<128x128xbf16>, vector<128x128xf32> -> vector<128x128xf32>
    %484 = arith.addf %477, %483 : vector<128x128xf32>
    %c12 = arith.constant 12 : index
    %c0_566 = arith.constant 0 : index
    %c0_567 = arith.constant 0 : index
    %485 = vector.load %arg5[%c12, %c0_566, %c0_567] : memref<16x1x128xf32, #tpu.memory_space<vmem>>, vector<1x1x128xf32>
    %486 = vector.shape_cast %485 : vector<1x1x128xf32> to vector<1x128xf32>
    %487 = vector.broadcast %486 : vector<1x128xf32> to vector<128x128xf32>
    %488 = arith.mulf %484, %487 : vector<128x128xf32>
    %c13 = arith.constant 13 : index
    %c0_568 = arith.constant 0 : index
    %c0_569 = arith.constant 0 : index
    %489 = vector.load %arg5[%c13, %c0_568, %c0_569] : memref<16x1x128xf32, #tpu.memory_space<vmem>>, vector<1x1x128xf32>
    %490 = vector.shape_cast %489 : vector<1x1x128xf32> to vector<1x128xf32>
    %491 = vector.broadcast %490 : vector<1x128xf32> to vector<128x128xf32>
    %492 = arith.addf %488, %491 : vector<128x128xf32>
    %cst_570 = arith.constant 0.000000e+00 : f32
    %493 = vector.broadcast %cst_570 : f32 to vector<128x128xf32>
    %494 = arith.cmpf ogt, %492, %493 : vector<128x128xf32>
    %cst_571 = arith.constant 1.000000e-01 : f32
    %495 = vector.broadcast %cst_571 : f32 to vector<128x128xf32>
    %496 = arith.mulf %495, %492 : vector<128x128xf32>
    %497 = arith.select %494, %492, %496 : vector<128x128xi1>, vector<128x128xf32>
    %498 = vector.shape_cast %497 : vector<128x128xf32> to vector<2x8x8x128xf32>
    %c0_572 = arith.constant 0 : index
    %c1_573 = arith.constant 1 : index
    %c1_574 = arith.constant 1 : index
    %c0_575 = arith.constant 0 : index
    %499 = vector.load %arg7[%c0_572, %c1_573, %c1_574, %c0_575] : memref<2x10x10x128xf32, #tpu.memory_space<vmem>>, vector<2x8x8x128xf32>
    tpu.vector_store %arg7[%c0_572, %c1_573, %c1_574, %c0_575], %498 {strides = array<i32>} : memref<2x10x10x128xf32, #tpu.memory_space<vmem>>, vector<2x8x8x128xf32>,
    %cst_576 = arith.constant 0.000000e+00 : f32
    %500 = vector.broadcast %cst_576 : f32 to vector<128x128xf32>
    %c0_577 = arith.constant 0 : index
    %c0_578 = arith.constant 0 : index
    %c0_579 = arith.constant 0 : index
    %c0_580 = arith.constant 0 : index
    %501 = vector.load %arg7[%c0_577, %c0_578, %c0_579, %c0_580] : memref<2x10x10x128xf32, #tpu.memory_space<vmem>>, vector<2x8x8x128xf32>
    %502 = vector.shape_cast %501 : vector<2x8x8x128xf32> to vector<128x128xf32>
    %503 = arith.truncf %502 : vector<128x128xf32> to vector<128x128xbf16>
    %c6_581 = arith.constant 6 : index
    %c0_582 = arith.constant 0 : index
    %c0_583 = arith.constant 0 : index
    %c0_584 = arith.constant 0 : index
    %504 = vector.load %arg4[%c6_581, %c0_582, %c0_583, %c0_584] : memref<7x9x128x128xbf16, #tpu.memory_space<vmem>>, vector<1x1x128x128xbf16>
    %505 = vector.shape_cast %504 : vector<1x1x128x128xbf16> to vector<128x128xbf16>
    %cst_585 = arith.constant dense<0.000000e+00> : vector<128x128xf32>
    %506 = tpu.matmul %503, %505, %cst_585 {dimension_numbers = #tpu.dot_dimension_numbers<[1], [0], [0], [1], [0, 0, 1, 1], [], []>} : vector<128x128xbf16>, vector<128x128xbf16>, vector<128x128xf32> -> vector<128x128xf32>
    %507 = arith.addf %500, %506 : vector<128x128xf32>
    %c0_586 = arith.constant 0 : index
    %c0_587 = arith.constant 0 : index
    %c1_588 = arith.constant 1 : index
    %c0_589 = arith.constant 0 : index
    %508 = vector.load %arg7[%c0_586, %c0_587, %c1_588, %c0_589] : memref<2x10x10x128xf32, #tpu.memory_space<vmem>>, vector<2x8x8x128xf32>
    %509 = vector.shape_cast %508 : vector<2x8x8x128xf32> to vector<128x128xf32>
    %510 = arith.truncf %509 : vector<128x128xf32> to vector<128x128xbf16>
    %c6_590 = arith.constant 6 : index
    %c1_591 = arith.constant 1 : index
    %c0_592 = arith.constant 0 : index
    %c0_593 = arith.constant 0 : index
    %511 = vector.load %arg4[%c6_590, %c1_591, %c0_592, %c0_593] : memref<7x9x128x128xbf16, #tpu.memory_space<vmem>>, vector<1x1x128x128xbf16>
    %512 = vector.shape_cast %511 : vector<1x1x128x128xbf16> to vector<128x128xbf16>
    %cst_594 = arith.constant dense<0.000000e+00> : vector<128x128xf32>
    %513 = tpu.matmul %510, %512, %cst_594 {dimension_numbers = #tpu.dot_dimension_numbers<[1], [0], [0], [1], [0, 0, 1, 1], [], []>} : vector<128x128xbf16>, vector<128x128xbf16>, vector<128x128xf32> -> vector<128x128xf32>
    %514 = arith.addf %507, %513 : vector<128x128xf32>
    %c0_595 = arith.constant 0 : index
    %c0_596 = arith.constant 0 : index
    %c2_597 = arith.constant 2 : index
    %c0_598 = arith.constant 0 : index
    %515 = vector.load %arg7[%c0_595, %c0_596, %c2_597, %c0_598] : memref<2x10x10x128xf32, #tpu.memory_space<vmem>>, vector<2x8x8x128xf32>
    %516 = vector.shape_cast %515 : vector<2x8x8x128xf32> to vector<128x128xf32>
    %517 = arith.truncf %516 : vector<128x128xf32> to vector<128x128xbf16>
    %c6_599 = arith.constant 6 : index
    %c2_600 = arith.constant 2 : index
    %c0_601 = arith.constant 0 : index
    %c0_602 = arith.constant 0 : index
    %518 = vector.load %arg4[%c6_599, %c2_600, %c0_601, %c0_602] : memref<7x9x128x128xbf16, #tpu.memory_space<vmem>>, vector<1x1x128x128xbf16>
    %519 = vector.shape_cast %518 : vector<1x1x128x128xbf16> to vector<128x128xbf16>
    %cst_603 = arith.constant dense<0.000000e+00> : vector<128x128xf32>
    %520 = tpu.matmul %517, %519, %cst_603 {dimension_numbers = #tpu.dot_dimension_numbers<[1], [0], [0], [1], [0, 0, 1, 1], [], []>} : vector<128x128xbf16>, vector<128x128xbf16>, vector<128x128xf32> -> vector<128x128xf32>
    %521 = arith.addf %514, %520 : vector<128x128xf32>
    %c0_604 = arith.constant 0 : index
    %c1_605 = arith.constant 1 : index
    %c0_606 = arith.constant 0 : index
    %c0_607 = arith.constant 0 : index
    %522 = vector.load %arg7[%c0_604, %c1_605, %c0_606, %c0_607] : memref<2x10x10x128xf32, #tpu.memory_space<vmem>>, vector<2x8x8x128xf32>
    %523 = vector.shape_cast %522 : vector<2x8x8x128xf32> to vector<128x128xf32>
    %524 = arith.truncf %523 : vector<128x128xf32> to vector<128x128xbf16>
    %c6_608 = arith.constant 6 : index
    %c3_609 = arith.constant 3 : index
    %c0_610 = arith.constant 0 : index
    %c0_611 = arith.constant 0 : index
    %525 = vector.load %arg4[%c6_608, %c3_609, %c0_610, %c0_611] : memref<7x9x128x128xbf16, #tpu.memory_space<vmem>>, vector<1x1x128x128xbf16>
    %526 = vector.shape_cast %525 : vector<1x1x128x128xbf16> to vector<128x128xbf16>
    %cst_612 = arith.constant dense<0.000000e+00> : vector<128x128xf32>
    %527 = tpu.matmul %524, %526, %cst_612 {dimension_numbers = #tpu.dot_dimension_numbers<[1], [0], [0], [1], [0, 0, 1, 1], [], []>} : vector<128x128xbf16>, vector<128x128xbf16>, vector<128x128xf32> -> vector<128x128xf32>
    %528 = arith.addf %521, %527 : vector<128x128xf32>
    %c0_613 = arith.constant 0 : index
    %c1_614 = arith.constant 1 : index
    %c1_615 = arith.constant 1 : index
    %c0_616 = arith.constant 0 : index
    %529 = vector.load %arg7[%c0_613, %c1_614, %c1_615, %c0_616] : memref<2x10x10x128xf32, #tpu.memory_space<vmem>>, vector<2x8x8x128xf32>
    %530 = vector.shape_cast %529 : vector<2x8x8x128xf32> to vector<128x128xf32>
    %531 = arith.truncf %530 : vector<128x128xf32> to vector<128x128xbf16>
    %c6_617 = arith.constant 6 : index
    %c4_618 = arith.constant 4 : index
    %c0_619 = arith.constant 0 : index
    %c0_620 = arith.constant 0 : index
    %532 = vector.load %arg4[%c6_617, %c4_618, %c0_619, %c0_620] : memref<7x9x128x128xbf16, #tpu.memory_space<vmem>>, vector<1x1x128x128xbf16>
    %533 = vector.shape_cast %532 : vector<1x1x128x128xbf16> to vector<128x128xbf16>
    %cst_621 = arith.constant dense<0.000000e+00> : vector<128x128xf32>
    %534 = tpu.matmul %531, %533, %cst_621 {dimension_numbers = #tpu.dot_dimension_numbers<[1], [0], [0], [1], [0, 0, 1, 1], [], []>} : vector<128x128xbf16>, vector<128x128xbf16>, vector<128x128xf32> -> vector<128x128xf32>
    %535 = arith.addf %528, %534 : vector<128x128xf32>
    %c0_622 = arith.constant 0 : index
    %c1_623 = arith.constant 1 : index
    %c2_624 = arith.constant 2 : index
    %c0_625 = arith.constant 0 : index
    %536 = vector.load %arg7[%c0_622, %c1_623, %c2_624, %c0_625] : memref<2x10x10x128xf32, #tpu.memory_space<vmem>>, vector<2x8x8x128xf32>
    %537 = vector.shape_cast %536 : vector<2x8x8x128xf32> to vector<128x128xf32>
    %538 = arith.truncf %537 : vector<128x128xf32> to vector<128x128xbf16>
    %c6_626 = arith.constant 6 : index
    %c5_627 = arith.constant 5 : index
    %c0_628 = arith.constant 0 : index
    %c0_629 = arith.constant 0 : index
    %539 = vector.load %arg4[%c6_626, %c5_627, %c0_628, %c0_629] : memref<7x9x128x128xbf16, #tpu.memory_space<vmem>>, vector<1x1x128x128xbf16>
    %540 = vector.shape_cast %539 : vector<1x1x128x128xbf16> to vector<128x128xbf16>
    %cst_630 = arith.constant dense<0.000000e+00> : vector<128x128xf32>
    %541 = tpu.matmul %538, %540, %cst_630 {dimension_numbers = #tpu.dot_dimension_numbers<[1], [0], [0], [1], [0, 0, 1, 1], [], []>} : vector<128x128xbf16>, vector<128x128xbf16>, vector<128x128xf32> -> vector<128x128xf32>
    %542 = arith.addf %535, %541 : vector<128x128xf32>
    %c0_631 = arith.constant 0 : index
    %c2_632 = arith.constant 2 : index
    %c0_633 = arith.constant 0 : index
    %c0_634 = arith.constant 0 : index
    %543 = vector.load %arg7[%c0_631, %c2_632, %c0_633, %c0_634] : memref<2x10x10x128xf32, #tpu.memory_space<vmem>>, vector<2x8x8x128xf32>
    %544 = vector.shape_cast %543 : vector<2x8x8x128xf32> to vector<128x128xf32>
    %545 = arith.truncf %544 : vector<128x128xf32> to vector<128x128xbf16>
    %c6_635 = arith.constant 6 : index
    %c6_636 = arith.constant 6 : index
    %c0_637 = arith.constant 0 : index
    %c0_638 = arith.constant 0 : index
    %546 = vector.load %arg4[%c6_635, %c6_636, %c0_637, %c0_638] : memref<7x9x128x128xbf16, #tpu.memory_space<vmem>>, vector<1x1x128x128xbf16>
    %547 = vector.shape_cast %546 : vector<1x1x128x128xbf16> to vector<128x128xbf16>
    %cst_639 = arith.constant dense<0.000000e+00> : vector<128x128xf32>
    %548 = tpu.matmul %545, %547, %cst_639 {dimension_numbers = #tpu.dot_dimension_numbers<[1], [0], [0], [1], [0, 0, 1, 1], [], []>} : vector<128x128xbf16>, vector<128x128xbf16>, vector<128x128xf32> -> vector<128x128xf32>
    %549 = arith.addf %542, %548 : vector<128x128xf32>
    %c0_640 = arith.constant 0 : index
    %c2_641 = arith.constant 2 : index
    %c1_642 = arith.constant 1 : index
    %c0_643 = arith.constant 0 : index
    %550 = vector.load %arg7[%c0_640, %c2_641, %c1_642, %c0_643] : memref<2x10x10x128xf32, #tpu.memory_space<vmem>>, vector<2x8x8x128xf32>
    %551 = vector.shape_cast %550 : vector<2x8x8x128xf32> to vector<128x128xf32>
    %552 = arith.truncf %551 : vector<128x128xf32> to vector<128x128xbf16>
    %c6_644 = arith.constant 6 : index
    %c7_645 = arith.constant 7 : index
    %c0_646 = arith.constant 0 : index
    %c0_647 = arith.constant 0 : index
    %553 = vector.load %arg4[%c6_644, %c7_645, %c0_646, %c0_647] : memref<7x9x128x128xbf16, #tpu.memory_space<vmem>>, vector<1x1x128x128xbf16>
    %554 = vector.shape_cast %553 : vector<1x1x128x128xbf16> to vector<128x128xbf16>
    %cst_648 = arith.constant dense<0.000000e+00> : vector<128x128xf32>
    %555 = tpu.matmul %552, %554, %cst_648 {dimension_numbers = #tpu.dot_dimension_numbers<[1], [0], [0], [1], [0, 0, 1, 1], [], []>} : vector<128x128xbf16>, vector<128x128xbf16>, vector<128x128xf32> -> vector<128x128xf32>
    %556 = arith.addf %549, %555 : vector<128x128xf32>
    %c0_649 = arith.constant 0 : index
    %c2_650 = arith.constant 2 : index
    %c2_651 = arith.constant 2 : index
    %c0_652 = arith.constant 0 : index
    %557 = vector.load %arg7[%c0_649, %c2_650, %c2_651, %c0_652] : memref<2x10x10x128xf32, #tpu.memory_space<vmem>>, vector<2x8x8x128xf32>
    %558 = vector.shape_cast %557 : vector<2x8x8x128xf32> to vector<128x128xf32>
    %559 = arith.truncf %558 : vector<128x128xf32> to vector<128x128xbf16>
    %c6_653 = arith.constant 6 : index
    %c8_654 = arith.constant 8 : index
    %c0_655 = arith.constant 0 : index
    %c0_656 = arith.constant 0 : index
    %560 = vector.load %arg4[%c6_653, %c8_654, %c0_655, %c0_656] : memref<7x9x128x128xbf16, #tpu.memory_space<vmem>>, vector<1x1x128x128xbf16>
    %561 = vector.shape_cast %560 : vector<1x1x128x128xbf16> to vector<128x128xbf16>
    %cst_657 = arith.constant dense<0.000000e+00> : vector<128x128xf32>
    %562 = tpu.matmul %559, %561, %cst_657 {dimension_numbers = #tpu.dot_dimension_numbers<[1], [0], [0], [1], [0, 0, 1, 1], [], []>} : vector<128x128xbf16>, vector<128x128xbf16>, vector<128x128xf32> -> vector<128x128xf32>
    %563 = arith.addf %556, %562 : vector<128x128xf32>
    %564 = arith.addf %405, %563 : vector<128x128xf32>
    %c14 = arith.constant 14 : index
    %c0_658 = arith.constant 0 : index
    %c0_659 = arith.constant 0 : index
    %565 = vector.load %arg5[%c14, %c0_658, %c0_659] : memref<16x1x128xf32, #tpu.memory_space<vmem>>, vector<1x1x128xf32>
    %566 = vector.shape_cast %565 : vector<1x1x128xf32> to vector<1x128xf32>
    %567 = vector.broadcast %566 : vector<1x128xf32> to vector<128x128xf32>
    %568 = arith.mulf %564, %567 : vector<128x128xf32>
    %c15 = arith.constant 15 : index
    %c0_660 = arith.constant 0 : index
    %c0_661 = arith.constant 0 : index
    %569 = vector.load %arg5[%c15, %c0_660, %c0_661] : memref<16x1x128xf32, #tpu.memory_space<vmem>>, vector<1x1x128xf32>
    %570 = vector.shape_cast %569 : vector<1x1x128xf32> to vector<1x128xf32>
    %571 = vector.broadcast %570 : vector<1x128xf32> to vector<128x128xf32>
    %572 = arith.addf %568, %571 : vector<128x128xf32>
    %cst_662 = arith.constant 0.000000e+00 : f32
    %573 = vector.broadcast %cst_662 : f32 to vector<128x128xf32>
    %574 = arith.cmpf ogt, %572, %573 : vector<128x128xf32>
    %cst_663 = arith.constant 1.000000e-01 : f32
    %575 = vector.broadcast %cst_663 : f32 to vector<128x128xf32>
    %576 = arith.mulf %575, %572 : vector<128x128xf32>
    %577 = arith.select %574, %572, %576 : vector<128x128xi1>, vector<128x128xf32>
    %578 = vector.shape_cast %577 : vector<128x128xf32> to vector<2x64x128xf32>
    %cst_664 = arith.constant dense<0.000000e+00> : vector<2x128xf32>
    %579 = vector.multi_reduction <add>, %578, %cst_664 [1] : vector<2x64x128xf32> to vector<2x128xf32>
    %cst_665 = arith.constant 6.400000e+01 : f32
    %580 = vector.broadcast %cst_665 : f32 to vector<2x128xf32>
    %581 = arith.divf %579, %580 : vector<2x128xf32>
    %c0_666 = arith.constant 0 : index
    %c0_667 = arith.constant 0 : index
    %582 = vector.load %arg6[%c0_666, %c0_667] : memref<2x128xf32, #tpu.memory_space<vmem>>, vector<2x128xf32>
    tpu.vector_store %arg6[%c0_666, %c0_667], %581 {strides = array<i32>} : memref<2x128xf32, #tpu.memory_space<vmem>>, vector<2x128xf32>,
    return
  }
}

</mosaic_0001>

<bundles_post_ra>
// kernel: wide_resnet_aet_share_forward.1
= control target key start
LH: loop header
LB: loop body
LE: loop exit
PB: predicated region body
PF: predicated region fallthrough
CT: control target
= control target key end

     0   :  { %s20675_s0 = inlined_call_operand.vmem [shape: bf16[128,576], index: 0, kind: input, shape index: {}]   ;;  %s20676_s1 = inlined_call_operand.vmem [shape: bf16[128,64], index: 1, kind: input, shape index: {}]   ;;  %s20677_s2 = inlined_call_operand.vmem [shape: bf16[576,128], index: 2, kind: input, shape index: {}]   ;;  %s20678_s3 = inlined_call_operand.vmem [shape: bf16[64,128], index: 3, kind: input, shape index: {}]   ;;  %s20679_s4 = inlined_call_operand.vmem [shape: bf16[7,9,128,128], index: 4, kind: input, shape index: {}]   ;;  %s20680_s5 = inlined_call_operand.vmem [shape: f32[16,1,128], index: 5, kind: input, shape index: {}]   ;;  %s20681_s6 = inlined_call_operand.hbm [shape: f32[2,128], index: 6, kind: output, shape index: {}]  }
   0x1   :  { %v14885_v0 = vld [vmem:[%s20677_s2 + $0x38] sm:$0xff]  ;;  %v14884_v1 = vld [vmem:[%s20677_s2 + $0x30] sm:$0xff]  ;;  %v14883_v2 = vld [vmem:[%s20677_s2 + $0x28] sm:$0xff] }
   0x2   :  { %15430 = vmatpush.bf16.msra.mxu1 %v14885_v0  ;;  %15431 = vmatpush.bf16.msra.mxu2 %v14885_v0  ;;  %v14882_v3 = vld [vmem:[%s20677_s2 + $0x20] sm:$0xff]  ;;  %v14881_v4 = vld [vmem:[%s20677_s2 + $0x18] sm:$0xff]  ;;  %v14880_v5 = vld [vmem:[%s20677_s2 + $0x10] sm:$0xff] }
   0x3   :  { %15432 = vmatpush.bf16.msra.mxu3 %v14885_v0  ;;  %626 = vmatpush.bf16.msra.mxu0 %v14885_v0 }
   0x6   :  { %15433 = vmatpush.bf16.msra.mxu1 %v14884_v1  ;;  %15434 = vmatpush.bf16.msra.mxu2 %v14884_v1 }
   0x7   :  { %15435 = vmatpush.bf16.msra.mxu3 %v14884_v1  ;;  %627 = vmatpush.bf16.msra.mxu0 %v14884_v1 }
   0xa   :  { %15436 = vmatpush.bf16.msra.mxu1 %v14883_v2  ;;  %15437 = vmatpush.bf16.msra.mxu2 %v14883_v2 }
   0xb   :  { %15438 = vmatpush.bf16.msra.mxu3 %v14883_v2  ;;  %628 = vmatpush.bf16.msra.mxu0 %v14883_v2 }
   0xe   :  { %15439 = vmatpush.bf16.msra.mxu1 %v14882_v3  ;;  %15440 = vmatpush.bf16.msra.mxu2 %v14882_v3 }
   0xf   :  { %15441 = vmatpush.bf16.msra.mxu3 %v14882_v3  ;;  %629 = vmatpush.bf16.msra.mxu0 %v14882_v3 }
  0x12   :  { %15442 = vmatpush.bf16.msra.mxu1 %v14881_v4  ;;  %15443 = vmatpush.bf16.msra.mxu2 %v14881_v4 }
  0x13   :  { %11 = vsyncpa [#allocation4], 0  ;;  %15444 = vmatpush.bf16.msra.mxu3 %v14881_v4  ;;  %630 = vmatpush.bf16.msra.mxu0 %v14881_v4  ;;  %v14879_v6 = vld [vmem:[%s20677_s2 + $0x8] sm:$0xff]  ;;  %v14878_v7 = vld [vmem:[%s20677_s2] sm:$0xff]  ;;  %vm601_vm0 = vcmask 523264   ;;  %s11438_s22 = sshll.u32 %s20681_s6, 4  ;;  %s11439_s22 = int_to_ptr.hbm [resolvable:$true] %s11438_s22 }
  0x14   :  { %v11489_v8 = vld [vmem:[%s20675_s0 + $0x50] sm:$0xf]  ;;  %v14850_v9 = vld [vmem:[%s20675_s0 + $0x60] sm:$0xf0]  ;;  %v11529_v10 = vld [vmem:[%s20675_s0 + $0xa0] sm:$0xf] }
  0x15   :  { %v14860_v11 = vld [vmem:[%s20675_s0 + $0xb0] sm:$0xf0]  ;;  %v11569_v12 = vld [vmem:[%s20675_s0 + $0xf0] sm:$0xf]  ;;  %v14870_v13 = vld [vmem:[%s20675_s0 + $0x100] sm:$0xf0]  ;;  %v11490_v18 = vor.u32 %v14850_v9, %v11489_v8 }
  0x16   :  { %15445 = vmatpush.bf16.msra.mxu1 %v14880_v5  ;;  %15446 = vmatpush.bf16.msra.mxu2 %v14880_v5  ;;  %v11449_v14 = vld [vmem:[%s20675_s0] sm:$0xf]  ;;  %v14840_v15 = vld [vmem:[%s20675_s0 + $0x10] sm:$0xf0]  ;;  %v14901_v16 = vld [vmem:[%s20677_s2 + $0xb8] sm:$0xff]  ;;  %v11530_v19 = vor.u32 %v14860_v11, %v11529_v10  ;;  %v11570_v20 = vor.u32 %v14870_v13, %v11569_v12 }
  0x17   :  { %15447 = vmatpush.bf16.msra.mxu3 %v14880_v5  ;;  %631 = vmatpush.bf16.msra.mxu0 %v14880_v5  ;;  %v14893_v17 = vld [vmem:[%s20677_s2 + $0x78] sm:$0xff]  ;;  %v11450_v21 = vor.u32 %v14840_v15, %v11449_v14  ;;  %v14900_v24 = vld [vmem:[%s20677_s2 + $0xb0] sm:$0xff]  ;;  %v14899_v28 = vld [vmem:[%s20677_s2 + $0xa8] sm:$0xff] }
  0x18   :  { %v14909_v22 = vld [vmem:[%s20677_s2 + $0xf8] sm:$0xff]  ;;  %v14892_v25 = vld [vmem:[%s20677_s2 + $0x70] sm:$0xff]  ;;  %v14891_v29 = vld [vmem:[%s20677_s2 + $0x68] sm:$0xff] }
  0x19   :  { %v14913_v23 = vld [vmem:[%s20677_s2 + $0x118] sm:$0xff]  ;;  %v14908_v26 = vld [vmem:[%s20677_s2 + $0xf0] sm:$0xff]  ;;  %v14907_v30 = vld [vmem:[%s20677_s2 + $0xe8] sm:$0xff] }
  0x1a   :  { %15448 = vmatpush.bf16.msra.mxu1 %v14879_v6  ;;  %15449 = vmatpush.bf16.msra.mxu2 %v14879_v6  ;;  %v14912_v27 = vld [vmem:[%s20677_s2 + $0x110] sm:$0xff]  ;;  %v14911_v31 = vld [vmem:[%s20677_s2 + $0x108] sm:$0xff]  ;;  %v14898_v32 = vld [vmem:[%s20677_s2 + $0xa0] sm:$0xff] }
  0x1b   :  { %15450 = vmatpush.bf16.msra.mxu3 %v14879_v6  ;;  %632 = vmatpush.bf16.msra.mxu0 %v14879_v6  ;;  %v14890_v33 = vld [vmem:[%s20677_s2 + $0x60] sm:$0xff]  ;;  %v11509_v35 = vld [vmem:[%s20675_s0 + $0x78] sm:$0xf]  ;;  %v14855_v36 = vld [vmem:[%s20675_s0 + $0x88] sm:$0xf0] }
  0x1c   :  { %v14906_v34 = vld [vmem:[%s20677_s2 + $0xe0] sm:$0xff]  ;;  %v11549_v37 = vld [vmem:[%s20675_s0 + $0xc8] sm:$0xf]  ;;  %v14865_v38 = vld [vmem:[%s20675_s0 + $0xd8] sm:$0xf0]  ;;  %v11510_v46 = vor.u32 %v14855_v36, %v11509_v35 }
  0x1d   :  { %v11589_v39 = vld [vmem:[%s20675_s0 + $0x118] sm:$0xf]  ;;  %v14875_v40 = vld [vmem:[%s20675_s0 + $0x128] sm:$0xf0]  ;;  %v11469_v41 = vld [vmem:[%s20675_s0 + $0x28] sm:$0xf]  ;;  %v11550_v47 = vor.u32 %v14865_v38, %v11549_v37 }
  0x1e   :  { %15451 = vmatpush.bf16.msra.mxu1 %v14878_v7  ;;  %15452 = vmatpush.bf16.msra.mxu2 %v14878_v7  ;;  %v14845_v42 = vld [vmem:[%s20675_s0 + $0x38] sm:$0xf0]  ;;  %v14910_v43 = vld [vmem:[%s20677_s2 + $0x100] sm:$0xff]  ;;  %v11590_v48 = vor.u32 %v14875_v40, %v11589_v39  ;;  %v14896_v51 = vld [vmem:[%s20677_s2 + $0x90] sm:$0xff] }
  0x1f   :  { %15453 = vmatpush.bf16.msra.mxu3 %v14878_v7  ;;  %633 = vmatpush.bf16.msra.mxu0 %v14878_v7  ;;  %v14897_v44 = vld [vmem:[%s20677_s2 + $0x98] sm:$0xff]  ;;  %v11470_v49 = vor.u32 %v14845_v42, %v11469_v41  ;;  %v14888_v52 = vld [vmem:[%s20677_s2 + $0x50] sm:$0xff]  ;;  %v14895_v54 = vld [vmem:[%s20677_s2 + $0x88] sm:$0xff] }
  0x20   :  { %v14889_v45 = vld [vmem:[%s20677_s2 + $0x58] sm:$0xff]  ;;  %v14904_v53 = vld [vmem:[%s20677_s2 + $0xd0] sm:$0xff]  ;;  %v14887_v55 = vld [vmem:[%s20677_s2 + $0x48] sm:$0xff] }
  0x21   :  { %644 = vmatmul.bf16.vlgmr.msra.gmra.mxu1 %v11490_v18  ;;  %654 = vmatmul.bf16.vlgmr.msra.gmra.mxu2 %v11530_v19  ;;  %v14905_v50 = vld [vmem:[%s20677_s2 + $0xd8] sm:$0xff]  ;;  %v14903_v56 = vld [vmem:[%s20677_s2 + $0xc8] sm:$0xff]  ;;  %v14894_v57 = vld [vmem:[%s20677_s2 + $0x80] sm:$0xff] }
  0x22   :  { %724 = vmatpush.bf16.msrb.mxu2 %v14901_v16  ;;  %675 = vmatpush.bf16.msrb.mxu1 %v14893_v17  ;;  %v14886_v58 = vld [vmem:[%s20677_s2 + $0x40] sm:$0xff]  ;;  %v11451_v61 = vld [vmem:[%s20675_s0 + $0x14] sm:$0xf0]  ;;  %v11457_v0 = vld [vmem:[%s20675_s0 + $0x8] sm:$0xf] }
  0x23   :  { %664 = vmatmul.bf16.vlgmr.msra.gmra.mxu3 %v11570_v20  ;;  %634 = vmatmul.bf16.vlgmr.msra.gmra.mxu0 %v11450_v21  ;;  %v14838_v59 = vld [vmem:[%s20675_s0 + $0x4] sm:$0xf]  ;;  %v14933_v62 = vld [vmem:[%s20679_s4 + $0x38] sm:$0xff]  ;;  %v14839_v2 = vld [vmem:[%s20675_s0 + $0xc] sm:$0xf] }
  0x24   :  { %773 = vmatpush.bf16.msrb.mxu3 %v14909_v22  ;;  %826 = vmatpush.bf16.msrb.mxu0 %v14913_v23  ;;  %v14902_v60 = vld [vmem:[%s20677_s2 + $0xc0] sm:$0xff]  ;;  %v14941_v63 = vld [vmem:[%s20679_s4 + $0x78] sm:$0xff]  ;;  %v11465_v4 = vld [vmem:[%s20675_s0 + $0x10] sm:$0xf]  ;;  %v11454_v6 = vor.u32 %v14838_v59, %v11451_v61 }
  0x25   :  { %v14841_v1 = vld [vmem:[%s20675_s0 + $0x18] sm:$0xf0]  ;;  %v11459_v3 = vld [vmem:[%s20675_s0 + $0x1c] sm:$0xf0]  ;;  %v14842_v5 = vld [vmem:[%s20675_s0 + $0x20] sm:$0xf0] }
  0x26   :  { %725 = vmatpush.bf16.msrb.mxu2 %v14900_v24  ;;  %676 = vmatpush.bf16.msrb.mxu1 %v14892_v25  ;;  %v11458_v7 = vor.u32 %v14841_v1, %v11457_v0  ;;  %v11462_v8 = vor.u32 %v14839_v2, %v11459_v3  ;;  %v11466_v9 = vor.u32 %v14842_v5, %v11465_v4  ;;  %v14932_v10 = vld [vmem:[%s20679_s4 + $0x30] sm:$0xff]  ;;  %v14843_v12 = vld [vmem:[%s20675_s0 + $0x2c] sm:$0xf]  ;;  %v11471_v13 = vld [vmem:[%s20675_s0 + $0x3c] sm:$0xf0] }
  0x27   :  { %v14940_v11 = vld [vmem:[%s20679_s4 + $0x70] sm:$0xff]  ;;  %v14846_v15 = vld [vmem:[%s20675_s0 + $0x40] sm:$0xf0]  ;;  %v11479_v17 = vld [vmem:[%s20675_s0 + $0x44] sm:$0xf0]  ;;  %v11474_v20 = vor.u32 %v14843_v12, %v11471_v13 }
  0x28   :  { %774 = vmatpush.bf16.msrb.mxu3 %v14908_v26  ;;  %827 = vmatpush.bf16.msrb.mxu0 %v14912_v27  ;;  %v11477_v14 = vld [vmem:[%s20675_s0 + $0x30] sm:$0xf]  ;;  %v14844_v16 = vld [vmem:[%s20675_s0 + $0x34] sm:$0xf]  ;;  %v11485_v18 = vld [vmem:[%s20675_s0 + $0x38] sm:$0xf] }
  0x29   :  { %v14847_v19 = vld [vmem:[%s20675_s0 + $0x48] sm:$0xf0]  ;;  %v11478_v21 = vor.u32 %v14846_v15, %v11477_v14  ;;  %v11482_v22 = vor.u32 %v14844_v16, %v11479_v17  ;;  %v14848_v26 = vld [vmem:[%s20675_s0 + $0x54] sm:$0xf]  ;;  %v11491_v27 = vld [vmem:[%s20675_s0 + $0x64] sm:$0xf0] }
  0x2a   :  { %726 = vmatpush.bf16.msrb.mxu2 %v14899_v28  ;;  %677 = vmatpush.bf16.msrb.mxu1 %v14891_v29  ;;  %v11486_v23 = vor.u32 %v14847_v19, %v11485_v18  ;;  %v14931_v24 = vld [vmem:[%s20679_s4 + $0x28] sm:$0xff]  ;;  %v11497_v28 = vld [vmem:[%s20675_s0 + $0x58] sm:$0xf]  ;;  %v14930_v38 = vld [vmem:[%s20679_s4 + $0x20] sm:$0xff] }
  0x2b   :  { %v14939_v25 = vld [vmem:[%s20679_s4 + $0x68] sm:$0xff]  ;;  %v14938_v39 = vld [vmem:[%s20679_s4 + $0x60] sm:$0xff]  ;;  %v14853_v40 = vld [vmem:[%s20675_s0 + $0x7c] sm:$0xf] }
  0x2c   :  { %775 = vmatpush.bf16.msrb.mxu3 %v14907_v30  ;;  %828 = vmatpush.bf16.msrb.mxu0 %v14911_v31  ;;  %v14851_v29 = vld [vmem:[%s20675_s0 + $0x68] sm:$0xf0]  ;;  %v14849_v30 = vld [vmem:[%s20675_s0 + $0x5c] sm:$0xf]  ;;  %v11499_v31 = vld [vmem:[%s20675_s0 + $0x6c] sm:$0xf0] }
  0x2d   :  { %v11498_v35 = vor.u32 %v14851_v29, %v11497_v28  ;;  %v11502_v36 = vor.u32 %v14849_v30, %v11499_v31  ;;  %v11511_v41 = vld [vmem:[%s20675_s0 + $0x8c] sm:$0xf0]  ;;  %v11517_v42 = vld [vmem:[%s20675_s0 + $0x80] sm:$0xf]  ;;  %v14937_v1 = vld [vmem:[%s20679_s4 + $0x58] sm:$0xff] }
  0x2e   :  { %727 = vmatpush.bf16.msrb.mxu2 %v14898_v32  ;;  %678 = vmatpush.bf16.msrb.mxu1 %v14890_v33  ;;  %v11505_v32 = vld [vmem:[%s20675_s0 + $0x60] sm:$0xf]  ;;  %v14852_v33 = vld [vmem:[%s20675_s0 + $0x70] sm:$0xf0]  ;;  %v11545_v59 = vld [vmem:[%s20675_s0 + $0xb0] sm:$0xf] }
  0x2f   :  { %v11506_v37 = vor.u32 %v14852_v33, %v11505_v32  ;;  %v14863_v2 = vld [vmem:[%s20675_s0 + $0xcc] sm:$0xf]  ;;  %v11551_v3 = vld [vmem:[%s20675_s0 + $0xdc] sm:$0xf0]  ;;  %v11557_v4 = vld [vmem:[%s20675_s0 + $0xd0] sm:$0xf] }
  0x30   :  { %776 = vmatpush.bf16.msrb.mxu3 %v14906_v34  ;;  %829 = vmatpush.bf16.msrb.mxu0 %v14910_v43  ;;  %v11494_v34 = vor.u32 %v14848_v26, %v11491_v27  ;;  %v14856_v43 = vld [vmem:[%s20675_s0 + $0x90] sm:$0xf0]  ;;  %v14866_v5 = vld [vmem:[%s20675_s0 + $0xe0] sm:$0xf0]  ;;  %v11571_v17 = vld [vmem:[%s20675_s0 + $0x104] sm:$0xf0] }
  0x31   :  { %649 = vmatmul.bf16.gmra.mxu1 %v11510_v46  ;;  %659 = vmatmul.bf16.gmra.mxu2 %v11550_v47  ;;  %v11525_v46 = vld [vmem:[%s20675_s0 + $0x88] sm:$0xf]  ;;  %v14857_v47 = vld [vmem:[%s20675_s0 + $0x98] sm:$0xf0]  ;;  %v14928_v12 = vld [vmem:[%s20679_s4 + $0x10] sm:$0xff] }
  0x32   :  { %728 = vmatpush.bf16.msrb.mxu2 %v14897_v44  ;;  %679 = vmatpush.bf16.msrb.mxu1 %v14889_v45  ;;  %v14854_v44 = vld [vmem:[%s20675_s0 + $0x84] sm:$0xf]  ;;  %v11519_v45 = vld [vmem:[%s20675_s0 + $0x94] sm:$0xf0]  ;;  %v14936_v15 = vld [vmem:[%s20679_s4 + $0x50] sm:$0xff] }
  0x33   :  { %669 = vmatmul.bf16.gmra.mxu3 %v11590_v48  ;;  %639 = vmatmul.bf16.gmra.mxu0 %v11470_v49  ;;  %v11514_v48 = vor.u32 %v14853_v40, %v11511_v41  ;;  %v11518_v49 = vor.u32 %v14856_v43, %v11517_v42  ;;  %v14868_v16 = vld [vmem:[%s20675_s0 + $0xf4] sm:$0xf]  ;;  %v11577_v18 = vld [vmem:[%s20675_s0 + $0xf8] sm:$0xf]  ;;  %v14871_v19 = vld [vmem:[%s20675_s0 + $0x108] sm:$0xf0] }
  0x34   :  { %777 = vmatpush.bf16.msrb.mxu3 %v14905_v50  ;;  %v11522_v50 = vor.u32 %v14854_v44, %v11519_v45  ;;  %v11578_v26 = vor.u32 %v14871_v19, %v11577_v18  ;;  %v14927_v27 = vld [vmem:[%s20679_s4 + $0x8] sm:$0xff]  ;;  %v14948_v33 = vld [vmem:[%s20679_s4 + $0xb0] sm:$0xff]  ;;  %v14873_v41 = vld [vmem:[%s20675_s0 + $0x11c] sm:$0xf] }
  0x35   :  { %v14935_v32 = vld [vmem:[%s20679_s4 + $0x48] sm:$0xff]  ;;  %v11591_v42 = vld [vmem:[%s20675_s0 + $0x12c] sm:$0xf0]  ;;  %v14946_v43 = vld [vmem:[%s20679_s4 + $0xa0] sm:$0xff] }
  0x36   :  { %729 = vmatpush.bf16.msrb.mxu2 %v14896_v51  ;;  %680 = vmatpush.bf16.msrb.mxu1 %v14888_v52  ;;  %v11526_v51 = vor.u32 %v14857_v47, %v11525_v46  ;;  %v14929_v52 = vld [vmem:[%s20679_s4 + $0x18] sm:$0xff]  ;;  %v14956_v44 = vld [vmem:[%s20679_s4 + $0xf0] sm:$0xff]  ;;  %v11597_v45 = vld [vmem:[%s20675_s0 + $0x120] sm:$0xf] }
  0x37   :  { %v14876_v46 = vld [vmem:[%s20675_s0 + $0x130] sm:$0xf0]  ;;  %v14874_v47 = vld [vmem:[%s20675_s0 + $0x124] sm:$0xf] }
  0x38   :  { %778 = vmatpush.bf16.msrb.mxu3 %v14904_v53  ;;  %v14858_v53 = vld [vmem:[%s20675_s0 + $0xa4] sm:$0xf] }
  0x3a   :  { %730 = vmatpush.bf16.msrb.mxu2 %v14895_v54  ;;  %681 = vmatpush.bf16.msrb.mxu1 %v14887_v55  ;;  %v11531_v54 = vld [vmem:[%s20675_s0 + $0xb4] sm:$0xf0]  ;;  %v11537_v55 = vld [vmem:[%s20675_s0 + $0xa8] sm:$0xf] }
  0x3b   :  { %v11534_v61 = vor.u32 %v14858_v53, %v11531_v54  ;;  %v14955_v53 = vld [vmem:[%s20679_s4 + $0xe8] sm:$0xff] }
  0x3c   :  { %779 = vmatpush.bf16.msrb.mxu3 %v14903_v56  ;;  %v14861_v56 = vld [vmem:[%s20675_s0 + $0xb8] sm:$0xf0] }
  0x3e   :  { %731 = vmatpush.bf16.msrb.mxu2 %v14894_v57  ;;  %682 = vmatpush.bf16.msrb.mxu1 %v14886_v58  ;;  %v14859_v57 = vld [vmem:[%s20675_s0 + $0xac] sm:$0xf]  ;;  %v11539_v58 = vld [vmem:[%s20675_s0 + $0xbc] sm:$0xf0] }
  0x40   :  { %780 = vmatpush.bf16.msrb.mxu3 %v14902_v60  ;;  %v14862_v60 = vld [vmem:[%s20675_s0 + $0xc0] sm:$0xf0] }
  0x41   :  { %683 = vmatmul.bf16.vlgmr.msrb.gmra.mxu1 %v11454_v6  ;;  %732 = vmatmul.bf16.vlgmr.msrb.gmra.mxu2 %v11458_v7  ;;  %v11546_v0 = vor.u32 %v14862_v60, %v11545_v59  ;;  %v14864_v6 = vld [vmem:[%s20675_s0 + $0xd4] sm:$0xf]  ;;  %v11559_v7 = vld [vmem:[%s20675_s0 + $0xe4] sm:$0xf0] }
  0x42   :  { %1227 = vmatpush.bf16.msra.mxu2 %v14933_v62  ;;  %1130 = vmatpush.bf16.msra.mxu1 %v14941_v63  ;;  %v11538_v62 = vor.u32 %v14861_v56, %v11537_v55  ;;  %v11542_v63 = vor.u32 %v14859_v57, %v11539_v58  ;;  %v11562_v13 = vor.u32 %v14864_v6, %v11559_v7  ;;  %v14926_v6 = vld [vmem:[%s20679_s4] sm:$0xff] }
  0x43   :  { %781 = vmatmul.bf16.vlgmr.msrb.gmra.mxu3 %v11462_v8  ;;  %11751 = vmatmul.msk.bf16.vlgmr.msrb.gmra.mxu0 %vm601_vm0, %v11466_v9  ;;  %v11565_v8 = vld [vmem:[%s20675_s0 + $0xd8] sm:$0xf]  ;;  %v14867_v9 = vld [vmem:[%s20675_s0 + $0xe8] sm:$0xf0]  ;;  %v11594_v55 = vor.u32 %v14873_v41, %v11591_v42  ;;  %v11598_v56 = vor.u32 %v14876_v46, %v11597_v45  ;;  %v14942_v7 = vld [vmem:[%s20679_s4 + $0x80] sm:$0xff] }
  0x44   :  { %v11566_v14 = vor.u32 %v14867_v9, %v11565_v8  ;;  %v14952_v8 = vld [vmem:[%s20679_s4 + $0xd0] sm:$0xff] }
  0x46   :  { %1228 = vmatpush.bf16.msra.mxu2 %v14932_v10  ;;  %1131 = vmatpush.bf16.msra.mxu1 %v14940_v11  ;;  %v11554_v10 = vor.u32 %v14863_v2, %v11551_v3  ;;  %v11558_v11 = vor.u32 %v14866_v5, %v11557_v4  ;;  %v14953_v2 = vld [vmem:[%s20679_s4 + $0xd8] sm:$0xff] }
  0x4a   :  { %1229 = vmatpush.bf16.msra.mxu2 %v14931_v24  ;;  %1132 = vmatpush.bf16.msra.mxu1 %v14939_v25  ;;  %v14949_v24 = vld [vmem:[%s20679_s4 + $0xb8] sm:$0xff]  ;;  %v11574_v25 = vor.u32 %v14868_v16, %v11571_v17 }
  0x4b   :  { %1365 = vmatpush.bf16.msra.mxu3 %v14949_v24  ;;  %v16074_v24 = vld [vmem:[%s20680_s5 + $0x1] ss:$0 sm:$0xff] }
  0x4e   :  { %1230 = vmatpush.bf16.msra.mxu2 %v14930_v38  ;;  %1133 = vmatpush.bf16.msra.mxu1 %v14938_v39  ;;  %v15508_v39 = vmov 0.0  }
  0x4f   :  { %1366 = vmatpush.bf16.msra.mxu3 %v14948_v33  ;;  %27 = vst [vmem:[#allocation2 + $0x10] sm:$0xff] %v15508_v39 }
  0x50   :  { %28 = vst [vmem:[#allocation2 + $0x18] sm:$0x3] %v15508_v39 }
  0x51   :  { %688 = vmatmul.bf16.gmra.mxu1 %v11474_v20  ;;  %737 = vmatmul.bf16.gmra.mxu2 %v11478_v21  ;;  %v14869_v20 = vld [vmem:[%s20675_s0 + $0xfc] sm:$0xf]  ;;  %v11579_v21 = vld [vmem:[%s20675_s0 + $0x10c] sm:$0xf0]  ;;  %25 = vst [vmem:[#allocation2] sm:$0xff] %v15508_v39 }
  0x52   :  { %1231 = vmatpush.bf16.msra.mxu2 %v14929_v52  ;;  %1134 = vmatpush.bf16.msra.mxu1 %v14937_v1  ;;  %v11582_v29 = vor.u32 %v14869_v20, %v11579_v21  ;;  %26 = vst [vmem:[#allocation2 + $0x8] sm:$0x3] %v15508_v39  ;;  %v14945_v52 = vld [vmem:[%s20679_s4 + $0x98] sm:$0xff]  ;;  %v14943_v1 = vld [vmem:[%s20679_s4 + $0x88] sm:$0xff]  ;;  %v16067_v21 = vld [vmem:[%s20680_s5] ss:$0 sm:$0xff] }
  0x53   :  { %786 = vmatmul.bf16.gmra.mxu3 %v11482_v22  ;;  %11752 = vmatmul.msk.bf16.gmra.mxu0 %vm601_vm0, %v11486_v23  ;;  %v11585_v22 = vld [vmem:[%s20675_s0 + $0x100] sm:$0xf]  ;;  %v14872_v23 = vld [vmem:[%s20675_s0 + $0x110] sm:$0xf0]  ;;  %29 = vst [vmem:[#allocation2 + $0x20] sm:$0xff] %v15508_v39 }
  0x54   :  { %v11586_v30 = vor.u32 %v14872_v23, %v11585_v22  ;;  %30 = vst [vmem:[#allocation2 + $0x28] sm:$0x3] %v15508_v39 }
  0x55   :  { %31 = vst [vmem:[#allocation2 + $0x30] sm:$0xff] %v15508_v39 }
  0x56   :  { %1232 = vmatpush.bf16.msra.mxu2 %v14928_v12  ;;  %1135 = vmatpush.bf16.msra.mxu1 %v14936_v15  ;;  %32 = vst [vmem:[#allocation2 + $0x38] sm:$0x3] %v15508_v39 }
  0x57   :  { %33 = vst [vmem:[#allocation2 + $0x40] sm:$0xff] %v15508_v39 }
  0x58   :  { %34 = vst [vmem:[#allocation2 + $0x48] sm:$0x3] %v15508_v39 }
  0x59   :  { %35 = vst [vmem:[#allocation2 + $0x50] sm:$0xff] %v15508_v39 }
  0x5a   :  { %1233 = vmatpush.bf16.msra.mxu2 %v14927_v27  ;;  %1136 = vmatpush.bf16.msra.mxu1 %v14935_v32  ;;  %36 = vst [vmem:[#allocation2 + $0x58] sm:$0x3] %v15508_v39 }
  0x5b   :  { %37 = vst [vmem:[#allocation2 + $0x60] sm:$0xff] %v15508_v39 }
  0x5c   :  { %38 = vst [vmem:[#allocation2 + $0x68] sm:$0x3] %v15508_v39 }
  0x5d   :  { %39 = vst [vmem:[#allocation2 + $0x70] sm:$0xff] %v15508_v39 }
  0x5e   :  { %40 = vst [vmem:[#allocation2 + $0x78] sm:$0x3] %v15508_v39  ;;  %1234 = vmatpush.bf16.msra.mxu2 %v14926_v6  ;;  %v14972_v6 = vld [vmem:[%s20679_s4 + $0x170] sm:$0xff] }
  0x5f   :  { %41 = vst [vmem:[#allocation2 + $0x80] sm:$0xff] %v15508_v39 }
  0x60   :  { %42 = vst [vmem:[#allocation2 + $0x88] sm:$0x3] %v15508_v39 }
  0x61   :  { %693 = vmatmul.bf16.gmra.mxu1 %v11494_v34  ;;  %742 = vmatmul.bf16.gmra.mxu2 %v11498_v35  ;;  %v14947_v35 = vld [vmem:[%s20679_s4 + $0xa8] sm:$0xff]  ;;  %43 = vst [vmem:[#allocation2 + $0x90] sm:$0xff] %v15508_v39 }
  0x62   :  { %1367 = vmatpush.bf16.msra.mxu3 %v14947_v35  ;;  %44 = vst [vmem:[#allocation2 + $0x98] sm:$0x3] %v15508_v39 }
  0x63   :  { %791 = vmatmul.bf16.gmra.mxu3 %v11502_v36  ;;  %11753 = vmatmul.msk.bf16.gmra.mxu0 %vm601_vm0, %v11506_v37  ;;  %v14957_v36 = vld [vmem:[%s20679_s4 + $0xf8] sm:$0xff]  ;;  %45 = vst [vmem:[#allocation2 + $0xa0] sm:$0xff] %v15508_v39 }
  0x64   :  { %1519 = vmatpush.bf16.msra.mxu0 %v14957_v36  ;;  %46 = vst [vmem:[#allocation2 + $0xa8] sm:$0x3] %v15508_v39 }
  0x65   :  { %47 = vst [vmem:[#allocation2 + $0xb0] sm:$0xff] %v15508_v39 }
  0x66   :  { %1368 = vmatpush.bf16.msra.mxu3 %v14946_v43  ;;  %48 = vst [vmem:[#allocation2 + $0xb8] sm:$0x3] %v15508_v39  ;;  %v1041_v43 = vld [vmem:[#allocation2 + $0x1] sm:$0xff] }
  0x67   :  { %49 = vst [vmem:[#allocation2 + $0xc0] sm:$0xff] %v15508_v39 }
  0x68   :  { %1520 = vmatpush.bf16.msra.mxu0 %v14956_v44  ;;  %50 = vst [vmem:[#allocation2 + $0xc8] sm:$0x3] %v15508_v39 }
  0x69   :  { %51 = vst [vmem:[#allocation2 + $0xd0] sm:$0xff] %v15508_v39 }
  0x6a   :  { %1369 = vmatpush.bf16.msra.mxu3 %v14945_v52  ;;  %52 = vst [vmem:[#allocation2 + $0xd8] sm:$0x3] %v15508_v39 }
  0x6b   :  { %53 = vst [vmem:[#allocation2 + $0xe0] sm:$0xff] %v15508_v39 }
  0x6c   :  { %1521 = vmatpush.bf16.msra.mxu0 %v14955_v53  ;;  %54 = vst [vmem:[#allocation2 + $0xe8] sm:$0x3] %v15508_v39 }
  0x6d   :  { %55 = vst [vmem:[#allocation2 + $0xf0] sm:$0xff] %v15508_v39 }
  0x6e   :  { %56 = vst [vmem:[#allocation2 + $0xf8] sm:$0x3] %v15508_v39 }
  0x6f   :  { %57 = vst [vmem:[#allocation2 + $0x100] sm:$0xff] %v15508_v39 }
  0x70   :  { %58 = vst [vmem:[#allocation2 + $0x108] sm:$0x3] %v15508_v39 }
  0x71   :  { %698 = vmatmul.bf16.gmra.mxu1 %v11514_v48  ;;  %747 = vmatmul.bf16.gmra.mxu2 %v11518_v49  ;;  %v11599_v48 = vld [vmem:[%s20675_s0 + $0x134] sm:$0xf0]  ;;  %v11605_v49 = vld [vmem:[%s20675_s0 + $0x128] sm:$0xf]  ;;  %59 = vst [vmem:[#allocation2 + $0x110] sm:$0xff] %v15508_v39 }
  0x72   :  { %v11602_v58 = vor.u32 %v14874_v47, %v11599_v48  ;;  %60 = vst [vmem:[#allocation2 + $0x118] sm:$0x3] %v15508_v39 }
  0x73   :  { %796 = vmatmul.bf16.gmra.mxu3 %v11522_v50  ;;  %11754 = vmatmul.msk.bf16.gmra.mxu0 %vm601_vm0, %v11526_v51  ;;  %v14877_v50 = vld [vmem:[%s20675_s0 + $0x138] sm:$0xf0]  ;;  %61 = vst [vmem:[#allocation2 + $0x120] sm:$0xff] %v15508_v39 }
  0x74   :  { %v11606_v59 = vor.u32 %v14877_v50, %v11605_v49  ;;  %62 = vst [vmem:[#allocation2 + $0x128] sm:$0x3] %v15508_v39 }
  0x75   :  { %63 = vst [vmem:[#allocation2 + $0x130] sm:$0xff] %v15508_v39 }
  0x76   :  { %64 = vst [vmem:[#allocation2 + $0x138] sm:$0x3] %v15508_v39 }
  0x81   :  { %703 = vmatmul.bf16.gmra.mxu1 %v11534_v61  ;;  %752 = vmatmul.bf16.gmra.mxu2 %v11538_v62  ;;  %v14934_v61 = vld [vmem:[%s20679_s4 + $0x40] sm:$0xff]  ;;  %v14944_v62 = vld [vmem:[%s20679_s4 + $0x90] sm:$0xff] }
  0x82   :  { %1137 = vmatpush.bf16.msra.mxu1 %v14934_v61  ;;  %1370 = vmatpush.bf16.msra.mxu3 %v14944_v62 }
  0x83   :  { %801 = vmatmul.bf16.gmra.mxu3 %v11542_v63  ;;  %11755 = vmatmul.msk.bf16.gmra.mxu0 %vm601_vm0, %v11546_v0  ;;  %v14954_v63 = vld [vmem:[%s20679_s4 + $0xe0] sm:$0xff] }
  0x84   :  { %1522 = vmatpush.bf16.msra.mxu0 %v14954_v63 }
  0x86   :  { %1371 = vmatpush.bf16.msra.mxu3 %v14943_v1 }
  0x88   :  { %1523 = vmatpush.bf16.msra.mxu0 %v14953_v2 }
  0x8a   :  { %1372 = vmatpush.bf16.msra.mxu3 %v14942_v7  ;;  %v14964_v7 = vld [vmem:[%s20679_s4 + $0x130] sm:$0xff] }
  0x8c   :  { %1524 = vmatpush.bf16.msra.mxu0 %v14952_v8 }
  0x91   :  { %708 = vmatmul.bf16.gmra.mxu1 %v11554_v10  ;;  %757 = vmatmul.bf16.gmra.mxu2 %v11558_v11  ;;  %v14951_v10 = vld [vmem:[%s20679_s4 + $0xc8] sm:$0xff] }
  0x92   :  { %1525 = vmatpush.bf16.msra.mxu0 %v14951_v10 }
  0x93   :  { %806 = vmatmul.bf16.gmra.mxu3 %v11562_v13  ;;  %11756 = vmatmul.msk.bf16.gmra.mxu0 %vm601_vm0, %v11566_v14  ;;  %v14950_v14 = vld [vmem:[%s20679_s4 + $0xc0] sm:$0xff] }
  0x96   :  { %1526 = vmatpush.bf16.msra.mxu0 %v14950_v14 }
  0x9e   :  { %v15918_v28 = vpop.f32.mrf.mxu1 }
  0xa0   :  { %v15920_v31 = vpop.f32.mrf.mxu0 }
  0xa1   :  { %713 = vmatmul.bf16.gmra.mxu1 %v11574_v25  ;;  %762 = vmatmul.bf16.gmra.mxu2 %v11578_v26  ;;  %v14973_v25 = vld [vmem:[%s20679_s4 + $0x178] sm:$0xff] }
  0xa2   :  { %v14965_v26 = vld [vmem:[%s20679_s4 + $0x138] sm:$0xff]  ;;  %1827 = vmatpush.bf16.msrb.mxu2 %v14973_v25 }
  0xa3   :  { %811 = vmatmul.bf16.gmra.mxu3 %v11582_v29  ;;  %11757 = vmatmul.msk.bf16.gmra.mxu0 %vm601_vm0, %v11586_v30 }
  0xa4   :  { %v15929_v34 = vpop.f32.mrf.mxu2  ;;  %1673 = vmatpush.bf16.msrb.mxu1 %v14965_v26 }
  0xa6   :  { %v15937_v37 = vpop.f32.mrf.mxu3  ;;  %v15939_v38 = vpop.f32.mrf.mxu1  ;;  %1828 = vmatpush.bf16.msrb.mxu2 %v14972_v6 }
  0xa8   :  { %v15942_v40 = vpop.f32.mrf.mxu0  ;;  %1674 = vmatpush.bf16.msrb.mxu1 %v14964_v7 }
  0xac   :  { %v15979_v51 = vpop.f32.mrf.mxu2 }
  0xae   :  { %v15988_v54 = vpop.f32.mrf.mxu3  ;;  %v15991_v57 = vpop.f32.mrf.mxu1 }
  0xb0   :  { %v15994_v60 = vpop.f32.mrf.mxu0 }
  0xb1   :  { %718 = vmatmul.bf16.gmra.mxu1 %v11594_v55  ;;  %767 = vmatmul.bf16.gmra.mxu2 %v11598_v56 }
  0xb3   :  { %816 = vmatmul.bf16.gmra.mxu3 %v11602_v58  ;;  %11758 = vmatmul.msk.bf16.gmra.mxu0 %vm601_vm0, %v11606_v59  ;;  %v1276_v59 = vld [vmem:[#allocation2 + $0x2] sm:$0xff] }
  0xb4   :  { %v16011_v0 = vpop.f32.mrf.mxu2 }
  0xb6   :  { %v16020_v3 = vpop.f32.mrf.mxu3  ;;  %v16023_v4 = vpop.f32.mrf.mxu1 }
  0xb8   :  { %v16026_v5 = vpop.f32.mrf.mxu0 }
  0xbc   :  { %v16042_v9 = vpop.f32.mrf.mxu2 }
  0xbe   :  { %v16048_v11 = vpop.f32.mrf.mxu3  ;;  %v684_v12 = vpop.f32.mrf.mxu1 }
  0xbf   :  { %v685_v15 = vadd.f32 %v684_v12, %v15920_v31 }
  0xc0   :  { %v831_v13 = vpop.f32.mrf.mxu0 }
  0xc4   :  { %v733_v16 = vpop.f32.mrf.mxu2 }
  0xc5   :  { %v734_v17 = vadd.f32 %v733_v16, %v685_v15 }
  0xc6   :  { %v782_v18 = vpop.f32.mrf.mxu3  ;;  %v686_v19 = vpop.f32.mrf.mxu1 }
  0xc7   :  { %v783_v20 = vadd.f32 %v782_v18, %v734_v17  ;;  %v687_v29 = vadd.f32 %v686_v19, %v15942_v40 }
  0xc8   :  { %v833_v22 = vpop.f32.mrf.mxu0 }
  0xc9   :  { %v832_v23 = vadd.f32 %v831_v13, %v783_v20 }
  0xcb   :  { %v875_v27 = vmul.f32 %v16067_v21, %v832_v23 }
  0xcc   :  { %v735_v30 = vpop.f32.mrf.mxu2 }
  0xcd   :  { %v896_v31 = vadd.f32 %v16074_v24, %v875_v27  ;;  %v736_v32 = vadd.f32 %v735_v30, %v687_v29 }
  0xce   :  { %v784_v33 = vpop.f32.mrf.mxu3  ;;  %v689_v35 = vpop.f32.mrf.mxu1 }
  0xcf   :  { %vm912_vm1 = vcmp.gt.f32.partialorder %v896_v31, 0.0  ;;  %v928_v36 = vmul.f32 0.1, %v896_v31  ;;  %v785_v41 = vadd.f32 %v784_v33, %v736_v32  ;;  %v690_v47 = vadd.f32 %v689_v35, %v15994_v60 }
  0xd0   :  { %v836_v42 = vpop.f32.mrf.mxu0 }
  0xd1   :  { %v944_v44 = vsel %vm912_vm1, %v896_v31, %v928_v36  ;;  %v834_v45 = vadd.f32 %v833_v22, %v785_v41 }
  0xd2   :  { %985 = vst [vmem:[#allocation2 + $0x11] sm:$0xff] %v944_v44  ;;  %v1057_v40 = vpack.c.bf16 %v944_v44, %v1041_v43 }
  0xd3   :  { %v876_v46 = vmul.f32 %v16067_v21, %v834_v45 }
  0xd4   :  { %v738_v48 = vpop.f32.mrf.mxu2  ;;  %1138 = vmatmul.bf16.vlgmr.msra.gmra.mxu1 %v1057_v40 }
  0xd5   :  { %v897_v49 = vadd.f32 %v16074_v24, %v876_v46  ;;  %v739_v50 = vadd.f32 %v738_v48, %v690_v47  ;;  %v14971_v47 = vld [vmem:[%s20679_s4 + $0x168] sm:$0xff] }
  0xd6   :  { %v787_v52 = vpop.f32.mrf.mxu3  ;;  %v691_v53 = vpop.f32.mrf.mxu1  ;;  %v14963_v48 = vld [vmem:[%s20679_s4 + $0x128] sm:$0xff]  ;;  %1829 = vmatpush.bf16.msrb.mxu2 %v14971_v47 }
  0xd7   :  { %vm913_vm2 = vcmp.gt.f32.partialorder %v897_v49, 0.0  ;;  %v929_v55 = vmul.f32 0.1, %v897_v49  ;;  %v788_v56 = vadd.f32 %v787_v52, %v739_v50  ;;  %v692_v10 = vadd.f32 %v691_v53, %v16026_v5  ;;  %1675 = vmatpush.bf16.msrb.mxu1 %v14963_v48 }
  0xd8   :  { %v838_v58 = vpop.f32.mrf.mxu0 }
  0xd9   :  { %v16093_v61 = vsel %vm913_vm2, %v897_v49, %v929_v55  ;;  %v837_v62 = vadd.f32 %v836_v42, %v788_v56  ;;  %v1002_v63 = vld [vmem:[#allocation2 + $0x10] sm:$0xff] }
  0xda   :  { %v16095_v1 = vld [vmem:[#allocation2 + $0x12] sm:$0xff]  ;;  %986 = vst [vmem:[#allocation2 + $0x21] sm:$0xff] %v16093_v61  ;;  %v1017_v60 = vpack.c.bf16 %v1002_v63, %v15508_v39 }
  0xdb   :  { %v1292_v2 = vpack.c.bf16 %v16095_v1, %v1276_v59  ;;  %v877_v8 = vmul.f32 %v16067_v21, %v837_v62 }
  0xdc   :  { %v740_v12 = vpop.f32.mrf.mxu2  ;;  %1235 = vmatmul.bf16.vlgmr.msra.gmra.mxu2 %v1017_v60 }
  0xdd   :  { %1373 = vmatmul.bf16.vlgmr.msra.gmra.mxu3 %v1292_v2  ;;  %v898_v13 = vadd.f32 %v16074_v24, %v877_v8  ;;  %v741_v14 = vadd.f32 %v740_v12, %v692_v10 }
  0xde   :  { %v789_v15 = vpop.f32.mrf.mxu3  ;;  %v694_v16 = vpop.f32.mrf.mxu1 }
  0xdf   :  { %vm914_vm3 = vcmp.gt.f32.partialorder %v898_v13, 0.0  ;;  %v930_v17 = vmul.f32 0.1, %v898_v13  ;;  %v790_v18 = vadd.f32 %v789_v15, %v741_v14  ;;  %v695_v27 = vadd.f32 %v694_v16, %v15918_v28 }
  0xe0   :  { %v841_v19 = vpop.f32.mrf.mxu0 }
  0xe1   :  { %v16109_v20 = vsel %vm914_vm3, %v898_v13, %v930_v17  ;;  %v839_v22 = vadd.f32 %v838_v58, %v790_v18  ;;  %v1431_v23 = vld [vmem:[#allocation2 + $0x20] sm:$0xff] }
  0xe2   :  { %987 = vst [vmem:[#allocation2 + $0x31] sm:$0xff] %v16109_v20  ;;  %v1446_v5 = vpack.c.bf16 %v1431_v23, %v1002_v63  ;;  %v1058_v25 = vpack.c.bf16 %v16109_v20, %v16093_v61  ;;  %v16119_v45 = vld [vmem:[#allocation2 + $0x22] sm:$0xff] }
  0xe3   :  { %v878_v26 = vmul.f32 %v16067_v21, %v839_v22 }
  0xe4   :  { %v743_v29 = vpop.f32.mrf.mxu2  ;;  %1527 = vmatmul.bf16.vlgmr.msra.gmra.mxu0 %v1446_v5  ;;  %1143 = vmatmul.bf16.gmra.mxu1 %v1058_v25 }
  0xe5   :  { %v899_v30 = vadd.f32 %v16074_v24, %v878_v26  ;;  %v744_v31 = vadd.f32 %v743_v29, %v695_v27 }
  0xe6   :  { %v792_v32 = vpop.f32.mrf.mxu3  ;;  %v696_v33 = vpop.f32.mrf.mxu1 }
  0xe7   :  { %vm915_vm4 = vcmp.gt.f32.partialorder %v899_v30, 0.0  ;;  %v931_v35 = vmul.f32 0.1, %v899_v30  ;;  %v793_v36 = vadd.f32 %v792_v32, %v744_v31  ;;  %v697_v52 = vadd.f32 %v696_v33, %v15939_v38  ;;  %v14962_v31 = vld [vmem:[%s20679_s4 + $0x120] sm:$0xff] }
  0xe8   :  { %v843_v41 = vpop.f32.mrf.mxu0  ;;  %1676 = vmatpush.bf16.msrb.mxu1 %v14962_v31 }
  0xe9   :  { %v16117_v42 = vsel %vm915_vm4, %v899_v30, %v931_v35  ;;  %v842_v43 = vadd.f32 %v841_v19, %v793_v36  ;;  %v1004_v44 = vld [vmem:[#allocation2 + $0x30] sm:$0xff]  ;;  %v14970_v30 = vld [vmem:[%s20679_s4 + $0x160] sm:$0xff] }
  0xea   :  { %v16121_v40 = vld [vmem:[#allocation2 + $0x32] sm:$0xff]  ;;  %988 = vst [vmem:[#allocation2 + $0x41] sm:$0xff] %v16117_v42  ;;  %v16124_v28 = vpack.c.bf16 %v1004_v44, %v1431_v23  ;;  %v1601_v49 = vpack.c.bf16 %v16117_v42, %v16109_v20  ;;  %1830 = vmatpush.bf16.msrb.mxu2 %v14970_v30 }
  0xeb   :  { %v1293_v46 = vpack.c.bf16 %v16121_v40, %v16119_v45  ;;  %v879_v50 = vmul.f32 %v16067_v21, %v842_v43 }
  0xec   :  { %v745_v53 = vpop.f32.mrf.mxu2  ;;  %1240 = vmatmul.bf16.gmra.mxu2 %v16124_v28 }
  0xed   :  { %1378 = vmatmul.bf16.gmra.mxu3 %v1293_v46  ;;  %v900_v55 = vadd.f32 %v16074_v24, %v879_v50  ;;  %v746_v56 = vadd.f32 %v745_v53, %v697_v52 }
  0xee   :  { %v794_v58 = vpop.f32.mrf.mxu3  ;;  %v699_v59 = vpop.f32.mrf.mxu1 }
  0xef   :  { %vm916_vm5 = vcmp.gt.f32.partialorder %v900_v55, 0.0  ;;  %v932_v62 = vmul.f32 0.1, %v900_v55  ;;  %v795_v63 = vadd.f32 %v794_v58, %v746_v56  ;;  %v700_v12 = vadd.f32 %v699_v59, %v15991_v57 }
  0xf0   :  { %v846_v60 = vpop.f32.mrf.mxu0 }
  0xf1   :  { %v16140_v2 = vsel %vm916_vm5, %v900_v55, %v932_v62  ;;  %v844_v6 = vadd.f32 %v843_v41, %v795_v63  ;;  %v1433_v7 = vld [vmem:[#allocation2 + $0x40] sm:$0xff] }
  0xf2   :  { %989 = vst [vmem:[#allocation2 + $0x51] sm:$0xff] %v16140_v2  ;;  %v1447_v38 = vpack.c.bf16 %v1433_v7, %v1004_v44  ;;  %v16145_v8 = vpack.c.bf16 %v16140_v2, %v16117_v42  ;;  %v16153_v26 = vld [vmem:[#allocation2 + $0x42] sm:$0xff] }
  0xf3   :  { %v880_v10 = vmul.f32 %v16067_v21, %v844_v6 }
  0xf4   :  { %v748_v13 = vpop.f32.mrf.mxu2  ;;  %1532 = vmatmul.bf16.gmra.mxu0 %v1447_v38  ;;  %1148 = vmatmul.bf16.gmra.mxu1 %v16145_v8 }
  0xf5   :  { %v901_v14 = vadd.f32 %v16074_v24, %v880_v10  ;;  %v749_v15 = vadd.f32 %v748_v13, %v700_v12 }
  0xf6   :  { %v797_v16 = vpop.f32.mrf.mxu3  ;;  %v701_v17 = vpop.f32.mrf.mxu1 }
  0xf7   :  { %vm917_vm6 = vcmp.gt.f32.partialorder %v901_v14, 0.0  ;;  %v933_v18 = vmul.f32 0.1, %v901_v14  ;;  %v798_v19 = vadd.f32 %v797_v16, %v749_v15  ;;  %v702_v35 = vadd.f32 %v701_v17, %v16023_v4 }
  0xf8   :  { %v848_v22 = vpop.f32.mrf.mxu0 }
  0xf9   :  { %v16151_v23 = vsel %vm917_vm6, %v901_v14, %v933_v18  ;;  %v847_v5 = vadd.f32 %v846_v60, %v798_v19  ;;  %v1006_v25 = vld [vmem:[#allocation2 + $0x50] sm:$0xff]  ;;  %v14969_v19 = vld [vmem:[%s20679_s4 + $0x158] sm:$0xff] }
  0xfa   :  { %v16155_v57 = vld [vmem:[#allocation2 + $0x52] sm:$0xff]  ;;  %990 = vst [vmem:[#allocation2 + $0x61] sm:$0xff] %v16151_v23  ;;  %v16158_v27 = vpack.c.bf16 %v1006_v25, %v1433_v7  ;;  %v1602_v32 = vpack.c.bf16 %v16151_v23, %v16140_v2  ;;  %1831 = vmatpush.bf16.msrb.mxu2 %v14969_v19  ;;  %v14923_v2 = vld [vmem:[%s20678_s3 + $0x8] sm:$0xff] }
  0xfb   :  { %v1294_v29 = vpack.c.bf16 %v16155_v57, %v16153_v26  ;;  %v881_v33 = vmul.f32 %v16067_v21, %v847_v5 }
  0xfc   :  { %v750_v36 = vpop.f32.mrf.mxu2  ;;  %1245 = vmatmul.bf16.gmra.mxu2 %v16158_v27 }
  0xfd   :  { %1383 = vmatmul.bf16.gmra.mxu3 %v1294_v29  ;;  %v902_v41 = vadd.f32 %v16074_v24, %v881_v33  ;;  %v751_v43 = vadd.f32 %v750_v36, %v702_v35 }
  0xfe   :  { %v799_v44 = vpop.f32.mrf.mxu3  ;;  %v704_v46 = vpop.f32.mrf.mxu1 }
  0xff   :  { %vm918_vm7 = vcmp.gt.f32.partialorder %v902_v41, 0.0  ;;  %v934_v47 = vmul.f32 0.1, %v902_v41  ;;  %v800_v48 = vadd.f32 %v799_v44, %v751_v43  ;;  %v705_v59 = vadd.f32 %v704_v46, %v15929_v34  ;;  %v1049_v46 = vld [vmem:[#allocation2 + $0xa1] sm:$0xff] }
 0x100   :  { %v851_v50 = vpop.f32.mrf.mxu0 }
 0x101   :  { %v16174_v52 = vsel %vm918_vm7, %v902_v41, %v934_v47  ;;  %v849_v53 = vadd.f32 %v848_v22, %v800_v48  ;;  %v1435_v55 = vld [vmem:[#allocation2 + $0x60] sm:$0xff]  ;;  %v14961_v22 = vld [vmem:[%s20679_s4 + $0x118] sm:$0xff] }
 0x102   :  { %991 = vst [vmem:[#allocation2 + $0x71] sm:$0xff] %v16174_v52  ;;  %v1448_v4 = vpack.c.bf16 %v1435_v55, %v1006_v25  ;;  %v16179_v56 = vpack.c.bf16 %v16174_v52, %v16151_v23  ;;  %v16187_v16 = vld [vmem:[#allocation2 + $0x62] sm:$0xff]  ;;  %1677 = vmatpush.bf16.msrb.mxu1 %v14961_v22  ;;  %v14968_v22 = vld [vmem:[%s20679_s4 + $0x150] sm:$0xff] }
 0x103   :  { %v882_v58 = vmul.f32 %v16067_v21, %v849_v53  ;;  %1832 = vmatpush.bf16.msrb.mxu2 %v14968_v22 }
 0x104   :  { %v753_v62 = vpop.f32.mrf.mxu2  ;;  %1537 = vmatmul.bf16.gmra.mxu0 %v1448_v4  ;;  %1153 = vmatmul.bf16.gmra.mxu1 %v16179_v56 }
 0x105   :  { %v903_v63 = vadd.f32 %v16074_v24, %v882_v58  ;;  %v754_v60 = vadd.f32 %v753_v62, %v705_v59 }
 0x106   :  { %v802_v6 = vpop.f32.mrf.mxu3  ;;  %v706_v7 = vpop.f32.mrf.mxu1 }
 0x107   :  { %vm919_vm8 = vcmp.gt.f32.partialorder %v903_v63, 0.0  ;;  %v935_v38 = vmul.f32 0.1, %v903_v63  ;;  %v803_v10 = vadd.f32 %v802_v6, %v754_v60  ;;  %v707_v29 = vadd.f32 %v706_v7, %v15979_v51 }
 0x108   :  { %v853_v12 = vpop.f32.mrf.mxu0 }
 0x109   :  { %v16185_v13 = vsel %vm919_vm8, %v903_v63, %v935_v38  ;;  %v852_v14 = vadd.f32 %v851_v50, %v803_v10  ;;  %v1008_v15 = vld [vmem:[#allocation2 + $0x70] sm:$0xff]  ;;  %v1284_v38 = vld [vmem:[#allocation2 + $0xa2] sm:$0xff] }
 0x10a   :  { %v16189_v34 = vld [vmem:[#allocation2 + $0x72] sm:$0xff]  ;;  %992 = vst [vmem:[#allocation2 + $0x81] sm:$0xff] %v16185_v13  ;;  %v16192_v17 = vpack.c.bf16 %v1008_v15, %v1435_v55  ;;  %v1603_v5 = vpack.c.bf16 %v16185_v13, %v16174_v52 }
 0x10b   :  { %v1295_v18 = vpack.c.bf16 %v16189_v34, %v16187_v16  ;;  %v883_v25 = vmul.f32 %v16067_v21, %v852_v14 }
 0x10c   :  { %v755_v30 = vpop.f32.mrf.mxu2  ;;  %1250 = vmatmul.bf16.gmra.mxu2 %v16192_v17 }
 0x10d   :  { %1388 = vmatmul.bf16.gmra.mxu3 %v1295_v18  ;;  %v904_v31 = vadd.f32 %v16074_v24, %v883_v25  ;;  %v756_v33 = vadd.f32 %v755_v30, %v707_v29  ;;  %v14960_v25 = vld [vmem:[%s20679_s4 + $0x110] sm:$0xff] }
 0x10e   :  { %v804_v35 = vpop.f32.mrf.mxu3  ;;  %v709_v36 = vpop.f32.mrf.mxu1  ;;  %1678 = vmatpush.bf16.msrb.mxu1 %v14960_v25 }
 0x10f   :  { %vm920_vm9 = vcmp.gt.f32.partialorder %v904_v31, 0.0  ;;  %v936_v41 = vmul.f32 0.1, %v904_v31  ;;  %v805_v43 = vadd.f32 %v804_v35, %v756_v33  ;;  %v710_v4 = vadd.f32 %v709_v36, %v16011_v0 }
 0x110   :  { %v856_v44 = vpop.f32.mrf.mxu0 }
 0x111   :  { %v16208_v47 = vsel %vm920_vm9, %v904_v31, %v936_v41  ;;  %v854_v48 = vadd.f32 %v853_v12, %v805_v43  ;;  %v16210_v51 = vld [vmem:[#allocation2 + $0x80] sm:$0xff] }
 0x112   :  { %993 = vst [vmem:[#allocation2 + $0xb1] sm:$0xff] %v16208_v47  ;;  %v1449_v50 = vpack.c.bf16 %v16210_v51, %v1008_v15  ;;  %v1061_v53 = vpack.c.bf16 %v16208_v47, %v1049_v46 }
 0x113   :  { %v884_v55 = vmul.f32 %v16067_v21, %v854_v48 }
 0x114   :  { %v758_v58 = vpop.f32.mrf.mxu2  ;;  %1542 = vmatmul.bf16.gmra.mxu0 %v1449_v50  ;;  %1158 = vmatmul.bf16.gmra.mxu1 %v1061_v53 }
 0x115   :  { %v905_v59 = vadd.f32 %v16074_v24, %v884_v55  ;;  %v759_v62 = vadd.f32 %v758_v58, %v710_v4 }
 0x116   :  { %v807_v63 = vpop.f32.mrf.mxu3  ;;  %v711_v60 = vpop.f32.mrf.mxu1 }
 0x117   :  { %vm921_vm10 = vcmp.gt.f32.partialorder %v905_v59, 0.0  ;;  %v937_v6 = vmul.f32 0.1, %v905_v59  ;;  %v808_v7 = vadd.f32 %v807_v63, %v759_v62  ;;  %v712_v31 = vadd.f32 %v711_v60, %v16042_v9  ;;  %v14980_v9 = vld [vmem:[%s20679_s4 + $0x1b0] sm:$0xff]  ;;  %v14979_v60 = vld [vmem:[%s20679_s4 + $0x1a8] sm:$0xff] }
 0x118   :  { %v858_v10 = vpop.f32.mrf.mxu0 }
 0x119   :  { %v16218_v12 = vsel %vm921_vm10, %v905_v59, %v937_v6  ;;  %v857_v14 = vadd.f32 %v856_v44, %v808_v7  ;;  %v1010_v15 = vld [vmem:[#allocation2 + $0xb0] sm:$0xff]  ;;  %v14989_v6 = vld [vmem:[%s20679_s4 + $0x1f8] sm:$0xff] }
 0x11a   :  { %v16220_v18 = vld [vmem:[#allocation2 + $0xb2] sm:$0xff]  ;;  %994 = vst [vmem:[#allocation2 + $0xc1] sm:$0xff] %v16218_v12  ;;  %v1021_v0 = vpack.c.bf16 %v1010_v15, %v15508_v39  ;;  %v1604_v29 = vpack.c.bf16 %v16218_v12, %v16208_v47  ;;  %2136 = vmatpush.bf16.msrb.mxu0 %v14989_v6  ;;  %v14922_v47 = vld [vmem:[%s20678_s3] sm:$0xff] }
 0x11b   :  { %v1296_v19 = vpack.c.bf16 %v16220_v18, %v1284_v38  ;;  %v885_v30 = vmul.f32 %v16067_v21, %v857_v14  ;;  %v14981_v39 = vld [vmem:[%s20679_s4 + $0x1b8] sm:$0xff]  ;;  %v14976_v6 = vld [vmem:[%s20679_s4 + $0x190] sm:$0xff] }
 0x11c   :  { %v760_v33 = vpop.f32.mrf.mxu2  ;;  %1255 = vmatmul.bf16.gmra.mxu2 %v1021_v0  ;;  %1982 = vmatpush.bf16.msrb.mxu3 %v14981_v39  ;;  %v14978_v0 = vld [vmem:[%s20679_s4 + $0x1a0] sm:$0xff] }
 0x11d   :  { %1393 = vmatmul.bf16.gmra.mxu3 %v1296_v19  ;;  %v906_v35 = vadd.f32 %v16074_v24, %v885_v30  ;;  %v761_v36 = vadd.f32 %v760_v33, %v712_v31  ;;  %v14988_v19 = vld [vmem:[%s20679_s4 + $0x1f0] sm:$0xff] }
 0x11e   :  { %v809_v41 = vpop.f32.mrf.mxu3  ;;  %v714_v43 = vpop.f32.mrf.mxu1  ;;  %2137 = vmatpush.bf16.msrb.mxu0 %v14988_v19 }
 0x11f   :  { %vm922_vm11 = vcmp.gt.f32.partialorder %v906_v35, 0.0  ;;  %v938_v44 = vmul.f32 0.1, %v906_v35  ;;  %v810_v46 = vadd.f32 %v809_v41, %v761_v36  ;;  %v715_v62 = vadd.f32 %v714_v43, %v15937_v37  ;;  %v14967_v36 = vld [vmem:[%s20679_s4 + $0x148] sm:$0xff] }
 0x120   :  { %v861_v55 = vpop.f32.mrf.mxu0  ;;  %1983 = vmatpush.bf16.msrb.mxu3 %v14980_v9  ;;  %v14959_v41 = vld [vmem:[%s20679_s4 + $0x108] sm:$0xff]  ;;  %1833 = vmatpush.bf16.msrb.mxu2 %v14967_v36 }
 0x121   :  { %v16242_v48 = vsel %vm922_vm11, %v906_v35, %v938_v44  ;;  %v859_v50 = vadd.f32 %v858_v10, %v810_v46  ;;  %v1439_v53 = vld [vmem:[#allocation2 + $0xc0] sm:$0xff]  ;;  %1679 = vmatpush.bf16.msrb.mxu1 %v14959_v41  ;;  %v14975_v41 = vld [vmem:[%s20679_s4 + $0x188] sm:$0xff] }
 0x122   :  { %995 = vst [vmem:[#allocation2 + $0xd1] sm:$0xff] %v16242_v48  ;;  %v1450_v4 = vpack.c.bf16 %v1439_v53, %v1010_v15  ;;  %v16247_v58 = vpack.c.bf16 %v16242_v48, %v16218_v12  ;;  %v16267_v31 = vld [vmem:[#allocation2 + $0xc2] sm:$0xff] }
 0x123   :  { %v886_v59 = vmul.f32 %v16067_v21, %v859_v50 }
 0x124   :  { %v763_v63 = vpop.f32.mrf.mxu2  ;;  %1547 = vmatmul.bf16.gmra.mxu0 %v1450_v4  ;;  %1163 = vmatmul.bf16.gmra.mxu1 %v16247_v58 }
 0x125   :  { %v907_v7 = vadd.f32 %v16074_v24, %v886_v59  ;;  %v764_v38 = vadd.f32 %v763_v63, %v715_v62  ;;  %1984 = vmatpush.bf16.msrb.mxu3 %v14979_v60  ;;  %v14958_v63 = vld [vmem:[%s20679_s4 + $0x100] sm:$0xff] }
 0x126   :  { %v812_v10 = vpop.f32.mrf.mxu3  ;;  %v716_v14 = vpop.f32.mrf.mxu1  ;;  %1680 = vmatpush.bf16.msrb.mxu1 %v14958_v63 }
 0x127   :  { %vm923_vm12 = vcmp.gt.f32.partialorder %v907_v7, 0.0  ;;  %v939_v37 = vmul.f32 0.1, %v907_v7  ;;  %v813_v15 = vadd.f32 %v812_v10, %v764_v38  ;;  %v717_v46 = vadd.f32 %v716_v14, %v15988_v54  ;;  %v14966_v54 = vld [vmem:[%s20679_s4 + $0x140] sm:$0xff] }
 0x128   :  { %v863_v9 = vpop.f32.mrf.mxu0  ;;  %1834 = vmatpush.bf16.msrb.mxu2 %v14966_v54 }
 0x129   :  { %v16265_v22 = vsel %vm923_vm12, %v907_v7, %v939_v37  ;;  %v862_v25 = vadd.f32 %v861_v55, %v813_v15  ;;  %v1012_v30 = vld [vmem:[#allocation2 + $0xd0] sm:$0xff]  ;;  %1985 = vmatpush.bf16.msrb.mxu3 %v14978_v0  ;;  %v14987_v55 = vld [vmem:[%s20679_s4 + $0x1e8] sm:$0xff]  ;;  %v14986_v7 = vld [vmem:[%s20679_s4 + $0x1e0] sm:$0xff] }
 0x12a   :  { %v16269_v33 = vld [vmem:[#allocation2 + $0xd2] sm:$0xff]  ;;  %996 = vst [vmem:[#allocation2 + $0xe1] sm:$0xff] %v16265_v22  ;;  %v16272_v39 = vpack.c.bf16 %v1012_v30, %v1439_v53  ;;  %v1605_v43 = vpack.c.bf16 %v16265_v22, %v16242_v48  ;;  %2138 = vmatpush.bf16.msrb.mxu0 %v14987_v55  ;;  %v14990_v48 = vld [vmem:[%s20679_s4 + $0x200] sm:$0xff] }
 0x12b   :  { %v1297_v35 = vpack.c.bf16 %v16269_v33, %v16267_v31  ;;  %v887_v44 = vmul.f32 %v16067_v21, %v862_v25  ;;  %v14977_v53 = vld [vmem:[%s20679_s4 + $0x198] sm:$0xff] }
 0x12c   :  { %v765_v50 = vpop.f32.mrf.mxu2  ;;  %1260 = vmatmul.bf16.gmra.mxu2 %v16272_v39 }
 0x12d   :  { %1398 = vmatmul.bf16.gmra.mxu3 %v1297_v35  ;;  %v908_v4 = vadd.f32 %v16074_v24, %v887_v44  ;;  %v766_v59 = vadd.f32 %v765_v50, %v717_v46 }
 0x12e   :  { %v814_v62 = vpop.f32.mrf.mxu3  ;;  %v719_v60 = vpop.f32.mrf.mxu1  ;;  %1986 = vmatpush.bf16.msrb.mxu3 %v14977_v53  ;;  %2139 = vmatpush.bf16.msrb.mxu0 %v14986_v7  ;;  %v14984_v53 = vld [vmem:[%s20679_s4 + $0x1d0] sm:$0xff] }
 0x12f   :  { %vm924_vm13 = vcmp.gt.f32.partialorder %v908_v4, 0.0  ;;  %v940_v38 = vmul.f32 0.1, %v908_v4  ;;  %v815_v10 = vadd.f32 %v814_v62, %v766_v59  ;;  %v720_v35 = vadd.f32 %v719_v60, %v16020_v3  ;;  %v14974_v3 = vld [vmem:[%s20679_s4 + $0x180] sm:$0xff] }
 0x130   :  { %v866_v50 = vpop.f32.mrf.mxu0 }
 0x131   :  { %v16306_v14 = vsel %vm924_vm13, %v908_v4, %v940_v38  ;;  %v864_v37 = vadd.f32 %v863_v9, %v815_v10  ;;  %v1441_v15 = vld [vmem:[#allocation2 + $0xe0] sm:$0xff] }
 0x132   :  { %997 = vst [vmem:[#allocation2 + $0xf1] sm:$0xff] %v16306_v14  ;;  %v1451_v0 = vpack.c.bf16 %v1441_v15, %v1012_v30  ;;  %v16311_v19 = vpack.c.bf16 %v16306_v14, %v16265_v22  ;;  %1987 = vmatpush.bf16.msrb.mxu3 %v14976_v6  ;;  %v14985_v30 = vld [vmem:[%s20679_s4 + $0x1d8] sm:$0xff]  ;;  %v16331_v60 = vld [vmem:[#allocation2 + $0xe2] sm:$0xff] }
 0x133   :  { %v888_v25 = vmul.f32 %v16067_v21, %v864_v37  ;;  %2140 = vmatpush.bf16.msrb.mxu0 %v14985_v30 }
 0x134   :  { %v768_v36 = vpop.f32.mrf.mxu2  ;;  %1552 = vmatmul.bf16.gmra.mxu0 %v1451_v0  ;;  %1168 = vmatmul.bf16.gmra.mxu1 %v16311_v19 }
 0x135   :  { %v909_v44 = vadd.f32 %v16074_v24, %v888_v25  ;;  %v769_v46 = vadd.f32 %v768_v36, %v720_v35  ;;  %v14983_v35 = vld [vmem:[%s20679_s4 + $0x1c8] sm:$0xff] }
 0x136   :  { %v817_v9 = vpop.f32.mrf.mxu3  ;;  %1988 = vmatpush.bf16.msrb.mxu3 %v14975_v41  ;;  %v721_v59 = vpop.f32.mrf.mxu1 }
 0x137   :  { %vm925_vm14 = vcmp.gt.f32.partialorder %v909_v44, 0.0  ;;  %v941_v55 = vmul.f32 0.1, %v909_v44  ;;  %v818_v4 = vadd.f32 %v817_v9, %v769_v46  ;;  %2141 = vmatpush.bf16.msrb.mxu0 %v14984_v53  ;;  %v722_v0 = vadd.f32 %v721_v59, %v16048_v11  ;;  %v14982_v9 = vld [vmem:[%s20679_s4 + $0x1c0] sm:$0xff]  ;;  %v14997_v59 = vld [vmem:[%s20679_s4 + $0x238] sm:$0xff] }
 0x138   :  { %v868_v46 = vpop.f32.mrf.mxu0  ;;  %2290 = vmatpush.bf16.msra.mxu1 %v14997_v59  ;;  %v2047_v59 = vld [vmem:[#allocation2 + $0x21] sm:$0xff] }
 0x139   :  { %v16329_v62 = vsel %vm925_vm14, %v909_v44, %v941_v55  ;;  %v867_v54 = vadd.f32 %v866_v50, %v818_v4  ;;  %v1014_v63 = vld [vmem:[#allocation2 + $0xf0] sm:$0xff] }
 0x13a   :  { %v16333_v6 = vld [vmem:[#allocation2 + $0xf2] sm:$0xff]  ;;  %998 = vst [vmem:[#allocation2 + $0x101] sm:$0xff] %v16329_v62  ;;  %v16336_v7 = vpack.c.bf16 %v1014_v63, %v1441_v15  ;;  %1989 = vmatpush.bf16.msrb.mxu3 %v14974_v3  ;;  %v1606_v10 = vpack.c.bf16 %v16329_v62, %v16306_v14 }
 0x13b   :  { %v1298_v38 = vpack.c.bf16 %v16333_v6, %v16331_v60  ;;  %v889_v37 = vmul.f32 %v16067_v21, %v867_v54  ;;  %v14925_v15 = vld [vmem:[%s20678_s3 + $0x18] sm:$0xff]  ;;  %2142 = vmatpush.bf16.msrb.mxu0 %v14983_v35 }
 0x13c   :  { %v770_v25 = vpop.f32.mrf.mxu2  ;;  %1265 = vmatmul.bf16.gmra.mxu2 %v16336_v7 }
 0x13d   :  { %1403 = vmatmul.bf16.gmra.mxu3 %v1298_v38  ;;  %v910_v36 = vadd.f32 %v16074_v24, %v889_v37  ;;  %v771_v41 = vadd.f32 %v770_v25, %v722_v0  ;;  %2447 = vmatpush.bf16.msra.mxu2 %v14925_v15 }
 0x13e   :  { %v819_v30 = vpop.f32.mrf.mxu3 }
 0x13f   :  { %vm926_vm15 = vcmp.gt.f32.partialorder %v910_v36, 0.0  ;;  %v942_v11 = vmul.f32 0.1, %v910_v36  ;;  %v820_v44 = vadd.f32 %v819_v30, %v771_v41  ;;  %2143 = vmatpush.bf16.msrb.mxu0 %v14982_v9 }
 0x141   :  { %v16355_v50 = vsel %vm926_vm15, %v910_v36, %v942_v11  ;;  %v869_v3 = vadd.f32 %v868_v46, %v820_v44  ;;  %v1443_v53 = vld [vmem:[#allocation2 + $0x100] sm:$0xff]  ;;  %v1584_v36 = vld [vmem:[#allocation2 + $0x11] sm:$0xff] }
 0x142   :  { %999 = vst [vmem:[#allocation2 + $0x111] sm:$0xff] %v16355_v50  ;;  %v1452_v55 = vpack.c.bf16 %v1443_v53, %v1014_v63  ;;  %v16360_v4 = vpack.c.bf16 %v16355_v50, %v16329_v62  ;;  %v16370_v25 = vld [vmem:[#allocation2 + $0x102] sm:$0xff]  ;;  %v1600_v44 = vpack.c.bf16 %v16093_v61, %v1584_v36  ;;  %v14996_v46 = vld [vmem:[%s20679_s4 + $0x230] sm:$0xff]  ;;  %v2063_v36 = vpack.c.bf16 %v16109_v20, %v2047_v59 }
 0x143   :  { %v890_v54 = vmul.f32 %v16067_v21, %v869_v3  ;;  %2291 = vmatpush.bf16.msra.mxu1 %v14996_v46  ;;  %v1754_v3 = vpack.c.bf16 %v16119_v45, %v16095_v1  ;;  %v14995_v1 = vld [vmem:[%s20679_s4 + $0x228] sm:$0xff] }
 0x144   :  { %1557 = vmatmul.bf16.gmra.mxu0 %v1452_v55  ;;  %1173 = vmatmul.bf16.gmra.mxu1 %v16360_v4 }
 0x145   :  { %v911_v38 = vadd.f32 %v16074_v24, %v890_v54 }
 0x147   :  { %vm927_vm1 = vcmp.gt.f32.partialorder %v911_v38, 0.0  ;;  %v943_v37 = vmul.f32 0.1, %v911_v38  ;;  %2292 = vmatpush.bf16.msra.mxu1 %v14995_v1  ;;  %v1756_v1 = vpack.c.bf16 %v16187_v16, %v16155_v57  ;;  %v14993_v57 = vld [vmem:[%s20679_s4 + $0x218] sm:$0xff] }
 0x149   :  { %v16368_v63 = vsel %vm927_vm1, %v911_v38, %v943_v37  ;;  %v1016_v0 = vld [vmem:[#allocation2 + $0x110] sm:$0xff] }
 0x14a   :  { %v16372_v15 = vld [vmem:[#allocation2 + $0x112] sm:$0xff]  ;;  %1000 = vst [vmem:[#allocation2 + $0x121] sm:$0xff] %v16368_v63  ;;  %v16375_v35 = vpack.c.bf16 %v1016_v0, %v1443_v53  ;;  %v1607_v24 = vpack.c.bf16 %v16368_v63, %v16355_v50 }
 0x14b   :  { %v16379_v21 = vpack.c.bf16 %v16372_v15, %v16370_v25  ;;  %v14924_v53 = vld [vmem:[%s20678_s3 + $0x10] sm:$0xff] }
 0x14c   :  { %1270 = vmatmul.bf16.gmra.mxu2 %v16375_v35 }
 0x14d   :  { %1408 = vmatmul.bf16.gmra.mxu3 %v16379_v21  ;;  %2448 = vmatpush.bf16.msra.mxu2 %v14924_v53  ;;  %v1755_v53 = vpack.c.bf16 %v16153_v26, %v16121_v40 }
 0x151   :  { %v16385_v41 = vld [vmem:[#allocation2 + $0x120] sm:$0xff]  ;;  %v1139_v30 = vpop.f32.mrf.mxu1  ;;  %2449 = vmatpush.bf16.msra.mxu2 %v14923_v2 }
 0x152   :  { %v1453_v11 = vpack.c.bf16 %v16385_v41, %v1016_v0 }
 0x154   :  { %1562 = vmatmul.bf16.gmra.mxu0 %v1453_v11  ;;  %1681 = vmatmul.bf16.vlgmr.msrb.gmra.mxu1 %v1600_v44 }
 0x155   :  { %2450 = vmatpush.bf16.msra.mxu2 %v14922_v47  ;;  %v2201_v47 = vld [vmem:[#allocation2 + $0x22] sm:$0xff] }
 0x159   :  { %v1141_v9 = vpop.f32.mrf.mxu1 }
 0x15c   :  { %1835 = vmatmul.bf16.vlgmr.msrb.gmra.mxu2 %v1754_v3 }
 0x15d   :  { %1990 = vmatmul.bf16.vlgmr.msrb.gmra.mxu3 %v16124_v28 }
 0x15f   :  { %v1236_v61 = vpop.f32.mrf.mxu2 }
 0x160   :  { %v1374_v55 = vpop.f32.mrf.mxu3  ;;  %v1237_v54 = vadd.f32 %v1236_v61, %v1139_v30 }
 0x161   :  { %v1528_v38 = vpop.f32.mrf.mxu0  ;;  %v1144_v37 = vpop.f32.mrf.mxu1 }
 0x162   :  { %v1414_v0 = vadd.f32 %v1374_v55, %v1237_v54 }
 0x164   :  { %v16402_v45 = vadd.f32 %v1528_v38, %v1414_v0  ;;  %2144 = vmatmul.bf16.vlgmr.msrb.gmra.mxu0 %v2063_v36  ;;  %1686 = vmatmul.bf16.gmra.mxu1 %v1601_v49 }
 0x167   :  { %v1238_v28 = vpop.f32.mrf.mxu2 }
 0x168   :  { %v1376_v11 = vpop.f32.mrf.mxu3  ;;  %v1239_v30 = vadd.f32 %v1238_v28, %v1141_v9  ;;  %v14994_v9 = vld [vmem:[%s20679_s4 + $0x220] sm:$0xff] }
 0x169   :  { %v1530_v44 = vpop.f32.mrf.mxu0  ;;  %v1146_v46 = vpop.f32.mrf.mxu1  ;;  %2293 = vmatpush.bf16.msra.mxu1 %v14994_v9  ;;  %v2054_v9 = vld [vmem:[#allocation2 + $0x91] sm:$0xff] }
 0x16a   :  { %v1415_v3 = vadd.f32 %v1376_v11, %v1239_v30 }
 0x16c   :  { %v16409_v61 = vadd.f32 %v1530_v44, %v1415_v3  ;;  %1840 = vmatmul.bf16.gmra.mxu2 %v1755_v53  ;;  %v16438_v3 = vld [vmem:[#allocation2 + $0x82] sm:$0xff] }
 0x16d   :  { %1995 = vmatmul.bf16.gmra.mxu3 %v16158_v27  ;;  %2294 = vmatpush.bf16.msra.mxu1 %v14993_v57 }
 0x16f   :  { %v1241_v55 = vpop.f32.mrf.mxu2 }
 0x170   :  { %v1379_v59 = vpop.f32.mrf.mxu3  ;;  %v1242_v54 = vadd.f32 %v1241_v55, %v1144_v37 }
 0x171   :  { %v1533_v20 = vpop.f32.mrf.mxu0  ;;  %v1149_v42 = vpop.f32.mrf.mxu1 }
 0x172   :  { %v1416_v49 = vadd.f32 %v1379_v59, %v1242_v54 }
 0x174   :  { %v16415_v38 = vadd.f32 %v1533_v20, %v1416_v49  ;;  %2149 = vmatmul.bf16.gmra.mxu0 %v16145_v8  ;;  %1691 = vmatmul.bf16.gmra.mxu1 %v1602_v32  ;;  %v1757_v20 = vpack.c.bf16 %v16438_v3, %v16189_v34  ;;  %v14992_v34 = vld [vmem:[%s20679_s4 + $0x210] sm:$0xff] }
 0x175   :  { %2295 = vmatpush.bf16.msra.mxu1 %v14992_v34 }
 0x177   :  { %v1243_v40 = vpop.f32.mrf.mxu2 }
 0x178   :  { %v1381_v26 = vpop.f32.mrf.mxu3  ;;  %v1244_v27 = vadd.f32 %v1243_v40, %v1146_v46 }
 0x179   :  { %v1535_v37 = vpop.f32.mrf.mxu0  ;;  %v1151_v0 = vpop.f32.mrf.mxu1 }
 0x17a   :  { %v1417_v36 = vadd.f32 %v1381_v26, %v1244_v27 }
 0x17c   :  { %v16423_v28 = vadd.f32 %v1535_v37, %v1417_v36  ;;  %1845 = vmatmul.bf16.gmra.mxu2 %v1756_v1 }
 0x17d   :  { %2000 = vmatmul.bf16.gmra.mxu3 %v16192_v17 }
 0x17f   :  { %v1246_v8 = vpop.f32.mrf.mxu2 }
 0x180   :  { %v1384_v23 = vpop.f32.mrf.mxu3  ;;  %v1247_v32 = vadd.f32 %v1246_v8, %v1149_v42  ;;  %v16442_v42 = vld [vmem:[#allocation2] sm:$0xff] }
 0x181   :  { %v1538_v11 = vpop.f32.mrf.mxu0  ;;  %v1154_v30 = vpop.f32.mrf.mxu1 }
 0x182   :  { %v1418_v44 = vadd.f32 %v1384_v23, %v1247_v32 }
 0x184   :  { %v16432_v16 = vadd.f32 %v1538_v11, %v1418_v44  ;;  %2154 = vmatmul.bf16.gmra.mxu0 %v16179_v56  ;;  %1696 = vmatmul.bf16.gmra.mxu1 %v1603_v5  ;;  %v1912_v56 = vpack.c.bf16 %v16442_v42, %v16210_v51 }
 0x187   :  { %v1248_v17 = vpop.f32.mrf.mxu2 }
 0x188   :  { %v1386_v46 = vpop.f32.mrf.mxu3  ;;  %v1249_v53 = vadd.f32 %v1248_v17, %v1151_v0  ;;  %v2066_v0 = vpack.c.bf16 %v2054_v9, %v16185_v13  ;;  %v1758_v13 = vpack.c.bf16 %v16267_v31, %v16220_v18  ;;  %v14991_v18 = vld [vmem:[%s20679_s4 + $0x208] sm:$0xff] }
 0x189   :  { %v1540_v55 = vpop.f32.mrf.mxu0  ;;  %v1156_v59 = vpop.f32.mrf.mxu1  ;;  %2296 = vmatpush.bf16.msra.mxu1 %v14991_v18 }
 0x18a   :  { %v1419_v54 = vadd.f32 %v1386_v46, %v1249_v53 }
 0x18c   :  { %v16446_v49 = vadd.f32 %v1540_v55, %v1419_v54  ;;  %1850 = vmatmul.bf16.gmra.mxu2 %v1757_v20  ;;  %v1759_v54 = vpack.c.bf16 %v16331_v60, %v16269_v33 }
 0x18d   :  { %2005 = vmatmul.bf16.gmra.mxu3 %v1912_v56  ;;  %2297 = vmatpush.bf16.msra.mxu1 %v14990_v48 }
 0x18f   :  { %v1251_v52 = vpop.f32.mrf.mxu2 }
 0x190   :  { %v1389_v5 = vpop.f32.mrf.mxu3  ;;  %v1252_v40 = vadd.f32 %v1251_v52, %v1154_v30 }
 0x191   :  { %v1543_v26 = vpop.f32.mrf.mxu0  ;;  %v1159_v27 = vpop.f32.mrf.mxu1 }
 0x192   :  { %v1420_v37 = vadd.f32 %v1389_v5, %v1252_v40 }
 0x194   :  { %v16452_v36 = vadd.f32 %v1543_v26, %v1420_v37  ;;  %2159 = vmatmul.bf16.gmra.mxu0 %v2066_v0  ;;  %1701 = vmatmul.bf16.gmra.mxu1 %v1604_v29  ;;  %v1760_v26 = vpack.c.bf16 %v16370_v25, %v16333_v6  ;;  %v16509_v6 = vld [vmem:[#allocation2 + $0x122] sm:$0xff] }
 0x197   :  { %v1253_v51 = vpop.f32.mrf.mxu2 }
 0x198   :  { %v1391_v1 = vpop.f32.mrf.mxu3  ;;  %v1254_v2 = vadd.f32 %v1253_v51, %v1156_v59 }
 0x199   :  { %v1545_v8 = vpop.f32.mrf.mxu0  ;;  %v1161_v23 = vpop.f32.mrf.mxu1 }
 0x19a   :  { %v1421_v32 = vadd.f32 %v1391_v1, %v1254_v2  ;;  %v1761_v2 = vpack.c.bf16 %v16509_v6, %v16372_v15 }
 0x19c   :  { %v16459_v11 = vadd.f32 %v1545_v8, %v1421_v32  ;;  %1855 = vmatmul.bf16.gmra.mxu2 %v1758_v13  ;;  %v2202_v8 = vld [vmem:[#allocation2 + $0x32] sm:$0xff] }
 0x19d   :  { %2010 = vmatmul.bf16.gmra.mxu3 %v16272_v39 }
 0x19f   :  { %v1256_v12 = vpop.f32.mrf.mxu2 }
 0x1a0   :  { %v1394_v29 = vpop.f32.mrf.mxu3  ;;  %v1257_v30 = vadd.f32 %v1256_v12, %v1159_v27 }
 0x1a1   :  { %v1548_v44 = vpop.f32.mrf.mxu0  ;;  %v1164_v57 = vpop.f32.mrf.mxu1 }
 0x1a2   :  { %v1422_v17 = vadd.f32 %v1394_v29, %v1257_v30 }
 0x1a4   :  { %v16468_v31 = vadd.f32 %v1548_v44, %v1422_v17  ;;  %2164 = vmatmul.bf16.gmra.mxu0 %v16247_v58  ;;  %1706 = vmatmul.bf16.gmra.mxu1 %v1605_v43  ;;  %v2217_v44 = vpack.c.bf16 %v2202_v8, %v2201_v47  ;;  %v15010_v47 = vld [vmem:[%s20679_s4 + $0x2a0] sm:$0xff] }
 0x1a7   :  { %v1258_v39 = vpop.f32.mrf.mxu2 }
 0x1a8   :  { %v16474_v46 = vpop.f32.mrf.mxu3  ;;  %v16476_v53 = vadd.f32 %v1258_v39, %v1161_v23 }
 0x1a9   :  { %v16478_v55 = vpop.f32.mrf.mxu0  ;;  %v1166_v59 = vpop.f32.mrf.mxu1 }
 0x1ac   :  { %1860 = vmatmul.bf16.gmra.mxu2 %v1759_v54  ;;  %v2204_v54 = vld [vmem:[#allocation2 + $0x52] sm:$0xff] }
 0x1ad   :  { %2015 = vmatmul.bf16.gmra.mxu3 %v16336_v7 }
 0x1af   :  { %v1261_v58 = vpop.f32.mrf.mxu2 }
 0x1b0   :  { %v1399_v20 = vpop.f32.mrf.mxu3  ;;  %v1262_v56 = vadd.f32 %v1261_v58, %v1164_v57 }
 0x1b1   :  { %v1553_v22 = vpop.f32.mrf.mxu0  ;;  %v1169_v43 = vpop.f32.mrf.mxu1 }
 0x1b2   :  { %v1424_v52 = vadd.f32 %v1399_v20, %v1262_v56  ;;  %v2203_v56 = vld [vmem:[#allocation2 + $0x42] sm:$0xff] }
 0x1b4   :  { %v16486_v5 = vadd.f32 %v1553_v22, %v1424_v52  ;;  %2169 = vmatmul.bf16.gmra.mxu0 %v16311_v19  ;;  %1711 = vmatmul.bf16.gmra.mxu1 %v1606_v10  ;;  %v2218_v22 = vpack.c.bf16 %v2204_v54, %v2203_v56 }
 0x1b7   :  { %v1263_v33 = vpop.f32.mrf.mxu2 }
 0x1b8   :  { %v16492_v60 = vpop.f32.mrf.mxu3  ;;  %v16494_v7 = vadd.f32 %v1263_v33, %v1166_v59 }
 0x1b9   :  { %v16496_v9 = vpop.f32.mrf.mxu0  ;;  %v1171_v40 = vpop.f32.mrf.mxu1 }
 0x1bc   :  { %1865 = vmatmul.bf16.gmra.mxu2 %v1760_v26 }
 0x1bd   :  { %2020 = vmatmul.bf16.gmra.mxu3 %v16375_v35 }
 0x1bf   :  { %v1266_v27 = vpop.f32.mrf.mxu2 }
 0x1c0   :  { %v1404_v19 = vpop.f32.mrf.mxu3  ;;  %v1267_v37 = vadd.f32 %v1266_v27, %v1169_v43  ;;  %v15012_v43 = vld [vmem:[%s20679_s4 + $0x2b0] sm:$0xff] }
 0x1c1   :  { %v1558_v0 = vpop.f32.mrf.mxu0  ;;  %v1174_v14 = vpop.f32.mrf.mxu1  ;;  %v2206_v27 = vld [vmem:[#allocation2 + $0x72] sm:$0xff] }
 0x1c2   :  { %v1426_v62 = vadd.f32 %v1404_v19, %v1267_v37 }
 0x1c4   :  { %v16501_v10 = vadd.f32 %v1558_v0, %v1426_v62  ;;  %2174 = vmatmul.bf16.gmra.mxu0 %v16360_v4  ;;  %1716 = vmatmul.bf16.gmra.mxu1 %v1607_v24  ;;  %v1916_v4 = vpack.c.bf16 %v16442_v42, %v16385_v41  ;;  %v2062_v24 = vld [vmem:[#allocation2 + $0x131] sm:$0xff]  ;;  %v2205_v0 = vld [vmem:[#allocation2 + $0x62] sm:$0xff] }
 0x1c5   :  { %v2070_v29 = vpack.c.bf16 %v2062_v24, %v16368_v63  ;;  %v15013_v41 = vld [vmem:[%s20679_s4 + $0x2b8] sm:$0xff]  ;;  %v14914_v63 = vld [vmem:[%s20676_s1] sm:$0xff]  ;;  %v2219_v62 = vpack.c.bf16 %v2206_v27, %v2205_v0 }
 0x1c6   :  { %2728 = vmatpush.bf16.msra.mxu3 %v15013_v41  ;;  %v2208_v24 = vld [vmem:[#allocation2 + $0x92] sm:$0xff] }
 0x1c7   :  { %v1268_v34 = vpop.f32.mrf.mxu2 }
 0x1c8   :  { %v16507_v51 = vpop.f32.mrf.mxu3  ;;  %v16511_v25 = vadd.f32 %v1268_v34, %v1171_v40  ;;  %v15011_v34 = vld [vmem:[%s20679_s4 + $0x2a8] sm:$0xff] }
 0x1c9   :  { %v16513_v35 = vpop.f32.mrf.mxu0  ;;  %v1176_v1 = vpop.f32.mrf.mxu1 }
 0x1ca   :  { %2729 = vmatpush.bf16.msra.mxu3 %v15012_v43  ;;  %v2211_v43 = vld [vmem:[#allocation2 + $0xe2] sm:$0xff] }
 0x1cc   :  { %1870 = vmatmul.bf16.gmra.mxu2 %v1761_v2 }
 0x1cd   :  { %2025 = vmatmul.bf16.gmra.mxu3 %v1916_v4 }
 0x1ce   :  { %2730 = vmatpush.bf16.msra.mxu3 %v15011_v34 }
 0x1cf   :  { %v1271_v50 = vpop.f32.mrf.mxu2 }
 0x1d0   :  { %v1272_v23 = vadd.f32 %v1271_v50, %v1174_v14  ;;  %v1409_v32 = vpop.f32.mrf.mxu3 }
 0x1d1   :  { %v1682_v13 = vpop.f32.mrf.mxu1  ;;  %v1563_v57 = vpop.f32.mrf.mxu0 }
 0x1d2   :  { %v1428_v12 = vadd.f32 %v1409_v32, %v1272_v23  ;;  %v1722_v30 = vadd.f32 %v1682_v13, %v16402_v45  ;;  %v2220_v13 = vpack.c.bf16 %v2208_v24, %v16438_v3  ;;  %2731 = vmatpush.bf16.msra.mxu3 %v15010_v47  ;;  %v2210_v3 = vld [vmem:[#allocation2 + $0xd2] sm:$0xff] }
 0x1d3   :  { %v15029_v47 = vld [vmem:[%s20679_s4 + $0x338] sm:$0xff] }
 0x1d4   :  { %v16521_v15 = vadd.f32 %v1563_v57, %v1428_v12  ;;  %2179 = vmatmul.bf16.gmra.mxu0 %v2070_v29  ;;  %2298 = vmatmul.bf16.vlgmr.msra.gmra.mxu1 %v2217_v44 }
 0x1d5   :  { %3117 = vmatpush.bf16.msrb.mxu2 %v15029_v47 }
 0x1d7   :  { %v1273_v17 = vpop.f32.mrf.mxu2 }
 0x1d8   :  { %v16526_v18 = vadd.f32 %v1273_v17, %v1176_v1  ;;  %v2209_v17 = vld [vmem:[#allocation2 + $0xc2] sm:$0xff] }
 0x1d9   :  { %v1684_v39 = vpop.f32.mrf.mxu1 }
 0x1da   :  { %v1723_v45 = vadd.f32 %v1684_v39, %v16409_v61  ;;  %v14915_v61 = vld [vmem:[%s20676_s1 + $0x8] sm:$0xff]  ;;  %v2221_v39 = vpack.c.bf16 %v2210_v3, %v2209_v17  ;;  %v15028_v3 = vld [vmem:[%s20679_s4 + $0x330] sm:$0xff] }
 0x1db   :  { %3118 = vmatpush.bf16.msrb.mxu2 %v15028_v3  ;;  %v15037_v3 = vld [vmem:[%s20679_s4 + $0x378] sm:$0xff] }
 0x1dc   :  { %12224 = vmatmul.msk.bf16.vlgmr.msra.gmra.mxu2 %vm601_vm0, %v14914_v63 }
 0x1df   :  { %v1836_v59 = vpop.f32.mrf.mxu2 }
 0x1e0   :  { %v16533_v58 = vadd.f32 %v1836_v59, %v1722_v30 }
 0x1e1   :  { %v1687_v20 = vpop.f32.mrf.mxu1 }
 0x1e2   :  { %v1724_v48 = vadd.f32 %v1687_v20, %v16415_v38 }
 0x1e4   :  { %2303 = vmatmul.bf16.gmra.mxu1 %v2218_v22 }
 0x1e7   :  { %v1838_v52 = vpop.f32.mrf.mxu2 }
 0x1e8   :  { %v16539_v33 = vadd.f32 %v1838_v52, %v1723_v45  ;;  %v15009_v45 = vld [vmem:[%s20679_s4 + $0x298] sm:$0xff] }
 0x1e9   :  { %v1689_v40 = vpop.f32.mrf.mxu1  ;;  %2732 = vmatpush.bf16.msra.mxu3 %v15009_v45 }
 0x1ea   :  { %v1725_v26 = vadd.f32 %v1689_v40, %v16423_v28  ;;  %v14916_v28 = vld [vmem:[%s20676_s1 + $0x10] sm:$0xff] }
 0x1eb   :  { %v15008_v40 = vld [vmem:[%s20679_s4 + $0x290] sm:$0xff] }
 0x1ec   :  { %12225 = vmatmul.msk.bf16.gmra.mxu2 %vm601_vm0, %v14915_v61 }
 0x1ed   :  { %2733 = vmatpush.bf16.msra.mxu3 %v15008_v40 }
 0x1ef   :  { %v1841_v38 = vpop.f32.mrf.mxu2 }
 0x1f0   :  { %v16546_v19 = vadd.f32 %v1841_v38, %v1724_v48  ;;  %v14919_v38 = vld [vmem:[%s20676_s1 + $0x28] sm:$0xff] }
 0x1f1   :  { %v1692_v37 = vpop.f32.mrf.mxu1 }
 0x1f2   :  { %v1726_v14 = vadd.f32 %v1692_v37, %v16432_v16  ;;  %v16601_v37 = vpop.f32.mrf.mxu3 }
 0x1f4   :  { %2308 = vmatmul.bf16.gmra.mxu1 %v2219_v62  ;;  %v16605_v62 = vpop.f32.mrf.mxu0 }
 0x1f7   :  { %v1843_v1 = vpop.f32.mrf.mxu2 }
 0x1f8   :  { %v16552_v2 = vadd.f32 %v1843_v1, %v1725_v26  ;;  %v15005_v1 = vld [vmem:[%s20679_s4 + $0x278] sm:$0xff] }
 0x1f9   :  { %v1694_v4 = vpop.f32.mrf.mxu1  ;;  %2825 = vmatpush.bf16.msra.mxu0 %v15005_v1 }
 0x1fa   :  { %v1727_v50 = vadd.f32 %v1694_v4, %v16446_v49  ;;  %v14917_v49 = vld [vmem:[%s20676_s1 + $0x18] sm:$0xff]  ;;  %v15007_v4 = vld [vmem:[%s20679_s4 + $0x288] sm:$0xff]  ;;  %v16629_v24 = vpop.f32.mrf.mxu3 }
 0x1fb   :  { %2734 = vmatpush.bf16.msra.mxu3 %v15007_v4  ;;  %v15014_v4 = vld [vmem:[%s20679_s4 + $0x2c0] sm:$0xff] }
 0x1fc   :  { %12226 = vmatmul.msk.bf16.gmra.mxu2 %vm601_vm0, %v14916_v28  ;;  %v15021_v28 = vld [vmem:[%s20679_s4 + $0x2f8] sm:$0xff] }
 0x1fd   :  { %2963 = vmatpush.bf16.msrb.mxu1 %v15021_v28  ;;  %v14998_v28 = vld [vmem:[%s20679_s4 + $0x240] sm:$0xff] }
 0x1ff   :  { %v1846_v16 = vpop.f32.mrf.mxu2 }
 0x200   :  { %v16559_v8 = vadd.f32 %v1846_v16, %v1726_v14  ;;  %v15020_v16 = vld [vmem:[%s20679_s4 + $0x2f0] sm:$0xff] }
 0x201   :  { %v1697_v23 = vpop.f32.mrf.mxu1  ;;  %2964 = vmatpush.bf16.msrb.mxu1 %v15020_v16 }
 0x202   :  { %v1728_v32 = vadd.f32 %v1697_v23, %v16452_v36  ;;  %v1993_v45 = vpop.f32.mrf.mxu3 }
 0x204   :  { %2313 = vmatmul.bf16.gmra.mxu1 %v2220_v13  ;;  %v15019_v13 = vld [vmem:[%s20679_s4 + $0x2e8] sm:$0xff] }
 0x205   :  { %2965 = vmatpush.bf16.msrb.mxu1 %v15019_v13  ;;  %v15023_v13 = vld [vmem:[%s20679_s4 + $0x308] sm:$0xff] }
 0x207   :  { %v1848_v12 = vpop.f32.mrf.mxu2 }
 0x208   :  { %v16566_v29 = vadd.f32 %v1848_v12, %v1727_v50  ;;  %v16642_v12 = vpop.f32.mrf.mxu0 }
 0x209   :  { %v1699_v30 = vpop.f32.mrf.mxu1 }
 0x20a   :  { %v1729_v44 = vadd.f32 %v1699_v30, %v16459_v11  ;;  %v14918_v11 = vld [vmem:[%s20676_s1 + $0x20] sm:$0xff] }
 0x20c   :  { %12227 = vmatmul.msk.bf16.gmra.mxu2 %vm601_vm0, %v14917_v49  ;;  %v2216_v49 = vld [vmem:[#allocation2 + $0x132] sm:$0xff] }
 0x20f   :  { %v1851_v36 = vpop.f32.mrf.mxu2 }
 0x210   :  { %v16573_v57 = vadd.f32 %v1851_v36, %v1728_v32  ;;  %v15003_v32 = vld [vmem:[%s20679_s4 + $0x268] sm:$0xff]  ;;  %v15018_v36 = vld [vmem:[%s20679_s4 + $0x2e0] sm:$0xff] }
 0x211   :  { %v1702_v41 = vpop.f32.mrf.mxu1  ;;  %2966 = vmatpush.bf16.msrb.mxu1 %v15018_v36 }
 0x212   :  { %v1730_v63 = vadd.f32 %v1702_v41, %v16468_v31  ;;  %v2212_v31 = vld [vmem:[#allocation2 + $0xf2] sm:$0xff] }
 0x213   :  { %v2222_v61 = vpack.c.bf16 %v2212_v31, %v2211_v43  ;;  %v15006_v31 = vld [vmem:[%s20679_s4 + $0x280] sm:$0xff]  ;;  %v15016_v43 = vld [vmem:[%s20679_s4 + $0x2d0] sm:$0xff] }
 0x214   :  { %2318 = vmatmul.bf16.gmra.mxu1 %v2221_v39  ;;  %v2224_v39 = vpack.c.bf16 %v2216_v49, %v16509_v6  ;;  %2735 = vmatpush.bf16.msra.mxu3 %v15006_v31 }
 0x217   :  { %v1853_v59 = vpop.f32.mrf.mxu2 }
 0x218   :  { %v16579_v54 = vadd.f32 %v1853_v59, %v1729_v44  ;;  %v15002_v44 = vld [vmem:[%s20679_s4 + $0x260] sm:$0xff]  ;;  %v15001_v59 = vld [vmem:[%s20679_s4 + $0x258] sm:$0xff]  ;;  %3271 = vmatpush.bf16.msrb.mxu3 %v15037_v3 }
 0x219   :  { %v16584_v20 = vpop.f32.mrf.mxu1  ;;  %v2874_v3 = vld [vmem:[#allocation2 + $0x2] sm:$0xff] }
 0x21c   :  { %12228 = vmatmul.msk.bf16.gmra.mxu2 %vm601_vm0, %v14918_v11  ;;  %v15017_v11 = vld [vmem:[%s20679_s4 + $0x2d8] sm:$0xff] }
 0x21d   :  { %2967 = vmatpush.bf16.msrb.mxu1 %v15017_v11 }
 0x21f   :  { %v1856_v56 = vpop.f32.mrf.mxu2 }
 0x220   :  { %v16587_v48 = vadd.f32 %v1856_v56, %v1730_v63  ;;  %v15027_v56 = vld [vmem:[%s20679_s4 + $0x328] sm:$0xff] }
 0x221   :  { %v1707_v22 = vpop.f32.mrf.mxu1  ;;  %3119 = vmatpush.bf16.msrb.mxu2 %v15027_v56  ;;  %2968 = vmatpush.bf16.msrb.mxu1 %v15016_v43  ;;  %v2032_v56 = vadd.f32 %v1993_v45, %v16539_v33  ;;  %v2639_v33 = vld [vmem:[#allocation2 + $0x1] sm:$0xff] }
 0x222   :  { %v1732_v52 = vadd.f32 %v1707_v22, %v16486_v5  ;;  %v15000_v22 = vld [vmem:[%s20679_s4 + $0x250] sm:$0xff] }
 0x224   :  { %2323 = vmatmul.bf16.gmra.mxu1 %v2222_v61  ;;  %v15026_v61 = vld [vmem:[%s20679_s4 + $0x320] sm:$0xff] }
 0x225   :  { %3120 = vmatpush.bf16.msrb.mxu2 %v15026_v61 }
 0x227   :  { %v16593_v26 = vpop.f32.mrf.mxu2 }
 0x229   :  { %v16598_v27 = vpop.f32.mrf.mxu1 }
 0x22c   :  { %12229 = vmatmul.msk.bf16.gmra.mxu2 %vm601_vm0, %v14919_v38  ;;  %v14999_v38 = vld [vmem:[%s20679_s4 + $0x248] sm:$0xff] }
 0x22f   :  { %v1861_v5 = vpop.f32.mrf.mxu2 }
 0x230   :  { %v16603_v0 = vadd.f32 %v1861_v5, %v1732_v52  ;;  %v14921_v52 = vld [vmem:[%s20676_s1 + $0x38] sm:$0xff]  ;;  %v15015_v5 = vld [vmem:[%s20679_s4 + $0x2c8] sm:$0xff] }
 0x231   :  { %v1712_v14 = vpop.f32.mrf.mxu1  ;;  %2969 = vmatpush.bf16.msrb.mxu1 %v15015_v5 }
 0x232   :  { %v1734_v34 = vadd.f32 %v1712_v14, %v16501_v10  ;;  %v15004_v10 = vld [vmem:[%s20679_s4 + $0x270] sm:$0xff]  ;;  %v15025_v14 = vld [vmem:[%s20679_s4 + $0x318] sm:$0xff] }
 0x233   :  { %2826 = vmatpush.bf16.msra.mxu0 %v15004_v10  ;;  %3121 = vmatpush.bf16.msrb.mxu2 %v15025_v14  ;;  %v15024_v10 = vld [vmem:[%s20679_s4 + $0x310] sm:$0xff] }
 0x234   :  { %2328 = vmatmul.bf16.gmra.mxu1 %v16379_v21  ;;  %v14920_v21 = vld [vmem:[%s20676_s1 + $0x30] sm:$0xff] }
 0x235   :  { %2970 = vmatpush.bf16.msrb.mxu1 %v15014_v4 }
 0x237   :  { %v16618_v50 = vpop.f32.mrf.mxu2  ;;  %2827 = vmatpush.bf16.msra.mxu0 %v15003_v32  ;;  %3122 = vmatpush.bf16.msrb.mxu2 %v15024_v10 }
 0x239   :  { %v16631_v23 = vpop.f32.mrf.mxu1 }
 0x23b   :  { %2828 = vmatpush.bf16.msra.mxu0 %v15002_v44  ;;  %3123 = vmatpush.bf16.msrb.mxu2 %v15023_v13  ;;  %v2031_v44 = vadd.f32 %v16629_v24, %v16533_v58  ;;  %v16732_v24 = vld [vmem:[%s20680_s5 + $0x3] ss:$0 sm:$0xff] }
 0x23c   :  { %12230 = vmatmul.msk.bf16.gmra.mxu2 %vm601_vm0, %v14920_v21 }
 0x23f   :  { %v1866_v30 = vpop.f32.mrf.mxu2  ;;  %2829 = vmatpush.bf16.msra.mxu0 %v15001_v59  ;;  %v16724_v59 = vld [vmem:[%s20680_s5 + $0x2] ss:$0 sm:$0xff] }
 0x240   :  { %v16654_v41 = vadd.f32 %v1866_v30, %v1734_v34  ;;  %v1996_v34 = vpop.f32.mrf.mxu3  ;;  %v15022_v30 = vld [vmem:[%s20679_s4 + $0x300] sm:$0xff] }
 0x241   :  { %v1717_v17 = vpop.f32.mrf.mxu1  ;;  %3124 = vmatpush.bf16.msrb.mxu2 %v15022_v30  ;;  %v2033_v14 = vadd.f32 %v1996_v34, %v16546_v19 }
 0x242   :  { %v1736_v63 = vadd.f32 %v1717_v17, %v16521_v15  ;;  %v2147_v15 = vpop.f32.mrf.mxu0 }
 0x243   :  { %2830 = vmatpush.bf16.msra.mxu0 %v15000_v22  ;;  %v2186_v43 = vadd.f32 %v2147_v15, %v2032_v56  ;;  %v15036_v15 = vld [vmem:[%s20679_s4 + $0x370] sm:$0xff] }
 0x244   :  { %2333 = vmatmul.bf16.gmra.mxu1 %v2224_v39  ;;  %3272 = vmatpush.bf16.msrb.mxu3 %v15036_v15 }
 0x247   :  { %v16667_v6 = vpop.f32.mrf.mxu2  ;;  %2831 = vmatpush.bf16.msra.mxu0 %v14999_v38 }
 0x248   :  { %v1998_v47 = vpop.f32.mrf.mxu3 }
 0x249   :  { %v16684_v40 = vpop.f32.mrf.mxu1 }
 0x24a   :  { %v2150_v16 = vpop.f32.mrf.mxu0 }
 0x24b   :  { %2832 = vmatpush.bf16.msra.mxu0 %v14998_v28  ;;  %v2187_v30 = vadd.f32 %v2150_v16, %v2033_v14 }
 0x24c   :  { %12231 = vmatmul.msk.bf16.gmra.mxu2 %vm601_vm0, %v14921_v52 }
 0x24f   :  { %v1871_v1 = vpop.f32.mrf.mxu2 }
 0x250   :  { %v16705_v21 = vadd.f32 %v1871_v1, %v1736_v63  ;;  %v2185_v63 = vadd.f32 %v16642_v12, %v2031_v44  ;;  %v2001_v31 = vpop.f32.mrf.mxu3 }
 0x251   :  { %v2299_v32 = vpop.f32.mrf.mxu1  ;;  %v2035_v15 = vadd.f32 %v2001_v31, %v16559_v8 }
 0x252   :  { %v2152_v17 = vpop.f32.mrf.mxu0  ;;  %v2339_v39 = vadd.f32 %v2299_v32, %v2185_v63 }
 0x257   :  { %v16710_v49 = vpop.f32.mrf.mxu2 }
 0x258   :  { %v2003_v13 = vpop.f32.mrf.mxu3 }
 0x259   :  { %v2301_v36 = vpop.f32.mrf.mxu1 }
 0x25a   :  { %v2155_v52 = vpop.f32.mrf.mxu0  ;;  %v2340_v5 = vadd.f32 %v2301_v36, %v2186_v43 }
 0x25b   :  { %v2189_v31 = vadd.f32 %v2155_v52, %v2035_v15 }
 0x25f   :  { %v2452_v11 = vpop.f32.mrf.mxu2 }
 0x260   :  { %v16727_v58 = vadd.f32 %v2452_v11, %v2339_v39  ;;  %v2034_v39 = vadd.f32 %v1998_v47, %v16552_v2 }
 0x261   :  { %v2304_v22 = vpop.f32.mrf.mxu1 }
 0x262   :  { %20731 = vst [vmem:[#allocation6_spill] sm:$0xff] %v16727_v58  ;;  %v2497_v12 = vmul.f32 %v16724_v59, %v16727_v58  ;;  %v2157_v34 = vpop.f32.mrf.mxu0  ;;  %v2341_v36 = vadd.f32 %v2304_v22, %v2187_v30  ;;  %v2188_v47 = vadd.f32 %v2152_v17, %v2034_v39 }
 0x264   :  { %v2518_v61 = vadd.f32 %v16732_v24, %v2497_v12 }
 0x266   :  { %vm2534_vm0 = vcmp.gt.f32.partialorder %v2518_v61, 0.0  ;;  %v2550_v38 = vmul.f32 0.1, %v2518_v61 }
 0x267   :  { %v2454_v45 = vpop.f32.mrf.mxu2 }
 0x268   :  { %v16738_v1 = vsel %vm2534_vm0, %v2518_v61, %v2550_v38  ;;  %v16740_v28 = vadd.f32 %v2454_v45, %v2340_v5 }
 0x269   :  { %2582 = vst [vmem:[#allocation2 + $0x11] sm:$0xff] %v16738_v1  ;;  %v2306_v4 = vpop.f32.mrf.mxu1  ;;  %v2655_v10 = vpack.c.bf16 %v16738_v1, %v2639_v33  ;;  %v2006_v33 = vpop.f32.mrf.mxu3 }
 0x26a   :  { %20732 = vst [vmem:[#allocation7_spill] sm:$0xff] %v16740_v28  ;;  %v2498_v32 = vmul.f32 %v16724_v59, %v16740_v28  ;;  %v2342_v14 = vadd.f32 %v2306_v4, %v2188_v47  ;;  %v15035_v4 = vld [vmem:[%s20679_s4 + $0x368] sm:$0xff] }
 0x26b   :  { %2736 = vmatmul.bf16.vlgmr.msra.gmra.mxu3 %v2655_v10 }
 0x26c   :  { %v2519_v19 = vadd.f32 %v16732_v24, %v2498_v32  ;;  %v2160_v32 = vpop.f32.mrf.mxu0  ;;  %3273 = vmatpush.bf16.msrb.mxu3 %v15035_v4 }
 0x26e   :  { %vm2535_vm2 = vcmp.gt.f32.partialorder %v2519_v19, 0.0  ;;  %v2551_v44 = vmul.f32 0.1, %v2519_v19 }
 0x26f   :  { %v2457_v63 = vpop.f32.mrf.mxu2 }
 0x270   :  { %v16751_v11 = vsel %vm2535_vm2, %v2519_v19, %v2551_v44  ;;  %v16753_v56 = vadd.f32 %v2457_v63, %v2341_v36  ;;  %v2599_v12 = vld [vmem:[#allocation2 + $0x10] sm:$0xff] }
 0x271   :  { %v16755_v43 = vld [vmem:[#allocation2 + $0x12] sm:$0xff]  ;;  %2583 = vst [vmem:[#allocation2 + $0x21] sm:$0xff] %v16751_v11  ;;  %v2614_v16 = vpack.c.bf16 %v2599_v12, %v16442_v42  ;;  %v2309_v38 = vpop.f32.mrf.mxu1 }
 0x272   :  { %20733 = vst [vmem:[#allocation8_spill] sm:$0xff] %v16753_v56  ;;  %v2890_v61 = vpack.c.bf16 %v16755_v43, %v2874_v3  ;;  %v2499_v2 = vmul.f32 %v16724_v59, %v16753_v56 }
 0x273   :  { %2833 = vmatmul.bf16.vlgmr.msra.gmra.mxu0 %v2614_v16  ;;  %v2008_v16 = vpop.f32.mrf.mxu3 }
 0x274   :  { %2971 = vmatmul.bf16.vlgmr.msrb.gmra.mxu1 %v2890_v61  ;;  %v2520_v5 = vadd.f32 %v16732_v24, %v2499_v2  ;;  %v2036_v2 = vadd.f32 %v2003_v13, %v16566_v29  ;;  %v2162_v13 = vpop.f32.mrf.mxu0 }
 0x276   :  { %vm2536_vm3 = vcmp.gt.f32.partialorder %v2520_v5, 0.0  ;;  %v2552_v45 = vmul.f32 0.1, %v2520_v5  ;;  %v2190_v4 = vadd.f32 %v2157_v34, %v2036_v2 }
 0x277   :  { %v2459_v10 = vpop.f32.mrf.mxu2 }
 0x278   :  { %v16766_v30 = vsel %vm2536_vm3, %v2520_v5, %v2552_v45  ;;  %v16768_v19 = vadd.f32 %v2459_v10, %v2342_v14  ;;  %v3029_v44 = vld [vmem:[#allocation2 + $0x20] sm:$0xff] }
 0x279   :  { %2584 = vst [vmem:[#allocation2 + $0x31] sm:$0xff] %v16766_v30  ;;  %v3044_v36 = vpack.c.bf16 %v3029_v44, %v2599_v12  ;;  %v2311_v3 = vpop.f32.mrf.mxu1  ;;  %v16773_v17 = vpack.c.bf16 %v16766_v30, %v16751_v11  ;;  %v2343_v12 = vadd.f32 %v2309_v38, %v2189_v31  ;;  %v16787_v14 = vld [vmem:[#allocation2 + $0x22] sm:$0xff] }
 0x27a   :  { %20734 = vst [vmem:[#allocation9_spill] sm:$0xff] %v16768_v19  ;;  %v2500_v8 = vmul.f32 %v16724_v59, %v16768_v19  ;;  %v2344_v31 = vadd.f32 %v2311_v3, %v2190_v4  ;;  %v15034_v3 = vld [vmem:[%s20679_s4 + $0x360] sm:$0xff] }
 0x27b   :  { %3125 = vmatmul.bf16.vlgmr.msrb.gmra.mxu2 %v3044_v36  ;;  %2741 = vmatmul.bf16.gmra.mxu3 %v16773_v17  ;;  %v2011_v22 = vpop.f32.mrf.mxu3 }
 0x27c   :  { %v2521_v63 = vadd.f32 %v16732_v24, %v2500_v8  ;;  %v2165_v2 = vpop.f32.mrf.mxu0  ;;  %3274 = vmatpush.bf16.msrb.mxu3 %v15034_v3  ;;  %v2039_v56 = vadd.f32 %v2011_v22, %v16587_v48 }
 0x27e   :  { %vm2537_vm4 = vcmp.gt.f32.partialorder %v2521_v63, 0.0  ;;  %v2553_v39 = vmul.f32 0.1, %v2521_v63  ;;  %v2193_v22 = vadd.f32 %v2165_v2, %v2039_v56 }
 0x27f   :  { %v2462_v61 = vpop.f32.mrf.mxu2 }
 0x280   :  { %v16783_v47 = vsel %vm2537_vm4, %v2521_v63, %v2553_v39  ;;  %v16785_v5 = vadd.f32 %v2462_v61, %v2343_v12  ;;  %v2601_v45 = vld [vmem:[#allocation2 + $0x30] sm:$0xff]  ;;  %v2037_v39 = vadd.f32 %v2006_v33, %v16573_v57 }
 0x281   :  { %v16789_v10 = vld [vmem:[#allocation2 + $0x32] sm:$0xff]  ;;  %2585 = vst [vmem:[#allocation2 + $0x41] sm:$0xff] %v16783_v47  ;;  %v16792_v52 = vpack.c.bf16 %v2601_v45, %v3029_v44  ;;  %v2314_v15 = vpop.f32.mrf.mxu1 }
 0x282   :  { %20735 = vst [vmem:[#allocation10_spill] sm:$0xff] %v16785_v5  ;;  %v2891_v38 = vpack.c.bf16 %v16789_v10, %v16787_v14  ;;  %v2501_v36 = vmul.f32 %v16724_v59, %v16785_v5  ;;  %v2191_v33 = vadd.f32 %v2160_v32, %v2037_v39 }
 0x283   :  { %2838 = vmatmul.bf16.gmra.mxu0 %v16792_v52  ;;  %v2013_v3 = vpop.f32.mrf.mxu3 }
 0x284   :  { %2976 = vmatmul.bf16.gmra.mxu1 %v2891_v38  ;;  %v2522_v8 = vadd.f32 %v16732_v24, %v2501_v36  ;;  %v2345_v36 = vadd.f32 %v2314_v15, %v2191_v33 }
 0x286   :  { %vm2538_vm5 = vcmp.gt.f32.partialorder %v2522_v8, 0.0  ;;  %v2554_v44 = vmul.f32 0.1, %v2522_v8 }
 0x287   :  { %v2464_v63 = vpop.f32.mrf.mxu2 }
 0x288   :  { %v16803_v12 = vsel %vm2538_vm5, %v2522_v8, %v2554_v44  ;;  %v16805_v61 = vadd.f32 %v2464_v63, %v2344_v31  ;;  %v3031_v29 = vld [vmem:[#allocation2 + $0x40] sm:$0xff]  ;;  %v2038_v8 = vadd.f32 %v2008_v16, %v16579_v54 }
 0x289   :  { %2586 = vst [vmem:[#allocation2 + $0x51] sm:$0xff] %v16803_v12  ;;  %v3045_v5 = vpack.c.bf16 %v3031_v29, %v2601_v45  ;;  %v2316_v19 = vpop.f32.mrf.mxu1  ;;  %v16810_v34 = vpack.c.bf16 %v16803_v12, %v16783_v47 }
 0x28a   :  { %20736 = vst [vmem:[#allocation11_spill] sm:$0xff] %v16805_v61  ;;  %v2502_v57 = vmul.f32 %v16724_v59, %v16805_v61  ;;  %v16824_v61 = vld [vmem:[#allocation2 + $0x42] sm:$0xff]  ;;  %v2192_v33 = vadd.f32 %v2162_v13, %v2038_v8 }
 0x28b   :  { %3130 = vmatmul.bf16.gmra.mxu2 %v3045_v5  ;;  %2746 = vmatmul.bf16.gmra.mxu3 %v16810_v34 }
 0x28c   :  { %v2523_v38 = vadd.f32 %v16732_v24, %v2502_v57  ;;  %v1423_v57 = vadd.f32 %v16474_v46, %v16476_v53 }
 0x28e   :  { %vm2539_vm6 = vcmp.gt.f32.partialorder %v2523_v38, 0.0  ;;  %v2555_v45 = vmul.f32 0.1, %v2523_v38  ;;  %v1577_v54 = vadd.f32 %v16478_v55, %v1423_v57 }
 0x28f   :  { %v2467_v4 = vpop.f32.mrf.mxu2 }
 0x290   :  { %v16820_v44 = vsel %vm2539_vm6, %v2523_v38, %v2555_v45  ;;  %v16822_v31 = vadd.f32 %v2467_v4, %v2345_v36  ;;  %v2603_v63 = vld [vmem:[#allocation2 + $0x50] sm:$0xff]  ;;  %v2167_v38 = vpop.f32.mrf.mxu0  ;;  %v2346_v36 = vadd.f32 %v2316_v19, %v2192_v33  ;;  %v15033_v19 = vld [vmem:[%s20679_s4 + $0x358] sm:$0xff]  ;;  %v1731_v55 = vadd.f32 %v16584_v20, %v1577_v54 }
 0x291   :  { %v16826_v5 = vld [vmem:[#allocation2 + $0x52] sm:$0xff]  ;;  %2587 = vst [vmem:[#allocation2 + $0x61] sm:$0xff] %v16820_v44  ;;  %v16829_v32 = vpack.c.bf16 %v2603_v63, %v3031_v29  ;;  %v2319_v15 = vpop.f32.mrf.mxu1  ;;  %3275 = vmatpush.bf16.msrb.mxu3 %v15033_v19 }
 0x292   :  { %20737 = vst [vmem:[#allocation12_spill] sm:$0xff] %v16822_v31  ;;  %v2892_v39 = vpack.c.bf16 %v16826_v5, %v16824_v61  ;;  %v2503_v16 = vmul.f32 %v16724_v59, %v16822_v31  ;;  %v1885_v8 = vadd.f32 %v16593_v26, %v1731_v55  ;;  %v2347_v33 = vadd.f32 %v2319_v15, %v2193_v22 }
 0x293   :  { %2843 = vmatmul.bf16.gmra.mxu0 %v16829_v32  ;;  %v1425_v55 = vadd.f32 %v16492_v60, %v16494_v7 }
 0x294   :  { %2981 = vmatmul.bf16.gmra.mxu1 %v2892_v39  ;;  %v2524_v29 = vadd.f32 %v16732_v24, %v2503_v16  ;;  %v2016_v16 = vpop.f32.mrf.mxu3 }
 0x296   :  { %vm2540_vm7 = vcmp.gt.f32.partialorder %v2524_v29, 0.0  ;;  %v2556_v45 = vmul.f32 0.1, %v2524_v29 }
 0x297   :  { %v2469_v4 = vpop.f32.mrf.mxu2 }
 0x298   :  { %v16843_v31 = vsel %vm2540_vm7, %v2524_v29, %v2556_v45  ;;  %v16845_v28 = vadd.f32 %v2469_v4, %v2346_v36  ;;  %v3033_v39 = vld [vmem:[#allocation2 + $0x60] sm:$0xff]  ;;  %v2040_v45 = vadd.f32 %v2013_v3, %v1885_v8  ;;  %v2170_v36 = vpop.f32.mrf.mxu0  ;;  %v2041_v3 = vadd.f32 %v2016_v16, %v16603_v0 }
 0x299   :  { %2588 = vst [vmem:[#allocation2 + $0x71] sm:$0xff] %v16843_v31  ;;  %v3046_v46 = vpack.c.bf16 %v3033_v39, %v2603_v63  ;;  %v2321_v53 = vpop.f32.mrf.mxu1  ;;  %v16850_v13 = vpack.c.bf16 %v16843_v31, %v16820_v44 }
 0x29a   :  { %20738 = vst [vmem:[#allocation13_spill] sm:$0xff] %v16845_v28  ;;  %v2504_v48 = vmul.f32 %v16724_v59, %v16845_v28 }
 0x29b   :  { %3135 = vmatmul.bf16.gmra.mxu2 %v3046_v46  ;;  %2751 = vmatmul.bf16.gmra.mxu3 %v16850_v13  ;;  %v16865_v46 = vld [vmem:[#allocation2 + $0x62] sm:$0xff] }
 0x29c   :  { %v2525_v63 = vadd.f32 %v16732_v24, %v2504_v48  ;;  %v2194_v48 = vadd.f32 %v2167_v38, %v2040_v45  ;;  %v15032_v38 = vld [vmem:[%s20679_s4 + $0x350] sm:$0xff]  ;;  %v2195_v45 = vadd.f32 %v2170_v36, %v2041_v3 }
 0x29d   :  { %3276 = vmatpush.bf16.msrb.mxu3 %v15032_v38 }
 0x29e   :  { %vm2541_vm8 = vcmp.gt.f32.partialorder %v2525_v63, 0.0  ;;  %v2557_v57 = vmul.f32 0.1, %v2525_v63  ;;  %v2348_v8 = vadd.f32 %v2321_v53, %v2194_v48 }
 0x29f   :  { %v2472_v29 = vpop.f32.mrf.mxu2 }
 0x2a0   :  { %v16861_v20 = vsel %vm2541_vm8, %v2525_v63, %v2557_v57  ;;  %v16863_v54 = vadd.f32 %v2472_v29, %v2347_v33  ;;  %v2605_v4 = vld [vmem:[#allocation2 + $0x70] sm:$0xff]  ;;  %v2647_v63 = vld [vmem:[#allocation2 + $0xa1] sm:$0xff]  ;;  %v2018_v57 = vpop.f32.mrf.mxu3  ;;  %v1579_v29 = vadd.f32 %v16496_v9, %v1425_v55  ;;  %v2172_v53 = vpop.f32.mrf.mxu0 }
 0x2a1   :  { %v16867_v56 = vld [vmem:[#allocation2 + $0x72] sm:$0xff]  ;;  %2589 = vst [vmem:[#allocation2 + $0x81] sm:$0xff] %v16861_v20  ;;  %v16870_v26 = vpack.c.bf16 %v2605_v4, %v3033_v39  ;;  %v2324_v15 = vpop.f32.mrf.mxu1 }
 0x2a2   :  { %20739 = vst [vmem:[#allocation14_spill] sm:$0xff] %v16863_v54  ;;  %v2893_v2 = vpack.c.bf16 %v16867_v56, %v16865_v46  ;;  %v2505_v19 = vmul.f32 %v16724_v59, %v16863_v54  ;;  %v1733_v9 = vadd.f32 %v16598_v27, %v1579_v29  ;;  %v2349_v48 = vadd.f32 %v2324_v15, %v2195_v45 }
 0x2a3   :  { %2848 = vmatmul.bf16.gmra.mxu0 %v16870_v26 }
 0x2a4   :  { %2986 = vmatmul.bf16.gmra.mxu1 %v2893_v2  ;;  %v2526_v39 = vadd.f32 %v16732_v24, %v2505_v19  ;;  %v1887_v19 = vadd.f32 %v16618_v50, %v1733_v9 }
 0x2a6   :  { %vm2542_vm9 = vcmp.gt.f32.partialorder %v2526_v39, 0.0  ;;  %v2558_v22 = vmul.f32 0.1, %v2526_v39 }
 0x2a7   :  { %v2474_v33 = vpop.f32.mrf.mxu2 }
 0x2a8   :  { %v16884_v54 = vsel %vm2542_vm9, %v2526_v39, %v2558_v22  ;;  %v16886_v28 = vadd.f32 %v2474_v33, %v2348_v8  ;;  %v16888_v2 = vld [vmem:[#allocation2 + $0x80] sm:$0xff]  ;;  %v2042_v8 = vadd.f32 %v2018_v57, %v1887_v19  ;;  %v15045_v57 = vld [vmem:[%s20679_s4 + $0x3b8] sm:$0xff]  ;;  %v2175_v9 = vpop.f32.mrf.mxu0 }
 0x2a9   :  { %2590 = vst [vmem:[#allocation2 + $0xb1] sm:$0xff] %v16884_v54  ;;  %v3047_v60 = vpack.c.bf16 %v16888_v2, %v2605_v4  ;;  %v2659_v7 = vpack.c.bf16 %v16884_v54, %v2647_v63  ;;  %v2326_v16 = vpop.f32.mrf.mxu1  ;;  %v2882_v39 = vld [vmem:[#allocation2 + $0xa2] sm:$0xff]  ;;  %3425 = vmatpush.bf16.msrb.mxu0 %v15045_v57  ;;  %v15061_v57 = vld [vmem:[%s20679_s4 + $0x438] sm:$0xff] }
 0x2aa   :  { %20740 = vst [vmem:[#allocation15_spill] sm:$0xff] %v16886_v28  ;;  %v2506_v0 = vmul.f32 %v16724_v59, %v16886_v28  ;;  %v2196_v38 = vadd.f32 %v2172_v53, %v2042_v8  ;;  %3733 = vmatpush.bf16.msra.mxu2 %v15061_v57  ;;  %v15049_v57 = vld [vmem:[%s20679_s4 + $0x3d8] sm:$0xff] }
 0x2ab   :  { %3140 = vmatmul.bf16.gmra.mxu2 %v3047_v60  ;;  %2756 = vmatmul.bf16.gmra.mxu3 %v2659_v7  ;;  %v2021_v60 = vpop.f32.mrf.mxu3  ;;  %v15053_v7 = vld [vmem:[%s20679_s4 + $0x3f8] sm:$0xff] }
 0x2ac   :  { %v2527_v4 = vadd.f32 %v16732_v24, %v2506_v0  ;;  %3579 = vmatpush.bf16.msra.mxu1 %v15053_v7 }
 0x2ae   :  { %vm2543_vm10 = vcmp.gt.f32.partialorder %v2527_v4, 0.0  ;;  %v2559_v55 = vmul.f32 0.1, %v2527_v4 }
 0x2af   :  { %v2477_v22 = vpop.f32.mrf.mxu2 }
 0x2b0   :  { %v16901_v27 = vsel %vm2543_vm10, %v2527_v4, %v2559_v55  ;;  %v16903_v63 = vadd.f32 %v2477_v22, %v2349_v48  ;;  %v2607_v33 = vld [vmem:[#allocation2 + $0xb0] sm:$0xff]  ;;  %v2350_v4 = vadd.f32 %v2326_v16, %v2196_v38  ;;  %v2177_v38 = vpop.f32.mrf.mxu0 }
 0x2b1   :  { %v16905_v29 = vld [vmem:[#allocation2 + $0xb2] sm:$0xff]  ;;  %2591 = vst [vmem:[#allocation2 + $0xc1] sm:$0xff] %v16901_v27  ;;  %v2618_v50 = vpack.c.bf16 %v2607_v33, %v16442_v42  ;;  %v3202_v15 = vpack.c.bf16 %v16901_v27, %v16884_v54  ;;  %v1427_v42 = vadd.f32 %v16507_v51, %v16511_v25  ;;  %v2329_v45 = vpop.f32.mrf.mxu1  ;;  %v2043_v25 = vadd.f32 %v2021_v60, %v16654_v41  ;;  %v15063_v54 = vld [vmem:[%s20679_s4 + $0x448] sm:$0xff] }
 0x2b2   :  { %20741 = vst [vmem:[#allocation16_spill] sm:$0xff] %v16903_v63  ;;  %v2894_v36 = vpack.c.bf16 %v16905_v29, %v2882_v39  ;;  %v2507_v3 = vmul.f32 %v16724_v59, %v16903_v63  ;;  %v15044_v48 = vld [vmem:[%s20679_s4 + $0x3b0] sm:$0xff] }
 0x2b3   :  { %2853 = vmatmul.bf16.gmra.mxu0 %v2618_v50  ;;  %v15052_v39 = vld [vmem:[%s20679_s4 + $0x3f0] sm:$0xff]  ;;  %v1581_v51 = vadd.f32 %v16513_v35, %v1427_v42  ;;  %v2023_v60 = vpop.f32.mrf.mxu3 }
 0x2b4   :  { %2991 = vmatmul.bf16.gmra.mxu1 %v2894_v36  ;;  %v2528_v0 = vadd.f32 %v16732_v24, %v2507_v3  ;;  %v15031_v36 = vld [vmem:[%s20679_s4 + $0x348] sm:$0xff]  ;;  %3426 = vmatpush.bf16.msrb.mxu0 %v15044_v48  ;;  %v15042_v48 = vld [vmem:[%s20679_s4 + $0x3a0] sm:$0xff] }
 0x2b5   :  { %3580 = vmatpush.bf16.msra.mxu1 %v15052_v39  ;;  %v1735_v35 = vadd.f32 %v16631_v23, %v1581_v51  ;;  %v15051_v3 = vld [vmem:[%s20679_s4 + $0x3e8] sm:$0xff]  ;;  %v2197_v23 = vadd.f32 %v2175_v9, %v2043_v25  ;;  %3277 = vmatpush.bf16.msrb.mxu3 %v15031_v36  ;;  %v15060_v9 = vld [vmem:[%s20679_s4 + $0x430] sm:$0xff] }
 0x2b6   :  { %vm2544_vm11 = vcmp.gt.f32.partialorder %v2528_v0, 0.0  ;;  %v2560_v19 = vmul.f32 0.1, %v2528_v0  ;;  %3734 = vmatpush.bf16.msra.mxu2 %v15060_v9 }
 0x2b7   :  { %v2479_v55 = vpop.f32.mrf.mxu2  ;;  %v1889_v7 = vadd.f32 %v16667_v6, %v1735_v35  ;;  %v15050_v6 = vld [vmem:[%s20679_s4 + $0x3e0] sm:$0xff] }
 0x2b8   :  { %v16931_v53 = vsel %vm2544_vm11, %v2528_v0, %v2560_v19  ;;  %v16933_v22 = vadd.f32 %v2479_v55, %v2350_v4  ;;  %v3037_v8 = vld [vmem:[#allocation2 + $0xc0] sm:$0xff]  ;;  %v2351_v19 = vadd.f32 %v2329_v45, %v2197_v23  ;;  %v1429_v23 = vadd.f32 %v16601_v37, %v16526_v18  ;;  %v15048_v18 = vld [vmem:[%s20679_s4 + $0x3d0] sm:$0xff] }
 0x2b9   :  { %2592 = vst [vmem:[#allocation2 + $0xd1] sm:$0xff] %v16931_v53  ;;  %v3048_v16 = vpack.c.bf16 %v3037_v8, %v2607_v33  ;;  %v16938_v50 = vpack.c.bf16 %v16931_v53, %v16901_v27  ;;  %v15043_v33 = vld [vmem:[%s20679_s4 + $0x3a8] sm:$0xff]  ;;  %3581 = vmatpush.bf16.msra.mxu1 %v15051_v3  ;;  %v2331_v55 = vpop.f32.mrf.mxu1  ;;  %v2044_v39 = vadd.f32 %v2023_v60, %v1889_v7  ;;  %v15041_v3 = vld [vmem:[%s20679_s4 + $0x398] sm:$0xff]  ;;  %v15058_v37 = vld [vmem:[%s20679_s4 + $0x420] sm:$0xff] }
 0x2ba   :  { %20742 = vst [vmem:[#allocation17_spill] sm:$0xff] %v16933_v22  ;;  %v2508_v41 = vmul.f32 %v16724_v59, %v16933_v22  ;;  %3427 = vmatpush.bf16.msrb.mxu0 %v15043_v33  ;;  %v1583_v9 = vadd.f32 %v16605_v62, %v1429_v23 }
 0x2bb   :  { %3145 = vmatmul.bf16.gmra.mxu2 %v3048_v16  ;;  %2761 = vmatmul.bf16.gmra.mxu3 %v16938_v50  ;;  %v16971_v16 = vld [vmem:[#allocation2 + $0xc2] sm:$0xff]  ;;  %v2198_v7 = vadd.f32 %v2177_v38, %v2044_v39 }
 0x2bc   :  { %v2529_v42 = vadd.f32 %v16732_v24, %v2508_v41 }
 0x2bd   :  { %3582 = vmatpush.bf16.msra.mxu1 %v15050_v6  ;;  %v2352_v6 = vadd.f32 %v2331_v55, %v2198_v7 }
 0x2be   :  { %vm2545_vm12 = vcmp.gt.f32.partialorder %v2529_v42, 0.0  ;;  %v2561_v0 = vmul.f32 0.1, %v2529_v42  ;;  %3428 = vmatpush.bf16.msrb.mxu0 %v15042_v48 }
 0x2bf   :  { %v2482_v4 = vpop.f32.mrf.mxu2 }
 0x2c0   :  { %v16967_v51 = vsel %vm2545_vm12, %v2529_v42, %v2561_v0  ;;  %v16969_v25 = vadd.f32 %v2482_v4, %v2351_v19  ;;  %v2609_v45 = vld [vmem:[#allocation2 + $0xd0] sm:$0xff]  ;;  %v15059_v0 = vld [vmem:[%s20679_s4 + $0x428] sm:$0xff]  ;;  %v2026_v19 = vpop.f32.mrf.mxu3 }
 0x2c1   :  { %v16973_v36 = vld [vmem:[#allocation2 + $0xd2] sm:$0xff]  ;;  %2593 = vst [vmem:[#allocation2 + $0xe1] sm:$0xff] %v16967_v51  ;;  %v16976_v35 = vpack.c.bf16 %v2609_v45, %v3037_v8  ;;  %v15030_v8 = vld [vmem:[%s20679_s4 + $0x340] sm:$0xff]  ;;  %3583 = vmatpush.bf16.msra.mxu1 %v15049_v57  ;;  %3735 = vmatpush.bf16.msra.mxu2 %v15059_v0  ;;  %v2045_v39 = vadd.f32 %v2026_v19, %v16705_v21  ;;  %v15039_v21 = vld [vmem:[%s20679_s4 + $0x388] sm:$0xff] }
 0x2c2   :  { %20743 = vst [vmem:[#allocation18_spill] sm:$0xff] %v16969_v25  ;;  %v2895_v41 = vpack.c.bf16 %v16973_v36, %v16971_v16  ;;  %v2509_v33 = vmul.f32 %v16724_v59, %v16969_v25  ;;  %3278 = vmatpush.bf16.msrb.mxu3 %v15030_v8  ;;  %3429 = vmatpush.bf16.msrb.mxu0 %v15041_v3  ;;  %v15040_v4 = vld [vmem:[%s20679_s4 + $0x390] sm:$0xff]  ;;  %v2180_v8 = vpop.f32.mrf.mxu0  ;;  %v2334_v3 = vpop.f32.mrf.mxu1 }
 0x2c3   :  { %2858 = vmatmul.bf16.gmra.mxu0 %v16976_v35  ;;  %v1737_v0 = vadd.f32 %v16684_v40, %v1583_v9  ;;  %v15057_v40 = vld [vmem:[%s20679_s4 + $0x418] sm:$0xff]  ;;  %v2199_v23 = vadd.f32 %v2180_v8, %v2045_v39 }
 0x2c4   :  { %2996 = vmatmul.bf16.gmra.mxu1 %v2895_v41  ;;  %v2530_v42 = vadd.f32 %v16732_v24, %v2509_v33 }
 0x2c5   :  { %3584 = vmatpush.bf16.msra.mxu1 %v15048_v18  ;;  %3736 = vmatpush.bf16.msra.mxu2 %v15058_v37  ;;  %v15038_v37 = vld [vmem:[%s20679_s4 + $0x380] sm:$0xff] }
 0x2c6   :  { %vm2546_vm13 = vcmp.gt.f32.partialorder %v2530_v42, 0.0  ;;  %v2562_v48 = vmul.f32 0.1, %v2530_v42  ;;  %3430 = vmatpush.bf16.msrb.mxu0 %v15040_v4 }
 0x2c7   :  { %v2484_v38 = vpop.f32.mrf.mxu2 }
 0x2c8   :  { %v17011_v41 = vsel %vm2546_vm13, %v2530_v42, %v2562_v48  ;;  %v17013_v33 = vadd.f32 %v2484_v38, %v2352_v6  ;;  %v3039_v55 = vld [vmem:[#allocation2 + $0xe0] sm:$0xff]  ;;  %v1891_v42 = vadd.f32 %v16710_v49, %v1737_v0  ;;  %v2353_v48 = vadd.f32 %v2334_v3, %v2199_v23  ;;  %v2028_v6 = vpop.f32.mrf.mxu3  ;;  %v15056_v49 = vld [vmem:[%s20679_s4 + $0x410] sm:$0xff] }
 0x2c9   :  { %2594 = vst [vmem:[#allocation2 + $0xf1] sm:$0xff] %v17011_v41  ;;  %v3049_v57 = vpack.c.bf16 %v3039_v55, %v2609_v45  ;;  %v17018_v7 = vpack.c.bf16 %v17011_v41, %v16967_v51  ;;  %v15047_v45 = vld [vmem:[%s20679_s4 + $0x3c8] sm:$0xff]  ;;  %3737 = vmatpush.bf16.msra.mxu2 %v15057_v40  ;;  %v15046_v38 = vld [vmem:[%s20679_s4 + $0x3c0] sm:$0xff] }
 0x2ca   :  { %20744 = vst [vmem:[#allocation19_spill] sm:$0xff] %v17013_v33  ;;  %v2510_v62 = vmul.f32 %v16724_v59, %v17013_v33  ;;  %3431 = vmatpush.bf16.msrb.mxu0 %v15039_v21  ;;  %3585 = vmatpush.bf16.msra.mxu1 %v15047_v45  ;;  %v2046_v9 = vadd.f32 %v2028_v6, %v1891_v42  ;;  %v2182_v23 = vpop.f32.mrf.mxu0  ;;  %v2336_v42 = vpop.f32.mrf.mxu1 }
 0x2cb   :  { %3150 = vmatmul.bf16.gmra.mxu2 %v3049_v57  ;;  %2766 = vmatmul.bf16.gmra.mxu3 %v17018_v7  ;;  %v17048_v57 = vld [vmem:[#allocation2 + $0xe2] sm:$0xff] }
 0x2cc   :  { %v2531_v19 = vadd.f32 %v16732_v24, %v2510_v62 }
 0x2cd   :  { %3738 = vmatpush.bf16.msra.mxu2 %v15056_v49 }
 0x2ce   :  { %vm2547_vm14 = vcmp.gt.f32.partialorder %v2531_v19, 0.0  ;;  %v2563_v4 = vmul.f32 0.1, %v2531_v19  ;;  %3432 = vmatpush.bf16.msrb.mxu0 %v15038_v37  ;;  %3586 = vmatpush.bf16.msra.mxu1 %v15046_v38  ;;  %v15054_v38 = vld [vmem:[%s20679_s4 + $0x400] sm:$0xff] }
 0x2cf   :  { %v2487_v18 = vpop.f32.mrf.mxu2 }
 0x2d0   :  { %v17044_v39 = vsel %vm2547_vm14, %v2531_v19, %v2563_v4  ;;  %v17046_v8 = vadd.f32 %v2487_v18, %v2353_v48  ;;  %v2611_v3 = vld [vmem:[#allocation2 + $0xf0] sm:$0xff]  ;;  %v15055_v19 = vld [vmem:[%s20679_s4 + $0x408] sm:$0xff]  ;;  %v2200_v4 = vadd.f32 %v2182_v23, %v2046_v9 }
 0x2d1   :  { %v17050_v0 = vld [vmem:[#allocation2 + $0xf2] sm:$0xff]  ;;  %2595 = vst [vmem:[#allocation2 + $0x101] sm:$0xff] %v17044_v39  ;;  %v17053_v62 = vpack.c.bf16 %v2611_v3, %v3039_v55  ;;  %3739 = vmatpush.bf16.msra.mxu2 %v15055_v19 }
 0x2d2   :  { %20745 = vst [vmem:[#allocation20_spill] sm:$0xff] %v17046_v8  ;;  %v2896_v21 = vpack.c.bf16 %v17050_v0, %v17048_v57  ;;  %v2511_v40 = vmul.f32 %v16724_v59, %v17046_v8  ;;  %v15069_v55 = vld [vmem:[%s20679_s4 + $0x478] sm:$0xff]  ;;  %v2354_v18 = vadd.f32 %v2336_v42, %v2200_v4 }
 0x2d3   :  { %2863 = vmatmul.bf16.gmra.mxu0 %v17053_v62  ;;  %3887 = vmatpush.bf16.msra.mxu3 %v15069_v55 }
 0x2d4   :  { %3001 = vmatmul.bf16.gmra.mxu1 %v2896_v21  ;;  %v2532_v48 = vadd.f32 %v16732_v24, %v2511_v40 }
 0x2d5   :  { %3740 = vmatpush.bf16.msra.mxu2 %v15054_v38  ;;  %v20747_v38 = vpack.c.bf16 %v16751_v11, %v16738_v1 }
 0x2d6   :  { %vm2548_vm15 = vcmp.gt.f32.partialorder %v2532_v48, 0.0  ;;  %v2564_v6 = vmul.f32 0.1, %v2532_v48 }
 0x2d7   :  { %v2489_v37 = vpop.f32.mrf.mxu2 }
 0x2d8   :  { %v17072_v49 = vsel %vm2548_vm15, %v2532_v48, %v2564_v6  ;;  %v17074_v21 = vadd.f32 %v2489_v37, %v2354_v18  ;;  %v3041_v45 = vld [vmem:[#allocation2 + $0x100] sm:$0xff]  ;;  %v15068_v18 = vld [vmem:[%s20679_s4 + $0x470] sm:$0xff] }
 0x2d9   :  { %2596 = vst [vmem:[#allocation2 + $0x111] sm:$0xff] %v17072_v49  ;;  %v3050_v9 = vpack.c.bf16 %v3041_v45, %v2611_v3  ;;  %v17079_v40 = vpack.c.bf16 %v17072_v49, %v17044_v39  ;;  %v17087_v48 = vld [vmem:[#allocation2 + $0x102] sm:$0xff]  ;;  %3888 = vmatpush.bf16.msra.mxu3 %v15068_v18 }
 0x2da   :  { %20746 = vst [vmem:[#allocation21_spill] sm:$0xff] %v17074_v21  ;;  %v2512_v23 = vmul.f32 %v16724_v59, %v17074_v21 }
 0x2db   :  { %3155 = vmatmul.bf16.gmra.mxu2 %v3050_v9  ;;  %2771 = vmatmul.bf16.gmra.mxu3 %v17079_v40 }
 0x2dc   :  { %v2533_v42 = vadd.f32 %v16732_v24, %v2512_v23 }
 0x2de   :  { %vm2549_vm1 = vcmp.gt.f32.partialorder %v2533_v42, 0.0  ;;  %v2565_v55 = vmul.f32 0.1, %v2533_v42 }
 0x2e0   :  { %v17085_v19 = vsel %vm2549_vm1, %v2533_v42, %v2565_v55  ;;  %v2613_v4 = vld [vmem:[#allocation2 + $0x110] sm:$0xff]  ;;  %v3352_v55 = vpack.c.bf16 %v16787_v14, %v16755_v43 }
 0x2e1   :  { %v17089_v3 = vld [vmem:[#allocation2 + $0x112] sm:$0xff]  ;;  %2597 = vst [vmem:[#allocation2 + $0x121] sm:$0xff] %v17085_v19  ;;  %v17092_v6 = vpack.c.bf16 %v2613_v4, %v3041_v45 }
 0x2e2   :  { %v17096_v59 = vpack.c.bf16 %v17089_v3, %v17087_v48 }
 0x2e3   :  { %2868 = vmatmul.bf16.gmra.mxu0 %v17092_v6 }
 0x2e4   :  { %3006 = vmatmul.bf16.gmra.mxu1 %v17096_v59 }
 0x2e8   :  { %v17105_v37 = vld [vmem:[#allocation2 + $0x120] sm:$0xff] }
 0x2e9   :  { %v3051_v45 = vpack.c.bf16 %v17105_v37, %v2613_v4  ;;  %v15067_v4 = vld [vmem:[%s20679_s4 + $0x468] sm:$0xff] }
 0x2ea   :  { %3889 = vmatpush.bf16.msra.mxu3 %v15067_v4 }
 0x2eb   :  { %3160 = vmatmul.bf16.gmra.mxu2 %v3051_v45  ;;  %3279 = vmatmul.bf16.vlgmr.msrb.gmra.mxu3 %v20747_v38  ;;  %v20748_v38 = vpack.c.bf16 %v16783_v47, %v16766_v30  ;;  %v15066_v30 = vld [vmem:[%s20679_s4 + $0x460] sm:$0xff] }
 0x2ee   :  { %v2737_v9 = vpop.f32.mrf.mxu3  ;;  %3890 = vmatpush.bf16.msra.mxu3 %v15066_v30 }
 0x2f0   :  { %v2834_v23 = vpop.f32.mrf.mxu0 }
 0x2f1   :  { %v2972_v42 = vpop.f32.mrf.mxu1  ;;  %v2835_v24 = vadd.f32 %v2834_v23, %v2737_v9 }
 0x2f3   :  { %3433 = vmatmul.bf16.vlgmr.msrb.gmra.mxu0 %v3352_v55  ;;  %v3012_v18 = vadd.f32 %v2972_v42, %v2835_v24  ;;  %v3353_v42 = vpack.c.bf16 %v16824_v61, %v16789_v10  ;;  %v20749_v10 = vpack.c.bf16 %v16820_v44, %v16803_v12  ;;  %v15065_v12 = vld [vmem:[%s20679_s4 + $0x458] sm:$0xff] }
 0x2f4   :  { %3587 = vmatmul.bf16.vlgmr.msra.gmra.mxu1 %v16792_v52  ;;  %3891 = vmatpush.bf16.msra.mxu3 %v15065_v12 }
 0x2f6   :  { %v2739_v45 = vpop.f32.mrf.mxu3 }
 0x2f8   :  { %v2836_v60 = vpop.f32.mrf.mxu0 }
 0x2f9   :  { %v2974_v1 = vpop.f32.mrf.mxu1  ;;  %v2837_v11 = vadd.f32 %v2836_v60, %v2739_v45 }
 0x2fb   :  { %3741 = vmatmul.bf16.vlgmr.msra.gmra.mxu2 %v16773_v17  ;;  %3284 = vmatmul.bf16.gmra.mxu3 %v20748_v38  ;;  %v3013_v43 = vadd.f32 %v2974_v1, %v2837_v11 }
 0x2fe   :  { %v3126_v14 = vpop.f32.mrf.mxu2  ;;  %v2742_v9 = vpop.f32.mrf.mxu3 }
 0x2ff   :  { %v17121_v52 = vadd.f32 %v3126_v14, %v3012_v18 }
 0x300   :  { %v2839_v24 = vpop.f32.mrf.mxu0 }
 0x301   :  { %v2977_v23 = vpop.f32.mrf.mxu1  ;;  %v2840_v55 = vadd.f32 %v2839_v24, %v2742_v9 }
 0x303   :  { %3438 = vmatmul.bf16.gmra.mxu0 %v3353_v42  ;;  %v3014_v60 = vadd.f32 %v2977_v23, %v2840_v55 }
 0x304   :  { %3592 = vmatmul.bf16.gmra.mxu1 %v16829_v32 }
 0x306   :  { %v3128_v17 = vpop.f32.mrf.mxu2  ;;  %v2744_v47 = vpop.f32.mrf.mxu3 }
 0x307   :  { %v17129_v4 = vadd.f32 %v3128_v17, %v3013_v43  ;;  %v3354_v43 = vpack.c.bf16 %v16865_v46, %v16826_v5  ;;  %v20750_v5 = vpack.c.bf16 %v16861_v20, %v16843_v31  ;;  %v17149_v17 = vld [vmem:[#allocation2 + $0x82] sm:$0xff] }
 0x308   :  { %v2841_v18 = vpop.f32.mrf.mxu0 }
 0x309   :  { %v2979_v45 = vpop.f32.mrf.mxu1  ;;  %v2842_v1 = vadd.f32 %v2841_v18, %v2744_v47 }
 0x30b   :  { %3746 = vmatmul.bf16.gmra.mxu2 %v16810_v34  ;;  %3289 = vmatmul.bf16.gmra.mxu3 %v20749_v10  ;;  %v3015_v61 = vadd.f32 %v2979_v45, %v2842_v1  ;;  %v3355_v10 = vpack.c.bf16 %v17149_v17, %v16867_v56 }
 0x30e   :  { %v3131_v32 = vpop.f32.mrf.mxu2  ;;  %v2747_v11 = vpop.f32.mrf.mxu3 }
 0x30f   :  { %v17135_v38 = vadd.f32 %v3131_v32, %v3014_v60 }
 0x310   :  { %v2844_v14 = vpop.f32.mrf.mxu0 }
 0x311   :  { %v2982_v9 = vpop.f32.mrf.mxu1  ;;  %v2845_v24 = vadd.f32 %v2844_v14, %v2747_v11  ;;  %v15064_v11 = vld [vmem:[%s20679_s4 + $0x450] sm:$0xff] }
 0x312   :  { %3892 = vmatpush.bf16.msra.mxu3 %v15064_v11 }
 0x313   :  { %3443 = vmatmul.bf16.gmra.mxu0 %v3354_v43  ;;  %v3016_v23 = vadd.f32 %v2982_v9, %v2845_v24  ;;  %v3651_v9 = vld [vmem:[#allocation2 + $0x91] sm:$0xff] }
 0x314   :  { %3597 = vmatmul.bf16.gmra.mxu1 %v16870_v26  ;;  %v3663_v12 = vpack.c.bf16 %v3651_v9, %v16861_v20 }
 0x316   :  { %v3133_v34 = vpop.f32.mrf.mxu2  ;;  %v2749_v44 = vpop.f32.mrf.mxu3  ;;  %3893 = vmatpush.bf16.msra.mxu3 %v15063_v54 }
 0x317   :  { %v17143_v42 = vadd.f32 %v3133_v34, %v3015_v61  ;;  %v17155_v61 = vld [vmem:[#allocation2] sm:$0xff] }
 0x318   :  { %v2846_v55 = vpop.f32.mrf.mxu0 }
 0x319   :  { %v2984_v60 = vpop.f32.mrf.mxu1  ;;  %v2847_v30 = vadd.f32 %v2846_v55, %v2749_v44 }
 0x31b   :  { %3751 = vmatmul.bf16.gmra.mxu2 %v16850_v13  ;;  %3294 = vmatmul.bf16.gmra.mxu3 %v20750_v5  ;;  %v3017_v46 = vadd.f32 %v2984_v60, %v2847_v30  ;;  %v3509_v13 = vpack.c.bf16 %v17155_v61, %v16888_v2 }
 0x31e   :  { %v3136_v26 = vpop.f32.mrf.mxu2  ;;  %v2752_v47 = vpop.f32.mrf.mxu3 }
 0x31f   :  { %v17151_v18 = vadd.f32 %v3136_v26, %v3016_v23 }
 0x320   :  { %v2849_v45 = vpop.f32.mrf.mxu0 }
 0x321   :  { %v2987_v1 = vpop.f32.mrf.mxu1  ;;  %v2850_v32 = vadd.f32 %v2849_v45, %v2752_v47 }
 0x323   :  { %3448 = vmatmul.bf16.gmra.mxu0 %v3355_v10  ;;  %v3018_v31 = vadd.f32 %v2987_v1, %v2850_v32 }
 0x324   :  { %3602 = vmatmul.bf16.gmra.mxu1 %v3509_v13 }
 0x326   :  { %v3138_v14 = vpop.f32.mrf.mxu2  ;;  %v2754_v43 = vpop.f32.mrf.mxu3 }
 0x327   :  { %v17162_v24 = vadd.f32 %v3138_v14, %v3017_v46  ;;  %v3356_v46 = vpack.c.bf16 %v16971_v16, %v16905_v29  ;;  %v20751_v29 = vpack.c.bf16 %v16967_v51, %v16931_v53 }
 0x328   :  { %v2851_v56 = vpop.f32.mrf.mxu0 }
 0x329   :  { %v2989_v23 = vpop.f32.mrf.mxu1  ;;  %v2852_v34 = vadd.f32 %v2851_v56, %v2754_v43 }
 0x32b   :  { %3756 = vmatmul.bf16.gmra.mxu2 %v3663_v12  ;;  %3299 = vmatmul.bf16.gmra.mxu3 %v3202_v15  ;;  %v3019_v2 = vadd.f32 %v2989_v23, %v2852_v34  ;;  %v3358_v34 = vpack.c.bf16 %v17087_v48, %v17050_v0  ;;  %v17225_v48 = vld [vmem:[#allocation2 + $0x122] sm:$0xff] }
 0x32e   :  { %v3141_v44 = vpop.f32.mrf.mxu2  ;;  %v2757_v55 = vpop.f32.mrf.mxu3 }
 0x32f   :  { %v17168_v60 = vadd.f32 %v3141_v44, %v3018_v31  ;;  %v3357_v31 = vpack.c.bf16 %v17048_v57, %v16973_v36  ;;  %v20752_v36 = vpack.c.bf16 %v17044_v39, %v17011_v41 }
 0x330   :  { %v2854_v30 = vpop.f32.mrf.mxu0 }
 0x331   :  { %v2992_v5 = vpop.f32.mrf.mxu1  ;;  %v2855_v26 = vadd.f32 %v2854_v30, %v2757_v55  ;;  %v20753_v30 = vpack.c.bf16 %v17085_v19, %v17072_v49 }
 0x333   :  { %3453 = vmatmul.bf16.gmra.mxu0 %v3356_v46  ;;  %v3020_v20 = vadd.f32 %v2992_v5, %v2855_v26  ;;  %v3359_v26 = vpack.c.bf16 %v17225_v48, %v17089_v3 }
 0x334   :  { %3607 = vmatmul.bf16.gmra.mxu1 %v16976_v35 }
 0x336   :  { %v3143_v27 = vpop.f32.mrf.mxu2  ;;  %v17176_v15 = vpop.f32.mrf.mxu3 }
 0x337   :  { %v17178_v47 = vadd.f32 %v3143_v27, %v3019_v2 }
 0x338   :  { %v17180_v45 = vpop.f32.mrf.mxu0 }
 0x339   :  { %v17182_v1 = vpop.f32.mrf.mxu1 }
 0x33b   :  { %3761 = vmatmul.bf16.gmra.mxu2 %v16938_v50  ;;  %3304 = vmatmul.bf16.gmra.mxu3 %v20751_v29  ;;  %v15062_v50 = vld [vmem:[%s20679_s4 + $0x440] sm:$0xff]  ;;  %v3659_v29 = vld [vmem:[#allocation2 + $0x131] sm:$0xff] }
 0x33c   :  { %3894 = vmatpush.bf16.msra.mxu3 %v15062_v50  ;;  %v3667_v3 = vpack.c.bf16 %v3659_v29, %v17085_v19  ;;  %v15084_v19 = vld [vmem:[%s20679_s4 + $0x4f0] sm:$0xff] }
 0x33e   :  { %v3146_v16 = vpop.f32.mrf.mxu2  ;;  %v2762_v35 = vpop.f32.mrf.mxu3 }
 0x33f   :  { %v17188_v10 = vadd.f32 %v3146_v16, %v3020_v20  ;;  %v3513_v20 = vpack.c.bf16 %v17155_v61, %v17105_v37 }
 0x340   :  { %v2859_v13 = vpop.f32.mrf.mxu0 }
 0x341   :  { %v2997_v32 = vpop.f32.mrf.mxu1  ;;  %v2860_v11 = vadd.f32 %v2859_v13, %v2762_v35  ;;  %v3799_v35 = vld [vmem:[#allocation2 + $0x32] sm:$0xff]  ;;  %v3798_v13 = vld [vmem:[#allocation2 + $0x22] sm:$0xff] }
 0x343   :  { %3458 = vmatmul.bf16.gmra.mxu0 %v3357_v31  ;;  %v3022_v14 = vadd.f32 %v2997_v32, %v2860_v11  ;;  %v15085_v32 = vld [vmem:[%s20679_s4 + $0x4f8] sm:$0xff]  ;;  %v3814_v31 = vpack.c.bf16 %v3799_v35, %v3798_v13 }
 0x344   :  { %3612 = vmatmul.bf16.gmra.mxu1 %v17053_v62  ;;  %4188 = vmatpush.bf16.msra.mxu0 %v15085_v32  ;;  %v3806_v32 = vld [vmem:[#allocation2 + $0xc2] sm:$0xff] }
 0x346   :  { %v17196_v53 = vpop.f32.mrf.mxu2  ;;  %v17198_v51 = vpop.f32.mrf.mxu3 }
 0x348   :  { %v17200_v9 = vpop.f32.mrf.mxu0  ;;  %4189 = vmatpush.bf16.msra.mxu0 %v15084_v19 }
 0x349   :  { %v17202_v43 = vpop.f32.mrf.mxu1 }
 0x34b   :  { %3766 = vmatmul.bf16.gmra.mxu2 %v17018_v7  ;;  %3309 = vmatmul.bf16.gmra.mxu3 %v20752_v36 }
 0x34e   :  { %v3151_v57 = vpop.f32.mrf.mxu2  ;;  %v2767_v62 = vpop.f32.mrf.mxu3 }
 0x34f   :  { %v17208_v56 = vadd.f32 %v3151_v57, %v3022_v14  ;;  %v3801_v57 = vld [vmem:[#allocation2 + $0x52] sm:$0xff] }
 0x350   :  { %v2864_v23 = vpop.f32.mrf.mxu0 }
 0x351   :  { %v3002_v12 = vpop.f32.mrf.mxu1  ;;  %v2865_v2 = vadd.f32 %v2864_v23, %v2767_v62  ;;  %v3800_v23 = vld [vmem:[#allocation2 + $0x42] sm:$0xff] }
 0x353   :  { %3463 = vmatmul.bf16.gmra.mxu0 %v3358_v34  ;;  %v3024_v44 = vadd.f32 %v3002_v12, %v2865_v2  ;;  %v3815_v12 = vpack.c.bf16 %v3801_v57, %v3800_v23 }
 0x354   :  { %3617 = vmatmul.bf16.gmra.mxu1 %v17092_v6 }
 0x356   :  { %v17213_v55 = vpop.f32.mrf.mxu2  ;;  %v17215_v7 = vpop.f32.mrf.mxu3 }
 0x358   :  { %v17217_v41 = vpop.f32.mrf.mxu0 }
 0x359   :  { %v17219_v39 = vpop.f32.mrf.mxu1 }
 0x35b   :  { %3771 = vmatmul.bf16.gmra.mxu2 %v17079_v40  ;;  %3314 = vmatmul.bf16.gmra.mxu3 %v20753_v30 }
 0x35e   :  { %v3156_v0 = vpop.f32.mrf.mxu2  ;;  %v2772_v5 = vpop.f32.mrf.mxu3 }
 0x35f   :  { %v17227_v6 = vadd.f32 %v3156_v0, %v3024_v44  ;;  %v3802_v0 = vld [vmem:[#allocation2 + $0x62] sm:$0xff] }
 0x360   :  { %v2869_v46 = vpop.f32.mrf.mxu0 }
 0x361   :  { %v2870_v54 = vadd.f32 %v2869_v46, %v2772_v5  ;;  %v3007_v27 = vpop.f32.mrf.mxu1 }
 0x363   :  { %3468 = vmatmul.bf16.gmra.mxu0 %v3359_v26  ;;  %v3026_v40 = vadd.f32 %v3007_v27, %v2870_v54 }
 0x364   :  { %3622 = vmatmul.bf16.gmra.mxu1 %v3513_v20 }
 0x366   :  { %v17233_v49 = vpop.f32.mrf.mxu2  ;;  %v17235_v16 = vpop.f32.mrf.mxu3 }
 0x368   :  { %v17288_v57 = vpop.f32.mrf.mxu0 }
 0x36b   :  { %3776 = vmatmul.bf16.gmra.mxu2 %v3667_v3  ;;  %3895 = vmatmul.bf16.vlgmr.msra.gmra.mxu3 %v3814_v31 }
 0x36e   :  { %v3161_v37 = vpop.f32.mrf.mxu2  ;;  %v3280_v11 = vpop.f32.mrf.mxu3 }
 0x36f   :  { %v17241_v14 = vadd.f32 %v3161_v37, %v3026_v40  ;;  %v17244_v50 = vadd.f32 %v3280_v11, %v17121_v52  ;;  %v3803_v52 = vld [vmem:[#allocation2 + $0x72] sm:$0xff]  ;;  %v3808_v11 = vld [vmem:[#allocation2 + $0xe2] sm:$0xff] }
 0x370   :  { %v3816_v5 = vpack.c.bf16 %v3803_v52, %v3802_v0  ;;  %v17303_v52 = vpop.f32.mrf.mxu0 }
 0x376   :  { %v3282_v36 = vpop.f32.mrf.mxu3 }
 0x377   :  { %v17247_v62 = vadd.f32 %v3282_v36, %v17129_v4  ;;  %v15083_v4 = vld [vmem:[%s20679_s4 + $0x4e8] sm:$0xff] }
 0x378   :  { %4190 = vmatpush.bf16.msra.mxu0 %v15083_v4  ;;  %v15092_v4 = vld [vmem:[%s20679_s4 + $0x530] sm:$0xff] }
 0x37b   :  { %3900 = vmatmul.bf16.gmra.mxu3 %v3815_v12  ;;  %v17293_v12 = vpop.f32.mrf.mxu1 }
 0x37e   :  { %v3285_v34 = vpop.f32.mrf.mxu3 }
 0x37f   :  { %v17253_v2 = vadd.f32 %v3285_v34, %v17135_v38  ;;  %v3805_v38 = vld [vmem:[#allocation2 + $0x92] sm:$0xff] }
 0x380   :  { %v3817_v27 = vpack.c.bf16 %v3805_v38, %v17149_v17  ;;  %v15077_v34 = vld [vmem:[%s20679_s4 + $0x4b8] sm:$0xff] }
 0x381   :  { %4285 = vmatpush.bf16.msrb.mxu1 %v15077_v34  ;;  %v15101_v38 = vld [vmem:[%s20679_s4 + $0x578] sm:$0xff]  ;;  %v15072_v34 = vld [vmem:[%s20679_s4 + $0x490] sm:$0xff] }
 0x382   :  { %4577 = vmatpush.bf16.msrb.mxu3 %v15101_v38  ;;  %v15097_v38 = vld [vmem:[%s20679_s4 + $0x558] sm:$0xff] }
 0x386   :  { %v3287_v44 = vpop.f32.mrf.mxu3 }
 0x387   :  { %v17256_v30 = vadd.f32 %v3287_v44, %v17143_v42  ;;  %v15082_v42 = vld [vmem:[%s20679_s4 + $0x4e0] sm:$0xff]  ;;  %v15093_v44 = vld [vmem:[%s20679_s4 + $0x538] sm:$0xff] }
 0x388   :  { %4191 = vmatpush.bf16.msra.mxu0 %v15082_v42  ;;  %4423 = vmatpush.bf16.msrb.mxu2 %v15093_v44  ;;  %v17325_v42 = vpop.f32.mrf.mxu1  ;;  %v15088_v44 = vld [vmem:[%s20679_s4 + $0x510] sm:$0xff] }
 0x38b   :  { %3905 = vmatmul.bf16.gmra.mxu3 %v3816_v5  ;;  %v15079_v5 = vld [vmem:[%s20679_s4 + $0x4c8] sm:$0xff] }
 0x38c   :  { %4424 = vmatpush.bf16.msrb.mxu2 %v15092_v4 }
 0x38e   :  { %v3290_v46 = vpop.f32.mrf.mxu3 }
 0x38f   :  { %v17262_v26 = vadd.f32 %v3290_v46, %v17151_v18  ;;  %v3807_v18 = vld [vmem:[#allocation2 + $0xd2] sm:$0xff]  ;;  %v15075_v46 = vld [vmem:[%s20679_s4 + $0x4a8] sm:$0xff] }
 0x390   :  { %v3818_v3 = vpack.c.bf16 %v3807_v18, %v3806_v32  ;;  %v15090_v18 = vld [vmem:[%s20679_s4 + $0x520] sm:$0xff]  ;;  %v15100_v32 = vld [vmem:[%s20679_s4 + $0x570] sm:$0xff] }
 0x391   :  { %4578 = vmatpush.bf16.msrb.mxu3 %v15100_v32 }
 0x396   :  { %v3292_v20 = vpop.f32.mrf.mxu3 }
 0x397   :  { %v17265_v54 = vadd.f32 %v3292_v20, %v17162_v24  ;;  %v15081_v24 = vld [vmem:[%s20679_s4 + $0x4d8] sm:$0xff]  ;;  %v15091_v20 = vld [vmem:[%s20679_s4 + $0x528] sm:$0xff] }
 0x398   :  { %4192 = vmatpush.bf16.msra.mxu0 %v15081_v24  ;;  %4425 = vmatpush.bf16.msrb.mxu2 %v15091_v20  ;;  %v15087_v20 = vld [vmem:[%s20679_s4 + $0x508] sm:$0xff] }
 0x39b   :  { %3910 = vmatmul.bf16.gmra.mxu3 %v3817_v27 }
 0x39c   :  { %4426 = vmatpush.bf16.msrb.mxu2 %v15090_v18  ;;  %v15096_v18 = vld [vmem:[%s20679_s4 + $0x550] sm:$0xff] }
 0x39e   :  { %v3295_v40 = vpop.f32.mrf.mxu3 }
 0x39f   :  { %v17272_v29 = vadd.f32 %v3295_v40, %v17168_v60  ;;  %v3809_v60 = vld [vmem:[#allocation2 + $0xf2] sm:$0xff] }
 0x3a0   :  { %v3819_v36 = vpack.c.bf16 %v3809_v60, %v3808_v11  ;;  %v15099_v60 = vld [vmem:[%s20679_s4 + $0x568] sm:$0xff]  ;;  %v3813_v11 = vld [vmem:[#allocation2 + $0x132] sm:$0xff] }
 0x3a1   :  { %4579 = vmatpush.bf16.msrb.mxu3 %v15099_v60  ;;  %v3821_v4 = vpack.c.bf16 %v3813_v11, %v17225_v48  ;;  %v15095_v60 = vld [vmem:[%s20679_s4 + $0x548] sm:$0xff] }
 0x3a6   :  { %v3297_v35 = vpop.f32.mrf.mxu3 }
 0x3a7   :  { %v17275_v13 = vadd.f32 %v3297_v35, %v17178_v47  ;;  %v15080_v47 = vld [vmem:[%s20679_s4 + $0x4d0] sm:$0xff]  ;;  %v15074_v35 = vld [vmem:[%s20679_s4 + $0x4a0] sm:$0xff] }
 0x3a8   :  { %4193 = vmatpush.bf16.msra.mxu0 %v15080_v47 }
 0x3ab   :  { %3915 = vmatmul.bf16.gmra.mxu3 %v3818_v3  ;;  %v15073_v3 = vld [vmem:[%s20679_s4 + $0x498] sm:$0xff] }
 0x3ac   :  { %4194 = vmatpush.bf16.msra.mxu0 %v15079_v5 }
 0x3ae   :  { %v3300_v17 = vpop.f32.mrf.mxu3 }
 0x3af   :  { %v17281_v31 = vadd.f32 %v3300_v17, %v17188_v10  ;;  %v17295_v10 = vpop.f32.mrf.mxu2  ;;  %v15089_v17 = vld [vmem:[%s20679_s4 + $0x518] sm:$0xff] }
 0x3b0   :  { %4427 = vmatpush.bf16.msrb.mxu2 %v15089_v17 }
 0x3b4   :  { %4428 = vmatpush.bf16.msrb.mxu2 %v15088_v44  ;;  %v15109_v44 = vld [vmem:[%s20679_s4 + $0x5b8] sm:$0xff] }
 0x3b6   :  { %v17283_v37 = vpop.f32.mrf.mxu3 }
 0x3b7   :  { %v3742_v27 = vpop.f32.mrf.mxu2 }
 0x3b8   :  { %4429 = vmatpush.bf16.msrb.mxu2 %v15087_v20 }
 0x3bb   :  { %3920 = vmatmul.bf16.gmra.mxu3 %v3819_v36 }
 0x3be   :  { %v3305_v23 = vpop.f32.mrf.mxu3 }
 0x3bf   :  { %v17291_v19 = vadd.f32 %v3305_v23, %v17208_v56  ;;  %v15076_v56 = vld [vmem:[%s20679_s4 + $0x4b0] sm:$0xff]  ;;  %v3744_v47 = vpop.f32.mrf.mxu2  ;;  %v15078_v23 = vld [vmem:[%s20679_s4 + $0x4c0] sm:$0xff] }
 0x3c0   :  { %4286 = vmatpush.bf16.msrb.mxu1 %v15076_v56  ;;  %v15098_v56 = vld [vmem:[%s20679_s4 + $0x560] sm:$0xff]  ;;  %4195 = vmatpush.bf16.msra.mxu0 %v15078_v23 }
 0x3c1   :  { %4580 = vmatpush.bf16.msrb.mxu3 %v15098_v56 }
 0x3c4   :  { %4287 = vmatpush.bf16.msrb.mxu1 %v15075_v46  ;;  %v15071_v46 = vld [vmem:[%s20679_s4 + $0x488] sm:$0xff]  ;;  %4731 = vmatpush.bf16.msrb.mxu0 %v15109_v44 }
 0x3c5   :  { %4581 = vmatpush.bf16.msrb.mxu3 %v15097_v38  ;;  %v17402_v38 = vld [vmem:[%s20680_s5 + $0x4] ss:$0 sm:$0xff] }
 0x3c6   :  { %v17305_v0 = vpop.f32.mrf.mxu3 }
 0x3c7   :  { %v3747_v17 = vpop.f32.mrf.mxu2 }
 0x3c8   :  { %4288 = vmatpush.bf16.msrb.mxu1 %v15074_v35  ;;  %v15086_v35 = vld [vmem:[%s20679_s4 + $0x500] sm:$0xff] }
 0x3c9   :  { %4430 = vmatpush.bf16.msrb.mxu2 %v15086_v35  ;;  %4582 = vmatpush.bf16.msrb.mxu3 %v15096_v18  ;;  %v17408_v35 = vld [vmem:[%s20680_s5 + $0x5] ss:$0 sm:$0xff] }
 0x3cb   :  { %3925 = vmatmul.bf16.gmra.mxu3 %v17096_v59  ;;  %v3436_v59 = vpop.f32.mrf.mxu0 }
 0x3cc   :  { %4289 = vmatpush.bf16.msrb.mxu1 %v15073_v3 }
 0x3cd   :  { %4583 = vmatpush.bf16.msrb.mxu3 %v15095_v60 }
 0x3ce   :  { %v3310_v40 = vpop.f32.mrf.mxu3 }
 0x3cf   :  { %v17338_v24 = vadd.f32 %v3310_v40, %v17227_v6  ;;  %v3590_v6 = vpop.f32.mrf.mxu1  ;;  %v15070_v40 = vld [vmem:[%s20679_s4 + $0x480] sm:$0xff] }
 0x3d0   :  { %4290 = vmatpush.bf16.msrb.mxu1 %v15072_v34  ;;  %v15094_v34 = vld [vmem:[%s20679_s4 + $0x540] sm:$0xff] }
 0x3d1   :  { %4584 = vmatpush.bf16.msrb.mxu3 %v15094_v34 }
 0x3d3   :  { %v3439_v5 = vpop.f32.mrf.mxu0 }
 0x3d4   :  { %4291 = vmatpush.bf16.msrb.mxu1 %v15071_v46 }
 0x3d6   :  { %v17349_v36 = vpop.f32.mrf.mxu3 }
 0x3d7   :  { %v3593_v32 = vpop.f32.mrf.mxu1 }
 0x3d8   :  { %4292 = vmatpush.bf16.msrb.mxu1 %v15070_v40 }
 0x3db   :  { %3930 = vmatmul.bf16.gmra.mxu3 %v3821_v4  ;;  %v3441_v11 = vpop.f32.mrf.mxu0  ;;  %v3749_v4 = vpop.f32.mrf.mxu2 }
 0x3de   :  { %v3315_v48 = vpop.f32.mrf.mxu3 }
 0x3df   :  { %v17383_v3 = vadd.f32 %v3315_v48, %v17241_v14  ;;  %v3474_v14 = vadd.f32 %v17303_v52, %v17244_v50  ;;  %v3595_v56 = vpop.f32.mrf.mxu1  ;;  %v3475_v50 = vadd.f32 %v3436_v59, %v17247_v62  ;;  %v3476_v62 = vadd.f32 %v3439_v5, %v17253_v2 }
 0x3e1   :  { %v3628_v46 = vadd.f32 %v17325_v42, %v3474_v14  ;;  %v3629_v60 = vadd.f32 %v3590_v6, %v3475_v50  ;;  %v15108_v6 = vld [vmem:[%s20679_s4 + $0x5b0] sm:$0xff]  ;;  %v3630_v50 = vadd.f32 %v3593_v32, %v3476_v62 }
 0x3e2   :  { %4732 = vmatpush.bf16.msrb.mxu0 %v15108_v6 }
 0x3e3   :  { %v3782_v20 = vadd.f32 %v3742_v27, %v3628_v46  ;;  %v3444_v48 = vpop.f32.mrf.mxu0  ;;  %v3752_v34 = vpop.f32.mrf.mxu2  ;;  %v3783_v14 = vadd.f32 %v3744_v47, %v3629_v60  ;;  %v4099_v46 = vld [vmem:[#allocation2 + $0x1] sm:$0xff]  ;;  %v3784_v2 = vadd.f32 %v3747_v17, %v3630_v50 }
 0x3e4   :  { %v4334_v60 = vld [vmem:[#allocation2 + $0x2] sm:$0xff] }
 0x3e6   :  { %v17388_v23 = vpop.f32.mrf.mxu3 }
 0x3e7   :  { %v3598_v42 = vpop.f32.mrf.mxu1 }
 0x3ee   :  { %v3896_v40 = vpop.f32.mrf.mxu3 }
 0x3ef   :  { %v3936_v52 = vadd.f32 %v3896_v40, %v3782_v20  ;;  %v3446_v40 = vpop.f32.mrf.mxu0  ;;  %v3600_v5 = vpop.f32.mrf.mxu1 }
 0x3f1   :  { %v3957_v18 = vmul.f32 %v17402_v38, %v3936_v52 }
 0x3f3   :  { %v3978_v27 = vadd.f32 %v17408_v35, %v3957_v18 }
 0x3f5   :  { %vm3994_vm0 = vcmp.gt.f32.partialorder %v3978_v27, 0.0  ;;  %v4010_v44 = vmul.f32 0.1, %v3978_v27 }
 0x3f6   :  { %v3898_v21 = vpop.f32.mrf.mxu3 }
 0x3f7   :  { %v17413_v59 = vsel %vm3994_vm0, %v3978_v27, %v4010_v44  ;;  %v3937_v20 = vadd.f32 %v3898_v21, %v3783_v14  ;;  %v3754_v27 = vpop.f32.mrf.mxu2  ;;  %v3477_v44 = vadd.f32 %v3441_v11, %v17256_v30 }
 0x3f8   :  { %4042 = vst [vmem:[#allocation2 + $0x11] sm:$0xff] %v17413_v59  ;;  %v4115_v52 = vpack.c.bf16 %v17413_v59, %v4099_v46 }
 0x3f9   :  { %v3958_v47 = vmul.f32 %v17402_v38, %v3937_v20  ;;  %v3631_v30 = vadd.f32 %v3595_v56, %v3477_v44 }
 0x3fa   :  { %4196 = vmatmul.bf16.vlgmr.msra.gmra.mxu0 %v4115_v52  ;;  %v3449_v52 = vpop.f32.mrf.mxu0 }
 0x3fb   :  { %v3979_v18 = vadd.f32 %v17408_v35, %v3958_v47  ;;  %v3785_v6 = vadd.f32 %v3749_v4, %v3631_v30  ;;  %v15107_v4 = vld [vmem:[%s20679_s4 + $0x5a8] sm:$0xff]  ;;  %v3479_v30 = vadd.f32 %v3446_v40, %v17265_v54 }
 0x3fc   :  { %4733 = vmatpush.bf16.msrb.mxu0 %v15107_v4 }
 0x3fd   :  { %vm3995_vm2 = vcmp.gt.f32.partialorder %v3979_v18, 0.0  ;;  %v4011_v21 = vmul.f32 0.1, %v3979_v18  ;;  %v3633_v4 = vadd.f32 %v3600_v5, %v3479_v30  ;;  %v15106_v5 = vld [vmem:[%s20679_s4 + $0x5a0] sm:$0xff] }
 0x3fe   :  { %v3901_v14 = vpop.f32.mrf.mxu3 }
 0x3ff   :  { %v17423_v46 = vsel %vm3995_vm2, %v3979_v18, %v4011_v21  ;;  %v3938_v8 = vadd.f32 %v3901_v14, %v3784_v2  ;;  %v4059_v33 = vld [vmem:[#allocation2 + $0x10] sm:$0xff]  ;;  %v3478_v18 = vadd.f32 %v3444_v48, %v17262_v26  ;;  %v3603_v2 = vpop.f32.mrf.mxu1  ;;  %v3757_v62 = vpop.f32.mrf.mxu2 }
 0x400   :  { %v17425_v25 = vld [vmem:[#allocation2 + $0x12] sm:$0xff]  ;;  %4043 = vst [vmem:[#allocation2 + $0x21] sm:$0xff] %v17423_v46  ;;  %v4074_v32 = vpack.c.bf16 %v4059_v33, %v17155_v61  ;;  %4734 = vmatpush.bf16.msrb.mxu0 %v15106_v5 }
 0x401   :  { %v4350_v17 = vpack.c.bf16 %v17425_v25, %v4334_v60  ;;  %v3959_v20 = vmul.f32 %v17402_v38, %v3938_v8  ;;  %v3632_v26 = vadd.f32 %v3598_v42, %v3478_v18 }
 0x402   :  { %4293 = vmatmul.bf16.vlgmr.msrb.gmra.mxu1 %v4074_v32  ;;  %v3451_v32 = vpop.f32.mrf.mxu0 }
 0x403   :  { %4431 = vmatmul.bf16.vlgmr.msrb.gmra.mxu2 %v4350_v17  ;;  %v3980_v11 = vadd.f32 %v17408_v35, %v3959_v20  ;;  %v3786_v17 = vadd.f32 %v3752_v34, %v3632_v26  ;;  %v3787_v26 = vadd.f32 %v3754_v27, %v3633_v4 }
 0x405   :  { %vm3996_vm3 = vcmp.gt.f32.partialorder %v3980_v11, 0.0  ;;  %v4012_v47 = vmul.f32 0.1, %v3980_v11 }
 0x406   :  { %v3903_v50 = vpop.f32.mrf.mxu3 }
 0x407   :  { %v17435_v21 = vsel %vm3996_vm3, %v3980_v11, %v4012_v47  ;;  %v3939_v60 = vadd.f32 %v3903_v50, %v3785_v6  ;;  %v4489_v14 = vld [vmem:[#allocation2 + $0x20] sm:$0xff]  ;;  %v3759_v40 = vpop.f32.mrf.mxu2 }
 0x408   :  { %4044 = vst [vmem:[#allocation2 + $0x31] sm:$0xff] %v17435_v21  ;;  %v4504_v8 = vpack.c.bf16 %v4489_v14, %v4059_v33  ;;  %v17440_v56 = vpack.c.bf16 %v17435_v21, %v17423_v46  ;;  %v17451_v50 = vld [vmem:[#allocation2 + $0x22] sm:$0xff] }
 0x409   :  { %v3960_v44 = vmul.f32 %v17402_v38, %v3939_v60 }
 0x40a   :  { %4585 = vmatmul.bf16.vlgmr.msrb.gmra.mxu3 %v4504_v8  ;;  %4201 = vmatmul.bf16.gmra.mxu0 %v17440_v56  ;;  %v3605_v8 = vpop.f32.mrf.mxu1 }
 0x40b   :  { %v3981_v48 = vadd.f32 %v17408_v35, %v3960_v44 }
 0x40d   :  { %vm3997_vm4 = vcmp.gt.f32.partialorder %v3981_v48, 0.0  ;;  %v4013_v33 = vmul.f32 0.1, %v3981_v48 }
 0x40e   :  { %v3906_v20 = vpop.f32.mrf.mxu3 }
 0x40f   :  { %v17449_v11 = vsel %vm3997_vm4, %v3981_v48, %v4013_v33  ;;  %v3940_v6 = vadd.f32 %v3906_v20, %v3786_v17  ;;  %v4061_v47 = vld [vmem:[#allocation2 + $0x30] sm:$0xff]  ;;  %v3454_v48 = vpop.f32.mrf.mxu0  ;;  %v3480_v33 = vadd.f32 %v3449_v52, %v17272_v29 }
 0x410   :  { %v17453_v60 = vld [vmem:[#allocation2 + $0x32] sm:$0xff]  ;;  %4045 = vst [vmem:[#allocation2 + $0x41] sm:$0xff] %v17449_v11  ;;  %v17456_v42 = vpack.c.bf16 %v4061_v47, %v4489_v14  ;;  %v3482_v5 = vadd.f32 %v3454_v48, %v17281_v31 }
 0x411   :  { %v4351_v34 = vpack.c.bf16 %v17453_v60, %v17451_v50  ;;  %v3961_v54 = vmul.f32 %v17402_v38, %v3940_v6  ;;  %v3634_v29 = vadd.f32 %v3603_v2, %v3480_v33 }
 0x412   :  { %4298 = vmatmul.bf16.gmra.mxu1 %v17456_v42  ;;  %v3608_v52 = vpop.f32.mrf.mxu1 }
 0x413   :  { %4436 = vmatmul.bf16.gmra.mxu2 %v4351_v34  ;;  %v3982_v44 = vadd.f32 %v17408_v35, %v3961_v54  ;;  %v3762_v54 = vpop.f32.mrf.mxu2 }
 0x415   :  { %vm3998_vm5 = vcmp.gt.f32.partialorder %v3982_v44, 0.0  ;;  %v4014_v14 = vmul.f32 0.1, %v3982_v44 }
 0x416   :  { %v3908_v17 = vpop.f32.mrf.mxu3 }
 0x417   :  { %v17466_v20 = vsel %vm3998_vm5, %v3982_v44, %v4014_v14  ;;  %v3941_v18 = vadd.f32 %v3908_v17, %v3787_v26  ;;  %v4491_v22 = vld [vmem:[#allocation2 + $0x40] sm:$0xff]  ;;  %v3481_v26 = vadd.f32 %v3451_v32, %v17275_v13  ;;  %v3456_v2 = vpop.f32.mrf.mxu0  ;;  %v2857_v32 = vadd.f32 %v17180_v45, %v17176_v15 }
 0x418   :  { %4046 = vst [vmem:[#allocation2 + $0x51] sm:$0xff] %v17466_v20  ;;  %v4505_v6 = vpack.c.bf16 %v4491_v22, %v4061_v47  ;;  %v17471_v34 = vpack.c.bf16 %v17466_v20, %v17449_v11  ;;  %v3788_v47 = vadd.f32 %v3757_v62, %v3634_v29 }
 0x419   :  { %v3962_v27 = vmul.f32 %v17402_v38, %v3941_v18  ;;  %v17482_v18 = vld [vmem:[#allocation2 + $0x42] sm:$0xff]  ;;  %v3021_v28 = vadd.f32 %v17182_v1, %v2857_v32 }
 0x41a   :  { %4590 = vmatmul.bf16.gmra.mxu3 %v4505_v6  ;;  %4206 = vmatmul.bf16.gmra.mxu0 %v17471_v34 }
 0x41b   :  { %v3983_v30 = vadd.f32 %v17408_v35, %v3962_v27  ;;  %v3635_v27 = vadd.f32 %v3605_v8, %v3481_v26  ;;  %v15105_v8 = vld [vmem:[%s20679_s4 + $0x598] sm:$0xff]  ;;  %v3636_v26 = vadd.f32 %v3608_v52, %v3482_v5  ;;  %v2862_v5 = vadd.f32 %v17200_v9, %v17198_v51 }
 0x41c   :  { %4735 = vmatpush.bf16.msrb.mxu0 %v15105_v8 }
 0x41d   :  { %vm3999_vm6 = vcmp.gt.f32.partialorder %v3983_v30, 0.0  ;;  %v4015_v4 = vmul.f32 0.1, %v3983_v30 }
 0x41e   :  { %v3911_v44 = vpop.f32.mrf.mxu3 }
 0x41f   :  { %v17480_v14 = vsel %vm3999_vm6, %v3983_v30, %v4015_v4  ;;  %v3942_v17 = vadd.f32 %v3911_v44, %v3788_v47  ;;  %v4063_v63 = vld [vmem:[#allocation2 + $0x50] sm:$0xff]  ;;  %v3789_v30 = vadd.f32 %v3759_v40, %v3635_v27  ;;  %v3764_v4 = vpop.f32.mrf.mxu2  ;;  %v3175_v40 = vadd.f32 %v17196_v53, %v3021_v28  ;;  %v3459_v31 = vpop.f32.mrf.mxu0 }
 0x420   :  { %v17484_v6 = vld [vmem:[#allocation2 + $0x52] sm:$0xff]  ;;  %4047 = vst [vmem:[#allocation2 + $0x61] sm:$0xff] %v17480_v14  ;;  %v17487_v33 = vpack.c.bf16 %v4063_v63, %v4491_v22  ;;  %v3610_v22 = vpop.f32.mrf.mxu1 }
 0x421   :  { %v4352_v62 = vpack.c.bf16 %v17484_v6, %v17482_v18  ;;  %v3963_v13 = vmul.f32 %v17402_v38, %v3942_v17  ;;  %v3329_v48 = vadd.f32 %v17283_v37, %v3175_v40 }
 0x422   :  { %4303 = vmatmul.bf16.gmra.mxu1 %v17487_v33 }
 0x423   :  { %4441 = vmatmul.bf16.gmra.mxu2 %v4352_v62  ;;  %v3984_v29 = vadd.f32 %v17408_v35, %v3963_v13  ;;  %v3790_v13 = vadd.f32 %v3762_v54, %v3636_v26  ;;  %v4107_v26 = vld [vmem:[#allocation2 + $0xa1] sm:$0xff] }
 0x425   :  { %vm4000_vm7 = vcmp.gt.f32.partialorder %v3984_v29, 0.0  ;;  %v4016_v47 = vmul.f32 0.1, %v3984_v29 }
 0x426   :  { %v3913_v44 = vpop.f32.mrf.mxu3 }
 0x427   :  { %v17500_v17 = vsel %vm4000_vm7, %v3984_v29, %v4016_v47  ;;  %v3943_v58 = vadd.f32 %v3913_v44, %v3789_v30  ;;  %v4493_v62 = vld [vmem:[#allocation2 + $0x60] sm:$0xff]  ;;  %v3483_v29 = vadd.f32 %v3456_v2, %v3329_v48 }
 0x428   :  { %4048 = vst [vmem:[#allocation2 + $0x71] sm:$0xff] %v17500_v17  ;;  %v4506_v15 = vpack.c.bf16 %v4493_v62, %v4063_v63  ;;  %v17505_v45 = vpack.c.bf16 %v17500_v17, %v17480_v14  ;;  %v3613_v30 = vpop.f32.mrf.mxu1  ;;  %v17517_v53 = vld [vmem:[#allocation2 + $0x62] sm:$0xff] }
 0x429   :  { %v3964_v1 = vmul.f32 %v17402_v38, %v3943_v58  ;;  %v3637_v8 = vadd.f32 %v3610_v22, %v3483_v29  ;;  %v15104_v22 = vld [vmem:[%s20679_s4 + $0x590] sm:$0xff] }
 0x42a   :  { %4595 = vmatmul.bf16.gmra.mxu3 %v4506_v15  ;;  %4211 = vmatmul.bf16.gmra.mxu0 %v17505_v45  ;;  %v3767_v15 = vpop.f32.mrf.mxu2 }
 0x42b   :  { %v3985_v63 = vadd.f32 %v17408_v35, %v3964_v1  ;;  %v3461_v1 = vpop.f32.mrf.mxu0  ;;  %4736 = vmatpush.bf16.msrb.mxu0 %v15104_v22 }
 0x42d   :  { %vm4001_vm8 = vcmp.gt.f32.partialorder %v3985_v63, 0.0  ;;  %v4017_v32 = vmul.f32 0.1, %v3985_v63 }
 0x42e   :  { %v3916_v27 = vpop.f32.mrf.mxu3 }
 0x42f   :  { %v17515_v47 = vsel %vm4001_vm8, %v3985_v63, %v4017_v32  ;;  %v3944_v28 = vadd.f32 %v3916_v27, %v3790_v13  ;;  %v4065_v58 = vld [vmem:[#allocation2 + $0x70] sm:$0xff]  ;;  %v3023_v13 = vadd.f32 %v17202_v43, %v2862_v5  ;;  %v3484_v32 = vadd.f32 %v3459_v31, %v17291_v19 }
 0x430   :  { %v17519_v44 = vld [vmem:[#allocation2 + $0x72] sm:$0xff]  ;;  %4049 = vst [vmem:[#allocation2 + $0x81] sm:$0xff] %v17515_v47  ;;  %v17522_v37 = vpack.c.bf16 %v4065_v58, %v4493_v62  ;;  %v4661_v54 = vpack.c.bf16 %v17515_v47, %v17500_v17  ;;  %v3791_v62 = vadd.f32 %v3764_v4, %v3637_v8  ;;  %v3615_v43 = vpop.f32.mrf.mxu1 }
 0x431   :  { %v4353_v52 = vpack.c.bf16 %v17519_v44, %v17517_v53  ;;  %v3965_v2 = vmul.f32 %v17402_v38, %v3944_v28  ;;  %v3177_v4 = vadd.f32 %v17213_v55, %v3023_v13  ;;  %v15136_v17 = vld [vmem:[%s20679_s4 + $0x690] sm:$0xff] }
 0x432   :  { %4308 = vmatmul.bf16.gmra.mxu1 %v17522_v37  ;;  %v3769_v31 = vpop.f32.mrf.mxu2 }
 0x433   :  { %4446 = vmatmul.bf16.gmra.mxu2 %v4353_v52  ;;  %v3986_v40 = vadd.f32 %v17408_v35, %v3965_v2  ;;  %v3331_v29 = vadd.f32 %v17305_v0, %v3177_v4  ;;  %v3638_v2 = vadd.f32 %v3613_v30, %v3484_v32 }
 0x435   :  { %vm4002_vm9 = vcmp.gt.f32.partialorder %v3986_v40, 0.0  ;;  %v4018_v48 = vmul.f32 0.1, %v3986_v40 }
 0x436   :  { %v3918_v63 = vpop.f32.mrf.mxu3 }
 0x437   :  { %v17535_v27 = vsel %vm4002_vm9, %v3986_v40, %v4018_v48  ;;  %v3945_v28 = vadd.f32 %v3918_v63, %v3791_v62  ;;  %v17537_v52 = vld [vmem:[#allocation2 + $0x80] sm:$0xff]  ;;  %v3464_v62 = vpop.f32.mrf.mxu0 }
 0x438   :  { %4050 = vst [vmem:[#allocation2 + $0xb1] sm:$0xff] %v17535_v27  ;;  %v4507_v51 = vpack.c.bf16 %v17537_v52, %v4065_v58  ;;  %v4119_v9 = vpack.c.bf16 %v17535_v27, %v4107_v26  ;;  %v3792_v58 = vadd.f32 %v3767_v15, %v3638_v2  ;;  %v4342_v40 = vld [vmem:[#allocation2 + $0xa2] sm:$0xff]  ;;  %v3485_v26 = vadd.f32 %v3461_v1, %v3331_v29  ;;  %v15117_v1 = vld [vmem:[%s20679_s4 + $0x5f8] sm:$0xff] }
 0x439   :  { %v3966_v19 = vmul.f32 %v17402_v38, %v3945_v28  ;;  %4885 = vmatpush.bf16.msra.mxu1 %v15117_v1 }
 0x43a   :  { %4600 = vmatmul.bf16.gmra.mxu3 %v4507_v51  ;;  %4216 = vmatmul.bf16.gmra.mxu0 %v4119_v9  ;;  %v15125_v51 = vld [vmem:[%s20679_s4 + $0x638] sm:$0xff]  ;;  %v3618_v9 = vpop.f32.mrf.mxu1  ;;  %v3639_v22 = vadd.f32 %v3615_v43, %v3485_v26 }
 0x43b   :  { %v3987_v5 = vadd.f32 %v17408_v35, %v3966_v19  ;;  %v3772_v19 = vpop.f32.mrf.mxu2  ;;  %5039 = vmatpush.bf16.msra.mxu2 %v15125_v51 }
 0x43c   :  { %v3793_v29 = vadd.f32 %v3769_v31, %v3639_v22 }
 0x43d   :  { %vm4003_vm10 = vcmp.gt.f32.partialorder %v3987_v5, 0.0  ;;  %v4019_v8 = vmul.f32 0.1, %v3987_v5 }
 0x43e   :  { %v3921_v48 = vpop.f32.mrf.mxu3 }
 0x43f   :  { %v17549_v55 = vsel %vm4003_vm10, %v3987_v5, %v4019_v8  ;;  %v3946_v63 = vadd.f32 %v3921_v48, %v3792_v58  ;;  %v4067_v13 = vld [vmem:[#allocation2 + $0xb0] sm:$0xff]  ;;  %v3466_v31 = vpop.f32.mrf.mxu0 }
 0x440   :  { %v17551_v28 = vld [vmem:[#allocation2 + $0xb2] sm:$0xff]  ;;  %4051 = vst [vmem:[#allocation2 + $0xc1] sm:$0xff] %v17549_v55  ;;  %v4078_v0 = vpack.c.bf16 %v4067_v13, %v17155_v61  ;;  %v4662_v15 = vpack.c.bf16 %v17549_v55, %v17535_v27  ;;  %v2867_v61 = vadd.f32 %v17217_v41, %v17215_v7  ;;  %v3486_v41 = vadd.f32 %v3464_v62, %v17338_v24  ;;  %v15115_v62 = vld [vmem:[%s20679_s4 + $0x5e8] sm:$0xff] }
 0x441   :  { %v4354_v30 = vpack.c.bf16 %v17551_v28, %v4342_v40  ;;  %v3967_v32 = vmul.f32 %v17402_v38, %v3946_v63  ;;  %v15116_v58 = vld [vmem:[%s20679_s4 + $0x5f0] sm:$0xff] }
 0x442   :  { %4313 = vmatmul.bf16.gmra.mxu1 %v4078_v0  ;;  %v15124_v8 = vld [vmem:[%s20679_s4 + $0x630] sm:$0xff]  ;;  %v3025_v7 = vadd.f32 %v17219_v39, %v2867_v61  ;;  %v15103_v0 = vld [vmem:[%s20679_s4 + $0x588] sm:$0xff]  ;;  %v3620_v51 = vpop.f32.mrf.mxu1 }
 0x443   :  { %4451 = vmatmul.bf16.gmra.mxu2 %v4354_v30  ;;  %v3988_v4 = vadd.f32 %v17408_v35, %v3967_v32  ;;  %4886 = vmatpush.bf16.msra.mxu1 %v15116_v58  ;;  %v15133_v30 = vld [vmem:[%s20679_s4 + $0x678] sm:$0xff] }
 0x444   :  { %5040 = vmatpush.bf16.msra.mxu2 %v15124_v8  ;;  %v3179_v39 = vadd.f32 %v17233_v49, %v3025_v7  ;;  %v3640_v49 = vadd.f32 %v3618_v9, %v3486_v41  ;;  %4737 = vmatpush.bf16.msrb.mxu0 %v15103_v0  ;;  %v15132_v9 = vld [vmem:[%s20679_s4 + $0x670] sm:$0xff] }
 0x445   :  { %vm4004_vm11 = vcmp.gt.f32.partialorder %v3988_v4, 0.0  ;;  %v4020_v2 = vmul.f32 0.1, %v3988_v4  ;;  %5193 = vmatpush.bf16.msra.mxu3 %v15133_v30 }
 0x446   :  { %v3923_v5 = vpop.f32.mrf.mxu3  ;;  %v3333_v32 = vadd.f32 %v17349_v36, %v3179_v39  ;;  %v3794_v61 = vadd.f32 %v3772_v19, %v3640_v49  ;;  %v15122_v36 = vld [vmem:[%s20679_s4 + $0x620] sm:$0xff]  ;;  %v15131_v49 = vld [vmem:[%s20679_s4 + $0x668] sm:$0xff] }
 0x447   :  { %v17576_v43 = vsel %vm4004_vm11, %v3988_v4, %v4020_v2  ;;  %v3947_v40 = vadd.f32 %v3923_v5, %v3793_v29  ;;  %v4497_v48 = vld [vmem:[#allocation2 + $0xc0] sm:$0xff]  ;;  %4887 = vmatpush.bf16.msra.mxu1 %v15115_v62  ;;  %v3774_v4 = vpop.f32.mrf.mxu2  ;;  %v3469_v39 = vpop.f32.mrf.mxu0  ;;  %v15121_v62 = vld [vmem:[%s20679_s4 + $0x618] sm:$0xff] }
 0x448   :  { %4052 = vst [vmem:[#allocation2 + $0xd1] sm:$0xff] %v17576_v43  ;;  %v4508_v26 = vpack.c.bf16 %v4497_v48, %v4067_v13  ;;  %v17581_v63 = vpack.c.bf16 %v17576_v43, %v17549_v55  ;;  %v15123_v13 = vld [vmem:[%s20679_s4 + $0x628] sm:$0xff]  ;;  %v15114_v2 = vld [vmem:[%s20679_s4 + $0x5e0] sm:$0xff]  ;;  %v3487_v5 = vadd.f32 %v3466_v31, %v3333_v32 }
 0x449   :  { %v3968_v24 = vmul.f32 %v17402_v38, %v3947_v40  ;;  %5041 = vmatpush.bf16.msra.mxu2 %v15123_v13  ;;  %v17611_v7 = vld [vmem:[#allocation2 + $0xc2] sm:$0xff]  ;;  %5194 = vmatpush.bf16.msra.mxu3 %v15132_v9  ;;  %v2872_v13 = vadd.f32 %v17288_v57, %v17235_v16  ;;  %v15120_v16 = vld [vmem:[%s20679_s4 + $0x610] sm:$0xff] }
 0x44a   :  { %4605 = vmatmul.bf16.gmra.mxu3 %v4508_v26  ;;  %4221 = vmatmul.bf16.gmra.mxu0 %v17581_v63  ;;  %v3641_v30 = vadd.f32 %v3620_v51, %v3487_v5  ;;  %v15130_v57 = vld [vmem:[%s20679_s4 + $0x660] sm:$0xff]  ;;  %v3623_v5 = vpop.f32.mrf.mxu1 }
 0x44b   :  { %v3989_v1 = vadd.f32 %v17408_v35, %v3968_v24  ;;  %4888 = vmatpush.bf16.msra.mxu1 %v15114_v2  ;;  %v15113_v24 = vld [vmem:[%s20679_s4 + $0x5d8] sm:$0xff]  ;;  %v3488_v2 = vadd.f32 %v3469_v39, %v17383_v3  ;;  %v15111_v3 = vld [vmem:[%s20679_s4 + $0x5c8] sm:$0xff] }
 0x44c   :  { %v15129_v39 = vld [vmem:[%s20679_s4 + $0x658] sm:$0xff] }
 0x44d   :  { %vm4005_vm12 = vcmp.gt.f32.partialorder %v3989_v1, 0.0  ;;  %v4021_v22 = vmul.f32 0.1, %v3989_v1  ;;  %5042 = vmatpush.bf16.msra.mxu2 %v15122_v36  ;;  %5195 = vmatpush.bf16.msra.mxu3 %v15131_v49 }
 0x44e   :  { %v3926_v29 = vpop.f32.mrf.mxu3 }
 0x44f   :  { %v17609_v58 = vsel %vm4005_vm12, %v3989_v1, %v4021_v22  ;;  %v3948_v19 = vadd.f32 %v3926_v29, %v3794_v61  ;;  %v4069_v8 = vld [vmem:[#allocation2 + $0xd0] sm:$0xff]  ;;  %4889 = vmatpush.bf16.msra.mxu1 %v15113_v24  ;;  %v3795_v61 = vadd.f32 %v3774_v4, %v3641_v30  ;;  %v3027_v29 = vadd.f32 %v17293_v12, %v2872_v13  ;;  %v3471_v13 = vpop.f32.mrf.mxu0 }
 0x450   :  { %v17613_v41 = vld [vmem:[#allocation2 + $0xd2] sm:$0xff]  ;;  %4053 = vst [vmem:[#allocation2 + $0xe1] sm:$0xff] %v17609_v58  ;;  %v17616_v40 = vpack.c.bf16 %v4069_v8, %v4497_v48  ;;  %v4663_v31 = vpack.c.bf16 %v17609_v58, %v17576_v43  ;;  %v15102_v48 = vld [vmem:[%s20679_s4 + $0x580] sm:$0xff]  ;;  %v3642_v24 = vadd.f32 %v3623_v5, %v3488_v2 }
 0x451   :  { %v4355_v26 = vpack.c.bf16 %v17613_v41, %v17611_v7  ;;  %v3969_v0 = vmul.f32 %v17402_v38, %v3948_v19  ;;  %4738 = vmatpush.bf16.msrb.mxu0 %v15102_v48  ;;  %v15112_v1 = vld [vmem:[%s20679_s4 + $0x5d0] sm:$0xff]  ;;  %5043 = vmatpush.bf16.msra.mxu2 %v15121_v62  ;;  %v3777_v19 = vpop.f32.mrf.mxu2  ;;  %v3181_v48 = vadd.f32 %v17295_v10, %v3027_v29  ;;  %v15134_v43 = vld [vmem:[%s20679_s4 + $0x680] sm:$0xff] }
 0x452   :  { %4318 = vmatmul.bf16.gmra.mxu1 %v17616_v40  ;;  %5196 = vmatpush.bf16.msra.mxu3 %v15130_v57  ;;  %v3796_v30 = vadd.f32 %v3777_v19, %v3642_v24 }
 0x453   :  { %4456 = vmatmul.bf16.gmra.mxu2 %v4355_v26  ;;  %v3990_v32 = vadd.f32 %v17408_v35, %v3969_v0  ;;  %4890 = vmatpush.bf16.msra.mxu1 %v15112_v1  ;;  %v3335_v10 = vadd.f32 %v17388_v23, %v3181_v48  ;;  %v15110_v1 = vld [vmem:[%s20679_s4 + $0x5c0] sm:$0xff]  ;;  %v15128_v23 = vld [vmem:[%s20679_s4 + $0x650] sm:$0xff]  ;;  %v3625_v48 = vpop.f32.mrf.mxu1 }
 0x455   :  { %vm4006_vm13 = vcmp.gt.f32.partialorder %v3990_v32, 0.0  ;;  %v4022_v22 = vmul.f32 0.1, %v3990_v32  ;;  %5044 = vmatpush.bf16.msra.mxu2 %v15120_v16 }
 0x456   :  { %v3928_v51 = vpop.f32.mrf.mxu3  ;;  %5197 = vmatpush.bf16.msra.mxu3 %v15129_v39 }
 0x457   :  { %v17650_v36 = vsel %vm4006_vm13, %v3990_v32, %v4022_v22  ;;  %v3949_v4 = vadd.f32 %v3928_v51, %v3795_v61  ;;  %v4499_v9 = vld [vmem:[#allocation2 + $0xe0] sm:$0xff]  ;;  %4891 = vmatpush.bf16.msra.mxu1 %v15111_v3  ;;  %v3489_v22 = vadd.f32 %v3471_v13, %v3335_v10  ;;  %v15127_v3 = vld [vmem:[%s20679_s4 + $0x648] sm:$0xff] }
 0x458   :  { %4054 = vst [vmem:[#allocation2 + $0xf1] sm:$0xff] %v17650_v36  ;;  %v4509_v26 = vpack.c.bf16 %v4499_v9, %v4069_v8  ;;  %v17655_v0 = vpack.c.bf16 %v17650_v36, %v17609_v58  ;;  %v15119_v8 = vld [vmem:[%s20679_s4 + $0x608] sm:$0xff]  ;;  %v15118_v61 = vld [vmem:[%s20679_s4 + $0x600] sm:$0xff] }
 0x459   :  { %v3970_v12 = vmul.f32 %v17402_v38, %v3949_v4  ;;  %5045 = vmatpush.bf16.msra.mxu2 %v15119_v8  ;;  %v17682_v29 = vld [vmem:[#allocation2 + $0xe2] sm:$0xff]  ;;  %v3643_v8 = vadd.f32 %v3625_v48, %v3489_v22 }
 0x45a   :  { %4610 = vmatmul.bf16.gmra.mxu3 %v4509_v26  ;;  %4226 = vmatmul.bf16.gmra.mxu0 %v17655_v0  ;;  %v15126_v13 = vld [vmem:[%s20679_s4 + $0x640] sm:$0xff] }
 0x45b   :  { %v3991_v62 = vadd.f32 %v17408_v35, %v3970_v12  ;;  %4892 = vmatpush.bf16.msra.mxu1 %v15110_v1  ;;  %5198 = vmatpush.bf16.msra.mxu3 %v15128_v23  ;;  %v3779_v12 = vpop.f32.mrf.mxu2 }
 0x45c   :  { %v3797_v10 = vadd.f32 %v3779_v12, %v3643_v8 }
 0x45d   :  { %vm4007_vm14 = vcmp.gt.f32.partialorder %v3991_v62, 0.0  ;;  %v4023_v32 = vmul.f32 0.1, %v3991_v62  ;;  %5046 = vmatpush.bf16.msra.mxu2 %v15118_v61 }
 0x45e   :  { %v3931_v49 = vpop.f32.mrf.mxu3 }
 0x45f   :  { %v17680_v16 = vsel %vm4007_vm14, %v3991_v62, %v4023_v32  ;;  %v3950_v57 = vadd.f32 %v3931_v49, %v3796_v30  ;;  %v4071_v51 = vld [vmem:[#allocation2 + $0xf0] sm:$0xff]  ;;  %5199 = vmatpush.bf16.msra.mxu3 %v15127_v3 }
 0x460   :  { %v17684_v2 = vld [vmem:[#allocation2 + $0xf2] sm:$0xff]  ;;  %4055 = vst [vmem:[#allocation2 + $0x101] sm:$0xff] %v17680_v16  ;;  %v17687_v4 = vpack.c.bf16 %v4071_v51, %v4499_v9  ;;  %v4664_v19 = vpack.c.bf16 %v17680_v16, %v17650_v36 }
 0x461   :  { %v4356_v5 = vpack.c.bf16 %v17684_v2, %v17682_v29  ;;  %v3971_v26 = vmul.f32 %v17402_v38, %v3950_v57  ;;  %v15141_v9 = vld [vmem:[%s20679_s4 + $0x6b8] sm:$0xff] }
 0x462   :  { %4323 = vmatmul.bf16.gmra.mxu1 %v17687_v4  ;;  %5347 = vmatpush.bf16.msra.mxu0 %v15141_v9  ;;  %v15140_v9 = vld [vmem:[%s20679_s4 + $0x6b0] sm:$0xff] }
 0x463   :  { %4461 = vmatmul.bf16.gmra.mxu2 %v4356_v5  ;;  %v3992_v39 = vadd.f32 %v17408_v35, %v3971_v26  ;;  %5200 = vmatpush.bf16.msra.mxu3 %v15126_v13 }
 0x465   :  { %vm4008_vm15 = vcmp.gt.f32.partialorder %v3992_v39, 0.0  ;;  %v4024_v24 = vmul.f32 0.1, %v3992_v39 }
 0x466   :  { %v3933_v62 = vpop.f32.mrf.mxu3  ;;  %5348 = vmatpush.bf16.msra.mxu0 %v15140_v9 }
 0x467   :  { %v17705_v30 = vsel %vm4008_vm15, %v3992_v39, %v4024_v24  ;;  %v3951_v32 = vadd.f32 %v3933_v62, %v3797_v10  ;;  %v4501_v49 = vld [vmem:[#allocation2 + $0x100] sm:$0xff]  ;;  %v20754_v10 = vpack.c.bf16 %v17423_v46, %v17413_v59  ;;  %v20755_v46 = vpack.c.bf16 %v17449_v11, %v17435_v21 }
 0x468   :  { %4056 = vst [vmem:[#allocation2 + $0x111] sm:$0xff] %v17705_v30  ;;  %v4510_v1 = vpack.c.bf16 %v4501_v49, %v4071_v51  ;;  %v17710_v61 = vpack.c.bf16 %v17705_v30, %v17680_v16  ;;  %v17717_v48 = vld [vmem:[#allocation2 + $0x102] sm:$0xff] }
 0x469   :  { %v3972_v23 = vmul.f32 %v17402_v38, %v3951_v32  ;;  %v4812_v32 = vpack.c.bf16 %v17451_v50, %v17425_v25 }
 0x46a   :  { %4615 = vmatmul.bf16.gmra.mxu3 %v4510_v1  ;;  %4231 = vmatmul.bf16.gmra.mxu0 %v17710_v61 }
 0x46b   :  { %v3993_v22 = vadd.f32 %v17408_v35, %v3972_v23 }
 0x46d   :  { %vm4009_vm1 = vcmp.gt.f32.partialorder %v3993_v22, 0.0  ;;  %v4025_v57 = vmul.f32 0.1, %v3993_v22 }
 0x46f   :  { %v17715_v5 = vsel %vm4009_vm1, %v3993_v22, %v4025_v57  ;;  %v4073_v26 = vld [vmem:[#allocation2 + $0x110] sm:$0xff] }
 0x470   :  { %v17719_v51 = vld [vmem:[#allocation2 + $0x112] sm:$0xff]  ;;  %4057 = vst [vmem:[#allocation2 + $0x121] sm:$0xff] %v17715_v5  ;;  %v17722_v12 = vpack.c.bf16 %v4073_v26, %v4501_v49  ;;  %v4665_v35 = vpack.c.bf16 %v17715_v5, %v17705_v30  ;;  %v15139_v49 = vld [vmem:[%s20679_s4 + $0x6a8] sm:$0xff] }
 0x471   :  { %v17726_v38 = vpack.c.bf16 %v17719_v51, %v17717_v48  ;;  %5349 = vmatpush.bf16.msra.mxu0 %v15139_v49 }
 0x472   :  { %4328 = vmatmul.bf16.gmra.mxu1 %v17722_v12 }
 0x473   :  { %4466 = vmatmul.bf16.gmra.mxu2 %v17726_v38 }
 0x477   :  { %v17735_v3 = vld [vmem:[#allocation2 + $0x120] sm:$0xff]  ;;  %v4197_v8 = vpop.f32.mrf.mxu0 }
 0x478   :  { %v4511_v39 = vpack.c.bf16 %v17735_v3, %v4073_v26 }
 0x47a   :  { %4620 = vmatmul.bf16.gmra.mxu3 %v4511_v39  ;;  %4739 = vmatmul.bf16.vlgmr.msrb.gmra.mxu0 %v20754_v10  ;;  %v4813_v10 = vpack.c.bf16 %v17482_v18, %v17453_v60  ;;  %v20756_v60 = vpack.c.bf16 %v17480_v14, %v17466_v20 }
 0x47f   :  { %v4294_v24 = vpop.f32.mrf.mxu1  ;;  %v4199_v62 = vpop.f32.mrf.mxu0 }
 0x480   :  { %v4295_v13 = vadd.f32 %v4294_v24, %v4197_v8 }
 0x482   :  { %4893 = vmatmul.bf16.vlgmr.msra.gmra.mxu1 %v4812_v32 }
 0x483   :  { %5047 = vmatmul.bf16.vlgmr.msra.gmra.mxu2 %v17456_v42 }
 0x486   :  { %v4432_v1 = vpop.f32.mrf.mxu2 }
 0x487   :  { %v4472_v23 = vadd.f32 %v4432_v1, %v4295_v13  ;;  %v4296_v22 = vpop.f32.mrf.mxu1  ;;  %v4202_v57 = vpop.f32.mrf.mxu0 }
 0x488   :  { %v4297_v59 = vadd.f32 %v4296_v22, %v4199_v62 }
 0x48a   :  { %5201 = vmatmul.bf16.vlgmr.msra.gmra.mxu3 %v17440_v56  ;;  %4744 = vmatmul.bf16.gmra.mxu0 %v20755_v46  ;;  %v15138_v56 = vld [vmem:[%s20679_s4 + $0x6a0] sm:$0xff]  ;;  %v4814_v46 = vpack.c.bf16 %v17517_v53, %v17484_v6 }
 0x48b   :  { %5350 = vmatpush.bf16.msra.mxu0 %v15138_v56 }
 0x48d   :  { %v4586_v50 = vpop.f32.mrf.mxu3 }
 0x48e   :  { %v4434_v25 = vpop.f32.mrf.mxu2  ;;  %v17751_v42 = vadd.f32 %v4586_v50, %v4472_v23 }
 0x48f   :  { %v4473_v26 = vadd.f32 %v4434_v25, %v4297_v59  ;;  %v4299_v9 = vpop.f32.mrf.mxu1  ;;  %v4204_v8 = vpop.f32.mrf.mxu0 }
 0x490   :  { %v4300_v39 = vadd.f32 %v4299_v9, %v4202_v57 }
 0x492   :  { %4898 = vmatmul.bf16.gmra.mxu1 %v4813_v10 }
 0x493   :  { %5052 = vmatmul.bf16.gmra.mxu2 %v17487_v33 }
 0x495   :  { %v4588_v11 = vpop.f32.mrf.mxu3 }
 0x496   :  { %v4437_v21 = vpop.f32.mrf.mxu2  ;;  %v17759_v62 = vadd.f32 %v4588_v11, %v4473_v26 }
 0x497   :  { %v4474_v24 = vadd.f32 %v4437_v21, %v4300_v39  ;;  %v4301_v13 = vpop.f32.mrf.mxu1  ;;  %v4207_v32 = vpop.f32.mrf.mxu0 }
 0x498   :  { %v4302_v49 = vadd.f32 %v4301_v13, %v4204_v8  ;;  %v17785_v13 = vld [vmem:[#allocation2] sm:$0xff] }
 0x49a   :  { %5206 = vmatmul.bf16.gmra.mxu3 %v17471_v34  ;;  %4749 = vmatmul.bf16.gmra.mxu0 %v20756_v60  ;;  %v15137_v34 = vld [vmem:[%s20679_s4 + $0x698] sm:$0xff] }
 0x49b   :  { %5351 = vmatpush.bf16.msra.mxu0 %v15137_v34 }
 0x49d   :  { %v4591_v33 = vpop.f32.mrf.mxu3 }
 0x49e   :  { %v4439_v18 = vpop.f32.mrf.mxu2  ;;  %v17765_v23 = vadd.f32 %v4591_v33, %v4474_v24 }
 0x49f   :  { %v4475_v1 = vadd.f32 %v4439_v18, %v4302_v49  ;;  %v4304_v22 = vpop.f32.mrf.mxu1  ;;  %v4209_v57 = vpop.f32.mrf.mxu0  ;;  %5352 = vmatpush.bf16.msra.mxu0 %v15136_v17  ;;  %v5111_v49 = vld [vmem:[#allocation2 + $0x91] sm:$0xff] }
 0x4a0   :  { %v4305_v59 = vadd.f32 %v4304_v22, %v4207_v32  ;;  %v5123_v22 = vpack.c.bf16 %v5111_v49, %v17515_v47  ;;  %v15135_v47 = vld [vmem:[%s20679_s4 + $0x688] sm:$0xff] }
 0x4a2   :  { %4903 = vmatmul.bf16.gmra.mxu1 %v4814_v46 }
 0x4a3   :  { %5057 = vmatmul.bf16.gmra.mxu2 %v17522_v37  ;;  %v17779_v37 = vld [vmem:[#allocation2 + $0x82] sm:$0xff]  ;;  %5353 = vmatpush.bf16.msra.mxu0 %v15135_v47 }
 0x4a4   :  { %v4815_v24 = vpack.c.bf16 %v17779_v37, %v17519_v44 }
 0x4a5   :  { %v4593_v14 = vpop.f32.mrf.mxu3 }
 0x4a6   :  { %v4442_v20 = vpop.f32.mrf.mxu2  ;;  %v17773_v50 = vadd.f32 %v4593_v14, %v4475_v1 }
 0x4a7   :  { %v4476_v25 = vadd.f32 %v4442_v20, %v4305_v59  ;;  %v4306_v26 = vpop.f32.mrf.mxu1  ;;  %v4212_v9 = vpop.f32.mrf.mxu0  ;;  %5354 = vmatpush.bf16.msra.mxu0 %v15134_v43 }
 0x4a8   :  { %v4307_v8 = vadd.f32 %v4306_v26, %v4209_v57 }
 0x4aa   :  { %5211 = vmatmul.bf16.gmra.mxu3 %v17505_v45  ;;  %4754 = vmatmul.bf16.gmra.mxu0 %v4661_v54  ;;  %v4969_v45 = vpack.c.bf16 %v17785_v13, %v17537_v52 }
 0x4ad   :  { %v4596_v53 = vpop.f32.mrf.mxu3 }
 0x4ae   :  { %v4444_v6 = vpop.f32.mrf.mxu2  ;;  %v17781_v10 = vadd.f32 %v4596_v53, %v4476_v25  ;;  %v4816_v25 = vpack.c.bf16 %v17611_v7, %v17551_v28 }
 0x4af   :  { %v4477_v39 = vadd.f32 %v4444_v6, %v4307_v8  ;;  %v4309_v56 = vpop.f32.mrf.mxu1  ;;  %v4214_v21 = vpop.f32.mrf.mxu0 }
 0x4b0   :  { %v4310_v11 = vadd.f32 %v4309_v56, %v4212_v9  ;;  %v4817_v56 = vpack.c.bf16 %v17682_v29, %v17613_v41 }
 0x4b2   :  { %4908 = vmatmul.bf16.gmra.mxu1 %v4815_v24 }
 0x4b3   :  { %5062 = vmatmul.bf16.gmra.mxu2 %v4969_v45 }
 0x4b5   :  { %v4598_v32 = vpop.f32.mrf.mxu3 }
 0x4b6   :  { %v4447_v54 = vpop.f32.mrf.mxu2  ;;  %v17792_v18 = vadd.f32 %v4598_v32, %v4477_v39 }
 0x4b7   :  { %v4478_v60 = vadd.f32 %v4447_v54, %v4310_v11  ;;  %v4311_v33 = vpop.f32.mrf.mxu1  ;;  %v4217_v44 = vpop.f32.mrf.mxu0  ;;  %v4818_v54 = vpack.c.bf16 %v17717_v48, %v17684_v2  ;;  %v17855_v2 = vld [vmem:[#allocation2 + $0x122] sm:$0xff] }
 0x4b8   :  { %v4312_v1 = vadd.f32 %v4311_v33, %v4214_v21 }
 0x4ba   :  { %5216 = vmatmul.bf16.gmra.mxu3 %v5123_v22  ;;  %4759 = vmatmul.bf16.gmra.mxu0 %v4662_v15  ;;  %v5119_v22 = vld [vmem:[#allocation2 + $0x131] sm:$0xff] }
 0x4bd   :  { %v4601_v57 = vpop.f32.mrf.mxu3 }
 0x4be   :  { %v4449_v52 = vpop.f32.mrf.mxu2  ;;  %v17798_v46 = vadd.f32 %v4601_v57, %v4478_v60 }
 0x4bf   :  { %v4479_v59 = vadd.f32 %v4449_v52, %v4312_v1  ;;  %v4314_v34 = vpop.f32.mrf.mxu1  ;;  %v17800_v20 = vpop.f32.mrf.mxu0  ;;  %v4819_v1 = vpack.c.bf16 %v17855_v2, %v17719_v51  ;;  %v5259_v52 = vld [vmem:[#allocation2 + $0x32] sm:$0xff] }
 0x4c0   :  { %v4315_v14 = vadd.f32 %v4314_v34, %v4217_v44 }
 0x4c2   :  { %4913 = vmatmul.bf16.gmra.mxu1 %v4816_v25  ;;  %v5127_v25 = vpack.c.bf16 %v5119_v22, %v17715_v5 }
 0x4c3   :  { %5067 = vmatmul.bf16.gmra.mxu2 %v17616_v40 }
 0x4c5   :  { %v4603_v55 = vpop.f32.mrf.mxu3 }
 0x4c6   :  { %v4452_v27 = vpop.f32.mrf.mxu2  ;;  %v17808_v26 = vadd.f32 %v4603_v55, %v4479_v59  ;;  %v15157_v59 = vld [vmem:[%s20679_s4 + $0x738] sm:$0xff] }
 0x4c7   :  { %v4480_v15 = vadd.f32 %v4452_v27, %v4315_v14  ;;  %v17810_v9 = vpop.f32.mrf.mxu1  ;;  %v4222_v8 = vpop.f32.mrf.mxu0  ;;  %v5258_v14 = vld [vmem:[#allocation2 + $0x22] sm:$0xff]  ;;  %5664 = vmatpush.bf16.msrb.mxu1 %v15157_v59 }
 0x4ca   :  { %5221 = vmatmul.bf16.gmra.mxu3 %v17581_v63  ;;  %4764 = vmatmul.bf16.gmra.mxu0 %v4663_v31 }
 0x4cd   :  { %v4606_v7 = vpop.f32.mrf.mxu3 }
 0x4ce   :  { %v17816_v28 = vpop.f32.mrf.mxu2  ;;  %v17818_v40 = vadd.f32 %v4606_v7, %v4480_v15  ;;  %v15156_v7 = vld [vmem:[%s20679_s4 + $0x730] sm:$0xff] }
 0x4cf   :  { %v4319_v6 = vpop.f32.mrf.mxu1  ;;  %v17820_v53 = vpop.f32.mrf.mxu0  ;;  %5665 = vmatpush.bf16.msrb.mxu1 %v15156_v7 }
 0x4d0   :  { %v4320_v39 = vadd.f32 %v4319_v6, %v4222_v8  ;;  %v5261_v8 = vld [vmem:[#allocation2 + $0x52] sm:$0xff]  ;;  %v5260_v6 = vld [vmem:[#allocation2 + $0x42] sm:$0xff] }
 0x4d2   :  { %4918 = vmatmul.bf16.gmra.mxu1 %v4817_v56 }
 0x4d3   :  { %5072 = vmatmul.bf16.gmra.mxu2 %v17687_v4 }
 0x4d5   :  { %v17828_v58 = vpop.f32.mrf.mxu3 }
 0x4d6   :  { %v4457_v63 = vpop.f32.mrf.mxu2 }
 0x4d7   :  { %v4482_v31 = vadd.f32 %v4457_v63, %v4320_v39  ;;  %v17830_v21 = vpop.f32.mrf.mxu1  ;;  %v4227_v11 = vpop.f32.mrf.mxu0  ;;  %v5275_v39 = vpack.c.bf16 %v5261_v8, %v5260_v6  ;;  %v5263_v63 = vld [vmem:[#allocation2 + $0x72] sm:$0xff]  ;;  %v15147_v6 = vld [vmem:[%s20679_s4 + $0x6e8] sm:$0xff] }
 0x4d8   :  { %v15164_v8 = vld [vmem:[%s20679_s4 + $0x770] sm:$0xff] }
 0x4da   :  { %5226 = vmatmul.bf16.gmra.mxu3 %v17655_v0  ;;  %4769 = vmatmul.bf16.gmra.mxu0 %v4664_v19 }
 0x4dd   :  { %v4611_v29 = vpop.f32.mrf.mxu3 }
 0x4de   :  { %v17836_v41 = vpop.f32.mrf.mxu2  ;;  %v17838_v4 = vadd.f32 %v4611_v29, %v4482_v31 }
 0x4df   :  { %v4324_v24 = vpop.f32.mrf.mxu1  ;;  %v17840_v45 = vpop.f32.mrf.mxu0 }
 0x4e0   :  { %v4325_v17 = vadd.f32 %v4324_v24, %v4227_v11  ;;  %v5262_v11 = vld [vmem:[#allocation2 + $0x62] sm:$0xff] }
 0x4e1   :  { %v5276_v24 = vpack.c.bf16 %v5263_v63, %v5262_v11  ;;  %v15151_v63 = vld [vmem:[%s20679_s4 + $0x708] sm:$0xff]  ;;  %v15146_v11 = vld [vmem:[%s20679_s4 + $0x6e0] sm:$0xff] }
 0x4e2   :  { %4923 = vmatmul.bf16.gmra.mxu1 %v4818_v54  ;;  %v5265_v54 = vld [vmem:[#allocation2 + $0x92] sm:$0xff] }
 0x4e3   :  { %5077 = vmatmul.bf16.gmra.mxu2 %v17722_v12 }
 0x4e5   :  { %v17845_v32 = vpop.f32.mrf.mxu3 }
 0x4e6   :  { %v4462_v0 = vpop.f32.mrf.mxu2 }
 0x4e7   :  { %v4484_v36 = vadd.f32 %v4462_v0, %v4325_v17  ;;  %v17847_v16 = vpop.f32.mrf.mxu1  ;;  %v4232_v19 = vpop.f32.mrf.mxu0 }
 0x4ea   :  { %5231 = vmatmul.bf16.gmra.mxu3 %v17710_v61  ;;  %4774 = vmatmul.bf16.gmra.mxu0 %v4665_v35  ;;  %v4973_v61 = vpack.c.bf16 %v17785_v13, %v17735_v3  ;;  %v5274_v3 = vpack.c.bf16 %v5259_v52, %v5258_v14 }
 0x4ed   :  { %v4616_v60 = vpop.f32.mrf.mxu3 }
 0x4ee   :  { %v17853_v49 = vpop.f32.mrf.mxu2  ;;  %v17857_v48 = vadd.f32 %v4616_v60, %v4484_v36 }
 0x4ef   :  { %v4329_v12 = vpop.f32.mrf.mxu1  ;;  %v17859_v33 = vpop.f32.mrf.mxu0 }
 0x4f0   :  { %v4330_v44 = vadd.f32 %v4329_v12, %v4232_v19  ;;  %v5277_v19 = vpack.c.bf16 %v5265_v54, %v17779_v37  ;;  %v5267_v12 = vld [vmem:[#allocation2 + $0xd2] sm:$0xff] }
 0x4f2   :  { %4928 = vmatmul.bf16.gmra.mxu1 %v4819_v1  ;;  %v5266_v1 = vld [vmem:[#allocation2 + $0xc2] sm:$0xff] }
 0x4f3   :  { %5082 = vmatmul.bf16.gmra.mxu2 %v4973_v61 }
 0x4f5   :  { %v17865_v35 = vpop.f32.mrf.mxu3 }
 0x4f6   :  { %v4467_v30 = vpop.f32.mrf.mxu2 }
 0x4f7   :  { %v4486_v57 = vadd.f32 %v4467_v30, %v4330_v44  ;;  %v4740_v34 = vpop.f32.mrf.mxu0  ;;  %v5269_v30 = vld [vmem:[#allocation2 + $0xf2] sm:$0xff]  ;;  %v17918_v22 = vpop.f32.mrf.mxu1 }
 0x4f8   :  { %v17872_v51 = vadd.f32 %v4740_v34, %v17751_v42 }
 0x4fa   :  { %5236 = vmatmul.bf16.gmra.mxu3 %v5127_v25  ;;  %5355 = vmatmul.bf16.vlgmr.msra.gmra.mxu0 %v5274_v3  ;;  %v15149_v25 = vld [vmem:[%s20679_s4 + $0x6f8] sm:$0xff] }
 0x4fb   :  { %v15165_v3 = vld [vmem:[%s20679_s4 + $0x778] sm:$0xff]  ;;  %5761 = vmatpush.bf16.msrb.mxu2 %v15149_v25 }
 0x4fc   :  { %5899 = vmatpush.bf16.msrb.mxu3 %v15165_v3 }
 0x4fd   :  { %v4621_v47 = vpop.f32.mrf.mxu3 }
 0x4fe   :  { %v17874_v27 = vadd.f32 %v4621_v47, %v4486_v57  ;;  %v5268_v57 = vld [vmem:[#allocation2 + $0xe2] sm:$0xff] }
 0x4ff   :  { %v4742_v55 = vpop.f32.mrf.mxu0  ;;  %v5279_v34 = vpack.c.bf16 %v5269_v30, %v5268_v57  ;;  %v15169_v57 = vld [vmem:[%s20679_s4 + $0x798] sm:$0xff] }
 0x500   :  { %v17877_v15 = vadd.f32 %v4742_v55, %v17759_v62  ;;  %v15155_v62 = vld [vmem:[%s20679_s4 + $0x728] sm:$0xff]  ;;  %v15148_v55 = vld [vmem:[%s20679_s4 + $0x6f0] sm:$0xff]  ;;  %5900 = vmatpush.bf16.msrb.mxu3 %v15164_v8 }
 0x501   :  { %5666 = vmatpush.bf16.msrb.mxu1 %v15155_v62  ;;  %5762 = vmatpush.bf16.msrb.mxu2 %v15148_v55 }
 0x505   :  { %v17925_v14 = vpop.f32.mrf.mxu3  ;;  %5763 = vmatpush.bf16.msrb.mxu2 %v15147_v6  ;;  %v15142_v6 = vld [vmem:[%s20679_s4 + $0x6c0] sm:$0xff] }
 0x507   :  { %v4745_v5 = vpop.f32.mrf.mxu0 }
 0x508   :  { %v17883_v42 = vadd.f32 %v4745_v5, %v17765_v23 }
 0x509   :  { %5764 = vmatpush.bf16.msrb.mxu2 %v15146_v11  ;;  %v15166_v11 = vld [vmem:[%s20679_s4 + $0x780] sm:$0xff] }
 0x50a   :  { %5360 = vmatmul.bf16.gmra.mxu0 %v5275_v39  ;;  %v15163_v39 = vld [vmem:[%s20679_s4 + $0x768] sm:$0xff] }
 0x50b   :  { %5901 = vmatpush.bf16.msrb.mxu3 %v15163_v39  ;;  %v15158_v39 = vld [vmem:[%s20679_s4 + $0x740] sm:$0xff] }
 0x50d   :  { %v17945_v5 = vpop.f32.mrf.mxu3 }
 0x50f   :  { %v4747_v56 = vpop.f32.mrf.mxu0 }
 0x510   :  { %v17886_v43 = vadd.f32 %v4747_v56, %v17773_v50  ;;  %v15154_v50 = vld [vmem:[%s20679_s4 + $0x720] sm:$0xff]  ;;  %v15173_v56 = vld [vmem:[%s20679_s4 + $0x7b8] sm:$0xff] }
 0x511   :  { %5667 = vmatpush.bf16.msrb.mxu1 %v15154_v50  ;;  %6053 = vmatpush.bf16.msrb.mxu0 %v15173_v56  ;;  %v15145_v50 = vld [vmem:[%s20679_s4 + $0x6d8] sm:$0xff]  ;;  %v15168_v56 = vld [vmem:[%s20679_s4 + $0x790] sm:$0xff] }
 0x512   :  { %5765 = vmatpush.bf16.msrb.mxu2 %v15145_v50  ;;  %v15181_v50 = vld [vmem:[%s20679_s4 + $0x7f8] sm:$0xff] }
 0x517   :  { %v4750_v31 = vpop.f32.mrf.mxu0 }
 0x518   :  { %v17892_v29 = vadd.f32 %v4750_v31, %v17781_v10 }
 0x51a   :  { %5365 = vmatmul.bf16.gmra.mxu0 %v5276_v24  ;;  %v15162_v24 = vld [vmem:[%s20679_s4 + $0x760] sm:$0xff] }
 0x51b   :  { %5902 = vmatpush.bf16.msrb.mxu3 %v15162_v24 }
 0x51f   :  { %v4752_v23 = vpop.f32.mrf.mxu0 }
 0x520   :  { %v17895_v17 = vadd.f32 %v4752_v23, %v17792_v18  ;;  %v15153_v18 = vld [vmem:[%s20679_s4 + $0x718] sm:$0xff]  ;;  %v15172_v23 = vld [vmem:[%s20679_s4 + $0x7b0] sm:$0xff] }
 0x521   :  { %5668 = vmatpush.bf16.msrb.mxu1 %v15153_v18  ;;  %6054 = vmatpush.bf16.msrb.mxu0 %v15172_v23  ;;  %v15144_v18 = vld [vmem:[%s20679_s4 + $0x6d0] sm:$0xff] }
 0x522   :  { %5766 = vmatpush.bf16.msrb.mxu2 %v15144_v18 }
 0x527   :  { %v4755_v0 = vpop.f32.mrf.mxu0 }
 0x528   :  { %v17901_v36 = vadd.f32 %v4755_v0, %v17798_v46  ;;  %v5278_v46 = vpack.c.bf16 %v5267_v12, %v5266_v1  ;;  %v15161_v0 = vld [vmem:[%s20679_s4 + $0x758] sm:$0xff]  ;;  %v15170_v1 = vld [vmem:[%s20679_s4 + $0x7a0] sm:$0xff] }
 0x529   :  { %5903 = vmatpush.bf16.msrb.mxu3 %v15161_v0 }
 0x52a   :  { %5370 = vmatmul.bf16.gmra.mxu0 %v5277_v19  ;;  %v15171_v19 = vld [vmem:[%s20679_s4 + $0x7a8] sm:$0xff] }
 0x52b   :  { %6055 = vmatpush.bf16.msrb.mxu0 %v15171_v19 }
 0x52f   :  { %v4757_v10 = vpop.f32.mrf.mxu0  ;;  %6056 = vmatpush.bf16.msrb.mxu0 %v15170_v1 }
 0x530   :  { %v17905_v60 = vadd.f32 %v4757_v10, %v17808_v26  ;;  %v15152_v26 = vld [vmem:[%s20679_s4 + $0x710] sm:$0xff]  ;;  %v5204_v10 = vpop.f32.mrf.mxu3 }
 0x531   :  { %5669 = vmatpush.bf16.msrb.mxu1 %v15152_v26  ;;  %v15143_v26 = vld [vmem:[%s20679_s4 + $0x6c8] sm:$0xff] }
 0x532   :  { %5767 = vmatpush.bf16.msrb.mxu2 %v15143_v26 }
 0x533   :  { %6057 = vmatpush.bf16.msrb.mxu0 %v15169_v57 }
 0x535   :  { %5670 = vmatpush.bf16.msrb.mxu1 %v15151_v63 }
 0x536   :  { %5768 = vmatpush.bf16.msrb.mxu2 %v15142_v6 }
 0x537   :  { %v4760_v44 = vpop.f32.mrf.mxu0  ;;  %6058 = vmatpush.bf16.msrb.mxu0 %v15168_v56 }
 0x538   :  { %v17911_v61 = vadd.f32 %v4760_v44, %v17818_v40  ;;  %v17923_v40 = vpop.f32.mrf.mxu2  ;;  %v15160_v44 = vld [vmem:[%s20679_s4 + $0x750] sm:$0xff]  ;;  %v5207_v8 = vpop.f32.mrf.mxu3 }
 0x539   :  { %5904 = vmatpush.bf16.msrb.mxu3 %v15160_v44  ;;  %v18035_v44 = vld [vmem:[%s20680_s5 + $0x6] ss:$0 sm:$0xff] }
 0x53a   :  { %5375 = vmatmul.bf16.gmra.mxu0 %v5278_v46  ;;  %v5273_v46 = vld [vmem:[#allocation2 + $0x132] sm:$0xff] }
 0x53b   :  { %v5281_v55 = vpack.c.bf16 %v5273_v46, %v17855_v2  ;;  %v15167_v2 = vld [vmem:[%s20679_s4 + $0x788] sm:$0xff] }
 0x53c   :  { %6059 = vmatpush.bf16.msrb.mxu0 %v15167_v2 }
 0x53f   :  { %v17913_v37 = vpop.f32.mrf.mxu0 }
 0x540   :  { %v17943_v7 = vpop.f32.mrf.mxu2  ;;  %v5209_v23 = vpop.f32.mrf.mxu3  ;;  %6060 = vmatpush.bf16.msrb.mxu0 %v15166_v11  ;;  %v20759_v11 = vld [vmem:[#allocation7_spill] sm:$0xff] }
 0x547   :  { %v4765_v52 = vpop.f32.mrf.mxu0 }
 0x548   :  { %v17921_v59 = vadd.f32 %v4765_v52, %v17838_v4  ;;  %v17935_v4 = vpop.f32.mrf.mxu1  ;;  %v15159_v52 = vld [vmem:[%s20679_s4 + $0x748] sm:$0xff]  ;;  %v5212_v57 = vpop.f32.mrf.mxu3 }
 0x549   :  { %5905 = vmatpush.bf16.msrb.mxu3 %v15159_v52  ;;  %v4934_v24 = vadd.f32 %v17935_v4, %v17872_v51  ;;  %v20757_v4 = vld [vmem:[#allocation6_spill] sm:$0xff] }
 0x54a   :  { %5380 = vmatmul.bf16.gmra.mxu0 %v5279_v34 }
 0x54b   :  { %v5088_v0 = vadd.f32 %v17943_v7, %v4934_v24  ;;  %v18044_v7 = vld [vmem:[%s20680_s5 + $0x7] ss:$0 sm:$0xff] }
 0x54d   :  { %5906 = vmatpush.bf16.msrb.mxu3 %v15158_v39  ;;  %v5242_v19 = vadd.f32 %v17945_v5, %v5088_v0  ;;  %v5575_v39 = vld [vmem:[#allocation2 + $0x1] sm:$0xff] }
 0x54f   :  { %v17933_v47 = vpop.f32.mrf.mxu0 }
 0x550   :  { %v4896_v54 = vpop.f32.mrf.mxu1 }
 0x551   :  { %v4935_v51 = vadd.f32 %v4896_v54, %v17877_v15 }
 0x557   :  { %v4770_v62 = vpop.f32.mrf.mxu0 }
 0x558   :  { %v17960_v31 = vadd.f32 %v4770_v62, %v17857_v48  ;;  %v5050_v48 = vpop.f32.mrf.mxu2  ;;  %v4899_v30 = vpop.f32.mrf.mxu1 }
 0x559   :  { %v5089_v5 = vadd.f32 %v5050_v48, %v4935_v51  ;;  %v4936_v56 = vadd.f32 %v4899_v30, %v17883_v42 }
 0x55a   :  { %5385 = vmatmul.bf16.gmra.mxu0 %v17726_v38  ;;  %v15150_v38 = vld [vmem:[%s20679_s4 + $0x700] sm:$0xff] }
 0x55b   :  { %5671 = vmatpush.bf16.msrb.mxu1 %v15150_v38 }
 0x55f   :  { %v17981_v12 = vpop.f32.mrf.mxu0  ;;  %6207 = vmatpush.bf16.msra.mxu1 %v15181_v50 }
 0x560   :  { %v5053_v34 = vpop.f32.mrf.mxu2 }
 0x561   :  { %v5090_v0 = vadd.f32 %v5053_v34, %v4936_v56 }
 0x563   :  { %v5244_v42 = vadd.f32 %v5207_v8, %v5090_v0 }
 0x567   :  { %v4775_v25 = vpop.f32.mrf.mxu0 }
 0x568   :  { %v18005_v3 = vadd.f32 %v4775_v25, %v17874_v27  ;;  %v4901_v27 = vpop.f32.mrf.mxu1  ;;  %v5055_v62 = vpop.f32.mrf.mxu2  ;;  %v5243_v25 = vadd.f32 %v5204_v10, %v5089_v5  ;;  %v15180_v10 = vld [vmem:[%s20679_s4 + $0x7f0] sm:$0xff] }
 0x569   :  { %6208 = vmatpush.bf16.msra.mxu1 %v15180_v10 }
 0x56a   :  { %5390 = vmatmul.bf16.gmra.mxu0 %v5281_v55 }
 0x56f   :  { %v18020_v63 = vpop.f32.mrf.mxu0 }
 0x570   :  { %v4904_v1 = vpop.f32.mrf.mxu1  ;;  %v5058_v26 = vpop.f32.mrf.mxu2 }
 0x577   :  { %v5356_v38 = vpop.f32.mrf.mxu0 }
 0x578   :  { %v5396_v18 = vadd.f32 %v5356_v38, %v5242_v19  ;;  %v4906_v48 = vpop.f32.mrf.mxu1  ;;  %v18062_v38 = vpop.f32.mrf.mxu2 }
 0x57a   :  { %v18039_v46 = vadd.f32 %v5396_v18, %v20757_v4  ;;  %v18065_v18 = vpop.f32.mrf.mxu3 }
 0x57c   :  { %20758 = vst [vmem:[#allocation6_spill] sm:$0xff] %v18039_v46  ;;  %v5433_v52 = vmul.f32 %v18035_v44, %v18039_v46 }
 0x57e   :  { %v5454_v55 = vadd.f32 %v18044_v7, %v5433_v52  ;;  %v5810_v52 = vld [vmem:[#allocation2 + $0x2] sm:$0xff] }
 0x57f   :  { %v5358_v6 = vpop.f32.mrf.mxu0 }
 0x580   :  { %vm5470_vm0 = vcmp.gt.f32.partialorder %v5454_v55, 0.0  ;;  %v5486_v15 = vmul.f32 0.1, %v5454_v55  ;;  %v5397_v54 = vadd.f32 %v5358_v6, %v5243_v25  ;;  %v4937_v25 = vadd.f32 %v4901_v27, %v17886_v43  ;;  %v4909_v27 = vpop.f32.mrf.mxu1  ;;  %v5063_v0 = vpop.f32.mrf.mxu2 }
 0x581   :  { %v4940_v56 = vadd.f32 %v4909_v27, %v17901_v36 }
 0x582   :  { %v18050_v2 = vsel %vm5470_vm0, %v5454_v55, %v5486_v15  ;;  %v18053_v24 = vadd.f32 %v5397_v54, %v20759_v11  ;;  %v20761_v55 = vld [vmem:[#allocation8_spill] sm:$0xff]  ;;  %v5091_v11 = vadd.f32 %v5055_v62, %v4937_v25  ;;  %v20763_v62 = vld [vmem:[#allocation9_spill] sm:$0xff] }
 0x583   :  { %5518 = vst [vmem:[#allocation2 + $0x11] sm:$0xff] %v18050_v2  ;;  %v5591_v50 = vpack.c.bf16 %v18050_v2, %v5575_v39 }
 0x584   :  { %20760 = vst [vmem:[#allocation7_spill] sm:$0xff] %v18053_v24  ;;  %v5434_v19 = vmul.f32 %v18035_v44, %v18053_v24  ;;  %v4317_v24 = vadd.f32 %v17810_v9, %v17800_v20 }
 0x585   :  { %5672 = vmatmul.bf16.vlgmr.msrb.gmra.mxu1 %v5591_v50  ;;  %v5245_v50 = vadd.f32 %v5209_v23, %v5091_v11 }
 0x586   :  { %v5455_v30 = vadd.f32 %v18044_v7, %v5434_v19  ;;  %v4481_v20 = vadd.f32 %v17816_v28, %v4317_v24 }
 0x587   :  { %v5361_v51 = vpop.f32.mrf.mxu0 }
 0x588   :  { %vm5471_vm2 = vcmp.gt.f32.partialorder %v5455_v30, 0.0  ;;  %v5487_v4 = vmul.f32 0.1, %v5455_v30  ;;  %v5398_v5 = vadd.f32 %v5361_v51, %v5244_v42  ;;  %v5217_v51 = vpop.f32.mrf.mxu3 }
 0x58a   :  { %v18068_v34 = vsel %vm5471_vm2, %v5455_v30, %v5487_v4  ;;  %v18071_v6 = vadd.f32 %v5398_v5, %v20761_v55  ;;  %v5535_v15 = vld [vmem:[#allocation2 + $0x10] sm:$0xff]  ;;  %v4938_v4 = vadd.f32 %v4904_v1, %v17892_v29 }
 0x58b   :  { %v18073_v54 = vld [vmem:[#allocation2 + $0x12] sm:$0xff]  ;;  %5519 = vst [vmem:[#allocation2 + $0x21] sm:$0xff] %v18068_v34  ;;  %v5550_v8 = vpack.c.bf16 %v5535_v15, %v17785_v13 }
 0x58c   :  { %20762 = vst [vmem:[#allocation8_spill] sm:$0xff] %v18071_v6  ;;  %v5826_v39 = vpack.c.bf16 %v18073_v54, %v5810_v52  ;;  %v5435_v43 = vmul.f32 %v18035_v44, %v18071_v6 }
 0x58d   :  { %5769 = vmatmul.bf16.vlgmr.msrb.gmra.mxu2 %v5550_v8  ;;  %v15179_v8 = vld [vmem:[%s20679_s4 + $0x7e8] sm:$0xff] }
 0x58e   :  { %5907 = vmatmul.bf16.vlgmr.msrb.gmra.mxu3 %v5826_v39  ;;  %v5456_v10 = vadd.f32 %v18044_v7, %v5435_v43  ;;  %v5092_v39 = vadd.f32 %v5058_v26, %v4938_v4  ;;  %6209 = vmatpush.bf16.msra.mxu1 %v15179_v8  ;;  %v20765_v26 = vld [vmem:[#allocation10_spill] sm:$0xff] }
 0x58f   :  { %v5363_v19 = vpop.f32.mrf.mxu0 }
 0x590   :  { %vm5472_vm3 = vcmp.gt.f32.partialorder %v5456_v10, 0.0  ;;  %v5488_v42 = vmul.f32 0.1, %v5456_v10  ;;  %v5399_v30 = vadd.f32 %v5363_v19, %v5245_v50  ;;  %v5246_v1 = vadd.f32 %v5212_v57, %v5092_v39  ;;  %v5065_v19 = vpop.f32.mrf.mxu2  ;;  %v5219_v39 = vpop.f32.mrf.mxu3 }
 0x592   :  { %v18084_v5 = vsel %vm5472_vm3, %v5456_v10, %v5488_v42  ;;  %v18087_v52 = vadd.f32 %v5399_v30, %v20763_v62  ;;  %v5965_v25 = vld [vmem:[#allocation2 + $0x20] sm:$0xff]  ;;  %v4939_v42 = vadd.f32 %v4906_v48, %v17895_v17 }
 0x593   :  { %5520 = vst [vmem:[#allocation2 + $0x31] sm:$0xff] %v18084_v5  ;;  %v5980_v55 = vpack.c.bf16 %v5965_v25, %v5535_v15  ;;  %v18092_v23 = vpack.c.bf16 %v18084_v5, %v18068_v34  ;;  %v4911_v15 = vpop.f32.mrf.mxu1 }
 0x594   :  { %20764 = vst [vmem:[#allocation9_spill] sm:$0xff] %v18087_v52  ;;  %v5436_v29 = vmul.f32 %v18035_v44, %v18087_v52  ;;  %v5093_v48 = vadd.f32 %v18062_v38, %v4939_v42  ;;  %v20767_v38 = vld [vmem:[#allocation11_spill] sm:$0xff] }
 0x595   :  { %6061 = vmatmul.bf16.vlgmr.msrb.gmra.mxu0 %v5980_v55  ;;  %5677 = vmatmul.bf16.gmra.mxu1 %v18092_v23  ;;  %v18107_v55 = vld [vmem:[#allocation2 + $0x22] sm:$0xff] }
 0x596   :  { %v5457_v11 = vadd.f32 %v18044_v7, %v5436_v29 }
 0x597   :  { %v5366_v43 = vpop.f32.mrf.mxu0 }
 0x598   :  { %vm5473_vm4 = vcmp.gt.f32.partialorder %v5457_v11, 0.0  ;;  %v5489_v50 = vmul.f32 0.1, %v5457_v11  ;;  %v5400_v10 = vadd.f32 %v5366_v43, %v5246_v1  ;;  %v5068_v52 = vpop.f32.mrf.mxu2  ;;  %v5222_v27 = vpop.f32.mrf.mxu3 }
 0x59a   :  { %v18102_v30 = vsel %vm5473_vm4, %v5457_v11, %v5489_v50  ;;  %v18105_v4 = vadd.f32 %v5400_v10, %v20765_v26  ;;  %v5537_v62 = vld [vmem:[#allocation2 + $0x30] sm:$0xff]  ;;  %v5247_v11 = vadd.f32 %v18065_v18, %v5093_v48  ;;  %v15178_v48 = vld [vmem:[%s20679_s4 + $0x7e0] sm:$0xff] }
 0x59b   :  { %v18109_v57 = vld [vmem:[#allocation2 + $0x32] sm:$0xff]  ;;  %5521 = vst [vmem:[#allocation2 + $0x41] sm:$0xff] %v18102_v30  ;;  %v18112_v8 = vpack.c.bf16 %v5537_v62, %v5965_v25  ;;  %v4914_v26 = vpop.f32.mrf.mxu1  ;;  %6210 = vmatpush.bf16.msra.mxu1 %v15178_v48 }
 0x59c   :  { %20766 = vst [vmem:[#allocation10_spill] sm:$0xff] %v18105_v4  ;;  %v5827_v29 = vpack.c.bf16 %v18109_v57, %v18107_v55  ;;  %v5437_v1 = vmul.f32 %v18035_v44, %v18105_v4 }
 0x59d   :  { %5774 = vmatmul.bf16.gmra.mxu2 %v18112_v8 }
 0x59e   :  { %5912 = vmatmul.bf16.gmra.mxu3 %v5827_v29  ;;  %v5458_v43 = vadd.f32 %v18044_v7, %v5437_v1  ;;  %v5094_v1 = vadd.f32 %v5063_v0, %v4940_v56  ;;  %v20769_v56 = vld [vmem:[#allocation12_spill] sm:$0xff] }
 0x59f   :  { %v5368_v25 = vpop.f32.mrf.mxu0 }
 0x5a0   :  { %vm5474_vm5 = vcmp.gt.f32.partialorder %v5458_v43, 0.0  ;;  %v5490_v50 = vmul.f32 0.1, %v5458_v43  ;;  %v5401_v10 = vadd.f32 %v5368_v25, %v5247_v11  ;;  %v5248_v11 = vadd.f32 %v5217_v51, %v5094_v1 }
 0x5a2   :  { %v18125_v17 = vsel %vm5474_vm5, %v5458_v43, %v5490_v50  ;;  %v18128_v42 = vadd.f32 %v5401_v10, %v20767_v38  ;;  %v5967_v4 = vld [vmem:[#allocation2 + $0x40] sm:$0xff]  ;;  %v4941_v10 = vadd.f32 %v4911_v15, %v17905_v60 }
 0x5a3   :  { %5522 = vst [vmem:[#allocation2 + $0x51] sm:$0xff] %v18125_v17  ;;  %v5981_v29 = vpack.c.bf16 %v5967_v4, %v5537_v62  ;;  %v18133_v18 = vpack.c.bf16 %v18125_v17, %v18102_v30  ;;  %v18148_v6 = vld [vmem:[#allocation2 + $0x42] sm:$0xff]  ;;  %v4916_v51 = vpop.f32.mrf.mxu1  ;;  %v20771_v60 = vld [vmem:[#allocation13_spill] sm:$0xff] }
 0x5a4   :  { %20768 = vst [vmem:[#allocation11_spill] sm:$0xff] %v18128_v42  ;;  %v5438_v36 = vmul.f32 %v18035_v44, %v18128_v42  ;;  %v5095_v15 = vadd.f32 %v5065_v19, %v4941_v10  ;;  %v4942_v19 = vadd.f32 %v4914_v26, %v17911_v61 }
 0x5a5   :  { %6066 = vmatmul.bf16.gmra.mxu0 %v5981_v29  ;;  %5682 = vmatmul.bf16.gmra.mxu1 %v18133_v18 }
 0x5a6   :  { %v5459_v43 = vadd.f32 %v18044_v7, %v5438_v36  ;;  %v5096_v9 = vadd.f32 %v5068_v52, %v4942_v19  ;;  %v20773_v19 = vld [vmem:[#allocation14_spill] sm:$0xff] }
 0x5a7   :  { %v5371_v62 = vpop.f32.mrf.mxu0 }
 0x5a8   :  { %vm5475_vm6 = vcmp.gt.f32.partialorder %v5459_v43, 0.0  ;;  %v5491_v25 = vmul.f32 0.1, %v5459_v43  ;;  %v5402_v50 = vadd.f32 %v5371_v62, %v5248_v11  ;;  %v5070_v11 = vpop.f32.mrf.mxu2 }
 0x5aa   :  { %v18143_v38 = vsel %vm5475_vm6, %v5459_v43, %v5491_v25  ;;  %v18146_v0 = vadd.f32 %v5402_v50, %v20769_v56  ;;  %v5539_v42 = vld [vmem:[#allocation2 + $0x50] sm:$0xff]  ;;  %v5249_v43 = vadd.f32 %v5219_v39, %v5095_v15  ;;  %v5224_v25 = vpop.f32.mrf.mxu3  ;;  %v15177_v15 = vld [vmem:[%s20679_s4 + $0x7d8] sm:$0xff] }
 0x5ab   :  { %v18150_v29 = vld [vmem:[#allocation2 + $0x52] sm:$0xff]  ;;  %5523 = vst [vmem:[#allocation2 + $0x61] sm:$0xff] %v18143_v38  ;;  %v18153_v48 = vpack.c.bf16 %v5539_v42, %v5967_v4  ;;  %v4919_v26 = vpop.f32.mrf.mxu1  ;;  %6211 = vmatpush.bf16.msra.mxu1 %v15177_v15 }
 0x5ac   :  { %20770 = vst [vmem:[#allocation12_spill] sm:$0xff] %v18146_v0  ;;  %v5828_v1 = vpack.c.bf16 %v18150_v29, %v18148_v6  ;;  %v5439_v36 = vmul.f32 %v18035_v44, %v18146_v0 }
 0x5ad   :  { %5779 = vmatmul.bf16.gmra.mxu2 %v18153_v48 }
 0x5ae   :  { %5917 = vmatmul.bf16.gmra.mxu3 %v5828_v1  ;;  %v5460_v62 = vadd.f32 %v18044_v7, %v5439_v36 }
 0x5af   :  { %v5373_v4 = vpop.f32.mrf.mxu0 }
 0x5b0   :  { %vm5476_vm7 = vcmp.gt.f32.partialorder %v5460_v62, 0.0  ;;  %v5492_v50 = vmul.f32 0.1, %v5460_v62  ;;  %v5403_v56 = vadd.f32 %v5373_v4, %v5249_v43  ;;  %v5073_v43 = vpop.f32.mrf.mxu2 }
 0x5b2   :  { %v18166_v10 = vsel %vm5476_vm7, %v5460_v62, %v5492_v50  ;;  %v18169_v0 = vadd.f32 %v5403_v56, %v20771_v60  ;;  %v5969_v46 = vld [vmem:[#allocation2 + $0x60] sm:$0xff]  ;;  %v5250_v60 = vadd.f32 %v5222_v27, %v5096_v9  ;;  %v5227_v52 = vpop.f32.mrf.mxu3 }
 0x5b3   :  { %5524 = vst [vmem:[#allocation2 + $0x71] sm:$0xff] %v18166_v10  ;;  %v5982_v39 = vpack.c.bf16 %v5969_v46, %v5539_v42  ;;  %v18174_v1 = vpack.c.bf16 %v18166_v10, %v18143_v38  ;;  %v4635_v42 = vadd.f32 %v17828_v58, %v4481_v20  ;;  %v18191_v58 = vld [vmem:[#allocation2 + $0x62] sm:$0xff] }
 0x5b4   :  { %20772 = vst [vmem:[#allocation13_spill] sm:$0xff] %v18169_v0  ;;  %v5440_v61 = vmul.f32 %v18035_v44, %v18169_v0 }
 0x5b5   :  { %6071 = vmatmul.bf16.gmra.mxu0 %v5982_v39  ;;  %5687 = vmatmul.bf16.gmra.mxu1 %v18174_v1  ;;  %v4789_v4 = vadd.f32 %v17913_v37, %v4635_v42 }
 0x5b6   :  { %v5461_v36 = vadd.f32 %v18044_v7, %v5440_v61 }
 0x5b7   :  { %v5376_v62 = vpop.f32.mrf.mxu0  ;;  %v4943_v50 = vadd.f32 %v4916_v51, %v4789_v4  ;;  %v5583_v4 = vld [vmem:[#allocation2 + $0xa1] sm:$0xff] }
 0x5b8   :  { %vm5477_vm8 = vcmp.gt.f32.partialorder %v5461_v36, 0.0  ;;  %v5493_v28 = vmul.f32 0.1, %v5461_v36  ;;  %v5404_v24 = vadd.f32 %v5376_v62, %v5250_v60  ;;  %v4921_v60 = vpop.f32.mrf.mxu1 }
 0x5b9   :  { %v5097_v20 = vadd.f32 %v5070_v11, %v4943_v50  ;;  %v4944_v11 = vadd.f32 %v4919_v26, %v17921_v59 }
 0x5ba   :  { %v18186_v56 = vsel %vm5477_vm8, %v5461_v36, %v5493_v28  ;;  %v18189_v39 = vadd.f32 %v5404_v24, %v20773_v19  ;;  %v5541_v0 = vld [vmem:[#allocation2 + $0x70] sm:$0xff]  ;;  %v5075_v28 = vpop.f32.mrf.mxu2  ;;  %v4322_v24 = vadd.f32 %v17830_v21, %v17820_v53 }
 0x5bb   :  { %v18193_v27 = vld [vmem:[#allocation2 + $0x72] sm:$0xff]  ;;  %5525 = vst [vmem:[#allocation2 + $0x81] sm:$0xff] %v18186_v56  ;;  %v18196_v15 = vpack.c.bf16 %v5541_v0, %v5969_v46  ;;  %v5251_v61 = vadd.f32 %v5224_v25, %v5097_v20  ;;  %v20774_v19 = vld [vmem:[#allocation15_spill] sm:$0xff]  ;;  %v5098_v59 = vadd.f32 %v5073_v43, %v4944_v11 }
 0x5bc   :  { %v5829_v37 = vpack.c.bf16 %v18193_v27, %v18191_v58  ;;  %v5441_v9 = vmul.f32 %v18035_v44, %v18189_v39  ;;  %v15176_v53 = vld [vmem:[%s20679_s4 + $0x7d0] sm:$0xff]  ;;  %v4483_v21 = vadd.f32 %v17836_v41, %v4322_v24 }
 0x5bd   :  { %5784 = vmatmul.bf16.gmra.mxu2 %v18196_v15  ;;  %6212 = vmatpush.bf16.msra.mxu1 %v15176_v53  ;;  %v20776_v11 = vld [vmem:[#allocation16_spill] sm:$0xff] }
 0x5be   :  { %5922 = vmatmul.bf16.gmra.mxu3 %v5829_v37  ;;  %v5462_v42 = vadd.f32 %v18044_v7, %v5441_v9  ;;  %v5229_v37 = vpop.f32.mrf.mxu3 }
 0x5bf   :  { %v5378_v36 = vpop.f32.mrf.mxu0 }
 0x5c0   :  { %vm5478_vm9 = vcmp.gt.f32.partialorder %v5462_v42, 0.0  ;;  %v5494_v46 = vmul.f32 0.1, %v5462_v42  ;;  %v5405_v62 = vadd.f32 %v5378_v36, %v5251_v61  ;;  %v4637_v61 = vadd.f32 %v17845_v32, %v4483_v21  ;;  %v4924_v41 = vpop.f32.mrf.mxu1 }
 0x5c2   :  { %v18209_v50 = vsel %vm5478_vm9, %v5462_v42, %v5494_v46  ;;  %v18212_v51 = vadd.f32 %v5405_v62, %v20774_v19  ;;  %v18214_v25 = vld [vmem:[#allocation2 + $0x80] sm:$0xff]  ;;  %v5252_v42 = vadd.f32 %v5227_v52, %v5098_v59  ;;  %v4791_v46 = vadd.f32 %v17933_v47, %v4637_v61  ;;  %v5078_v52 = vpop.f32.mrf.mxu2  ;;  %v15189_v61 = vld [vmem:[%s20679_s4 + $0x838] sm:$0xff] }
 0x5c3   :  { %5526 = vst [vmem:[#allocation2 + $0xb1] sm:$0xff] %v18209_v50  ;;  %v5983_v20 = vpack.c.bf16 %v18214_v25, %v5541_v0  ;;  %v5595_v9 = vpack.c.bf16 %v18209_v50, %v5583_v4  ;;  %v5818_v19 = vld [vmem:[#allocation2 + $0xa2] sm:$0xff]  ;;  %6361 = vmatpush.bf16.msra.mxu2 %v15189_v61 }
 0x5c4   :  { %20775 = vst [vmem:[#allocation14_spill] sm:$0xff] %v18212_v51  ;;  %v5442_v26 = vmul.f32 %v18035_v44, %v18212_v51  ;;  %v4945_v43 = vadd.f32 %v4921_v60, %v4791_v46 }
 0x5c5   :  { %6076 = vmatmul.bf16.gmra.mxu0 %v5983_v20  ;;  %5692 = vmatmul.bf16.gmra.mxu1 %v5595_v9 }
 0x5c6   :  { %v5463_v36 = vadd.f32 %v18044_v7, %v5442_v26  ;;  %v5099_v59 = vadd.f32 %v5075_v28, %v4945_v43  ;;  %v5232_v26 = vpop.f32.mrf.mxu3 }
 0x5c7   :  { %v5381_v0 = vpop.f32.mrf.mxu0 }
 0x5c8   :  { %vm5479_vm10 = vcmp.gt.f32.partialorder %v5463_v36, 0.0  ;;  %v5495_v62 = vmul.f32 0.1, %v5463_v36  ;;  %v5406_v4 = vadd.f32 %v5381_v0, %v5252_v42  ;;  %v5253_v42 = vadd.f32 %v5229_v37, %v5099_v59  ;;  %v4926_v59 = vpop.f32.mrf.mxu1 }
 0x5c9   :  { %v4946_v37 = vadd.f32 %v4924_v41, %v17960_v31 }
 0x5ca   :  { %v18228_v24 = vsel %vm5479_vm10, %v5463_v36, %v5495_v62  ;;  %v18231_v20 = vadd.f32 %v5406_v4, %v20776_v11  ;;  %v5543_v9 = vld [vmem:[#allocation2 + $0xb0] sm:$0xff]  ;;  %v20778_v11 = vld [vmem:[#allocation17_spill] sm:$0xff] }
 0x5cb   :  { %v18233_v32 = vld [vmem:[#allocation2 + $0xb2] sm:$0xff]  ;;  %5527 = vst [vmem:[#allocation2 + $0xc1] sm:$0xff] %v18228_v24  ;;  %v5554_v53 = vpack.c.bf16 %v5543_v9, %v17785_v13  ;;  %v5100_v31 = vadd.f32 %v5078_v52, %v4946_v37  ;;  %v15186_v37 = vld [vmem:[%s20679_s4 + $0x820] sm:$0xff] }
 0x5cc   :  { %20777 = vst [vmem:[#allocation15_spill] sm:$0xff] %v18231_v20  ;;  %v5830_v47 = vpack.c.bf16 %v18233_v32, %v5818_v19  ;;  %v5443_v60 = vmul.f32 %v18035_v44, %v18231_v20  ;;  %v15197_v13 = vld [vmem:[%s20679_s4 + $0x878] sm:$0xff]  ;;  %v15188_v62 = vld [vmem:[%s20679_s4 + $0x830] sm:$0xff]  ;;  %v4327_v19 = vadd.f32 %v17847_v16, %v17840_v45  ;;  %v15175_v45 = vld [vmem:[%s20679_s4 + $0x7c8] sm:$0xff] }
 0x5cd   :  { %5789 = vmatmul.bf16.gmra.mxu2 %v5554_v53  ;;  %6515 = vmatpush.bf16.msra.mxu3 %v15197_v13  ;;  %v15196_v4 = vld [vmem:[%s20679_s4 + $0x870] sm:$0xff]  ;;  %v5080_v13 = vpop.f32.mrf.mxu2 }
 0x5ce   :  { %5927 = vmatmul.bf16.gmra.mxu3 %v5830_v47  ;;  %v5464_v36 = vadd.f32 %v18044_v7, %v5443_v60  ;;  %6362 = vmatpush.bf16.msra.mxu2 %v15188_v62  ;;  %v4485_v16 = vadd.f32 %v17853_v49, %v4327_v19  ;;  %v15205_v49 = vld [vmem:[%s20679_s4 + $0x8b8] sm:$0xff] }
 0x5cf   :  { %v5383_v0 = vpop.f32.mrf.mxu0  ;;  %6213 = vmatpush.bf16.msra.mxu1 %v15175_v45  ;;  %6669 = vmatpush.bf16.msra.mxu0 %v15205_v49 }
 0x5d0   :  { %vm5480_vm11 = vcmp.gt.f32.partialorder %v5464_v36, 0.0  ;;  %v5496_v28 = vmul.f32 0.1, %v5464_v36  ;;  %v5407_v46 = vadd.f32 %v5383_v0, %v5253_v42  ;;  %v15195_v42 = vld [vmem:[%s20679_s4 + $0x868] sm:$0xff]  ;;  %v4639_v52 = vadd.f32 %v17865_v35, %v4485_v16  ;;  %v15194_v35 = vld [vmem:[%s20679_s4 + $0x860] sm:$0xff] }
 0x5d1   :  { %6516 = vmatpush.bf16.msra.mxu3 %v15196_v4 }
 0x5d2   :  { %v18258_v43 = vsel %vm5480_vm11, %v5464_v36, %v5496_v28  ;;  %v18261_v53 = vadd.f32 %v5407_v46, %v20778_v11  ;;  %v5973_v47 = vld [vmem:[#allocation2 + $0xc0] sm:$0xff]  ;;  %v5254_v36 = vadd.f32 %v5232_v26, %v5100_v31  ;;  %v5234_v28 = vpop.f32.mrf.mxu3  ;;  %v4793_v62 = vadd.f32 %v17981_v12, %v4639_v52  ;;  %v15204_v26 = vld [vmem:[%s20679_s4 + $0x8b0] sm:$0xff] }
 0x5d3   :  { %5528 = vst [vmem:[#allocation2 + $0xd1] sm:$0xff] %v18258_v43  ;;  %v5984_v60 = vpack.c.bf16 %v5973_v47, %v5543_v9  ;;  %v18266_v61 = vpack.c.bf16 %v18258_v43, %v18228_v24  ;;  %v15187_v9 = vld [vmem:[%s20679_s4 + $0x828] sm:$0xff]  ;;  %6670 = vmatpush.bf16.msra.mxu0 %v15204_v26 }
 0x5d4   :  { %20779 = vst [vmem:[#allocation16_spill] sm:$0xff] %v18261_v53  ;;  %v5444_v41 = vmul.f32 %v18035_v44, %v18261_v53  ;;  %6363 = vmatpush.bf16.msra.mxu2 %v15187_v9  ;;  %v4947_v11 = vadd.f32 %v4926_v59, %v4793_v62  ;;  %v20780_v12 = vld [vmem:[#allocation18_spill] sm:$0xff] }
 0x5d5   :  { %6081 = vmatmul.bf16.gmra.mxu0 %v5984_v60  ;;  %5697 = vmatmul.bf16.gmra.mxu1 %v18266_v61  ;;  %v18301_v31 = vld [vmem:[#allocation2 + $0xc2] sm:$0xff] }
 0x5d6   :  { %v5465_v0 = vadd.f32 %v18044_v7, %v5444_v41  ;;  %6517 = vmatpush.bf16.msra.mxu3 %v15195_v42  ;;  %v5101_v49 = vadd.f32 %v5080_v13, %v4947_v11  ;;  %v15193_v13 = vld [vmem:[%s20679_s4 + $0x858] sm:$0xff] }
 0x5d7   :  { %v5386_v46 = vpop.f32.mrf.mxu0 }
 0x5d8   :  { %vm5481_vm12 = vcmp.gt.f32.partialorder %v5465_v0, 0.0  ;;  %v5497_v4 = vmul.f32 0.1, %v5465_v0  ;;  %v5408_v19 = vadd.f32 %v5386_v46, %v5254_v36  ;;  %6364 = vmatpush.bf16.msra.mxu2 %v15186_v37  ;;  %v4929_v36 = vpop.f32.mrf.mxu1  ;;  %v5255_v46 = vadd.f32 %v5234_v28, %v5101_v49  ;;  %v15192_v28 = vld [vmem:[%s20679_s4 + $0x850] sm:$0xff] }
 0x5d9   :  { %v4332_v49 = vadd.f32 %v17918_v22, %v17859_v33  ;;  %v15183_v22 = vld [vmem:[%s20679_s4 + $0x808] sm:$0xff] }
 0x5da   :  { %v18296_v60 = vsel %vm5481_vm12, %v5465_v0, %v5497_v4  ;;  %v18299_v45 = vadd.f32 %v5408_v19, %v20780_v12  ;;  %v5545_v16 = vld [vmem:[#allocation2 + $0xd0] sm:$0xff]  ;;  %6518 = vmatpush.bf16.msra.mxu3 %v15194_v35  ;;  %v15185_v0 = vld [vmem:[%s20679_s4 + $0x818] sm:$0xff]  ;;  %v15203_v4 = vld [vmem:[%s20679_s4 + $0x8a8] sm:$0xff]  ;;  %v5083_v19 = vpop.f32.mrf.mxu2 }
 0x5db   :  { %v18303_v41 = vld [vmem:[#allocation2 + $0xd2] sm:$0xff]  ;;  %5529 = vst [vmem:[#allocation2 + $0xe1] sm:$0xff] %v18296_v60  ;;  %v18306_v9 = vpack.c.bf16 %v5545_v16, %v5973_v47  ;;  %v15174_v47 = vld [vmem:[%s20679_s4 + $0x7c0] sm:$0xff]  ;;  %6671 = vmatpush.bf16.msra.mxu0 %v15203_v4  ;;  %v4487_v59 = vadd.f32 %v17923_v40, %v4332_v49 }
 0x5dc   :  { %20781 = vst [vmem:[#allocation17_spill] sm:$0xff] %v18299_v45  ;;  %v5831_v42 = vpack.c.bf16 %v18303_v41, %v18301_v31  ;;  %v5445_v52 = vmul.f32 %v18035_v44, %v18299_v45  ;;  %6214 = vmatpush.bf16.msra.mxu1 %v15174_v47  ;;  %6365 = vmatpush.bf16.msra.mxu2 %v15185_v0  ;;  %v15184_v35 = vld [vmem:[%s20679_s4 + $0x810] sm:$0xff]  ;;  %v15202_v12 = vld [vmem:[%s20679_s4 + $0x8a0] sm:$0xff]  ;;  %v15201_v40 = vld [vmem:[%s20679_s4 + $0x898] sm:$0xff] }
 0x5dd   :  { %5794 = vmatmul.bf16.gmra.mxu2 %v18306_v9  ;;  %v20782_v0 = vld [vmem:[#allocation19_spill] sm:$0xff] }
 0x5de   :  { %5932 = vmatmul.bf16.gmra.mxu3 %v5831_v42  ;;  %v5466_v62 = vadd.f32 %v18044_v7, %v5445_v52  ;;  %v5237_v42 = vpop.f32.mrf.mxu3  ;;  %v4948_v52 = vadd.f32 %v4929_v36, %v18005_v3  ;;  %v15191_v3 = vld [vmem:[%s20679_s4 + $0x848] sm:$0xff] }
 0x5df   :  { %v5388_v37 = vpop.f32.mrf.mxu0  ;;  %6519 = vmatpush.bf16.msra.mxu3 %v15193_v13  ;;  %6672 = vmatpush.bf16.msra.mxu0 %v15202_v12 }
 0x5e0   :  { %vm5482_vm13 = vcmp.gt.f32.partialorder %v5466_v62, 0.0  ;;  %v5498_v26 = vmul.f32 0.1, %v5466_v62  ;;  %v5409_v11 = vadd.f32 %v5388_v37, %v5255_v46  ;;  %6366 = vmatpush.bf16.msra.mxu2 %v15184_v35  ;;  %v5102_v21 = vadd.f32 %v5083_v19, %v4948_v52  ;;  %v4931_v19 = vpop.f32.mrf.mxu1  ;;  %v20784_v52 = vld [vmem:[#allocation20_spill] sm:$0xff] }
 0x5e2   :  { %v18340_v47 = vsel %vm5482_vm13, %v5466_v62, %v5498_v26  ;;  %v18343_v46 = vadd.f32 %v5409_v11, %v20782_v0  ;;  %v5975_v13 = vld [vmem:[#allocation2 + $0xe0] sm:$0xff]  ;;  %v5256_v36 = vadd.f32 %v5237_v42, %v5102_v21  ;;  %v15200_v21 = vld [vmem:[%s20679_s4 + $0x890] sm:$0xff] }
 0x5e3   :  { %5530 = vst [vmem:[#allocation2 + $0xf1] sm:$0xff] %v18340_v47  ;;  %v5985_v4 = vpack.c.bf16 %v5975_v13, %v5545_v16  ;;  %v18348_v37 = vpack.c.bf16 %v18340_v47, %v18296_v60  ;;  %6520 = vmatpush.bf16.msra.mxu3 %v15192_v28  ;;  %v4641_v16 = vadd.f32 %v17925_v14, %v4487_v59  ;;  %v15182_v26 = vld [vmem:[%s20679_s4 + $0x800] sm:$0xff]  ;;  %v5085_v59 = vpop.f32.mrf.mxu2 }
 0x5e4   :  { %20783 = vst [vmem:[#allocation18_spill] sm:$0xff] %v18343_v46  ;;  %v5446_v33 = vmul.f32 %v18035_v44, %v18343_v46  ;;  %6367 = vmatpush.bf16.msra.mxu2 %v15183_v22  ;;  %6673 = vmatpush.bf16.msra.mxu0 %v15201_v40  ;;  %v15190_v14 = vld [vmem:[%s20679_s4 + $0x840] sm:$0xff] }
 0x5e5   :  { %6086 = vmatmul.bf16.gmra.mxu0 %v5985_v4  ;;  %5702 = vmatmul.bf16.gmra.mxu1 %v18348_v37  ;;  %v4795_v11 = vadd.f32 %v18020_v63, %v4641_v16  ;;  %v18380_v4 = vld [vmem:[#allocation2 + $0xe2] sm:$0xff] }
 0x5e6   :  { %v5467_v62 = vadd.f32 %v18044_v7, %v5446_v33  ;;  %v5239_v22 = vpop.f32.mrf.mxu3 }
 0x5e7   :  { %v5391_v35 = vpop.f32.mrf.mxu0  ;;  %6521 = vmatpush.bf16.msra.mxu3 %v15191_v3  ;;  %v4949_v42 = vadd.f32 %v4931_v19, %v4795_v11  ;;  %v15199_v19 = vld [vmem:[%s20679_s4 + $0x888] sm:$0xff] }
 0x5e8   :  { %vm5483_vm14 = vcmp.gt.f32.partialorder %v5467_v62, 0.0  ;;  %v5499_v28 = vmul.f32 0.1, %v5467_v62  ;;  %v5410_v12 = vadd.f32 %v5391_v35, %v5256_v36  ;;  %6368 = vmatpush.bf16.msra.mxu2 %v15182_v26  ;;  %6674 = vmatpush.bf16.msra.mxu0 %v15200_v21 }
 0x5e9   :  { %v5103_v36 = vadd.f32 %v5085_v59, %v4949_v42  ;;  %v20786_v59 = vld [vmem:[#allocation21_spill] sm:$0xff] }
 0x5ea   :  { %v18375_v49 = vsel %vm5483_vm14, %v5467_v62, %v5499_v28  ;;  %v18378_v0 = vadd.f32 %v5410_v12, %v20784_v52  ;;  %v5547_v63 = vld [vmem:[#allocation2 + $0xf0] sm:$0xff] }
 0x5eb   :  { %v18382_v33 = vld [vmem:[#allocation2 + $0xf2] sm:$0xff]  ;;  %5531 = vst [vmem:[#allocation2 + $0x101] sm:$0xff] %v18375_v49  ;;  %v18385_v3 = vpack.c.bf16 %v5547_v63, %v5975_v13  ;;  %6522 = vmatpush.bf16.msra.mxu3 %v15190_v14  ;;  %v5257_v35 = vadd.f32 %v5239_v22, %v5103_v36  ;;  %v15198_v14 = vld [vmem:[%s20679_s4 + $0x880] sm:$0xff] }
 0x5ec   :  { %20785 = vst [vmem:[#allocation19_spill] sm:$0xff] %v18378_v0  ;;  %v5832_v40 = vpack.c.bf16 %v18382_v33, %v18380_v4  ;;  %v5447_v62 = vmul.f32 %v18035_v44, %v18378_v0  ;;  %v15213_v13 = vld [vmem:[%s20679_s4 + $0x8f8] sm:$0xff]  ;;  %6675 = vmatpush.bf16.msra.mxu0 %v15199_v19 }
 0x5ed   :  { %5799 = vmatmul.bf16.gmra.mxu2 %v18385_v3  ;;  %6823 = vmatpush.bf16.msrb.mxu1 %v15213_v13 }
 0x5ee   :  { %5937 = vmatmul.bf16.gmra.mxu3 %v5832_v40  ;;  %v5468_v26 = vadd.f32 %v18044_v7, %v5447_v62 }
 0x5ef   :  { %v5393_v11 = vpop.f32.mrf.mxu0 }
 0x5f0   :  { %vm5484_vm15 = vcmp.gt.f32.partialorder %v5468_v26, 0.0  ;;  %v5500_v28 = vmul.f32 0.1, %v5468_v26  ;;  %v5411_v12 = vadd.f32 %v5393_v11, %v5257_v35  ;;  %6676 = vmatpush.bf16.msra.mxu0 %v15198_v14 }
 0x5f2   :  { %v18404_v21 = vsel %vm5484_vm15, %v5468_v26, %v5500_v28  ;;  %v18407_v42 = vadd.f32 %v5411_v12, %v20786_v59  ;;  %v5977_v52 = vld [vmem:[#allocation2 + $0x100] sm:$0xff]  ;;  %v15212_v28 = vld [vmem:[%s20679_s4 + $0x8f0] sm:$0xff] }
 0x5f3   :  { %5532 = vst [vmem:[#allocation2 + $0x111] sm:$0xff] %v18404_v21  ;;  %v5986_v22 = vpack.c.bf16 %v5977_v52, %v5547_v63  ;;  %v18412_v40 = vpack.c.bf16 %v18404_v21, %v18375_v49  ;;  %v18420_v26 = vld [vmem:[#allocation2 + $0x102] sm:$0xff]  ;;  %6824 = vmatpush.bf16.msrb.mxu1 %v15212_v28 }
 0x5f4   :  { %20787 = vst [vmem:[#allocation20_spill] sm:$0xff] %v18407_v42  ;;  %v5448_v36 = vmul.f32 %v18035_v44, %v18407_v42 }
 0x5f5   :  { %6091 = vmatmul.bf16.gmra.mxu0 %v5986_v22  ;;  %5707 = vmatmul.bf16.gmra.mxu1 %v18412_v40 }
 0x5f6   :  { %v5469_v62 = vadd.f32 %v18044_v7, %v5448_v36  ;;  %v6288_v36 = vpack.c.bf16 %v18107_v55, %v18073_v54 }
 0x5f8   :  { %vm5485_vm1 = vcmp.gt.f32.partialorder %v5469_v62, 0.0  ;;  %v5501_v13 = vmul.f32 0.1, %v5469_v62 }
 0x5fa   :  { %v18418_v19 = vsel %vm5485_vm1, %v5469_v62, %v5501_v13  ;;  %v5549_v35 = vld [vmem:[#allocation2 + $0x110] sm:$0xff]  ;;  %v15211_v62 = vld [vmem:[%s20679_s4 + $0x8e8] sm:$0xff] }
 0x5fb   :  { %v18422_v63 = vld [vmem:[#allocation2 + $0x112] sm:$0xff]  ;;  %5533 = vst [vmem:[#allocation2 + $0x121] sm:$0xff] %v18418_v19  ;;  %v18425_v11 = vpack.c.bf16 %v5549_v35, %v5977_v52  ;;  %v20788_v52 = vpack.c.bf16 %v18068_v34, %v18050_v2  ;;  %6825 = vmatpush.bf16.msrb.mxu1 %v15211_v62  ;;  %v20789_v34 = vpack.c.bf16 %v18102_v30, %v18084_v5 }
 0x5fc   :  { %v18429_v44 = vpack.c.bf16 %v18422_v63, %v18420_v26 }
 0x5fd   :  { %5804 = vmatmul.bf16.gmra.mxu2 %v18425_v11 }
 0x5fe   :  { %5942 = vmatmul.bf16.gmra.mxu3 %v18429_v44 }
 0x602   :  { %v18438_v12 = vld [vmem:[#allocation2 + $0x120] sm:$0xff]  ;;  %v5673_v14 = vpop.f32.mrf.mxu1 }
 0x603   :  { %v5987_v59 = vpack.c.bf16 %v18438_v12, %v5549_v35 }
 0x605   :  { %6096 = vmatmul.bf16.gmra.mxu0 %v5987_v59  ;;  %6215 = vmatmul.bf16.vlgmr.msra.gmra.mxu1 %v20788_v52 }
 0x60a   :  { %v5675_v22 = vpop.f32.mrf.mxu1 }
 0x60d   :  { %6369 = vmatmul.bf16.vlgmr.msra.gmra.mxu2 %v6288_v36 }
 0x60e   :  { %6523 = vmatmul.bf16.vlgmr.msra.gmra.mxu3 %v18112_v8 }
 0x610   :  { %v5770_v13 = vpop.f32.mrf.mxu2 }
 0x611   :  { %v5908_v28 = vpop.f32.mrf.mxu3  ;;  %v5771_v35 = vadd.f32 %v5770_v13, %v5673_v14  ;;  %v6289_v14 = vpack.c.bf16 %v18148_v6, %v18109_v57  ;;  %v20790_v6 = vpack.c.bf16 %v18143_v38, %v18125_v17 }
 0x612   :  { %v6062_v59 = vpop.f32.mrf.mxu0  ;;  %v5678_v7 = vpop.f32.mrf.mxu1 }
 0x613   :  { %v5948_v16 = vadd.f32 %v5908_v28, %v5771_v35 }
 0x615   :  { %v18450_v2 = vadd.f32 %v6062_v59, %v5948_v16  ;;  %6677 = vmatmul.bf16.vlgmr.msra.gmra.mxu0 %v18092_v23  ;;  %6220 = vmatmul.bf16.gmra.mxu1 %v20789_v34  ;;  %v15210_v23 = vld [vmem:[%s20679_s4 + $0x8e0] sm:$0xff] }
 0x616   :  { %6826 = vmatpush.bf16.msrb.mxu1 %v15210_v23 }
 0x618   :  { %v5772_v54 = vpop.f32.mrf.mxu2 }
 0x619   :  { %v5910_v55 = vpop.f32.mrf.mxu3  ;;  %v5773_v8 = vadd.f32 %v5772_v54, %v5675_v22 }
 0x61a   :  { %v6064_v52 = vpop.f32.mrf.mxu0  ;;  %v5680_v36 = vpop.f32.mrf.mxu1 }
 0x61b   :  { %v5949_v62 = vadd.f32 %v5910_v55, %v5773_v8 }
 0x61d   :  { %v18458_v13 = vadd.f32 %v6064_v52, %v5949_v62  ;;  %6374 = vmatmul.bf16.gmra.mxu2 %v6289_v14 }
 0x61e   :  { %6528 = vmatmul.bf16.gmra.mxu3 %v18153_v48 }
 0x620   :  { %v5775_v5 = vpop.f32.mrf.mxu2 }
 0x621   :  { %v5913_v30 = vpop.f32.mrf.mxu3  ;;  %v5776_v16 = vadd.f32 %v5775_v5, %v5678_v7  ;;  %v6290_v7 = vpack.c.bf16 %v18191_v58, %v18150_v29  ;;  %v20791_v29 = vpack.c.bf16 %v18186_v56, %v18166_v10  ;;  %v15208_v10 = vld [vmem:[%s20679_s4 + $0x8d0] sm:$0xff] }
 0x622   :  { %v6067_v22 = vpop.f32.mrf.mxu0  ;;  %v5683_v28 = vpop.f32.mrf.mxu1 }
 0x623   :  { %v5950_v35 = vadd.f32 %v5913_v30, %v5776_v16  ;;  %v18484_v30 = vld [vmem:[#allocation2 + $0x82] sm:$0xff] }
 0x625   :  { %v18464_v59 = vadd.f32 %v6067_v22, %v5950_v35  ;;  %6682 = vmatmul.bf16.gmra.mxu0 %v18133_v18  ;;  %6225 = vmatmul.bf16.gmra.mxu1 %v20790_v6  ;;  %v15209_v18 = vld [vmem:[%s20679_s4 + $0x8d8] sm:$0xff] }
 0x626   :  { %6827 = vmatpush.bf16.msrb.mxu1 %v15209_v18 }
 0x628   :  { %v5777_v57 = vpop.f32.mrf.mxu2 }
 0x629   :  { %v5915_v48 = vpop.f32.mrf.mxu3  ;;  %v5778_v34 = vadd.f32 %v5777_v57, %v5680_v36  ;;  %v18488_v57 = vld [vmem:[#allocation2] sm:$0xff] }
 0x62a   :  { %v6069_v54 = vpop.f32.mrf.mxu0  ;;  %v5685_v55 = vpop.f32.mrf.mxu1  ;;  %6828 = vmatpush.bf16.msrb.mxu1 %v15208_v10 }
 0x62b   :  { %v5951_v8 = vadd.f32 %v5915_v48, %v5778_v34 }
 0x62d   :  { %v18472_v52 = vadd.f32 %v6069_v54, %v5951_v8  ;;  %6379 = vmatmul.bf16.gmra.mxu2 %v6290_v7 }
 0x62e   :  { %6533 = vmatmul.bf16.gmra.mxu3 %v18196_v15 }
 0x630   :  { %v5780_v17 = vpop.f32.mrf.mxu2 }
 0x631   :  { %v5918_v38 = vpop.f32.mrf.mxu3  ;;  %v5781_v62 = vadd.f32 %v5780_v17, %v5683_v28  ;;  %v6291_v28 = vpack.c.bf16 %v18484_v30, %v18193_v27 }
 0x632   :  { %v6072_v36 = vpop.f32.mrf.mxu0  ;;  %v5688_v14 = vpop.f32.mrf.mxu1 }
 0x633   :  { %v5952_v23 = vadd.f32 %v5918_v38, %v5781_v62 }
 0x635   :  { %v18478_v5 = vadd.f32 %v6072_v36, %v5952_v23  ;;  %6687 = vmatmul.bf16.gmra.mxu0 %v18174_v1  ;;  %6230 = vmatmul.bf16.gmra.mxu1 %v20791_v29  ;;  %v6445_v1 = vpack.c.bf16 %v18488_v57, %v18214_v25  ;;  %v20792_v25 = vpack.c.bf16 %v18228_v24, %v18209_v50 }
 0x638   :  { %v5782_v58 = vpop.f32.mrf.mxu2 }
 0x639   :  { %v5920_v15 = vpop.f32.mrf.mxu3  ;;  %v5783_v16 = vadd.f32 %v5782_v58, %v5685_v55  ;;  %v6587_v55 = vld [vmem:[#allocation2 + $0x91] sm:$0xff] }
 0x63a   :  { %v6074_v22 = vpop.f32.mrf.mxu0  ;;  %v5690_v35 = vpop.f32.mrf.mxu1  ;;  %v6599_v17 = vpack.c.bf16 %v6587_v55, %v18186_v56  ;;  %v15207_v56 = vld [vmem:[%s20679_s4 + $0x8c8] sm:$0xff] }
 0x63b   :  { %v5953_v6 = vadd.f32 %v5920_v15, %v5783_v16  ;;  %6829 = vmatpush.bf16.msrb.mxu1 %v15207_v56 }
 0x63d   :  { %v18492_v48 = vadd.f32 %v6074_v22, %v5953_v6  ;;  %6384 = vmatmul.bf16.gmra.mxu2 %v6291_v28 }
 0x63e   :  { %6538 = vmatmul.bf16.gmra.mxu3 %v6445_v1 }
 0x640   :  { %v5785_v34 = vpop.f32.mrf.mxu2 }
 0x641   :  { %v5923_v54 = vpop.f32.mrf.mxu3  ;;  %v5786_v8 = vadd.f32 %v5785_v34, %v5688_v14  ;;  %v6292_v14 = vpack.c.bf16 %v18301_v31, %v18233_v32  ;;  %v20793_v32 = vpack.c.bf16 %v18296_v60, %v18258_v43 }
 0x642   :  { %v6077_v7 = vpop.f32.mrf.mxu0  ;;  %v5693_v27 = vpop.f32.mrf.mxu1 }
 0x643   :  { %v5954_v18 = vadd.f32 %v5923_v54, %v5786_v8  ;;  %v6293_v54 = vpack.c.bf16 %v18380_v4, %v18303_v41  ;;  %v20794_v41 = vpack.c.bf16 %v18375_v49, %v18340_v47 }
 0x645   :  { %v18498_v38 = vadd.f32 %v6077_v7, %v5954_v18  ;;  %6692 = vmatmul.bf16.gmra.mxu0 %v6599_v17  ;;  %6235 = vmatmul.bf16.gmra.mxu1 %v20792_v25 }
 0x648   :  { %v5787_v62 = vpop.f32.mrf.mxu2 }
 0x649   :  { %v5925_v36 = vpop.f32.mrf.mxu3  ;;  %v5788_v23 = vadd.f32 %v5787_v62, %v5690_v35  ;;  %v6294_v62 = vpack.c.bf16 %v18420_v26, %v18382_v33  ;;  %v18560_v26 = vld [vmem:[#allocation2 + $0x122] sm:$0xff] }
 0x64a   :  { %v6079_v29 = vpop.f32.mrf.mxu0  ;;  %v18503_v58 = vpop.f32.mrf.mxu1 }
 0x64b   :  { %v5955_v15 = vadd.f32 %v5925_v36, %v5788_v23 }
 0x64d   :  { %v18507_v16 = vadd.f32 %v6079_v29, %v5955_v15  ;;  %6389 = vmatmul.bf16.gmra.mxu2 %v6292_v14  ;;  %v20795_v14 = vpack.c.bf16 %v18418_v19, %v18404_v21  ;;  %v15229_v21 = vld [vmem:[%s20679_s4 + $0x978] sm:$0xff] }
 0x64e   :  { %6543 = vmatmul.bf16.gmra.mxu3 %v18306_v9  ;;  %7124 = vmatpush.bf16.msrb.mxu2 %v15229_v21 }
 0x650   :  { %v5790_v50 = vpop.f32.mrf.mxu2 }
 0x651   :  { %v5928_v24 = vpop.f32.mrf.mxu3  ;;  %v5791_v22 = vadd.f32 %v5790_v50, %v5693_v27 }
 0x652   :  { %v6082_v35 = vpop.f32.mrf.mxu0  ;;  %v5698_v6 = vpop.f32.mrf.mxu1 }
 0x653   :  { %v5956_v28 = vadd.f32 %v5928_v24, %v5791_v22  ;;  %v6295_v24 = vpack.c.bf16 %v18560_v26, %v18422_v63 }
 0x655   :  { %v18513_v1 = vadd.f32 %v6082_v35, %v5956_v28  ;;  %6697 = vmatmul.bf16.gmra.mxu0 %v18266_v61  ;;  %6240 = vmatmul.bf16.gmra.mxu1 %v20793_v32  ;;  %v15206_v61 = vld [vmem:[%s20679_s4 + $0x8c0] sm:$0xff]  ;;  %v6595_v35 = vld [vmem:[#allocation2 + $0x131] sm:$0xff] }
 0x656   :  { %6830 = vmatpush.bf16.msrb.mxu1 %v15206_v61  ;;  %v6734_v61 = vld [vmem:[#allocation2 + $0x22] sm:$0xff]  ;;  %v6603_v63 = vpack.c.bf16 %v6595_v35, %v18418_v19 }
 0x658   :  { %v18519_v31 = vpop.f32.mrf.mxu2 }
 0x659   :  { %v18521_v9 = vpop.f32.mrf.mxu3 }
 0x65a   :  { %v18523_v10 = vpop.f32.mrf.mxu0  ;;  %v18525_v34 = vpop.f32.mrf.mxu1 }
 0x65d   :  { %6394 = vmatmul.bf16.gmra.mxu2 %v6293_v54 }
 0x65e   :  { %6548 = vmatmul.bf16.gmra.mxu3 %v18385_v3 }
 0x660   :  { %v5795_v43 = vpop.f32.mrf.mxu2 }
 0x661   :  { %v5933_v60 = vpop.f32.mrf.mxu3  ;;  %v5796_v55 = vadd.f32 %v5795_v43, %v5698_v6  ;;  %v6735_v6 = vld [vmem:[#allocation2 + $0x32] sm:$0xff] }
 0x662   :  { %v6087_v8 = vpop.f32.mrf.mxu0  ;;  %v5703_v7 = vpop.f32.mrf.mxu1 }
 0x663   :  { %v5958_v27 = vadd.f32 %v5933_v60, %v5796_v55 }
 0x665   :  { %v18533_v18 = vadd.f32 %v6087_v8, %v5958_v27  ;;  %6702 = vmatmul.bf16.gmra.mxu0 %v18348_v37  ;;  %6245 = vmatmul.bf16.gmra.mxu1 %v20794_v41  ;;  %v15228_v41 = vld [vmem:[%s20679_s4 + $0x970] sm:$0xff] }
 0x666   :  { %7125 = vmatpush.bf16.msrb.mxu2 %v15228_v41  ;;  %v6744_v41 = vld [vmem:[#allocation2 + $0xe2] sm:$0xff] }
 0x668   :  { %v18539_v4 = vpop.f32.mrf.mxu2 }
 0x669   :  { %v18541_v3 = vpop.f32.mrf.mxu3 }
 0x66a   :  { %v18543_v17 = vpop.f32.mrf.mxu0  ;;  %v18545_v25 = vpop.f32.mrf.mxu1 }
 0x66d   :  { %6399 = vmatmul.bf16.gmra.mxu2 %v6294_v62  ;;  %v6737_v62 = vld [vmem:[#allocation2 + $0x52] sm:$0xff] }
 0x66e   :  { %6553 = vmatmul.bf16.gmra.mxu3 %v18425_v11 }
 0x670   :  { %v5800_v36 = vpop.f32.mrf.mxu2 }
 0x671   :  { %v5938_v37 = vpop.f32.mrf.mxu3  ;;  %v5801_v23 = vadd.f32 %v5800_v36, %v5703_v7  ;;  %v6736_v36 = vld [vmem:[#allocation2 + $0x42] sm:$0xff] }
 0x672   :  { %v6092_v29 = vpop.f32.mrf.mxu0  ;;  %v5708_v47 = vpop.f32.mrf.mxu1 }
 0x673   :  { %v5960_v49 = vadd.f32 %v5938_v37, %v5801_v23  ;;  %v6751_v37 = vpack.c.bf16 %v6737_v62, %v6736_v36  ;;  %v15221_v36 = vld [vmem:[%s20679_s4 + $0x938] sm:$0xff] }
 0x674   :  { %7221 = vmatpush.bf16.msrb.mxu3 %v15221_v36 }
 0x675   :  { %v18550_v15 = vadd.f32 %v6092_v29, %v5960_v49  ;;  %6707 = vmatmul.bf16.gmra.mxu0 %v18412_v40  ;;  %6250 = vmatmul.bf16.gmra.mxu1 %v20795_v14  ;;  %v6449_v40 = vpack.c.bf16 %v18488_v57, %v18438_v12  ;;  %v6750_v12 = vpack.c.bf16 %v6735_v6, %v6734_v61  ;;  %v6738_v14 = vld [vmem:[#allocation2 + $0x62] sm:$0xff] }
 0x678   :  { %v18556_v56 = vpop.f32.mrf.mxu2 }
 0x679   :  { %v18558_v33 = vpop.f32.mrf.mxu3 }
 0x67a   :  { %v18562_v11 = vpop.f32.mrf.mxu0  ;;  %v18564_v50 = vpop.f32.mrf.mxu1 }
 0x67d   :  { %6404 = vmatmul.bf16.gmra.mxu2 %v6295_v24 }
 0x67e   :  { %6558 = vmatmul.bf16.gmra.mxu3 %v6449_v40 }
 0x680   :  { %v5805_v22 = vpop.f32.mrf.mxu2 }
 0x681   :  { %v5806_v28 = vadd.f32 %v5805_v22, %v5708_v47  ;;  %v5943_v32 = vpop.f32.mrf.mxu3  ;;  %v6739_v47 = vld [vmem:[#allocation2 + $0x72] sm:$0xff] }
 0x682   :  { %v6216_v54 = vpop.f32.mrf.mxu1  ;;  %v6097_v55 = vpop.f32.mrf.mxu0  ;;  %v6752_v40 = vpack.c.bf16 %v6739_v47, %v6738_v14  ;;  %v6741_v22 = vld [vmem:[#allocation2 + $0x92] sm:$0xff]  ;;  %v15223_v14 = vld [vmem:[%s20679_s4 + $0x948] sm:$0xff] }
 0x683   :  { %v5962_v43 = vadd.f32 %v5943_v32, %v5806_v28  ;;  %v18575_v60 = vadd.f32 %v6216_v54, %v18450_v2  ;;  %v6753_v28 = vpack.c.bf16 %v6741_v22, %v18484_v30  ;;  %v6743_v54 = vld [vmem:[#allocation2 + $0xd2] sm:$0xff] }
 0x684   :  { %v15224_v30 = vld [vmem:[%s20679_s4 + $0x950] sm:$0xff]  ;;  %v15245_v22 = vld [vmem:[%s20679_s4 + $0x9f8] sm:$0xff] }
 0x685   :  { %v18577_v8 = vadd.f32 %v6097_v55, %v5962_v43  ;;  %6712 = vmatmul.bf16.gmra.mxu0 %v6603_v63  ;;  %6831 = vmatmul.bf16.vlgmr.msrb.gmra.mxu1 %v6750_v12  ;;  %v6742_v43 = vld [vmem:[#allocation2 + $0xc2] sm:$0xff]  ;;  %v6745_v55 = vld [vmem:[#allocation2 + $0xf2] sm:$0xff] }
 0x686   :  { %v15220_v47 = vld [vmem:[%s20679_s4 + $0x930] sm:$0xff]  ;;  %7513 = vmatpush.bf16.msra.mxu1 %v15245_v22 }
 0x687   :  { %7222 = vmatpush.bf16.msrb.mxu3 %v15220_v47 }
 0x68a   :  { %v6218_v7 = vpop.f32.mrf.mxu1 }
 0x68b   :  { %v18580_v27 = vadd.f32 %v6218_v7, %v18458_v13  ;;  %v15227_v13 = vld [vmem:[%s20679_s4 + $0x968] sm:$0xff] }
 0x68c   :  { %7126 = vmatpush.bf16.msrb.mxu2 %v15227_v13 }
 0x692   :  { %v6221_v19 = vpop.f32.mrf.mxu1 }
 0x693   :  { %v18586_v2 = vadd.f32 %v6221_v19, %v18464_v59  ;;  %v6755_v19 = vpack.c.bf16 %v6745_v55, %v6744_v41  ;;  %v15243_v55 = vld [vmem:[%s20679_s4 + $0x9e8] sm:$0xff]  ;;  %v15216_v41 = vld [vmem:[%s20679_s4 + $0x910] sm:$0xff] }
 0x695   :  { %6836 = vmatmul.bf16.gmra.mxu1 %v6751_v37  ;;  %v15237_v37 = vld [vmem:[%s20679_s4 + $0x9b8] sm:$0xff] }
 0x696   :  { %7359 = vmatpush.bf16.msrb.mxu0 %v15237_v37  ;;  %v15242_v37 = vld [vmem:[%s20679_s4 + $0x9e0] sm:$0xff] }
 0x69a   :  { %v6223_v23 = vpop.f32.mrf.mxu1 }
 0x69b   :  { %v18589_v29 = vadd.f32 %v6223_v23, %v18472_v52  ;;  %v15226_v52 = vld [vmem:[%s20679_s4 + $0x960] sm:$0xff]  ;;  %v18634_v23 = vpop.f32.mrf.mxu0 }
 0x69c   :  { %7127 = vmatpush.bf16.msrb.mxu2 %v15226_v52  ;;  %v15235_v52 = vld [vmem:[%s20679_s4 + $0x9a8] sm:$0xff] }
 0x6a2   :  { %v6226_v49 = vpop.f32.mrf.mxu1 }
 0x6a3   :  { %v18595_v24 = vadd.f32 %v6226_v49, %v18478_v5  ;;  %v15236_v49 = vld [vmem:[%s20679_s4 + $0x9b0] sm:$0xff] }
 0x6a4   :  { %7360 = vmatpush.bf16.msrb.mxu0 %v15236_v49  ;;  %v15215_v49 = vld [vmem:[%s20679_s4 + $0x908] sm:$0xff] }
 0x6a5   :  { %6841 = vmatmul.bf16.gmra.mxu1 %v6752_v40 }
 0x6a8   :  { %7361 = vmatpush.bf16.msrb.mxu0 %v15235_v52  ;;  %v6749_v52 = vld [vmem:[#allocation2 + $0x132] sm:$0xff] }
 0x6aa   :  { %v6228_v59 = vpop.f32.mrf.mxu1 }
 0x6ab   :  { %v18598_v21 = vadd.f32 %v6228_v59, %v18492_v48  ;;  %v15225_v48 = vld [vmem:[%s20679_s4 + $0x958] sm:$0xff]  ;;  %v15219_v59 = vld [vmem:[%s20679_s4 + $0x928] sm:$0xff] }
 0x6ac   :  { %7128 = vmatpush.bf16.msrb.mxu2 %v15225_v48  ;;  %7223 = vmatpush.bf16.msrb.mxu3 %v15219_v59  ;;  %v15218_v48 = vld [vmem:[%s20679_s4 + $0x920] sm:$0xff]  ;;  %v15241_v59 = vld [vmem:[%s20679_s4 + $0x9d8] sm:$0xff] }
 0x6b0   :  { %7129 = vmatpush.bf16.msrb.mxu2 %v15224_v30  ;;  %7224 = vmatpush.bf16.msrb.mxu3 %v15218_v48  ;;  %v15233_v30 = vld [vmem:[%s20679_s4 + $0x998] sm:$0xff]  ;;  %v15214_v48 = vld [vmem:[%s20679_s4 + $0x900] sm:$0xff] }
 0x6b2   :  { %v6231_v35 = vpop.f32.mrf.mxu1 }
 0x6b3   :  { %v18604_v6 = vadd.f32 %v6231_v35, %v18498_v38  ;;  %v6754_v38 = vpack.c.bf16 %v6743_v54, %v6742_v43  ;;  %v6678_v35 = vpop.f32.mrf.mxu0  ;;  %v15234_v54 = vld [vmem:[%s20679_s4 + $0x9a0] sm:$0xff] }
 0x6b4   :  { %7130 = vmatpush.bf16.msrb.mxu2 %v15223_v14  ;;  %7362 = vmatpush.bf16.msrb.mxu0 %v15234_v54  ;;  %v15231_v14 = vld [vmem:[%s20679_s4 + $0x988] sm:$0xff]  ;;  %v15230_v54 = vld [vmem:[%s20679_s4 + $0x980] sm:$0xff] }
 0x6b5   :  { %6846 = vmatmul.bf16.gmra.mxu1 %v6753_v28 }
 0x6b8   :  { %7363 = vmatpush.bf16.msrb.mxu0 %v15233_v30  ;;  %v6757_v30 = vpack.c.bf16 %v6749_v52, %v18560_v26  ;;  %v15238_v26 = vld [vmem:[%s20679_s4 + $0x9c0] sm:$0xff] }
 0x6ba   :  { %v6233_v5 = vpop.f32.mrf.mxu1 }
 0x6bb   :  { %v18608_v32 = vadd.f32 %v6233_v5, %v18507_v16  ;;  %v18621_v16 = vpop.f32.mrf.mxu2  ;;  %v6680_v36 = vpop.f32.mrf.mxu0 }
 0x6c2   :  { %v6236_v61 = vpop.f32.mrf.mxu1 }
 0x6c3   :  { %v18614_v63 = vadd.f32 %v6236_v61, %v18513_v1  ;;  %v18626_v1 = vpop.f32.mrf.mxu3  ;;  %v18636_v13 = vpop.f32.mrf.mxu2  ;;  %v15244_v61 = vld [vmem:[%s20679_s4 + $0x9f0] sm:$0xff] }
 0x6c4   :  { %7514 = vmatpush.bf16.msra.mxu1 %v15244_v61  ;;  %v15240_v61 = vld [vmem:[%s20679_s4 + $0x9d0] sm:$0xff] }
 0x6c5   :  { %6851 = vmatmul.bf16.gmra.mxu1 %v6754_v38  ;;  %v15217_v38 = vld [vmem:[%s20679_s4 + $0x918] sm:$0xff] }
 0x6c6   :  { %7225 = vmatpush.bf16.msrb.mxu3 %v15217_v38 }
 0x6c8   :  { %7515 = vmatpush.bf16.msra.mxu1 %v15243_v55  ;;  %v6683_v55 = vpop.f32.mrf.mxu0 }
 0x6ca   :  { %v18616_v12 = vpop.f32.mrf.mxu1  ;;  %7226 = vmatpush.bf16.msrb.mxu3 %v15216_v41  ;;  %v15239_v41 = vld [vmem:[%s20679_s4 + $0x9c8] sm:$0xff] }
 0x6cb   :  { %v18649_v40 = vpop.f32.mrf.mxu3  ;;  %v6372_v28 = vpop.f32.mrf.mxu2 }
 0x6cc   :  { %7516 = vmatpush.bf16.msra.mxu1 %v15242_v37 }
 0x6ce   :  { %7227 = vmatpush.bf16.msrb.mxu3 %v15215_v49  ;;  %v15253_v49 = vld [vmem:[%s20679_s4 + $0xa38] sm:$0xff] }
 0x6d0   :  { %7517 = vmatpush.bf16.msra.mxu1 %v15241_v59  ;;  %v6685_v59 = vpop.f32.mrf.mxu0 }
 0x6d2   :  { %v6241_v7 = vpop.f32.mrf.mxu1  ;;  %7228 = vmatpush.bf16.msrb.mxu3 %v15214_v48 }
 0x6d3   :  { %v18624_v62 = vadd.f32 %v6241_v7, %v18533_v18  ;;  %v6526_v7 = vpop.f32.mrf.mxu3  ;;  %v6375_v47 = vpop.f32.mrf.mxu2 }
 0x6d4   :  { %7518 = vmatpush.bf16.msra.mxu1 %v15240_v61  ;;  %v18741_v61 = vld [vmem:[%s20680_s5 + $0x9] ss:$0 sm:$0xff] }
 0x6d5   :  { %6856 = vmatmul.bf16.gmra.mxu1 %v6755_v19  ;;  %v15232_v19 = vld [vmem:[%s20679_s4 + $0x990] sm:$0xff] }
 0x6d6   :  { %7364 = vmatpush.bf16.msrb.mxu0 %v15232_v19  ;;  %v6410_v19 = vadd.f32 %v18636_v13, %v18575_v60  ;;  %v6411_v60 = vadd.f32 %v6372_v28, %v18580_v27  ;;  %v18736_v13 = vld [vmem:[%s20680_s5 + $0x8] ss:$0 sm:$0xff]  ;;  %v6412_v27 = vadd.f32 %v6375_v47, %v18586_v2 }
 0x6d8   :  { %7519 = vmatpush.bf16.msra.mxu1 %v15239_v41  ;;  %v6688_v28 = vpop.f32.mrf.mxu0 }
 0x6da   :  { %v18638_v18 = vpop.f32.mrf.mxu1  ;;  %7365 = vmatpush.bf16.msrb.mxu0 %v15231_v14  ;;  %v6564_v14 = vadd.f32 %v18649_v40, %v6410_v19  ;;  %v6565_v40 = vadd.f32 %v6526_v7, %v6411_v60  ;;  %v15252_v60 = vld [vmem:[%s20679_s4 + $0xa30] sm:$0xff] }
 0x6db   :  { %v6529_v22 = vpop.f32.mrf.mxu3 }
 0x6dc   :  { %7520 = vmatpush.bf16.msra.mxu1 %v15238_v26  ;;  %v6719_v19 = vadd.f32 %v6680_v36, %v6565_v40  ;;  %v6566_v36 = vadd.f32 %v6529_v22, %v6412_v27 }
 0x6de   :  { %7366 = vmatpush.bf16.msrb.mxu0 %v15230_v54  ;;  %v6720_v40 = vadd.f32 %v6683_v55, %v6566_v36 }
 0x6e2   :  { %v6246_v5 = vpop.f32.mrf.mxu1 }
 0x6e3   :  { %v18670_v43 = vadd.f32 %v6246_v5, %v18550_v15 }
 0x6e5   :  { %6861 = vmatmul.bf16.gmra.mxu1 %v18429_v44  ;;  %v15222_v44 = vld [vmem:[%s20679_s4 + $0x940] sm:$0xff] }
 0x6e6   :  { %7131 = vmatpush.bf16.msrb.mxu2 %v15222_v44  ;;  %v6377_v44 = vpop.f32.mrf.mxu2 }
 0x6ea   :  { %v18682_v15 = vpop.f32.mrf.mxu1  ;;  %7667 = vmatpush.bf16.msra.mxu2 %v15253_v49  ;;  %v7035_v49 = vld [vmem:[#allocation2 + $0x1] sm:$0xff] }
 0x6ee   :  { %v6380_v52 = vpop.f32.mrf.mxu2  ;;  %7668 = vmatpush.bf16.msra.mxu2 %v15252_v60 }
 0x6f2   :  { %v6251_v5 = vpop.f32.mrf.mxu1 }
 0x6f3   :  { %v18715_v38 = vadd.f32 %v6251_v5, %v18577_v8  ;;  %v6531_v8 = vpop.f32.mrf.mxu3  ;;  %v6718_v5 = vadd.f32 %v6678_v35, %v6564_v14 }
 0x6f5   :  { %6866 = vmatmul.bf16.gmra.mxu1 %v6757_v30 }
 0x6f6   :  { %v6382_v14 = vpop.f32.mrf.mxu2 }
 0x6fa   :  { %v18723_v37 = vpop.f32.mrf.mxu1 }
 0x6fb   :  { %v6534_v41 = vpop.f32.mrf.mxu3 }
 0x702   :  { %v6832_v48 = vpop.f32.mrf.mxu1 }
 0x703   :  { %v6872_v54 = vadd.f32 %v6832_v48, %v6718_v5 }
 0x705   :  { %v6893_v30 = vmul.f32 %v18736_v13, %v6872_v54  ;;  %v6536_v54 = vpop.f32.mrf.mxu3 }
 0x707   :  { %v6914_v35 = vadd.f32 %v18741_v61, %v6893_v30  ;;  %v6413_v30 = vadd.f32 %v6377_v44, %v18589_v29 }
 0x709   :  { %vm6930_vm0 = vcmp.gt.f32.partialorder %v6914_v35, 0.0  ;;  %v6946_v26 = vmul.f32 0.1, %v6914_v35  ;;  %v6567_v44 = vadd.f32 %v6531_v8, %v6413_v30 }
 0x70a   :  { %v6834_v5 = vpop.f32.mrf.mxu1 }
 0x70b   :  { %v18746_v48 = vsel %vm6930_vm0, %v6914_v35, %v6946_v26  ;;  %v6873_v42 = vadd.f32 %v6834_v5, %v6719_v19  ;;  %v7270_v19 = vld [vmem:[#allocation2 + $0x2] sm:$0xff]  ;;  %v6721_v36 = vadd.f32 %v6685_v59, %v6567_v44  ;;  %v6415_v44 = vadd.f32 %v6382_v14, %v18598_v21 }
 0x70c   :  { %6978 = vst [vmem:[#allocation2 + $0x11] sm:$0xff] %v18746_v48  ;;  %v7051_v7 = vpack.c.bf16 %v18746_v48, %v7035_v49  ;;  %v6690_v49 = vpop.f32.mrf.mxu0  ;;  %v15251_v59 = vld [vmem:[%s20679_s4 + $0xa28] sm:$0xff] }
 0x70d   :  { %v6894_v2 = vmul.f32 %v18736_v13, %v6873_v42  ;;  %v6385_v42 = vpop.f32.mrf.mxu2  ;;  %7669 = vmatpush.bf16.msra.mxu2 %v15251_v59  ;;  %v6569_v14 = vadd.f32 %v6536_v54, %v6415_v44 }
 0x70e   :  { %7132 = vmatmul.bf16.vlgmr.msrb.gmra.mxu2 %v7051_v7 }
 0x70f   :  { %v6915_v47 = vadd.f32 %v18741_v61, %v6894_v2  ;;  %v6414_v2 = vadd.f32 %v6380_v52, %v18595_v24 }
 0x711   :  { %vm6931_vm2 = vcmp.gt.f32.partialorder %v6915_v47, 0.0  ;;  %v6947_v35 = vmul.f32 0.1, %v6915_v47  ;;  %v6568_v24 = vadd.f32 %v6534_v41, %v6414_v2 }
 0x712   :  { %v6837_v26 = vpop.f32.mrf.mxu1 }
 0x713   :  { %v18756_v5 = vsel %vm6931_vm2, %v6915_v47, %v6947_v35  ;;  %v6874_v0 = vadd.f32 %v6837_v26, %v6720_v40  ;;  %v6995_v46 = vld [vmem:[#allocation2 + $0x10] sm:$0xff]  ;;  %v6539_v40 = vpop.f32.mrf.mxu3 }
 0x714   :  { %v18758_v22 = vld [vmem:[#allocation2 + $0x12] sm:$0xff]  ;;  %6979 = vst [vmem:[#allocation2 + $0x21] sm:$0xff] %v18756_v5  ;;  %v7010_v27 = vpack.c.bf16 %v6995_v46, %v18488_v57  ;;  %v6693_v52 = vpop.f32.mrf.mxu0 }
 0x715   :  { %v7286_v55 = vpack.c.bf16 %v18758_v22, %v7270_v19  ;;  %v6895_v7 = vmul.f32 %v18736_v13, %v6874_v0 }
 0x716   :  { %7229 = vmatmul.bf16.vlgmr.msrb.gmra.mxu3 %v7010_v27  ;;  %v6387_v27 = vpop.f32.mrf.mxu2 }
 0x717   :  { %7367 = vmatmul.bf16.vlgmr.msrb.gmra.mxu0 %v7286_v55  ;;  %v6916_v60 = vadd.f32 %v18741_v61, %v6895_v7 }
 0x719   :  { %vm6932_vm3 = vcmp.gt.f32.partialorder %v6916_v60, 0.0  ;;  %v6948_v47 = vmul.f32 0.1, %v6916_v60 }
 0x71a   :  { %v6839_v35 = vpop.f32.mrf.mxu1 }
 0x71b   :  { %v18768_v26 = vsel %vm6932_vm3, %v6916_v60, %v6948_v47  ;;  %v6875_v19 = vadd.f32 %v6839_v35, %v6721_v36  ;;  %v7425_v45 = vld [vmem:[#allocation2 + $0x20] sm:$0xff] }
 0x71c   :  { %6980 = vst [vmem:[#allocation2 + $0x31] sm:$0xff] %v18768_v26  ;;  %v7440_v8 = vpack.c.bf16 %v7425_v45, %v6995_v46  ;;  %v18773_v0 = vpack.c.bf16 %v18768_v26, %v18756_v5  ;;  %v6722_v46 = vadd.f32 %v6688_v28, %v6568_v24  ;;  %v18784_v2 = vld [vmem:[#allocation2 + $0x22] sm:$0xff]  ;;  %v6695_v24 = vpop.f32.mrf.mxu0 }
 0x71d   :  { %v6896_v30 = vmul.f32 %v18736_v13, %v6875_v19  ;;  %v6541_v19 = vpop.f32.mrf.mxu3 }
 0x71e   :  { %7521 = vmatmul.bf16.vlgmr.msra.gmra.mxu1 %v7440_v8  ;;  %7137 = vmatmul.bf16.gmra.mxu2 %v18773_v0 }
 0x71f   :  { %v6917_v55 = vadd.f32 %v18741_v61, %v6896_v30 }
 0x721   :  { %vm6933_vm4 = vcmp.gt.f32.partialorder %v6917_v55, 0.0  ;;  %v6949_v7 = vmul.f32 0.1, %v6917_v55 }
 0x722   :  { %v6842_v60 = vpop.f32.mrf.mxu1 }
 0x723   :  { %v18782_v36 = vsel %vm6933_vm4, %v6917_v55, %v6949_v7  ;;  %v6876_v47 = vadd.f32 %v6842_v60, %v6722_v46  ;;  %v6997_v41 = vld [vmem:[#allocation2 + $0x30] sm:$0xff]  ;;  %v6390_v55 = vpop.f32.mrf.mxu2  ;;  %v6723_v46 = vadd.f32 %v6690_v49, %v6569_v14  ;;  %v15250_v49 = vld [vmem:[%s20679_s4 + $0xa20] sm:$0xff] }
 0x724   :  { %v18786_v35 = vld [vmem:[#allocation2 + $0x32] sm:$0xff]  ;;  %6981 = vst [vmem:[#allocation2 + $0x41] sm:$0xff] %v18782_v36  ;;  %v18789_v8 = vpack.c.bf16 %v6997_v41, %v7425_v45  ;;  %v6416_v45 = vadd.f32 %v6385_v42, %v18604_v6  ;;  %7670 = vmatpush.bf16.msra.mxu2 %v15250_v49 }
 0x725   :  { %v7287_v28 = vpack.c.bf16 %v18786_v35, %v18784_v2  ;;  %v6897_v59 = vmul.f32 %v18736_v13, %v6876_v47  ;;  %v6544_v42 = vpop.f32.mrf.mxu3 }
 0x726   :  { %7234 = vmatmul.bf16.gmra.mxu3 %v18789_v8  ;;  %v6570_v47 = vadd.f32 %v6539_v40, %v6416_v45 }
 0x727   :  { %7372 = vmatmul.bf16.gmra.mxu0 %v7287_v28  ;;  %v6918_v30 = vadd.f32 %v18741_v61, %v6897_v59  ;;  %v6698_v59 = vpop.f32.mrf.mxu0 }
 0x728   :  { %v6724_v14 = vadd.f32 %v6693_v52, %v6570_v47 }
 0x729   :  { %vm6934_vm5 = vcmp.gt.f32.partialorder %v6918_v30, 0.0  ;;  %v6950_v7 = vmul.f32 0.1, %v6918_v30 }
 0x72a   :  { %v6844_v60 = vpop.f32.mrf.mxu1 }
 0x72b   :  { %v18799_v29 = vsel %vm6934_vm5, %v6918_v30, %v6950_v7  ;;  %v6877_v53 = vadd.f32 %v6844_v60, %v6723_v46  ;;  %v7427_v21 = vld [vmem:[#allocation2 + $0x40] sm:$0xff]  ;;  %v6392_v46 = vpop.f32.mrf.mxu2 }
 0x72c   :  { %6982 = vst [vmem:[#allocation2 + $0x51] sm:$0xff] %v18799_v29  ;;  %v7441_v54 = vpack.c.bf16 %v7427_v21, %v6997_v41  ;;  %v18804_v44 = vpack.c.bf16 %v18799_v29, %v18782_v36  ;;  %v6417_v41 = vadd.f32 %v6387_v27, %v18608_v32 }
 0x72d   :  { %v6898_v6 = vmul.f32 %v18736_v13, %v6877_v53  ;;  %v18815_v53 = vld [vmem:[#allocation2 + $0x42] sm:$0xff] }
 0x72e   :  { %7526 = vmatmul.bf16.gmra.mxu1 %v7441_v54  ;;  %7142 = vmatmul.bf16.gmra.mxu2 %v18804_v44  ;;  %v6571_v49 = vadd.f32 %v6541_v19, %v6417_v41 }
 0x72f   :  { %v6919_v28 = vadd.f32 %v18741_v61, %v6898_v6  ;;  %v5793_v6 = vadd.f32 %v18519_v31, %v18503_v58  ;;  %v6546_v31 = vpop.f32.mrf.mxu3  ;;  %v6700_v20 = vpop.f32.mrf.mxu0 }
 0x731   :  { %vm6935_vm6 = vcmp.gt.f32.partialorder %v6919_v28, 0.0  ;;  %v6951_v30 = vmul.f32 0.1, %v6919_v28  ;;  %v5957_v58 = vadd.f32 %v18521_v9, %v5793_v6  ;;  %v15249_v9 = vld [vmem:[%s20679_s4 + $0xa18] sm:$0xff] }
 0x732   :  { %v6847_v7 = vpop.f32.mrf.mxu1  ;;  %7671 = vmatpush.bf16.msra.mxu2 %v15249_v9 }
 0x733   :  { %v18813_v60 = vsel %vm6935_vm6, %v6919_v28, %v6951_v30  ;;  %v6878_v40 = vadd.f32 %v6847_v7, %v6724_v14  ;;  %v6999_v45 = vld [vmem:[#allocation2 + $0x50] sm:$0xff]  ;;  %v6725_v14 = vadd.f32 %v6695_v24, %v6571_v49 }
 0x734   :  { %v18817_v54 = vld [vmem:[#allocation2 + $0x52] sm:$0xff]  ;;  %6983 = vst [vmem:[#allocation2 + $0x61] sm:$0xff] %v18813_v60  ;;  %v18822_v52 = vpack.c.bf16 %v6999_v45, %v7427_v21  ;;  %v6418_v21 = vadd.f32 %v6390_v55, %v18614_v63  ;;  %v6111_v63 = vadd.f32 %v18523_v10, %v5957_v58 }
 0x735   :  { %v7288_v32 = vpack.c.bf16 %v18817_v54, %v18815_v53  ;;  %v6899_v47 = vmul.f32 %v18736_v13, %v6878_v40  ;;  %v6395_v40 = vpop.f32.mrf.mxu2 }
 0x736   :  { %7239 = vmatmul.bf16.gmra.mxu3 %v18822_v52  ;;  %v6572_v24 = vadd.f32 %v6544_v42, %v6418_v21  ;;  %v6265_v6 = vadd.f32 %v18616_v12, %v6111_v63  ;;  %v5798_v12 = vadd.f32 %v18539_v4, %v18525_v34 }
 0x737   :  { %7377 = vmatmul.bf16.gmra.mxu0 %v7288_v32  ;;  %v6920_v28 = vadd.f32 %v18741_v61, %v6899_v47  ;;  %v6703_v9 = vpop.f32.mrf.mxu0 }
 0x738   :  { %v6726_v49 = vadd.f32 %v6698_v59, %v6572_v24  ;;  %v5959_v4 = vadd.f32 %v18541_v3, %v5798_v12 }
 0x739   :  { %vm6936_vm7 = vcmp.gt.f32.partialorder %v6920_v28, 0.0  ;;  %v6952_v30 = vmul.f32 0.1, %v6920_v28 }
 0x73a   :  { %v6849_v7 = vpop.f32.mrf.mxu1  ;;  %v6113_v3 = vadd.f32 %v18543_v17, %v5959_v4 }
 0x73b   :  { %v18833_v51 = vsel %vm6936_vm7, %v6920_v28, %v6952_v30  ;;  %v6879_v19 = vadd.f32 %v6849_v7, %v6725_v14  ;;  %v7429_v41 = vld [vmem:[#allocation2 + $0x60] sm:$0xff]  ;;  %v6419_v28 = vadd.f32 %v6392_v46, %v6265_v6  ;;  %v6549_v30 = vpop.f32.mrf.mxu3 }
 0x73c   :  { %6984 = vst [vmem:[#allocation2 + $0x71] sm:$0xff] %v18833_v51  ;;  %v7442_v32 = vpack.c.bf16 %v7429_v41, %v6999_v45  ;;  %v18838_v47 = vpack.c.bf16 %v18833_v51, %v18813_v60  ;;  %v18850_v58 = vld [vmem:[#allocation2 + $0x62] sm:$0xff]  ;;  %v6267_v12 = vadd.f32 %v18638_v18, %v6113_v3  ;;  %v5803_v18 = vadd.f32 %v18556_v56, %v18545_v25  ;;  %v15269_v25 = vld [vmem:[%s20679_s4 + $0xab8] sm:$0xff] }
 0x73d   :  { %v6900_v55 = vmul.f32 %v18736_v13, %v6879_v19  ;;  %v6397_v24 = vpop.f32.mrf.mxu2  ;;  %7975 = vmatpush.bf16.msra.mxu0 %v15269_v25 }
 0x73e   :  { %7531 = vmatmul.bf16.gmra.mxu1 %v7442_v32  ;;  %7147 = vmatmul.bf16.gmra.mxu2 %v18838_v47  ;;  %v6573_v32 = vadd.f32 %v6546_v31, %v6419_v28  ;;  %v5961_v56 = vadd.f32 %v18558_v33, %v5803_v18 }
 0x73f   :  { %v6921_v45 = vadd.f32 %v18741_v61, %v6900_v55  ;;  %v6420_v55 = vadd.f32 %v6395_v40, %v18624_v62 }
 0x741   :  { %vm6937_vm8 = vcmp.gt.f32.partialorder %v6921_v45, 0.0  ;;  %v6953_v14 = vmul.f32 0.1, %v6921_v45  ;;  %v6574_v62 = vadd.f32 %v6549_v30, %v6420_v55 }
 0x742   :  { %v6852_v7 = vpop.f32.mrf.mxu1 }
 0x743   :  { %v18848_v27 = vsel %vm6937_vm8, %v6921_v45, %v6953_v14  ;;  %v6880_v10 = vadd.f32 %v6852_v7, %v6726_v49  ;;  %v7001_v42 = vld [vmem:[#allocation2 + $0x70] sm:$0xff]  ;;  %v7043_v45 = vld [vmem:[#allocation2 + $0xa1] sm:$0xff]  ;;  %v6551_v7 = vpop.f32.mrf.mxu3 }
 0x744   :  { %v18852_v21 = vld [vmem:[#allocation2 + $0x72] sm:$0xff]  ;;  %6985 = vst [vmem:[#allocation2 + $0x81] sm:$0xff] %v18848_v27  ;;  %v18857_v19 = vpack.c.bf16 %v7001_v42, %v7429_v41  ;;  %v6727_v41 = vadd.f32 %v6700_v20, %v6573_v32  ;;  %v6705_v32 = vpop.f32.mrf.mxu0 }
 0x745   :  { %v7289_v59 = vpack.c.bf16 %v18852_v21, %v18850_v58  ;;  %v6901_v63 = vmul.f32 %v18736_v13, %v6880_v10  ;;  %v15248_v20 = vld [vmem:[%s20679_s4 + $0xa10] sm:$0xff] }
 0x746   :  { %7244 = vmatmul.bf16.gmra.mxu3 %v18857_v19  ;;  %7672 = vmatpush.bf16.msra.mxu2 %v15248_v20  ;;  %v15261_v20 = vld [vmem:[%s20679_s4 + $0xa78] sm:$0xff] }
 0x747   :  { %7382 = vmatmul.bf16.gmra.mxu0 %v7289_v59  ;;  %v6922_v34 = vadd.f32 %v18741_v61, %v6901_v63  ;;  %7821 = vmatpush.bf16.msra.mxu3 %v15261_v20 }
 0x749   :  { %vm6938_vm9 = vcmp.gt.f32.partialorder %v6922_v34, 0.0  ;;  %v6954_v6 = vmul.f32 0.1, %v6922_v34 }
 0x74a   :  { %v6854_v49 = vpop.f32.mrf.mxu1 }
 0x74b   :  { %v18868_v14 = vsel %vm6938_vm9, %v6922_v34, %v6954_v6  ;;  %v6881_v31 = vadd.f32 %v6854_v49, %v6727_v41  ;;  %v18870_v28 = vld [vmem:[#allocation2 + $0x80] sm:$0xff]  ;;  %v6728_v34 = vadd.f32 %v6703_v9, %v6574_v62  ;;  %v6421_v41 = vadd.f32 %v6397_v24, %v6267_v12 }
 0x74c   :  { %6986 = vst [vmem:[#allocation2 + $0xb1] sm:$0xff] %v18868_v14  ;;  %v7443_v10 = vpack.c.bf16 %v18870_v28, %v7001_v42  ;;  %v7055_v59 = vpack.c.bf16 %v18868_v14, %v7043_v45  ;;  %v6400_v42 = vpop.f32.mrf.mxu2  ;;  %v7278_v45 = vld [vmem:[#allocation2 + $0xa2] sm:$0xff]  ;;  %v6708_v62 = vpop.f32.mrf.mxu0 }
 0x74d   :  { %v6902_v40 = vmul.f32 %v18736_v13, %v6881_v31  ;;  %v6575_v31 = vadd.f32 %v6551_v7, %v6421_v41  ;;  %v6422_v3 = vadd.f32 %v6400_v42, %v18670_v43  ;;  %v15268_v41 = vld [vmem:[%s20679_s4 + $0xab0] sm:$0xff]  ;;  %v15247_v42 = vld [vmem:[%s20679_s4 + $0xa08] sm:$0xff] }
 0x74e   :  { %7536 = vmatmul.bf16.gmra.mxu1 %v7443_v10  ;;  %7152 = vmatmul.bf16.gmra.mxu2 %v7055_v59  ;;  %v6554_v59 = vpop.f32.mrf.mxu3 }
 0x74f   :  { %v6923_v63 = vadd.f32 %v18741_v61, %v6902_v40  ;;  %v6729_v7 = vadd.f32 %v6705_v32, %v6575_v31  ;;  %7976 = vmatpush.bf16.msra.mxu0 %v15268_v41  ;;  %7673 = vmatpush.bf16.msra.mxu2 %v15247_v42 }
 0x751   :  { %vm6939_vm10 = vcmp.gt.f32.partialorder %v6923_v63, 0.0  ;;  %v6955_v6 = vmul.f32 0.1, %v6923_v63 }
 0x752   :  { %v6857_v49 = vpop.f32.mrf.mxu1 }
 0x753   :  { %v18882_v46 = vsel %vm6939_vm10, %v6923_v63, %v6955_v6  ;;  %v6882_v17 = vadd.f32 %v6857_v49, %v6728_v34  ;;  %v7003_v30 = vld [vmem:[#allocation2 + $0xb0] sm:$0xff]  ;;  %v6115_v49 = vadd.f32 %v18562_v11, %v5961_v56  ;;  %v15258_v56 = vld [vmem:[%s20679_s4 + $0xa60] sm:$0xff] }
 0x754   :  { %v18884_v4 = vld [vmem:[#allocation2 + $0xb2] sm:$0xff]  ;;  %6987 = vst [vmem:[#allocation2 + $0xc1] sm:$0xff] %v18882_v46  ;;  %v7014_v55 = vpack.c.bf16 %v7003_v30, %v18488_v57  ;;  %v7598_v24 = vpack.c.bf16 %v18882_v46, %v18868_v14  ;;  %v6402_v12 = vpop.f32.mrf.mxu2  ;;  %v6710_v41 = vpop.f32.mrf.mxu0 }
 0x755   :  { %v7290_v9 = vpack.c.bf16 %v18884_v4, %v7278_v45  ;;  %v6903_v10 = vmul.f32 %v18736_v13, %v6882_v17  ;;  %v15260_v34 = vld [vmem:[%s20679_s4 + $0xa70] sm:$0xff]  ;;  %v6576_v17 = vadd.f32 %v6554_v59, %v6422_v3  ;;  %v6269_v11 = vadd.f32 %v18682_v15, %v6115_v49  ;;  %v15266_v15 = vld [vmem:[%s20679_s4 + $0xaa0] sm:$0xff] }
 0x756   :  { %7249 = vmatmul.bf16.gmra.mxu3 %v7014_v55  ;;  %v15267_v55 = vld [vmem:[%s20679_s4 + $0xaa8] sm:$0xff]  ;;  %v5808_v3 = vadd.f32 %v18621_v16, %v18564_v50 }
 0x757   :  { %7387 = vmatmul.bf16.gmra.mxu0 %v7290_v9  ;;  %v6924_v57 = vadd.f32 %v18741_v61, %v6903_v10  ;;  %7822 = vmatpush.bf16.msra.mxu3 %v15260_v34  ;;  %v15277_v9 = vld [vmem:[%s20679_s4 + $0xaf8] sm:$0xff]  ;;  %v6556_v10 = vpop.f32.mrf.mxu3  ;;  %v6730_v59 = vadd.f32 %v6708_v62, %v6576_v17  ;;  %v6423_v20 = vadd.f32 %v6402_v12, %v6269_v11  ;;  %v15256_v11 = vld [vmem:[%s20679_s4 + $0xa50] sm:$0xff] }
 0x758   :  { %7977 = vmatpush.bf16.msra.mxu0 %v15267_v55  ;;  %8129 = vmatpush.bf16.msrb.mxu1 %v15277_v9  ;;  %v15257_v17 = vld [vmem:[%s20679_s4 + $0xa58] sm:$0xff]  ;;  %v15275_v55 = vld [vmem:[%s20679_s4 + $0xae8] sm:$0xff]  ;;  %v5963_v9 = vadd.f32 %v18626_v1, %v5808_v3  ;;  %v15274_v1 = vld [vmem:[%s20679_s4 + $0xae0] sm:$0xff] }
 0x759   :  { %vm6940_vm11 = vcmp.gt.f32.partialorder %v6924_v57, 0.0  ;;  %v6956_v40 = vmul.f32 0.1, %v6924_v57  ;;  %v6577_v16 = vadd.f32 %v6556_v10, %v6423_v20  ;;  %v15264_v20 = vld [vmem:[%s20679_s4 + $0xa90] sm:$0xff] }
 0x75a   :  { %v6859_v63 = vpop.f32.mrf.mxu1 }
 0x75b   :  { %v18909_v6 = vsel %vm6940_vm11, %v6924_v57, %v6956_v40  ;;  %v6883_v33 = vadd.f32 %v6859_v63, %v6729_v7  ;;  %v7433_v45 = vld [vmem:[#allocation2 + $0xc0] sm:$0xff]  ;;  %v15276_v7 = vld [vmem:[%s20679_s4 + $0xaf0] sm:$0xff] }
 0x75c   :  { %6988 = vst [vmem:[#allocation2 + $0xd1] sm:$0xff] %v18909_v6  ;;  %v7444_v43 = vpack.c.bf16 %v7433_v45, %v7003_v30  ;;  %v18914_v32 = vpack.c.bf16 %v18909_v6, %v18882_v46  ;;  %v15259_v30 = vld [vmem:[%s20679_s4 + $0xa68] sm:$0xff]  ;;  %7978 = vmatpush.bf16.msra.mxu0 %v15266_v15  ;;  %8130 = vmatpush.bf16.msrb.mxu1 %v15276_v7 }
 0x75d   :  { %v6904_v18 = vmul.f32 %v18736_v13, %v6883_v33  ;;  %7823 = vmatpush.bf16.msra.mxu3 %v15259_v30  ;;  %v18946_v63 = vld [vmem:[#allocation2 + $0xc2] sm:$0xff]  ;;  %v6405_v33 = vpop.f32.mrf.mxu2 }
 0x75e   :  { %7541 = vmatmul.bf16.gmra.mxu1 %v7444_v43  ;;  %7157 = vmatmul.bf16.gmra.mxu2 %v18914_v32  ;;  %v6424_v10 = vadd.f32 %v6405_v33, %v18715_v38 }
 0x75f   :  { %v6925_v31 = vadd.f32 %v18741_v61, %v6904_v18  ;;  %v15265_v18 = vld [vmem:[%s20679_s4 + $0xa98] sm:$0xff] }
 0x760   :  { %7979 = vmatpush.bf16.msra.mxu0 %v15265_v18  ;;  %8131 = vmatpush.bf16.msrb.mxu1 %v15275_v55 }
 0x761   :  { %vm6941_vm12 = vcmp.gt.f32.partialorder %v6925_v31, 0.0  ;;  %v6957_v25 = vmul.f32 0.1, %v6925_v31  ;;  %7824 = vmatpush.bf16.msra.mxu3 %v15258_v56 }
 0x762   :  { %v6862_v57 = vpop.f32.mrf.mxu1 }
 0x763   :  { %v18944_v62 = vsel %vm6941_vm12, %v6925_v31, %v6957_v25  ;;  %v6884_v40 = vadd.f32 %v6862_v57, %v6730_v59  ;;  %v7005_v12 = vld [vmem:[#allocation2 + $0xd0] sm:$0xff]  ;;  %v6731_v31 = vadd.f32 %v6710_v41, %v6577_v16  ;;  %v6559_v25 = vpop.f32.mrf.mxu3 }
 0x764   :  { %v18948_v34 = vld [vmem:[#allocation2 + $0xd2] sm:$0xff]  ;;  %6989 = vst [vmem:[#allocation2 + $0xe1] sm:$0xff] %v18944_v62  ;;  %v18951_v43 = vpack.c.bf16 %v7005_v12, %v7433_v45  ;;  %v7599_v50 = vpack.c.bf16 %v18944_v62, %v18909_v6  ;;  %v15246_v45 = vld [vmem:[%s20679_s4 + $0xa00] sm:$0xff]  ;;  %v6578_v41 = vadd.f32 %v6559_v25, %v6424_v10  ;;  %7980 = vmatpush.bf16.msra.mxu0 %v15264_v20 }
 0x765   :  { %v7291_v42 = vpack.c.bf16 %v18948_v34, %v18946_v63  ;;  %v6905_v49 = vmul.f32 %v18736_v13, %v6884_v40  ;;  %7674 = vmatpush.bf16.msra.mxu2 %v15246_v45  ;;  %7825 = vmatpush.bf16.msra.mxu3 %v15257_v17  ;;  %v6117_v40 = vadd.f32 %v18634_v23, %v5963_v9  ;;  %v6407_v16 = vpop.f32.mrf.mxu2  ;;  %v15273_v23 = vld [vmem:[%s20679_s4 + $0xad8] sm:$0xff] }
 0x766   :  { %7254 = vmatmul.bf16.gmra.mxu3 %v18951_v43  ;;  %8132 = vmatpush.bf16.msrb.mxu1 %v15274_v1 }
 0x767   :  { %7392 = vmatmul.bf16.gmra.mxu0 %v7291_v42  ;;  %v6926_v30 = vadd.f32 %v18741_v61, %v6905_v49  ;;  %v6713_v42 = vpop.f32.mrf.mxu0  ;;  %v15263_v49 = vld [vmem:[%s20679_s4 + $0xa88] sm:$0xff]  ;;  %v6271_v45 = vadd.f32 %v18723_v37, %v6117_v40  ;;  %v15272_v37 = vld [vmem:[%s20679_s4 + $0xad0] sm:$0xff] }
 0x768   :  { %v6732_v18 = vadd.f32 %v6713_v42, %v6578_v41  ;;  %7981 = vmatpush.bf16.msra.mxu0 %v15263_v49  ;;  %v15271_v42 = vld [vmem:[%s20679_s4 + $0xac8] sm:$0xff] }
 0x769   :  { %vm6942_vm13 = vcmp.gt.f32.partialorder %v6926_v30, 0.0  ;;  %v6958_v59 = vmul.f32 0.1, %v6926_v30  ;;  %7826 = vmatpush.bf16.msra.mxu3 %v15256_v11  ;;  %v15254_v11 = vld [vmem:[%s20679_s4 + $0xa40] sm:$0xff] }
 0x76a   :  { %v6864_v57 = vpop.f32.mrf.mxu1  ;;  %8133 = vmatpush.bf16.msrb.mxu1 %v15273_v23 }
 0x76b   :  { %v18983_v56 = vsel %vm6942_vm13, %v6926_v30, %v6958_v59  ;;  %v6885_v15 = vadd.f32 %v6864_v57, %v6731_v31  ;;  %v7435_v7 = vld [vmem:[#allocation2 + $0xe0] sm:$0xff]  ;;  %v6425_v30 = vadd.f32 %v6407_v16, %v6271_v45  ;;  %v6561_v57 = vpop.f32.mrf.mxu3 }
 0x76c   :  { %6990 = vst [vmem:[#allocation2 + $0xf1] sm:$0xff] %v18983_v56  ;;  %v7445_v38 = vpack.c.bf16 %v7435_v7, %v7005_v12  ;;  %v18988_v3 = vpack.c.bf16 %v18983_v56, %v18944_v62  ;;  %v15255_v12 = vld [vmem:[%s20679_s4 + $0xa48] sm:$0xff]  ;;  %v15262_v31 = vld [vmem:[%s20679_s4 + $0xa80] sm:$0xff] }
 0x76d   :  { %v6906_v33 = vmul.f32 %v18736_v13, %v6885_v15  ;;  %7827 = vmatpush.bf16.msra.mxu3 %v15255_v12  ;;  %v19015_v1 = vld [vmem:[#allocation2 + $0xe2] sm:$0xff]  ;;  %v6579_v41 = vadd.f32 %v6561_v57, %v6425_v30  ;;  %7982 = vmatpush.bf16.msra.mxu0 %v15262_v31 }
 0x76e   :  { %7546 = vmatmul.bf16.gmra.mxu1 %v7445_v38  ;;  %7162 = vmatmul.bf16.gmra.mxu2 %v18988_v3 }
 0x76f   :  { %v6927_v17 = vadd.f32 %v18741_v61, %v6906_v33  ;;  %8134 = vmatpush.bf16.msrb.mxu1 %v15272_v37  ;;  %v6715_v12 = vpop.f32.mrf.mxu0 }
 0x770   :  { %v6733_v49 = vadd.f32 %v6715_v12, %v6579_v41  ;;  %v20796_v12 = vpack.c.bf16 %v18756_v5, %v18746_v48 }
 0x771   :  { %vm6943_vm14 = vcmp.gt.f32.partialorder %v6927_v17, 0.0  ;;  %v6959_v55 = vmul.f32 0.1, %v6927_v17  ;;  %7828 = vmatpush.bf16.msra.mxu3 %v15254_v11 }
 0x772   :  { %v6867_v9 = vpop.f32.mrf.mxu1 }
 0x773   :  { %v19013_v10 = vsel %vm6943_vm14, %v6927_v17, %v6959_v55  ;;  %v6886_v59 = vadd.f32 %v6867_v9, %v6732_v18  ;;  %v7007_v20 = vld [vmem:[#allocation2 + $0xf0] sm:$0xff]  ;;  %8135 = vmatpush.bf16.msrb.mxu1 %v15271_v42  ;;  %v15270_v17 = vld [vmem:[%s20679_s4 + $0xac0] sm:$0xff] }
 0x774   :  { %v19017_v25 = vld [vmem:[#allocation2 + $0xf2] sm:$0xff]  ;;  %6991 = vst [vmem:[#allocation2 + $0x101] sm:$0xff] %v19013_v10  ;;  %v19020_v15 = vpack.c.bf16 %v7007_v20, %v7435_v7  ;;  %v7600_v40 = vpack.c.bf16 %v19013_v10, %v18983_v56 }
 0x775   :  { %v7292_v38 = vpack.c.bf16 %v19017_v25, %v19015_v1  ;;  %v6907_v33 = vmul.f32 %v18736_v13, %v6886_v59  ;;  %v15285_v7 = vld [vmem:[%s20679_s4 + $0xb38] sm:$0xff] }
 0x776   :  { %7259 = vmatmul.bf16.gmra.mxu3 %v19020_v15  ;;  %8283 = vmatpush.bf16.msrb.mxu2 %v15285_v7  ;;  %v15284_v7 = vld [vmem:[%s20679_s4 + $0xb30] sm:$0xff] }
 0x777   :  { %7397 = vmatmul.bf16.gmra.mxu0 %v7292_v38  ;;  %v6928_v16 = vadd.f32 %v18741_v61, %v6907_v33  ;;  %8136 = vmatpush.bf16.msrb.mxu1 %v15270_v17  ;;  %v15283_v17 = vld [vmem:[%s20679_s4 + $0xb28] sm:$0xff] }
 0x779   :  { %vm6944_vm15 = vcmp.gt.f32.partialorder %v6928_v16, 0.0  ;;  %v6960_v23 = vmul.f32 0.1, %v6928_v16 }
 0x77a   :  { %v6869_v45 = vpop.f32.mrf.mxu1  ;;  %8284 = vmatpush.bf16.msrb.mxu2 %v15284_v7 }
 0x77b   :  { %v19038_v18 = vsel %vm6944_vm15, %v6928_v16, %v6960_v23  ;;  %v6887_v30 = vadd.f32 %v6869_v45, %v6733_v49  ;;  %v7437_v55 = vld [vmem:[#allocation2 + $0x100] sm:$0xff]  ;;  %v7748_v45 = vpack.c.bf16 %v18784_v2, %v18758_v22  ;;  %v20797_v22 = vpack.c.bf16 %v18782_v36, %v18768_v26 }
 0x77c   :  { %6992 = vst [vmem:[#allocation2 + $0x111] sm:$0xff] %v19038_v18  ;;  %v7446_v9 = vpack.c.bf16 %v7437_v55, %v7007_v20  ;;  %v19043_v11 = vpack.c.bf16 %v19038_v18, %v19013_v10  ;;  %v19050_v41 = vld [vmem:[#allocation2 + $0x102] sm:$0xff] }
 0x77d   :  { %v6908_v31 = vmul.f32 %v18736_v13, %v6887_v30 }
 0x77e   :  { %7551 = vmatmul.bf16.gmra.mxu1 %v7446_v9  ;;  %7167 = vmatmul.bf16.gmra.mxu2 %v19043_v11 }
 0x77f   :  { %v6929_v37 = vadd.f32 %v18741_v61, %v6908_v31  ;;  %8285 = vmatpush.bf16.msrb.mxu2 %v15283_v17 }
 0x781   :  { %vm6945_vm1 = vcmp.gt.f32.partialorder %v6929_v37, 0.0  ;;  %v6961_v59 = vmul.f32 0.1, %v6929_v37 }
 0x783   :  { %v19048_v57 = vsel %vm6945_vm1, %v6929_v37, %v6961_v59  ;;  %v7009_v38 = vld [vmem:[#allocation2 + $0x110] sm:$0xff] }
 0x784   :  { %v19052_v20 = vld [vmem:[#allocation2 + $0x112] sm:$0xff]  ;;  %6993 = vst [vmem:[#allocation2 + $0x121] sm:$0xff] %v19048_v57  ;;  %v19055_v33 = vpack.c.bf16 %v7009_v38, %v7437_v55  ;;  %v7601_v61 = vpack.c.bf16 %v19048_v57, %v19038_v18 }
 0x785   :  { %v19059_v13 = vpack.c.bf16 %v19052_v20, %v19050_v41  ;;  %v8055_v18 = vld [vmem:[#allocation2 + $0x131] sm:$0xff] }
 0x786   :  { %7264 = vmatmul.bf16.gmra.mxu3 %v19055_v33 }
 0x787   :  { %7402 = vmatmul.bf16.gmra.mxu0 %v19059_v13 }
 0x78b   :  { %v19068_v42 = vld [vmem:[#allocation2 + $0x120] sm:$0xff] }
 0x78c   :  { %v7447_v16 = vpack.c.bf16 %v19068_v42, %v7009_v38 }
 0x78e   :  { %7556 = vmatmul.bf16.gmra.mxu1 %v7447_v16  ;;  %7675 = vmatmul.bf16.vlgmr.msra.gmra.mxu2 %v20796_v12  ;;  %v7749_v12 = vpack.c.bf16 %v18815_v53, %v18786_v35  ;;  %v20798_v35 = vpack.c.bf16 %v18813_v60, %v18799_v29 }
 0x791   :  { %v7133_v49 = vpop.f32.mrf.mxu2 }
 0x794   :  { %v7368_v23 = vpop.f32.mrf.mxu0 }
 0x796   :  { %7829 = vmatmul.bf16.vlgmr.msra.gmra.mxu3 %v7748_v45 }
 0x797   :  { %7983 = vmatmul.bf16.vlgmr.msra.gmra.mxu0 %v18789_v8 }
 0x799   :  { %v7230_v30 = vpop.f32.mrf.mxu3  ;;  %v7135_v55 = vpop.f32.mrf.mxu2 }
 0x79a   :  { %v7231_v9 = vadd.f32 %v7230_v30, %v7133_v49 }
 0x79b   :  { %v7522_v37 = vpop.f32.mrf.mxu1 }
 0x79c   :  { %v7370_v31 = vpop.f32.mrf.mxu0  ;;  %v7408_v48 = vadd.f32 %v7368_v23, %v7231_v9 }
 0x79e   :  { %v19080_v5 = vadd.f32 %v7522_v37, %v7408_v48  ;;  %8137 = vmatmul.bf16.vlgmr.msrb.gmra.mxu1 %v18773_v0  ;;  %7680 = vmatmul.bf16.gmra.mxu2 %v20797_v22  ;;  %v15282_v0 = vld [vmem:[%s20679_s4 + $0xb20] sm:$0xff]  ;;  %v7750_v22 = vpack.c.bf16 %v18850_v58, %v18817_v54  ;;  %v20799_v54 = vpack.c.bf16 %v18848_v27, %v18833_v51  ;;  %v15280_v51 = vld [vmem:[%s20679_s4 + $0xb10] sm:$0xff] }
 0x79f   :  { %8286 = vmatpush.bf16.msrb.mxu2 %v15282_v0 }
 0x7a1   :  { %v7232_v2 = vpop.f32.mrf.mxu3  ;;  %v7138_v8 = vpop.f32.mrf.mxu2 }
 0x7a2   :  { %v7233_v59 = vadd.f32 %v7232_v2, %v7135_v55 }
 0x7a3   :  { %v7524_v7 = vpop.f32.mrf.mxu1 }
 0x7a4   :  { %v7373_v38 = vpop.f32.mrf.mxu0  ;;  %v7409_v16 = vadd.f32 %v7370_v31, %v7233_v59 }
 0x7a6   :  { %v19088_v49 = vadd.f32 %v7524_v7, %v7409_v16  ;;  %7834 = vmatmul.bf16.gmra.mxu3 %v7749_v12 }
 0x7a7   :  { %7988 = vmatmul.bf16.gmra.mxu0 %v18822_v52 }
 0x7a9   :  { %v7235_v26 = vpop.f32.mrf.mxu3  ;;  %v7140_v36 = vpop.f32.mrf.mxu2 }
 0x7aa   :  { %v7236_v23 = vadd.f32 %v7235_v26, %v7138_v8 }
 0x7ab   :  { %v7527_v17 = vpop.f32.mrf.mxu1 }
 0x7ac   :  { %v7375_v45 = vpop.f32.mrf.mxu0  ;;  %v7410_v30 = vadd.f32 %v7373_v38, %v7236_v23 }
 0x7ae   :  { %v19094_v55 = vadd.f32 %v7527_v17, %v7410_v30  ;;  %8142 = vmatmul.bf16.gmra.mxu1 %v18804_v44  ;;  %7685 = vmatmul.bf16.gmra.mxu2 %v20798_v35  ;;  %v15281_v44 = vld [vmem:[%s20679_s4 + $0xb18] sm:$0xff]  ;;  %v19118_v17 = vld [vmem:[#allocation2] sm:$0xff] }
 0x7af   :  { %8287 = vmatpush.bf16.msrb.mxu2 %v15281_v44 }
 0x7b1   :  { %v7237_v53 = vpop.f32.mrf.mxu3  ;;  %v7143_v52 = vpop.f32.mrf.mxu2 }
 0x7b2   :  { %v7238_v9 = vadd.f32 %v7237_v53, %v7140_v36  ;;  %v8047_v53 = vld [vmem:[#allocation2 + $0x91] sm:$0xff] }
 0x7b3   :  { %v7529_v37 = vpop.f32.mrf.mxu1  ;;  %8288 = vmatpush.bf16.msrb.mxu2 %v15280_v51 }
 0x7b4   :  { %v7378_v31 = vpop.f32.mrf.mxu0  ;;  %v7411_v48 = vadd.f32 %v7375_v45, %v7238_v9 }
 0x7b6   :  { %v19102_v2 = vadd.f32 %v7529_v37, %v7411_v48  ;;  %7839 = vmatmul.bf16.gmra.mxu3 %v7750_v22  ;;  %v8059_v48 = vpack.c.bf16 %v8047_v53, %v18848_v27  ;;  %v15279_v27 = vld [vmem:[%s20679_s4 + $0xb08] sm:$0xff] }
 0x7b7   :  { %7993 = vmatmul.bf16.gmra.mxu0 %v18857_v19  ;;  %v19114_v19 = vld [vmem:[#allocation2 + $0x82] sm:$0xff]  ;;  %8289 = vmatpush.bf16.msrb.mxu2 %v15279_v27 }
 0x7b8   :  { %v7751_v45 = vpack.c.bf16 %v19114_v19, %v18852_v21 }
 0x7b9   :  { %v7240_v29 = vpop.f32.mrf.mxu3  ;;  %v7145_v60 = vpop.f32.mrf.mxu2 }
 0x7ba   :  { %v7241_v8 = vadd.f32 %v7240_v29, %v7143_v52 }
 0x7bb   :  { %v7532_v38 = vpop.f32.mrf.mxu1 }
 0x7bc   :  { %v7380_v59 = vpop.f32.mrf.mxu0  ;;  %v7412_v7 = vadd.f32 %v7378_v31, %v7241_v8 }
 0x7be   :  { %v19108_v16 = vadd.f32 %v7532_v38, %v7412_v7  ;;  %8147 = vmatmul.bf16.gmra.mxu1 %v18838_v47  ;;  %7690 = vmatmul.bf16.gmra.mxu2 %v20799_v54  ;;  %v7905_v47 = vpack.c.bf16 %v19118_v17, %v18870_v28  ;;  %v7752_v38 = vpack.c.bf16 %v18946_v63, %v18884_v4 }
 0x7c1   :  { %v7242_v58 = vpop.f32.mrf.mxu3  ;;  %v7148_v12 = vpop.f32.mrf.mxu2 }
 0x7c2   :  { %v7243_v0 = vadd.f32 %v7242_v58, %v7145_v60 }
 0x7c3   :  { %v7534_v36 = vpop.f32.mrf.mxu1 }
 0x7c4   :  { %v7383_v26 = vpop.f32.mrf.mxu0  ;;  %v7413_v23 = vadd.f32 %v7380_v59, %v7243_v0 }
 0x7c6   :  { %v19122_v30 = vadd.f32 %v7534_v36, %v7413_v23  ;;  %7844 = vmatmul.bf16.gmra.mxu3 %v7751_v45  ;;  %v7753_v36 = vpack.c.bf16 %v19015_v1, %v18948_v34 }
 0x7c7   :  { %7998 = vmatmul.bf16.gmra.mxu0 %v7905_v47 }
 0x7c9   :  { %v7245_v35 = vpop.f32.mrf.mxu3  ;;  %v7150_v52 = vpop.f32.mrf.mxu2 }
 0x7ca   :  { %v7246_v9 = vadd.f32 %v7245_v35, %v7148_v12  ;;  %v7754_v35 = vpack.c.bf16 %v19050_v41, %v19017_v25 }
 0x7cb   :  { %v7537_v21 = vpop.f32.mrf.mxu1 }
 0x7cc   :  { %v7385_v31 = vpop.f32.mrf.mxu0  ;;  %v7414_v37 = vadd.f32 %v7383_v26, %v7246_v9 }
 0x7ce   :  { %v19128_v22 = vadd.f32 %v7537_v21, %v7414_v37  ;;  %8152 = vmatmul.bf16.gmra.mxu1 %v8059_v48  ;;  %7695 = vmatmul.bf16.gmra.mxu2 %v7598_v24  ;;  %v7909_v48 = vpack.c.bf16 %v19118_v17, %v19068_v42 }
 0x7d1   :  { %v7247_v28 = vpop.f32.mrf.mxu3  ;;  %v7153_v44 = vpop.f32.mrf.mxu2 }
 0x7d2   :  { %v7248_v29 = vadd.f32 %v7247_v28, %v7150_v52  ;;  %v8195_v28 = vld [vmem:[#allocation2 + $0x32] sm:$0xff] }
 0x7d3   :  { %v7539_v8 = vpop.f32.mrf.mxu1 }
 0x7d4   :  { %v7388_v60 = vpop.f32.mrf.mxu0  ;;  %v7415_v59 = vadd.f32 %v7385_v31, %v7248_v29 }
 0x7d6   :  { %v19135_v7 = vadd.f32 %v7539_v8, %v7415_v59  ;;  %7849 = vmatmul.bf16.gmra.mxu3 %v7752_v38  ;;  %v8063_v59 = vpack.c.bf16 %v8055_v18, %v19048_v57  ;;  %v8196_v57 = vld [vmem:[#allocation2 + $0x42] sm:$0xff] }
 0x7d7   :  { %8003 = vmatmul.bf16.gmra.mxu0 %v18951_v43 }
 0x7d9   :  { %v7250_v46 = vpop.f32.mrf.mxu3  ;;  %v19141_v14 = vpop.f32.mrf.mxu2 }
 0x7da   :  { %v7251_v24 = vadd.f32 %v7250_v46, %v7153_v44 }
 0x7db   :  { %v7542_v58 = vpop.f32.mrf.mxu1 }
 0x7dc   :  { %v19143_v54 = vpop.f32.mrf.mxu0  ;;  %v7416_v12 = vadd.f32 %v7388_v60, %v7251_v24  ;;  %v8194_v60 = vld [vmem:[#allocation2 + $0x22] sm:$0xff] }
 0x7dd   :  { %v8210_v38 = vpack.c.bf16 %v8195_v28, %v8194_v60 }
 0x7de   :  { %v19145_v0 = vadd.f32 %v7542_v58, %v7416_v12  ;;  %8157 = vmatmul.bf16.gmra.mxu1 %v18914_v32  ;;  %7700 = vmatmul.bf16.gmra.mxu2 %v7599_v50  ;;  %v15278_v32 = vld [vmem:[%s20679_s4 + $0xb00] sm:$0xff]  ;;  %v8197_v12 = vld [vmem:[#allocation2 + $0x52] sm:$0xff] }
 0x7df   :  { %8290 = vmatpush.bf16.msrb.mxu2 %v15278_v32 }
 0x7e1   :  { %v19151_v4 = vpop.f32.mrf.mxu3  ;;  %v7158_v63 = vpop.f32.mrf.mxu2 }
 0x7e3   :  { %v19153_v26 = vpop.f32.mrf.mxu1 }
 0x7e4   :  { %v7393_v43 = vpop.f32.mrf.mxu0 }
 0x7e6   :  { %7854 = vmatmul.bf16.gmra.mxu3 %v7753_v36  ;;  %v15300_v36 = vld [vmem:[%s20679_s4 + $0xbb0] sm:$0xff] }
 0x7e7   :  { %8008 = vmatmul.bf16.gmra.mxu0 %v19020_v15 }
 0x7e9   :  { %v7255_v23 = vpop.f32.mrf.mxu3  ;;  %v19161_v6 = vpop.f32.mrf.mxu2 }
 0x7ea   :  { %v7256_v62 = vadd.f32 %v7255_v23, %v7158_v63 }
 0x7eb   :  { %v7547_v50 = vpop.f32.mrf.mxu1 }
 0x7ec   :  { %v19163_v45 = vpop.f32.mrf.mxu0  ;;  %v7418_v47 = vadd.f32 %v7393_v43, %v7256_v62  ;;  %v8211_v43 = vpack.c.bf16 %v8197_v12, %v8196_v57  ;;  %v15308_v57 = vld [vmem:[%s20679_s4 + $0xbf0] sm:$0xff] }
 0x7ee   :  { %v19165_v51 = vadd.f32 %v7547_v50, %v7418_v47  ;;  %8162 = vmatmul.bf16.gmra.mxu1 %v18988_v3  ;;  %7705 = vmatmul.bf16.gmra.mxu2 %v7600_v40  ;;  %v19190_v40 = vld [vmem:[#allocation2 + $0x122] sm:$0xff] }
 0x7ef   :  { %v7755_v37 = vpack.c.bf16 %v19190_v40, %v19052_v20  ;;  %v15301_v20 = vld [vmem:[%s20679_s4 + $0xbb8] sm:$0xff]  ;;  %v8198_v47 = vld [vmem:[#allocation2 + $0x62] sm:$0xff] }
 0x7f0   :  { %8600 = vmatpush.bf16.msrb.mxu3 %v15301_v20 }
 0x7f1   :  { %v19171_v34 = vpop.f32.mrf.mxu3  ;;  %v7163_v1 = vpop.f32.mrf.mxu2 }
 0x7f3   :  { %v19173_v15 = vpop.f32.mrf.mxu1 }
 0x7f4   :  { %v7398_v53 = vpop.f32.mrf.mxu0  ;;  %8601 = vmatpush.bf16.msrb.mxu3 %v15300_v36  ;;  %v15295_v36 = vld [vmem:[%s20679_s4 + $0xb88] sm:$0xff] }
 0x7f6   :  { %7859 = vmatmul.bf16.gmra.mxu3 %v7754_v35 }
 0x7f7   :  { %8013 = vmatmul.bf16.gmra.mxu0 %v19055_v33 }
 0x7f9   :  { %v7260_v52 = vpop.f32.mrf.mxu3  ;;  %v19178_v9 = vpop.f32.mrf.mxu2 }
 0x7fa   :  { %v7261_v3 = vadd.f32 %v7260_v52, %v7163_v1  ;;  %v15299_v1 = vld [vmem:[%s20679_s4 + $0xba8] sm:$0xff] }
 0x7fb   :  { %v7552_v31 = vpop.f32.mrf.mxu1  ;;  %8602 = vmatpush.bf16.msrb.mxu3 %v15299_v1 }
 0x7fc   :  { %v7420_v21 = vadd.f32 %v7398_v53, %v7261_v3  ;;  %v19186_v10 = vpop.f32.mrf.mxu0 }
 0x7fe   :  { %v19180_v56 = vadd.f32 %v7552_v31, %v7420_v21  ;;  %8167 = vmatmul.bf16.gmra.mxu1 %v19043_v11  ;;  %7710 = vmatmul.bf16.gmra.mxu2 %v7601_v61  ;;  %v15298_v31 = vld [vmem:[%s20679_s4 + $0xba0] sm:$0xff] }
 0x7ff   :  { %8603 = vmatpush.bf16.msrb.mxu3 %v15298_v31  ;;  %v15305_v31 = vld [vmem:[%s20679_s4 + $0xbd8] sm:$0xff] }
 0x801   :  { %v19188_v25 = vpop.f32.mrf.mxu3  ;;  %v7168_v41 = vpop.f32.mrf.mxu2 }
 0x803   :  { %v19192_v33 = vpop.f32.mrf.mxu1 }
 0x804   :  { %v7403_v29 = vpop.f32.mrf.mxu0 }
 0x806   :  { %7864 = vmatmul.bf16.gmra.mxu3 %v7755_v37 }
 0x807   :  { %8018 = vmatmul.bf16.gmra.mxu0 %v7909_v48 }
 0x809   :  { %v7265_v11 = vpop.f32.mrf.mxu3  ;;  %v19198_v61 = vpop.f32.mrf.mxu2 }
 0x80a   :  { %v7266_v44 = vadd.f32 %v7265_v11, %v7168_v41  ;;  %v8202_v11 = vld [vmem:[#allocation2 + $0xc2] sm:$0xff] }
 0x80b   :  { %v7557_v27 = vpop.f32.mrf.mxu1 }
 0x80c   :  { %v7422_v8 = vadd.f32 %v7403_v29, %v7266_v44  ;;  %v8204_v29 = vld [vmem:[#allocation2 + $0xe2] sm:$0xff] }
 0x80e   :  { %v19201_v46 = vadd.f32 %v7557_v27, %v7422_v8  ;;  %8172 = vmatmul.bf16.gmra.mxu1 %v8063_v59  ;;  %8291 = vmatmul.bf16.vlgmr.msrb.gmra.mxu2 %v8210_v38  ;;  %v19256_v27 = vpop.f32.mrf.mxu0 }
 0x811   :  { %v7676_v42 = vpop.f32.mrf.mxu2  ;;  %v19248_v8 = vpop.f32.mrf.mxu3 }
 0x812   :  { %v19207_v24 = vadd.f32 %v7676_v42, %v19080_v5  ;;  %v8199_v5 = vld [vmem:[#allocation2 + $0x72] sm:$0xff] }
 0x813   :  { %v15293_v42 = vld [vmem:[%s20679_s4 + $0xb78] sm:$0xff] }
 0x814   :  { %8697 = vmatpush.bf16.msrb.mxu0 %v15293_v42 }
 0x819   :  { %v7678_v58 = vpop.f32.mrf.mxu2  ;;  %v19260_v20 = vpop.f32.mrf.mxu3 }
 0x81a   :  { %v19210_v63 = vadd.f32 %v7678_v58, %v19088_v49  ;;  %v8212_v49 = vpack.c.bf16 %v8199_v5, %v8198_v47  ;;  %v15309_v58 = vld [vmem:[%s20679_s4 + $0xbf8] sm:$0xff] }
 0x81b   :  { %8835 = vmatpush.bf16.msra.mxu1 %v15309_v58  ;;  %v15317_v5 = vld [vmem:[%s20679_s4 + $0xc38] sm:$0xff] }
 0x81c   :  { %8989 = vmatpush.bf16.msra.mxu2 %v15317_v5 }
 0x81e   :  { %8296 = vmatmul.bf16.gmra.mxu2 %v8211_v43  ;;  %v19276_v43 = vpop.f32.mrf.mxu0 }
 0x81f   :  { %8836 = vmatpush.bf16.msra.mxu1 %v15308_v57  ;;  %v15286_v57 = vld [vmem:[%s20679_s4 + $0xb40] sm:$0xff] }
 0x821   :  { %v7681_v32 = vpop.f32.mrf.mxu2 }
 0x822   :  { %v19216_v23 = vadd.f32 %v7681_v32, %v19094_v55  ;;  %v8201_v55 = vld [vmem:[#allocation2 + $0x92] sm:$0xff]  ;;  %v15291_v32 = vld [vmem:[%s20679_s4 + $0xb68] sm:$0xff] }
 0x829   :  { %v7683_v62 = vpop.f32.mrf.mxu2 }
 0x82a   :  { %v19219_v50 = vadd.f32 %v7683_v62, %v19102_v2  ;;  %v8213_v2 = vpack.c.bf16 %v8201_v55, %v19114_v19  ;;  %v15297_v19 = vld [vmem:[%s20679_s4 + $0xb98] sm:$0xff]  ;;  %v15307_v62 = vld [vmem:[%s20679_s4 + $0xbe8] sm:$0xff]  ;;  %v15316_v55 = vld [vmem:[%s20679_s4 + $0xc30] sm:$0xff] }
 0x82b   :  { %8604 = vmatpush.bf16.msrb.mxu3 %v15297_v19  ;;  %8837 = vmatpush.bf16.msra.mxu1 %v15307_v62  ;;  %v15294_v19 = vld [vmem:[%s20679_s4 + $0xb80] sm:$0xff] }
 0x82c   :  { %8990 = vmatpush.bf16.msra.mxu2 %v15316_v55  ;;  %v15310_v55 = vld [vmem:[%s20679_s4 + $0xc00] sm:$0xff] }
 0x82e   :  { %8301 = vmatmul.bf16.gmra.mxu2 %v8212_v49 }
 0x831   :  { %v7686_v35 = vpop.f32.mrf.mxu2 }
 0x832   :  { %v19225_v53 = vadd.f32 %v7686_v35, %v19108_v16  ;;  %v8203_v16 = vld [vmem:[#allocation2 + $0xd2] sm:$0xff]  ;;  %v15290_v35 = vld [vmem:[%s20679_s4 + $0xb60] sm:$0xff] }
 0x839   :  { %v7688_v52 = vpop.f32.mrf.mxu2 }
 0x83a   :  { %v19228_v3 = vadd.f32 %v7688_v52, %v19122_v30  ;;  %v8214_v30 = vpack.c.bf16 %v8203_v16, %v8202_v11  ;;  %v15306_v52 = vld [vmem:[%s20679_s4 + $0xbe0] sm:$0xff]  ;;  %v8209_v16 = vld [vmem:[#allocation2 + $0x132] sm:$0xff] }
 0x83b   :  { %8838 = vmatpush.bf16.msra.mxu1 %v15306_v52 }
 0x83e   :  { %8306 = vmatmul.bf16.gmra.mxu2 %v8213_v2  ;;  %v7986_v2 = vpop.f32.mrf.mxu0 }
 0x83f   :  { %8839 = vmatpush.bf16.msra.mxu1 %v15305_v31  ;;  %v15325_v31 = vld [vmem:[%s20679_s4 + $0xc78] sm:$0xff] }
 0x841   :  { %v7691_v21 = vpop.f32.mrf.mxu2 }
 0x842   :  { %v19235_v41 = vadd.f32 %v7691_v21, %v19128_v22  ;;  %v8205_v22 = vld [vmem:[#allocation2 + $0xf2] sm:$0xff]  ;;  %v15315_v21 = vld [vmem:[%s20679_s4 + $0xc28] sm:$0xff] }
 0x843   :  { %v8215_v60 = vpack.c.bf16 %v8205_v22, %v8204_v29  ;;  %8991 = vmatpush.bf16.msra.mxu2 %v15315_v21  ;;  %v15304_v22 = vld [vmem:[%s20679_s4 + $0xbd0] sm:$0xff]  ;;  %v8217_v29 = vpack.c.bf16 %v8209_v16, %v19190_v40  ;;  %v15313_v40 = vld [vmem:[%s20679_s4 + $0xc18] sm:$0xff] }
 0x844   :  { %8840 = vmatpush.bf16.msra.mxu1 %v15304_v22  ;;  %v19372_v22 = vld [vmem:[%s20680_s5 + $0xa] ss:$0 sm:$0xff] }
 0x846   :  { %v7989_v42 = vpop.f32.mrf.mxu0 }
 0x849   :  { %v7693_v37 = vpop.f32.mrf.mxu2 }
 0x84a   :  { %v19238_v48 = vadd.f32 %v7693_v37, %v19135_v7  ;;  %v15296_v7 = vld [vmem:[%s20679_s4 + $0xb90] sm:$0xff] }
 0x84b   :  { %8605 = vmatpush.bf16.msrb.mxu3 %v15296_v7  ;;  %v15287_v7 = vld [vmem:[%s20679_s4 + $0xb48] sm:$0xff] }
 0x84e   :  { %8311 = vmatmul.bf16.gmra.mxu2 %v8214_v30  ;;  %v7991_v52 = vpop.f32.mrf.mxu0 }
 0x84f   :  { %8606 = vmatpush.bf16.msrb.mxu3 %v15295_v36  ;;  %v15302_v36 = vld [vmem:[%s20679_s4 + $0xbc0] sm:$0xff] }
 0x851   :  { %v7696_v18 = vpop.f32.mrf.mxu2 }
 0x852   :  { %v19244_v28 = vadd.f32 %v7696_v18, %v19145_v0  ;;  %v19258_v0 = vpop.f32.mrf.mxu1  ;;  %v15288_v18 = vld [vmem:[%s20679_s4 + $0xb50] sm:$0xff] }
 0x853   :  { %8607 = vmatpush.bf16.msrb.mxu3 %v15294_v19 }
 0x857   :  { %9143 = vmatpush.bf16.msra.mxu3 %v15325_v31 }
 0x859   :  { %v19246_v44 = vpop.f32.mrf.mxu2 }
 0x85a   :  { %v19291_v47 = vpop.f32.mrf.mxu1 }
 0x85e   :  { %8316 = vmatmul.bf16.gmra.mxu2 %v8215_v60  ;;  %v15314_v60 = vld [vmem:[%s20679_s4 + $0xc20] sm:$0xff] }
 0x85f   :  { %8992 = vmatpush.bf16.msra.mxu2 %v15314_v60 }
 0x861   :  { %v7701_v59 = vpop.f32.mrf.mxu2 }
 0x862   :  { %v19254_v38 = vadd.f32 %v7701_v59, %v19165_v51  ;;  %v15292_v51 = vld [vmem:[%s20679_s4 + $0xb70] sm:$0xff]  ;;  %v8140_v11 = vpop.f32.mrf.mxu1  ;;  %v15303_v59 = vld [vmem:[%s20679_s4 + $0xbc8] sm:$0xff] }
 0x863   :  { %8698 = vmatpush.bf16.msrb.mxu0 %v15292_v51  ;;  %8841 = vmatpush.bf16.msra.mxu1 %v15303_v59 }
 0x864   :  { %8993 = vmatpush.bf16.msra.mxu2 %v15313_v40 }
 0x867   :  { %8699 = vmatpush.bf16.msrb.mxu0 %v15291_v32  ;;  %v15312_v32 = vld [vmem:[%s20679_s4 + $0xc10] sm:$0xff]  ;;  %8842 = vmatpush.bf16.msra.mxu1 %v15302_v36 }
 0x868   :  { %8994 = vmatpush.bf16.msra.mxu2 %v15312_v32 }
 0x869   :  { %v19268_v12 = vpop.f32.mrf.mxu2 }
 0x86a   :  { %v8143_v62 = vpop.f32.mrf.mxu1 }
 0x86b   :  { %8700 = vmatpush.bf16.msrb.mxu0 %v15290_v35 }
 0x86e   :  { %8321 = vmatmul.bf16.gmra.mxu2 %v19059_v13  ;;  %v19293_v13 = vpop.f32.mrf.mxu3 }
 0x871   :  { %v7706_v49 = vpop.f32.mrf.mxu2 }
 0x872   :  { %v19296_v1 = vadd.f32 %v7706_v49, %v19180_v56  ;;  %v15289_v56 = vld [vmem:[%s20679_s4 + $0xb58] sm:$0xff]  ;;  %v7870_v49 = vadd.f32 %v19260_v20, %v19207_v24  ;;  %v8145_v21 = vpop.f32.mrf.mxu1  ;;  %v7871_v20 = vadd.f32 %v19293_v13, %v19210_v63 }
 0x873   :  { %8701 = vmatpush.bf16.msrb.mxu0 %v15289_v56 }
 0x874   :  { %v8024_v56 = vadd.f32 %v19276_v43, %v7870_v49  ;;  %v8025_v43 = vadd.f32 %v7986_v2, %v7871_v20 }
 0x876   :  { %v7835_v30 = vpop.f32.mrf.mxu3  ;;  %v8178_v24 = vadd.f32 %v19291_v47, %v8024_v56  ;;  %v7994_v47 = vpop.f32.mrf.mxu0  ;;  %v8179_v13 = vadd.f32 %v8140_v11, %v8025_v43  ;;  %v20802_v56 = vld [vmem:[#allocation7_spill] sm:$0xff] }
 0x877   :  { %8702 = vmatpush.bf16.msrb.mxu0 %v15288_v18  ;;  %v7872_v59 = vadd.f32 %v7835_v30, %v19216_v23  ;;  %v15324_v23 = vld [vmem:[%s20679_s4 + $0xc70] sm:$0xff] }
 0x878   :  { %9144 = vmatpush.bf16.msra.mxu3 %v15324_v23 }
 0x879   :  { %v19316_v37 = vpop.f32.mrf.mxu2  ;;  %v8026_v49 = vadd.f32 %v7989_v42, %v7872_v59 }
 0x87a   :  { %v8148_v40 = vpop.f32.mrf.mxu1 }
 0x87b   :  { %8703 = vmatpush.bf16.msrb.mxu0 %v15287_v7  ;;  %v19380_v7 = vld [vmem:[%s20680_s5 + $0xb] ss:$0 sm:$0xff]  ;;  %v8180_v20 = vadd.f32 %v8143_v62, %v8026_v49 }
 0x87e   :  { %8326 = vmatmul.bf16.gmra.mxu2 %v8217_v29  ;;  %v7837_v5 = vpop.f32.mrf.mxu3  ;;  %v20800_v29 = vld [vmem:[#allocation6_spill] sm:$0xff] }
 0x87f   :  { %8704 = vmatpush.bf16.msrb.mxu0 %v15286_v57  ;;  %v7873_v42 = vadd.f32 %v7837_v5, %v19219_v50 }
 0x881   :  { %v7711_v58 = vpop.f32.mrf.mxu2 }
 0x882   :  { %v19341_v51 = vadd.f32 %v7711_v58, %v19201_v46  ;;  %v15311_v46 = vld [vmem:[%s20679_s4 + $0xc08] sm:$0xff]  ;;  %v19400_v43 = vpop.f32.mrf.mxu1 }
 0x883   :  { %8995 = vmatpush.bf16.msra.mxu2 %v15311_v46  ;;  %v8511_v46 = vld [vmem:[#allocation2 + $0x1] sm:$0xff] }
 0x886   :  { %v7840_v16 = vpop.f32.mrf.mxu3 }
 0x887   :  { %8996 = vmatpush.bf16.msra.mxu2 %v15310_v55 }
 0x889   :  { %v19357_v35 = vpop.f32.mrf.mxu2 }
 0x88e   :  { %v7842_v57 = vpop.f32.mrf.mxu3 }
 0x891   :  { %v8292_v19 = vpop.f32.mrf.mxu2 }
 0x892   :  { %v8332_v18 = vadd.f32 %v8292_v19, %v8178_v24  ;;  %v7996_v24 = vpop.f32.mrf.mxu0 }
 0x894   :  { %v19375_v60 = vadd.f32 %v8332_v18, %v20800_v29 }
 0x896   :  { %20801 = vst [vmem:[#allocation21_spill] sm:$0xff] %v19375_v60  ;;  %v8369_v63 = vmul.f32 %v19372_v22, %v19375_v60  ;;  %v7845_v59 = vpop.f32.mrf.mxu3 }
 0x898   :  { %v8390_v58 = vadd.f32 %v19380_v7, %v8369_v63 }
 0x899   :  { %v8294_v2 = vpop.f32.mrf.mxu2 }
 0x89a   :  { %vm8406_vm0 = vcmp.gt.f32.partialorder %v8390_v58, 0.0  ;;  %v8422_v36 = vmul.f32 0.1, %v8390_v58  ;;  %v8333_v32 = vadd.f32 %v8294_v2, %v8179_v13  ;;  %v8746_v13 = vld [vmem:[#allocation2 + $0x2] sm:$0xff] }
 0x89c   :  { %v19386_v55 = vsel %vm8406_vm0, %v8390_v58, %v8422_v36  ;;  %v19389_v31 = vadd.f32 %v8333_v32, %v20802_v56  ;;  %v8027_v58 = vadd.f32 %v7991_v52, %v7873_v42  ;;  %v20804_v36 = vld [vmem:[#allocation8_spill] sm:$0xff] }
 0x89d   :  { %8454 = vst [vmem:[#allocation2 + $0x11] sm:$0xff] %v19386_v55  ;;  %v8527_v11 = vpack.c.bf16 %v19386_v55, %v8511_v46 }
 0x89e   :  { %20803 = vst [vmem:[#allocation6_spill] sm:$0xff] %v19389_v31  ;;  %v8370_v30 = vmul.f32 %v19372_v22, %v19389_v31  ;;  %v8181_v56 = vadd.f32 %v8145_v21, %v8027_v58 }
 0x89f   :  { %8608 = vmatmul.bf16.vlgmr.msrb.gmra.mxu3 %v8527_v11  ;;  %v7874_v11 = vadd.f32 %v7840_v16, %v19225_v53  ;;  %v15323_v16 = vld [vmem:[%s20679_s4 + $0xc68] sm:$0xff] }
 0x8a0   :  { %v8391_v19 = vadd.f32 %v19380_v7, %v8370_v30  ;;  %v7999_v30 = vpop.f32.mrf.mxu0  ;;  %9145 = vmatpush.bf16.msra.mxu3 %v15323_v16 }
 0x8a1   :  { %v8297_v18 = vpop.f32.mrf.mxu2 }
 0x8a2   :  { %vm8407_vm2 = vcmp.gt.f32.partialorder %v8391_v19, 0.0  ;;  %v8423_v29 = vmul.f32 0.1, %v8391_v19  ;;  %v8334_v63 = vadd.f32 %v8297_v18, %v8180_v20  ;;  %v8028_v18 = vadd.f32 %v7994_v47, %v7874_v11 }
 0x8a4   :  { %v19402_v2 = vsel %vm8407_vm2, %v8391_v19, %v8423_v29  ;;  %v19405_v32 = vadd.f32 %v8334_v63, %v20804_v36  ;;  %v8471_v62 = vld [vmem:[#allocation2 + $0x10] sm:$0xff]  ;;  %v8153_v29 = vpop.f32.mrf.mxu1  ;;  %v8182_v58 = vadd.f32 %v8148_v40, %v8028_v18 }
 0x8a5   :  { %v19407_v46 = vld [vmem:[#allocation2 + $0x12] sm:$0xff]  ;;  %8455 = vst [vmem:[#allocation2 + $0x21] sm:$0xff] %v19402_v2  ;;  %v8486_v50 = vpack.c.bf16 %v8471_v62, %v19118_v17 }
 0x8a6   :  { %20805 = vst [vmem:[#allocation7_spill] sm:$0xff] %v19405_v32  ;;  %v8762_v5 = vpack.c.bf16 %v19407_v46, %v8746_v13  ;;  %v8371_v52 = vmul.f32 %v19372_v22, %v19405_v32  ;;  %v20806_v13 = vld [vmem:[#allocation9_spill] sm:$0xff] }
 0x8a7   :  { %8705 = vmatmul.bf16.vlgmr.msrb.gmra.mxu0 %v8486_v50  ;;  %v7847_v50 = vpop.f32.mrf.mxu3 }
 0x8a8   :  { %8843 = vmatmul.bf16.vlgmr.msra.gmra.mxu1 %v8762_v5  ;;  %v8392_v23 = vadd.f32 %v19380_v7, %v8371_v52  ;;  %v7875_v5 = vadd.f32 %v7842_v57, %v19228_v3 }
 0x8a9   :  { %v8299_v20 = vpop.f32.mrf.mxu2 }
 0x8aa   :  { %vm8408_vm3 = vcmp.gt.f32.partialorder %v8392_v23, 0.0  ;;  %v8424_v42 = vmul.f32 0.1, %v8392_v23  ;;  %v8335_v19 = vadd.f32 %v8299_v20, %v8181_v56  ;;  %v8029_v20 = vadd.f32 %v7996_v24, %v7875_v5  ;;  %v20810_v24 = vld [vmem:[#allocation11_spill] sm:$0xff] }
 0x8ab   :  { %v7876_v5 = vadd.f32 %v7845_v59, %v19235_v41 }
 0x8ac   :  { %v19418_v63 = vsel %vm8408_vm3, %v8392_v23, %v8424_v42  ;;  %v19421_v36 = vadd.f32 %v8335_v19, %v20806_v13  ;;  %v8901_v49 = vld [vmem:[#allocation2 + $0x20] sm:$0xff]  ;;  %v8001_v23 = vpop.f32.mrf.mxu0  ;;  %v8155_v18 = vpop.f32.mrf.mxu1 }
 0x8ad   :  { %8456 = vst [vmem:[#allocation2 + $0x31] sm:$0xff] %v19418_v63  ;;  %v8916_v21 = vpack.c.bf16 %v8901_v49, %v8471_v62  ;;  %v19426_v53 = vpack.c.bf16 %v19418_v63, %v19402_v2  ;;  %v20808_v19 = vld [vmem:[#allocation10_spill] sm:$0xff] }
 0x8ae   :  { %20807 = vst [vmem:[#allocation8_spill] sm:$0xff] %v19421_v36  ;;  %v8372_v47 = vmul.f32 %v19372_v22, %v19421_v36  ;;  %v19441_v36 = vld [vmem:[#allocation2 + $0x22] sm:$0xff] }
 0x8af   :  { %8997 = vmatmul.bf16.vlgmr.msra.gmra.mxu2 %v8916_v21  ;;  %8613 = vmatmul.bf16.gmra.mxu3 %v19426_v53 }
 0x8b0   :  { %v8393_v52 = vadd.f32 %v19380_v7, %v8372_v47  ;;  %v7850_v47 = vpop.f32.mrf.mxu3 }
 0x8b1   :  { %v8302_v62 = vpop.f32.mrf.mxu2 }
 0x8b2   :  { %vm8409_vm4 = vcmp.gt.f32.partialorder %v8393_v52, 0.0  ;;  %v8425_v56 = vmul.f32 0.1, %v8393_v52  ;;  %v8336_v11 = vadd.f32 %v8302_v62, %v8182_v58  ;;  %v8183_v58 = vadd.f32 %v19400_v43, %v8029_v20  ;;  %v15322_v43 = vld [vmem:[%s20679_s4 + $0xc60] sm:$0xff] }
 0x8b3   :  { %v7877_v20 = vadd.f32 %v7847_v50, %v19238_v48  ;;  %9146 = vmatpush.bf16.msra.mxu3 %v15322_v43 }
 0x8b4   :  { %v19436_v42 = vsel %vm8409_vm4, %v8393_v52, %v8425_v56  ;;  %v19439_v13 = vadd.f32 %v8336_v11, %v20808_v19  ;;  %v8473_v21 = vld [vmem:[#allocation2 + $0x30] sm:$0xff]  ;;  %v8030_v11 = vadd.f32 %v7999_v30, %v7876_v5  ;;  %v8004_v31 = vpop.f32.mrf.mxu0 }
 0x8b5   :  { %v19443_v40 = vld [vmem:[#allocation2 + $0x32] sm:$0xff]  ;;  %8457 = vst [vmem:[#allocation2 + $0x41] sm:$0xff] %v19436_v42  ;;  %v19446_v3 = vpack.c.bf16 %v8473_v21, %v8901_v49 }
 0x8b6   :  { %20809 = vst [vmem:[#allocation9_spill] sm:$0xff] %v19439_v13  ;;  %v8763_v57 = vpack.c.bf16 %v19443_v40, %v19441_v36  ;;  %v8373_v16 = vmul.f32 %v19372_v22, %v19439_v13  ;;  %v8184_v30 = vadd.f32 %v8153_v29, %v8030_v11 }
 0x8b7   :  { %8710 = vmatmul.bf16.gmra.mxu0 %v19446_v3 }
 0x8b8   :  { %8848 = vmatmul.bf16.gmra.mxu1 %v8763_v57  ;;  %v8394_v49 = vadd.f32 %v19380_v7, %v8373_v16  ;;  %v7852_v16 = vpop.f32.mrf.mxu3 }
 0x8b9   :  { %v8304_v52 = vpop.f32.mrf.mxu2 }
 0x8ba   :  { %vm8410_vm5 = vcmp.gt.f32.partialorder %v8394_v49, 0.0  ;;  %v8426_v62 = vmul.f32 0.1, %v8394_v49  ;;  %v8337_v56 = vadd.f32 %v8304_v52, %v8183_v58  ;;  %v7253_v52 = vadd.f32 %v19151_v4, %v19141_v14 }
 0x8bc   :  { %v19458_v19 = vsel %vm8410_vm5, %v8394_v49, %v8426_v62  ;;  %v19461_v32 = vadd.f32 %v8337_v56, %v20810_v24  ;;  %v8903_v13 = vld [vmem:[#allocation2 + $0x40] sm:$0xff]  ;;  %v8158_v24 = vpop.f32.mrf.mxu1  ;;  %v8031_v62 = vadd.f32 %v8001_v23, %v7877_v20  ;;  %v8006_v23 = vpop.f32.mrf.mxu0  ;;  %v7878_v20 = vadd.f32 %v7850_v47, %v19244_v28  ;;  %v15321_v47 = vld [vmem:[%s20679_s4 + $0xc58] sm:$0xff] }
 0x8bd   :  { %8458 = vst [vmem:[#allocation2 + $0x51] sm:$0xff] %v19458_v19  ;;  %v8917_v57 = vpack.c.bf16 %v8903_v13, %v8473_v21  ;;  %v19466_v41 = vpack.c.bf16 %v19458_v19, %v19436_v42  ;;  %v19483_v48 = vld [vmem:[#allocation2 + $0x42] sm:$0xff]  ;;  %9147 = vmatpush.bf16.msra.mxu3 %v15321_v47 }
 0x8be   :  { %20811 = vst [vmem:[#allocation10_spill] sm:$0xff] %v19461_v32  ;;  %v8374_v59 = vmul.f32 %v19372_v22, %v19461_v32 }
 0x8bf   :  { %9002 = vmatmul.bf16.gmra.mxu2 %v8917_v57  ;;  %8618 = vmatmul.bf16.gmra.mxu3 %v19466_v41  ;;  %v20812_v57 = vld [vmem:[#allocation12_spill] sm:$0xff] }
 0x8c0   :  { %v8395_v21 = vadd.f32 %v19380_v7, %v8374_v59  ;;  %v7417_v59 = vadd.f32 %v19143_v54, %v7253_v52 }
 0x8c1   :  { %v8307_v58 = vpop.f32.mrf.mxu2 }
 0x8c2   :  { %vm8411_vm6 = vcmp.gt.f32.partialorder %v8395_v21, 0.0  ;;  %v8427_v5 = vmul.f32 0.1, %v8395_v21  ;;  %v8338_v49 = vadd.f32 %v8307_v58, %v8184_v30  ;;  %v8185_v30 = vadd.f32 %v8155_v18, %v8031_v62 }
 0x8c3   :  { %v7571_v14 = vadd.f32 %v19153_v26, %v7417_v59 }
 0x8c4   :  { %v19478_v56 = vsel %vm8411_vm6, %v8395_v21, %v8427_v5  ;;  %v19481_v32 = vadd.f32 %v8338_v49, %v20812_v57  ;;  %v8475_v29 = vld [vmem:[#allocation2 + $0x50] sm:$0xff]  ;;  %v8160_v58 = vpop.f32.mrf.mxu1  ;;  %v7855_v57 = vpop.f32.mrf.mxu3 }
 0x8c5   :  { %v19485_v50 = vld [vmem:[#allocation2 + $0x52] sm:$0xff]  ;;  %8459 = vst [vmem:[#allocation2 + $0x61] sm:$0xff] %v19478_v56  ;;  %v19488_v11 = vpack.c.bf16 %v8475_v29, %v8903_v13  ;;  %v7725_v26 = vadd.f32 %v19246_v44, %v7571_v14  ;;  %v7880_v47 = vadd.f32 %v7855_v57, %v19254_v38 }
 0x8c6   :  { %20813 = vst [vmem:[#allocation11_spill] sm:$0xff] %v19481_v32  ;;  %v8764_v43 = vpack.c.bf16 %v19485_v50, %v19483_v48  ;;  %v8375_v4 = vmul.f32 %v19372_v22, %v19481_v32  ;;  %v8032_v32 = vadd.f32 %v8004_v31, %v7878_v20  ;;  %v7258_v20 = vadd.f32 %v19171_v34, %v19161_v6  ;;  %v20818_v34 = vld [vmem:[#allocation14_spill] sm:$0xff]  ;;  %v15320_v57 = vld [vmem:[%s20679_s4 + $0xc50] sm:$0xff] }
 0x8c7   :  { %20814 = vst [vmem:[#allocation12_spill] sm:$0xff] %v19485_v50  ;;  %8715 = vmatmul.bf16.gmra.mxu0 %v19488_v11  ;;  %v20815_v50 = vld [vmem:[#allocation13_spill] sm:$0xff]  ;;  %v7879_v62 = vadd.f32 %v7852_v16, %v7725_v26  ;;  %9148 = vmatpush.bf16.msra.mxu3 %v15320_v57 }
 0x8c8   :  { %8853 = vmatmul.bf16.gmra.mxu1 %v8764_v43  ;;  %v8396_v13 = vadd.f32 %v19380_v7, %v8375_v4  ;;  %v8186_v52 = vadd.f32 %v8158_v24, %v8032_v32 }
 0x8c9   :  { %v8309_v21 = vpop.f32.mrf.mxu2  ;;  %v8033_v44 = vadd.f32 %v8006_v23, %v7879_v62  ;;  %v7419_v23 = vadd.f32 %v19163_v45, %v7258_v20  ;;  %v8519_v62 = vld [vmem:[#allocation2 + $0xa1] sm:$0xff] }
 0x8ca   :  { %vm8412_vm7 = vcmp.gt.f32.partialorder %v8396_v13, 0.0  ;;  %v8428_v5 = vmul.f32 0.1, %v8396_v13  ;;  %v8339_v49 = vadd.f32 %v8309_v21, %v8185_v30 }
 0x8cc   :  { %v19501_v60 = vsel %vm8412_vm7, %v8396_v13, %v8428_v5  ;;  %v19504_v43 = vadd.f32 %v8339_v49, %v20815_v50  ;;  %v8905_v54 = vld [vmem:[#allocation2 + $0x60] sm:$0xff]  ;;  %v8009_v50 = vpop.f32.mrf.mxu0  ;;  %v8163_v14 = vpop.f32.mrf.mxu1 }
 0x8cd   :  { %8460 = vst [vmem:[#allocation2 + $0x71] sm:$0xff] %v19501_v60  ;;  %v8918_v28 = vpack.c.bf16 %v8905_v54, %v8475_v29  ;;  %v19509_v18 = vpack.c.bf16 %v19501_v60, %v19478_v56  ;;  %v19526_v24 = vld [vmem:[#allocation2 + $0x62] sm:$0xff]  ;;  %v7857_v5 = vpop.f32.mrf.mxu3 }
 0x8ce   :  { %20816 = vst [vmem:[#allocation13_spill] sm:$0xff] %v19504_v43  ;;  %v8376_v31 = vmul.f32 %v19372_v22, %v19504_v43 }
 0x8cf   :  { %9007 = vmatmul.bf16.gmra.mxu2 %v8918_v28  ;;  %8623 = vmatmul.bf16.gmra.mxu3 %v19509_v18  ;;  %v8187_v28 = vadd.f32 %v8160_v58, %v8033_v44 }
 0x8d0   :  { %v8397_v29 = vadd.f32 %v19380_v7, %v8376_v31 }
 0x8d1   :  { %v8312_v4 = vpop.f32.mrf.mxu2 }
 0x8d2   :  { %vm8413_vm8 = vcmp.gt.f32.partialorder %v8397_v29, 0.0  ;;  %v8429_v59 = vmul.f32 0.1, %v8397_v29  ;;  %v8340_v30 = vadd.f32 %v8312_v4, %v8186_v52  ;;  %v7573_v4 = vadd.f32 %v19173_v15, %v7419_v23 }
 0x8d4   :  { %v19521_v13 = vsel %vm8413_vm8, %v8397_v29, %v8429_v59  ;;  %v19524_v21 = vadd.f32 %v8340_v30, %v18189_v39  ;;  %v8477_v32 = vld [vmem:[#allocation2 + $0x70] sm:$0xff]  ;;  %v8011_v29 = vpop.f32.mrf.mxu0  ;;  %v8034_v59 = vadd.f32 %v8009_v50, %v7880_v47  ;;  %v7727_v15 = vadd.f32 %v19268_v12, %v7573_v4  ;;  %v8165_v50 = vpop.f32.mrf.mxu1 }
 0x8d5   :  { %v19528_v16 = vld [vmem:[#allocation2 + $0x72] sm:$0xff]  ;;  %8461 = vst [vmem:[#allocation2 + $0x81] sm:$0xff] %v19521_v13  ;;  %v19531_v49 = vpack.c.bf16 %v8477_v32, %v8905_v54  ;;  %v7860_v44 = vpop.f32.mrf.mxu3  ;;  %v7263_v12 = vadd.f32 %v19188_v25, %v19178_v9 }
 0x8d6   :  { %20817 = vst [vmem:[#allocation22_spill] sm:$0xff] %v19524_v21  ;;  %v8765_v6 = vpack.c.bf16 %v19528_v16, %v19526_v24  ;;  %v8377_v39 = vmul.f32 %v19372_v22, %v19524_v21  ;;  %v15333_v25 = vld [vmem:[%s20679_s4 + $0xcb8] sm:$0xff] }
 0x8d7   :  { %8720 = vmatmul.bf16.gmra.mxu0 %v19531_v49 }
 0x8d8   :  { %8858 = vmatmul.bf16.gmra.mxu1 %v8765_v6  ;;  %v8398_v54 = vadd.f32 %v19380_v7, %v8377_v39  ;;  %v7881_v39 = vadd.f32 %v7857_v5, %v7727_v15  ;;  %v7882_v15 = vadd.f32 %v7860_v44, %v19296_v1  ;;  %9297 = vmatpush.bf16.msra.mxu0 %v15333_v25  ;;  %v15339_v25 = vld [vmem:[%s20679_s4 + $0xce8] sm:$0xff] }
 0x8d9   :  { %v8314_v26 = vpop.f32.mrf.mxu2 }
 0x8da   :  { %vm8414_vm9 = vcmp.gt.f32.partialorder %v8398_v54, 0.0  ;;  %v8430_v31 = vmul.f32 0.1, %v8398_v54  ;;  %v8341_v52 = vadd.f32 %v8314_v26, %v8187_v28  ;;  %v8035_v26 = vadd.f32 %v8011_v29, %v7881_v39  ;;  %v15341_v29 = vld [vmem:[%s20679_s4 + $0xcf8] sm:$0xff] }
 0x8db   :  { %9451 = vmatpush.bf16.msrb.mxu1 %v15341_v29  ;;  %v15349_v29 = vld [vmem:[%s20679_s4 + $0xd38] sm:$0xff] }
 0x8dc   :  { %v19544_v30 = vsel %vm8414_vm9, %v8398_v54, %v8430_v31  ;;  %v19547_v6 = vadd.f32 %v8341_v52, %v20818_v34  ;;  %v19549_v45 = vld [vmem:[#allocation2 + $0x80] sm:$0xff]  ;;  %v8188_v34 = vadd.f32 %v8163_v14, %v8034_v59  ;;  %v20820_v52 = vld [vmem:[#allocation15_spill] sm:$0xff]  ;;  %v8014_v5 = vpop.f32.mrf.mxu0  ;;  %v8189_v57 = vadd.f32 %v8165_v50, %v8035_v26  ;;  %9605 = vmatpush.bf16.msrb.mxu2 %v15349_v29  ;;  %v15337_v29 = vld [vmem:[%s20679_s4 + $0xcd8] sm:$0xff] }
 0x8dd   :  { %8462 = vst [vmem:[#allocation2 + $0xb1] sm:$0xff] %v19544_v30  ;;  %v8919_v38 = vpack.c.bf16 %v19549_v45, %v8477_v32  ;;  %v8531_v58 = vpack.c.bf16 %v19544_v30, %v8519_v62  ;;  %v8754_v54 = vld [vmem:[#allocation2 + $0xa2] sm:$0xff]  ;;  %v7862_v39 = vpop.f32.mrf.mxu3  ;;  %v8036_v50 = vadd.f32 %v8014_v5, %v7882_v15 }
 0x8de   :  { %20819 = vst [vmem:[#allocation14_spill] sm:$0xff] %v19547_v6  ;;  %v8378_v20 = vmul.f32 %v19372_v22, %v19547_v6 }
 0x8df   :  { %9012 = vmatmul.bf16.gmra.mxu2 %v8919_v38  ;;  %8628 = vmatmul.bf16.gmra.mxu3 %v8531_v58 }
 0x8e0   :  { %v8399_v23 = vadd.f32 %v19380_v7, %v8378_v20  ;;  %v8168_v20 = vpop.f32.mrf.mxu1 }
 0x8e1   :  { %v8317_v32 = vpop.f32.mrf.mxu2 }
 0x8e2   :  { %vm8415_vm10 = vcmp.gt.f32.partialorder %v8399_v23, 0.0  ;;  %v8431_v28 = vmul.f32 0.1, %v8399_v23  ;;  %v8342_v47 = vadd.f32 %v8317_v32, %v8188_v34 }
 0x8e4   :  { %v19563_v31 = vsel %vm8415_vm10, %v8399_v23, %v8431_v28  ;;  %v19566_v62 = vadd.f32 %v8342_v47, %v20820_v52  ;;  %v8479_v4 = vld [vmem:[#allocation2 + $0xb0] sm:$0xff] }
 0x8e5   :  { %v19568_v14 = vld [vmem:[#allocation2 + $0xb2] sm:$0xff]  ;;  %8463 = vst [vmem:[#allocation2 + $0xc1] sm:$0xff] %v19563_v31  ;;  %v8490_v59 = vpack.c.bf16 %v8479_v4, %v19118_v17  ;;  %v9074_v58 = vpack.c.bf16 %v19563_v31, %v19544_v30  ;;  %v7421_v17 = vadd.f32 %v19186_v10, %v7263_v12  ;;  %v15351_v30 = vld [vmem:[%s20679_s4 + $0xd48] sm:$0xff] }
 0x8e6   :  { %20821 = vst [vmem:[#allocation15_spill] sm:$0xff] %v19566_v62  ;;  %v8766_v38 = vpack.c.bf16 %v19568_v14, %v8754_v54  ;;  %v8379_v9 = vmul.f32 %v19372_v22, %v19566_v62  ;;  %v15332_v47 = vld [vmem:[%s20679_s4 + $0xcb0] sm:$0xff] }
 0x8e7   :  { %8725 = vmatmul.bf16.gmra.mxu0 %v8490_v59  ;;  %v15340_v10 = vld [vmem:[%s20679_s4 + $0xcf0] sm:$0xff]  ;;  %v7575_v1 = vadd.f32 %v19192_v33, %v7421_v17 }
 0x8e8   :  { %8863 = vmatmul.bf16.gmra.mxu1 %v8766_v38  ;;  %v8400_v34 = vadd.f32 %v19380_v7, %v8379_v9  ;;  %v20822_v54 = vld [vmem:[#allocation16_spill] sm:$0xff]  ;;  %v15319_v38 = vld [vmem:[%s20679_s4 + $0xc48] sm:$0xff]  ;;  %9298 = vmatpush.bf16.msra.mxu0 %v15332_v47  ;;  %v8016_v9 = vpop.f32.mrf.mxu0  ;;  %v15330_v47 = vld [vmem:[%s20679_s4 + $0xca0] sm:$0xff] }
 0x8e9   :  { %v8319_v23 = vpop.f32.mrf.mxu2  ;;  %9452 = vmatpush.bf16.msrb.mxu1 %v15340_v10  ;;  %v7729_v33 = vadd.f32 %v19316_v37, %v7575_v1  ;;  %v8190_v37 = vadd.f32 %v8168_v20, %v8036_v50  ;;  %9149 = vmatpush.bf16.msra.mxu3 %v15319_v38  ;;  %v15338_v20 = vld [vmem:[%s20679_s4 + $0xce0] sm:$0xff]  ;;  %v7268_v10 = vadd.f32 %v19248_v8, %v19198_v61 }
 0x8ea   :  { %vm8416_vm11 = vcmp.gt.f32.partialorder %v8400_v34, 0.0  ;;  %v8432_v32 = vmul.f32 0.1, %v8400_v34  ;;  %v8343_v28 = vadd.f32 %v8319_v23, %v8189_v57 }
 0x8eb   :  { %v7883_v17 = vadd.f32 %v7862_v39, %v7729_v33  ;;  %v15348_v39 = vld [vmem:[%s20679_s4 + $0xd30] sm:$0xff] }
 0x8ec   :  { %v19593_v44 = vsel %vm8416_vm11, %v8400_v34, %v8432_v32  ;;  %v19596_v12 = vadd.f32 %v8343_v28, %v20822_v54  ;;  %v8909_v26 = vld [vmem:[#allocation2 + $0xc0] sm:$0xff]  ;;  %v8170_v32 = vpop.f32.mrf.mxu1  ;;  %v7865_v28 = vpop.f32.mrf.mxu3  ;;  %9606 = vmatpush.bf16.msrb.mxu2 %v15348_v39 }
 0x8ed   :  { %8464 = vst [vmem:[#allocation2 + $0xd1] sm:$0xff] %v19593_v44  ;;  %v8920_v52 = vpack.c.bf16 %v8909_v26, %v8479_v4  ;;  %v19601_v59 = vpack.c.bf16 %v19593_v44, %v19563_v31  ;;  %v15331_v4 = vld [vmem:[%s20679_s4 + $0xca8] sm:$0xff]  ;;  %9453 = vmatpush.bf16.msrb.mxu1 %v15339_v25  ;;  %v8037_v1 = vadd.f32 %v8016_v9, %v7883_v17  ;;  %v20824_v54 = vld [vmem:[#allocation17_spill] sm:$0xff] }
 0x8ee   :  { %20823 = vst [vmem:[#allocation16_spill] sm:$0xff] %v19596_v12  ;;  %v8380_v5 = vmul.f32 %v19372_v22, %v19596_v12  ;;  %9299 = vmatpush.bf16.msra.mxu0 %v15331_v4  ;;  %v19636_v33 = vld [vmem:[#allocation2 + $0xc2] sm:$0xff]  ;;  %v15329_v9 = vld [vmem:[%s20679_s4 + $0xc98] sm:$0xff] }
 0x8ef   :  { %9017 = vmatmul.bf16.gmra.mxu2 %v8920_v52  ;;  %8633 = vmatmul.bf16.gmra.mxu3 %v19601_v59  ;;  %v8191_v17 = vadd.f32 %v8170_v32, %v8037_v1  ;;  %v15346_v32 = vld [vmem:[%s20679_s4 + $0xd20] sm:$0xff] }
 0x8f0   :  { %v8401_v57 = vadd.f32 %v19380_v7, %v8380_v5 }
 0x8f1   :  { %v8322_v15 = vpop.f32.mrf.mxu2  ;;  %9454 = vmatpush.bf16.msrb.mxu1 %v15338_v20  ;;  %v15328_v20 = vld [vmem:[%s20679_s4 + $0xc90] sm:$0xff] }
 0x8f2   :  { %vm8417_vm12 = vcmp.gt.f32.partialorder %v8401_v57, 0.0  ;;  %v8433_v34 = vmul.f32 0.1, %v8401_v57  ;;  %v8344_v23 = vadd.f32 %v8322_v15, %v8190_v37  ;;  %9300 = vmatpush.bf16.msra.mxu0 %v15330_v47  ;;  %v7423_v37 = vadd.f32 %v19256_v27, %v7268_v10 }
 0x8f4   :  { %v19631_v50 = vsel %vm8417_vm12, %v8401_v57, %v8433_v34  ;;  %v19634_v52 = vadd.f32 %v8344_v23, %v20824_v54  ;;  %v8481_v38 = vld [vmem:[#allocation2 + $0xd0] sm:$0xff]  ;;  %v7884_v57 = vadd.f32 %v7865_v28, %v19341_v51  ;;  %v15347_v34 = vld [vmem:[%s20679_s4 + $0xd28] sm:$0xff]  ;;  %v8019_v23 = vpop.f32.mrf.mxu0  ;;  %v7577_v28 = vadd.f32 %v19258_v0, %v7423_v37 }
 0x8f5   :  { %v19638_v5 = vld [vmem:[#allocation2 + $0xd2] sm:$0xff]  ;;  %8465 = vst [vmem:[#allocation2 + $0xe1] sm:$0xff] %v19631_v50  ;;  %v19641_v4 = vpack.c.bf16 %v8481_v38, %v8909_v26  ;;  %v15318_v26 = vld [vmem:[%s20679_s4 + $0xc40] sm:$0xff]  ;;  %9455 = vmatpush.bf16.msrb.mxu1 %v15337_v29  ;;  %9607 = vmatpush.bf16.msrb.mxu2 %v15347_v34  ;;  %v15327_v37 = vld [vmem:[%s20679_s4 + $0xc88] sm:$0xff] }
 0x8f6   :  { %20825 = vst [vmem:[#allocation17_spill] sm:$0xff] %v19634_v52  ;;  %v8767_v25 = vpack.c.bf16 %v19638_v5, %v19636_v33  ;;  %v8381_v8 = vmul.f32 %v19372_v22, %v19634_v52  ;;  %9150 = vmatpush.bf16.msra.mxu3 %v15318_v26  ;;  %9301 = vmatpush.bf16.msra.mxu0 %v15329_v9  ;;  %v15336_v51 = vld [vmem:[%s20679_s4 + $0xcd0] sm:$0xff]  ;;  %v20826_v54 = vld [vmem:[#allocation18_spill] sm:$0xff]  ;;  %v8173_v26 = vpop.f32.mrf.mxu1  ;;  %v7867_v9 = vpop.f32.mrf.mxu3 }
 0x8f7   :  { %8730 = vmatmul.bf16.gmra.mxu0 %v19641_v4  ;;  %v8038_v10 = vadd.f32 %v8019_v23, %v7884_v57  ;;  %v7731_v34 = vadd.f32 %v19357_v35, %v7577_v28  ;;  %v15345_v35 = vld [vmem:[%s20679_s4 + $0xd18] sm:$0xff]  ;;  %v15344_v28 = vld [vmem:[%s20679_s4 + $0xd10] sm:$0xff] }
 0x8f8   :  { %8868 = vmatmul.bf16.gmra.mxu1 %v8767_v25  ;;  %v8402_v15 = vadd.f32 %v19380_v7, %v8381_v8 }
 0x8f9   :  { %v8324_v47 = vpop.f32.mrf.mxu2  ;;  %9456 = vmatpush.bf16.msrb.mxu1 %v15336_v51  ;;  %9608 = vmatpush.bf16.msrb.mxu2 %v15346_v32  ;;  %v8192_v57 = vadd.f32 %v8173_v26, %v8038_v10  ;;  %v15326_v51 = vld [vmem:[%s20679_s4 + $0xc80] sm:$0xff]  ;;  %v20828_v26 = vld [vmem:[#allocation19_spill] sm:$0xff] }
 0x8fa   :  { %vm8418_vm13 = vcmp.gt.f32.partialorder %v8402_v15, 0.0  ;;  %v8434_v39 = vmul.f32 0.1, %v8402_v15  ;;  %v8345_v27 = vadd.f32 %v8324_v47, %v8191_v17  ;;  %9302 = vmatpush.bf16.msra.mxu0 %v15328_v20  ;;  %v15334_v32 = vld [vmem:[%s20679_s4 + $0xcc0] sm:$0xff] }
 0x8fc   :  { %v19675_v1 = vsel %vm8418_vm13, %v8402_v15, %v8434_v39  ;;  %v19678_v25 = vadd.f32 %v8345_v27, %v20826_v54  ;;  %v8911_v8 = vld [vmem:[#allocation2 + $0xe0] sm:$0xff]  ;;  %v7885_v15 = vadd.f32 %v7867_v9, %v7731_v34  ;;  %v8021_v27 = vpop.f32.mrf.mxu0 }
 0x8fd   :  { %8466 = vst [vmem:[#allocation2 + $0xf1] sm:$0xff] %v19675_v1  ;;  %v8921_v29 = vpack.c.bf16 %v8911_v8, %v8481_v38  ;;  %v19683_v17 = vpack.c.bf16 %v19675_v1, %v19631_v50  ;;  %v15335_v38 = vld [vmem:[%s20679_s4 + $0xcc8] sm:$0xff]  ;;  %9609 = vmatpush.bf16.msrb.mxu2 %v15345_v35 }
 0x8fe   :  { %20827 = vst [vmem:[#allocation18_spill] sm:$0xff] %v19678_v25  ;;  %v8382_v0 = vmul.f32 %v19372_v22, %v19678_v25  ;;  %9303 = vmatpush.bf16.msra.mxu0 %v15327_v37  ;;  %9457 = vmatpush.bf16.msrb.mxu1 %v15335_v38  ;;  %v8039_v10 = vadd.f32 %v8021_v27, %v7885_v15  ;;  %v19713_v34 = vld [vmem:[#allocation2 + $0xe2] sm:$0xff]  ;;  %v8175_v15 = vpop.f32.mrf.mxu1 }
 0x8ff   :  { %9022 = vmatmul.bf16.gmra.mxu2 %v8921_v29  ;;  %8638 = vmatmul.bf16.gmra.mxu3 %v19683_v17 }
 0x900   :  { %v8403_v23 = vadd.f32 %v19380_v7, %v8382_v0 }
 0x901   :  { %v8327_v47 = vpop.f32.mrf.mxu2  ;;  %9610 = vmatpush.bf16.msrb.mxu2 %v15344_v28 }
 0x902   :  { %vm8419_vm14 = vcmp.gt.f32.partialorder %v8403_v23, 0.0  ;;  %v8435_v20 = vmul.f32 0.1, %v8403_v23  ;;  %v8346_v39 = vadd.f32 %v8327_v47, %v8192_v57  ;;  %9304 = vmatpush.bf16.msra.mxu0 %v15326_v51  ;;  %9458 = vmatpush.bf16.msrb.mxu1 %v15334_v32  ;;  %v8193_v47 = vadd.f32 %v8175_v15, %v8039_v10  ;;  %v15342_v32 = vld [vmem:[%s20679_s4 + $0xd00] sm:$0xff] }
 0x904   :  { %v19708_v54 = vsel %vm8419_vm14, %v8403_v23, %v8435_v20  ;;  %v19711_v9 = vadd.f32 %v8346_v39, %v20828_v26  ;;  %v8483_v29 = vld [vmem:[#allocation2 + $0xf0] sm:$0xff]  ;;  %v15343_v23 = vld [vmem:[%s20679_s4 + $0xd08] sm:$0xff] }
 0x905   :  { %v19715_v0 = vld [vmem:[#allocation2 + $0xf2] sm:$0xff]  ;;  %8467 = vst [vmem:[#allocation2 + $0x101] sm:$0xff] %v19708_v54  ;;  %v19718_v37 = vpack.c.bf16 %v8483_v29, %v8911_v8  ;;  %9611 = vmatpush.bf16.msrb.mxu2 %v15343_v23 }
 0x906   :  { %20829 = vst [vmem:[#allocation19_spill] sm:$0xff] %v19711_v9  ;;  %v8768_v38 = vpack.c.bf16 %v19715_v0, %v19713_v34  ;;  %v8383_v57 = vmul.f32 %v19372_v22, %v19711_v9  ;;  %v15357_v8 = vld [vmem:[%s20679_s4 + $0xd78] sm:$0xff] }
 0x907   :  { %8735 = vmatmul.bf16.gmra.mxu0 %v19718_v37  ;;  %9759 = vmatpush.bf16.msrb.mxu3 %v15357_v8  ;;  %v20830_v26 = vld [vmem:[#allocation20_spill] sm:$0xff] }
 0x908   :  { %8873 = vmatmul.bf16.gmra.mxu1 %v8768_v38  ;;  %v8404_v20 = vadd.f32 %v19380_v7, %v8383_v57 }
 0x909   :  { %v8329_v39 = vpop.f32.mrf.mxu2  ;;  %9612 = vmatpush.bf16.msrb.mxu2 %v15342_v32 }
 0x90a   :  { %vm8420_vm15 = vcmp.gt.f32.partialorder %v8404_v20, 0.0  ;;  %v8436_v27 = vmul.f32 0.1, %v8404_v20  ;;  %v8347_v51 = vadd.f32 %v8329_v39, %v8193_v47 }
 0x90c   :  { %v19737_v28 = vsel %vm8420_vm15, %v8404_v20, %v8436_v27  ;;  %v19740_v38 = vadd.f32 %v8347_v51, %v20830_v26  ;;  %v8913_v35 = vld [vmem:[#allocation2 + $0x100] sm:$0xff]  ;;  %v15356_v51 = vld [vmem:[%s20679_s4 + $0xd70] sm:$0xff]  ;;  %v20832_v26 = vpack.c.bf16 %v19402_v2, %v19386_v55 }
 0x90d   :  { %8468 = vst [vmem:[#allocation2 + $0x111] sm:$0xff] %v19737_v28  ;;  %v8922_v10 = vpack.c.bf16 %v8913_v35, %v8483_v29  ;;  %v19745_v57 = vpack.c.bf16 %v19737_v28, %v19708_v54  ;;  %v19753_v39 = vld [vmem:[#allocation2 + $0x102] sm:$0xff]  ;;  %9760 = vmatpush.bf16.msrb.mxu3 %v15356_v51 }
 0x90e   :  { %20831 = vst [vmem:[#allocation20_spill] sm:$0xff] %v19740_v38  ;;  %v8384_v15 = vmul.f32 %v19372_v22, %v19740_v38  ;;  %v9971_v38 = vld [vmem:[#allocation2 + $0x1] sm:$0xff] }
 0x90f   :  { %9027 = vmatmul.bf16.gmra.mxu2 %v8922_v10  ;;  %8643 = vmatmul.bf16.gmra.mxu3 %v19745_v57 }
 0x910   :  { %v8405_v8 = vadd.f32 %v19380_v7, %v8384_v15 }
 0x912   :  { %vm8421_vm1 = vcmp.gt.f32.partialorder %v8405_v8, 0.0  ;;  %v8437_v23 = vmul.f32 0.1, %v8405_v8 }
 0x914   :  { %v19751_v47 = vsel %vm8421_vm1, %v8405_v8, %v8437_v23  ;;  %v8485_v20 = vld [vmem:[#allocation2 + $0x110] sm:$0xff]  ;;  %v9224_v23 = vpack.c.bf16 %v19441_v36, %v19407_v46 }
 0x915   :  { %v19755_v29 = vld [vmem:[#allocation2 + $0x112] sm:$0xff]  ;;  %8469 = vst [vmem:[#allocation2 + $0x121] sm:$0xff] %v19751_v47  ;;  %v19758_v27 = vpack.c.bf16 %v8485_v20, %v8913_v35 }
 0x916   :  { %v19762_v22 = vpack.c.bf16 %v19755_v29, %v19753_v39 }
 0x917   :  { %8740 = vmatmul.bf16.gmra.mxu0 %v19758_v27 }
 0x918   :  { %8878 = vmatmul.bf16.gmra.mxu1 %v19762_v22 }
 0x91c   :  { %v19771_v32 = vld [vmem:[#allocation2 + $0x120] sm:$0xff] }
 0x91d   :  { %v8923_v35 = vpack.c.bf16 %v19771_v32, %v8485_v20  ;;  %v15355_v20 = vld [vmem:[%s20679_s4 + $0xd68] sm:$0xff] }
 0x91e   :  { %9761 = vmatpush.bf16.msrb.mxu3 %v15355_v20 }
 0x91f   :  { %9032 = vmatmul.bf16.gmra.mxu2 %v8923_v35  ;;  %9151 = vmatmul.bf16.vlgmr.msra.gmra.mxu3 %v20832_v26  ;;  %v20833_v26 = vpack.c.bf16 %v19436_v42, %v19418_v63  ;;  %v15354_v63 = vld [vmem:[%s20679_s4 + $0xd60] sm:$0xff] }
 0x922   :  { %v8609_v10 = vpop.f32.mrf.mxu3  ;;  %9762 = vmatpush.bf16.msrb.mxu3 %v15354_v63 }
 0x924   :  { %v8706_v15 = vpop.f32.mrf.mxu0 }
 0x925   :  { %v8844_v8 = vpop.f32.mrf.mxu1  ;;  %v8707_v7 = vadd.f32 %v8706_v15, %v8609_v10 }
 0x927   :  { %9305 = vmatmul.bf16.vlgmr.msra.gmra.mxu0 %v9224_v23  ;;  %v8884_v51 = vadd.f32 %v8844_v8, %v8707_v7  ;;  %v9225_v8 = vpack.c.bf16 %v19483_v48, %v19443_v40  ;;  %v20834_v40 = vpack.c.bf16 %v19478_v56, %v19458_v19  ;;  %v15353_v19 = vld [vmem:[%s20679_s4 + $0xd58] sm:$0xff] }
 0x928   :  { %9459 = vmatmul.bf16.vlgmr.msrb.gmra.mxu1 %v19446_v3  ;;  %9763 = vmatpush.bf16.msrb.mxu3 %v15353_v19 }
 0x92a   :  { %v8611_v35 = vpop.f32.mrf.mxu3 }
 0x92c   :  { %v8708_v61 = vpop.f32.mrf.mxu0 }
 0x92d   :  { %v8846_v55 = vpop.f32.mrf.mxu1  ;;  %v8709_v2 = vadd.f32 %v8708_v61, %v8611_v35 }
 0x92f   :  { %9613 = vmatmul.bf16.vlgmr.msrb.gmra.mxu2 %v19426_v53  ;;  %9156 = vmatmul.bf16.gmra.mxu3 %v20833_v26  ;;  %v8885_v46 = vadd.f32 %v8846_v55, %v8709_v2 }
 0x932   :  { %v8998_v36 = vpop.f32.mrf.mxu2  ;;  %v8614_v10 = vpop.f32.mrf.mxu3 }
 0x933   :  { %v19787_v3 = vadd.f32 %v8998_v36, %v8884_v51 }
 0x934   :  { %v8711_v7 = vpop.f32.mrf.mxu0 }
 0x935   :  { %v8849_v15 = vpop.f32.mrf.mxu1  ;;  %v8712_v23 = vadd.f32 %v8711_v7, %v8614_v10  ;;  %v20835_v7 = vld [vmem:[#allocation12_spill] sm:$0xff] }
 0x937   :  { %9310 = vmatmul.bf16.gmra.mxu0 %v9225_v8  ;;  %v8886_v61 = vadd.f32 %v8849_v15, %v8712_v23 }
 0x938   :  { %9464 = vmatmul.bf16.gmra.mxu1 %v19488_v11 }
 0x93a   :  { %v9000_v53 = vpop.f32.mrf.mxu2  ;;  %v8616_v42 = vpop.f32.mrf.mxu3 }
 0x93b   :  { %v19795_v20 = vadd.f32 %v9000_v53, %v8885_v46  ;;  %v9226_v46 = vpack.c.bf16 %v19526_v24, %v20835_v7  ;;  %v20836_v24 = vpack.c.bf16 %v19521_v13, %v19501_v60 }
 0x93c   :  { %v8713_v51 = vpop.f32.mrf.mxu0 }
 0x93d   :  { %v8851_v35 = vpop.f32.mrf.mxu1  ;;  %v8714_v55 = vadd.f32 %v8713_v51, %v8616_v42  ;;  %v19815_v51 = vld [vmem:[#allocation2 + $0x82] sm:$0xff] }
 0x93f   :  { %9618 = vmatmul.bf16.gmra.mxu2 %v19466_v41  ;;  %9161 = vmatmul.bf16.gmra.mxu3 %v20834_v40  ;;  %v8887_v48 = vadd.f32 %v8851_v35, %v8714_v55 }
 0x942   :  { %v9003_v11 = vpop.f32.mrf.mxu2  ;;  %v8619_v2 = vpop.f32.mrf.mxu3 }
 0x943   :  { %v19801_v26 = vadd.f32 %v9003_v11, %v8886_v61 }
 0x944   :  { %v8716_v36 = vpop.f32.mrf.mxu0 }
 0x945   :  { %v8854_v10 = vpop.f32.mrf.mxu1  ;;  %v8717_v15 = vadd.f32 %v8716_v36, %v8619_v2  ;;  %v19821_v2 = vld [vmem:[#allocation2] sm:$0xff] }
 0x947   :  { %9315 = vmatmul.bf16.gmra.mxu0 %v9226_v46  ;;  %v8888_v8 = vadd.f32 %v8854_v10, %v8717_v15  ;;  %v15352_v10 = vld [vmem:[%s20679_s4 + $0xd50] sm:$0xff] }
 0x948   :  { %9469 = vmatmul.bf16.gmra.mxu1 %v19531_v49  ;;  %9764 = vmatpush.bf16.msrb.mxu3 %v15352_v10  ;;  %v9523_v46 = vld [vmem:[#allocation2 + $0x91] sm:$0xff]  ;;  %v9229_v10 = vpack.c.bf16 %v19713_v34, %v19638_v5  ;;  %v20838_v5 = vpack.c.bf16 %v19708_v54, %v19675_v1 }
 0x94a   :  { %v9005_v41 = vpop.f32.mrf.mxu2  ;;  %v8621_v56 = vpop.f32.mrf.mxu3 }
 0x94b   :  { %v19809_v23 = vadd.f32 %v9005_v41, %v8887_v48  ;;  %v9227_v48 = vpack.c.bf16 %v19815_v51, %v19528_v16  ;;  %v9535_v41 = vpack.c.bf16 %v9523_v46, %v19521_v13 }
 0x94c   :  { %v8718_v61 = vpop.f32.mrf.mxu0  ;;  %9765 = vmatpush.bf16.msrb.mxu3 %v15351_v30  ;;  %v9385_v30 = vpack.c.bf16 %v19821_v2, %v19771_v32 }
 0x94d   :  { %v8856_v63 = vpop.f32.mrf.mxu1  ;;  %v8719_v53 = vadd.f32 %v8718_v61, %v8621_v56 }
 0x94f   :  { %9623 = vmatmul.bf16.gmra.mxu2 %v19509_v18  ;;  %9166 = vmatmul.bf16.gmra.mxu3 %v20836_v24  ;;  %v8889_v49 = vadd.f32 %v8856_v63, %v8719_v53  ;;  %v9381_v18 = vpack.c.bf16 %v19821_v2, %v19549_v45 }
 0x952   :  { %v9008_v42 = vpop.f32.mrf.mxu2  ;;  %v8624_v35 = vpop.f32.mrf.mxu3 }
 0x953   :  { %v19817_v55 = vadd.f32 %v9008_v42, %v8888_v8 }
 0x954   :  { %v8721_v40 = vpop.f32.mrf.mxu0 }
 0x955   :  { %v8859_v11 = vpop.f32.mrf.mxu1  ;;  %v8722_v36 = vadd.f32 %v8721_v40, %v8624_v35 }
 0x957   :  { %9320 = vmatmul.bf16.gmra.mxu0 %v9227_v48  ;;  %v8890_v60 = vadd.f32 %v8859_v11, %v8722_v36 }
 0x958   :  { %9474 = vmatmul.bf16.gmra.mxu1 %v9381_v18 }
 0x95a   :  { %v9010_v7 = vpop.f32.mrf.mxu2  ;;  %v8626_v15 = vpop.f32.mrf.mxu3 }
 0x95b   :  { %v19828_v8 = vadd.f32 %v9010_v7, %v8889_v49  ;;  %v9228_v49 = vpack.c.bf16 %v19636_v33, %v19568_v14  ;;  %v20837_v14 = vpack.c.bf16 %v19631_v50, %v19593_v44 }
 0x95c   :  { %v8723_v16 = vpop.f32.mrf.mxu0 }
 0x95d   :  { %v8861_v19 = vpop.f32.mrf.mxu1  ;;  %v8724_v56 = vadd.f32 %v8723_v16, %v8626_v15 }
 0x95f   :  { %9628 = vmatmul.bf16.gmra.mxu2 %v9535_v41  ;;  %9171 = vmatmul.bf16.gmra.mxu3 %v9074_v58  ;;  %v8891_v45 = vadd.f32 %v8861_v19, %v8724_v56 }
 0x962   :  { %v9013_v61 = vpop.f32.mrf.mxu2  ;;  %v8629_v63 = vpop.f32.mrf.mxu3 }
 0x963   :  { %v19834_v53 = vadd.f32 %v9013_v61, %v8890_v60 }
 0x964   :  { %v8726_v24 = vpop.f32.mrf.mxu0 }
 0x965   :  { %v8864_v42 = vpop.f32.mrf.mxu1  ;;  %v8727_v35 = vadd.f32 %v8726_v24, %v8629_v63 }
 0x967   :  { %9325 = vmatmul.bf16.gmra.mxu0 %v9228_v49  ;;  %v8892_v13 = vadd.f32 %v8864_v42, %v8727_v35  ;;  %v20839_v42 = vpack.c.bf16 %v19751_v47, %v19737_v28 }
 0x968   :  { %9479 = vmatmul.bf16.gmra.mxu1 %v19641_v4 }
 0x96a   :  { %v9015_v31 = vpop.f32.mrf.mxu2  ;;  %v19842_v58 = vpop.f32.mrf.mxu3 }
 0x96b   :  { %v19844_v40 = vadd.f32 %v9015_v31, %v8891_v45  ;;  %v9230_v45 = vpack.c.bf16 %v19753_v39, %v19715_v0  ;;  %v19891_v39 = vld [vmem:[#allocation2 + $0x122] sm:$0xff] }
 0x96c   :  { %v19846_v11 = vpop.f32.mrf.mxu0 }
 0x96d   :  { %v19848_v48 = vpop.f32.mrf.mxu1 }
 0x96f   :  { %9633 = vmatmul.bf16.gmra.mxu2 %v19601_v59  ;;  %9176 = vmatmul.bf16.gmra.mxu3 %v20837_v14  ;;  %v15350_v59 = vld [vmem:[%s20679_s4 + $0xd40] sm:$0xff] }
 0x970   :  { %9766 = vmatpush.bf16.msrb.mxu3 %v15350_v59 }
 0x972   :  { %v9018_v33 = vpop.f32.mrf.mxu2  ;;  %v8634_v4 = vpop.f32.mrf.mxu3 }
 0x973   :  { %v19854_v18 = vadd.f32 %v9018_v33, %v8892_v13  ;;  %v9231_v13 = vpack.c.bf16 %v19891_v39, %v19755_v29  ;;  %v9531_v33 = vld [vmem:[#allocation2 + $0x131] sm:$0xff] }
 0x974   :  { %v8731_v36 = vpop.f32.mrf.mxu0  ;;  %v9539_v29 = vpack.c.bf16 %v9531_v33, %v19751_v47  ;;  %v15372_v47 = vld [vmem:[%s20679_s4 + $0xdf0] sm:$0xff] }
 0x975   :  { %v8869_v60 = vpop.f32.mrf.mxu1  ;;  %v8732_v7 = vadd.f32 %v8731_v36, %v8634_v4  ;;  %v9671_v36 = vld [vmem:[#allocation2 + $0x32] sm:$0xff] }
 0x977   :  { %9330 = vmatmul.bf16.gmra.mxu0 %v9229_v10  ;;  %v8894_v46 = vadd.f32 %v8869_v60, %v8732_v7  ;;  %v9670_v60 = vld [vmem:[#allocation2 + $0x22] sm:$0xff]  ;;  %v15373_v10 = vld [vmem:[%s20679_s4 + $0xdf8] sm:$0xff] }
 0x978   :  { %9484 = vmatmul.bf16.gmra.mxu1 %v19718_v37  ;;  %v9686_v7 = vpack.c.bf16 %v9671_v36, %v9670_v60  ;;  %10060 = vmatpush.bf16.msrb.mxu0 %v15373_v10 }
 0x97a   :  { %v19862_v44 = vpop.f32.mrf.mxu2  ;;  %v19864_v50 = vpop.f32.mrf.mxu3 }
 0x97c   :  { %v19866_v15 = vpop.f32.mrf.mxu0  ;;  %10061 = vmatpush.bf16.msrb.mxu0 %v15372_v47 }
 0x97d   :  { %v19868_v16 = vpop.f32.mrf.mxu1 }
 0x97f   :  { %9638 = vmatmul.bf16.gmra.mxu2 %v19683_v17  ;;  %9181 = vmatmul.bf16.gmra.mxu3 %v20838_v5 }
 0x982   :  { %v9023_v34 = vpop.f32.mrf.mxu2  ;;  %v8639_v37 = vpop.f32.mrf.mxu3 }
 0x983   :  { %v19874_v19 = vadd.f32 %v9023_v34, %v8894_v46 }
 0x984   :  { %v8736_v41 = vpop.f32.mrf.mxu0 }
 0x985   :  { %v8874_v56 = vpop.f32.mrf.mxu1  ;;  %v8737_v61 = vadd.f32 %v8736_v41, %v8639_v37  ;;  %v9673_v37 = vld [vmem:[#allocation2 + $0x52] sm:$0xff] }
 0x987   :  { %9335 = vmatmul.bf16.gmra.mxu0 %v9230_v45  ;;  %v8896_v63 = vadd.f32 %v8874_v56, %v8737_v61  ;;  %v9672_v56 = vld [vmem:[#allocation2 + $0x42] sm:$0xff] }
 0x988   :  { %9489 = vmatmul.bf16.gmra.mxu1 %v19758_v27  ;;  %v9687_v45 = vpack.c.bf16 %v9673_v37, %v9672_v56 }
 0x98a   :  { %v19879_v24 = vpop.f32.mrf.mxu2  ;;  %v19881_v17 = vpop.f32.mrf.mxu3 }
 0x98c   :  { %v19883_v1 = vpop.f32.mrf.mxu0 }
 0x98d   :  { %v19885_v54 = vpop.f32.mrf.mxu1 }
 0x98f   :  { %9643 = vmatmul.bf16.gmra.mxu2 %v19745_v57  ;;  %9186 = vmatmul.bf16.gmra.mxu3 %v20839_v42 }
 0x992   :  { %v9028_v0 = vpop.f32.mrf.mxu2  ;;  %v8644_v49 = vpop.f32.mrf.mxu3 }
 0x993   :  { %v19893_v27 = vadd.f32 %v9028_v0, %v8896_v63 }
 0x994   :  { %v8741_v35 = vpop.f32.mrf.mxu0 }
 0x995   :  { %v8742_v31 = vadd.f32 %v8741_v35, %v8644_v49  ;;  %v8879_v14 = vpop.f32.mrf.mxu1  ;;  %v9674_v49 = vld [vmem:[#allocation2 + $0x62] sm:$0xff] }
 0x997   :  { %9340 = vmatmul.bf16.gmra.mxu0 %v9231_v13  ;;  %v8898_v57 = vadd.f32 %v8879_v14, %v8742_v31 }
 0x998   :  { %9494 = vmatmul.bf16.gmra.mxu1 %v9385_v30 }
 0x99a   :  { %v19899_v28 = vpop.f32.mrf.mxu2  ;;  %v19901_v4 = vpop.f32.mrf.mxu3 }
 0x99c   :  { %v19954_v56 = vpop.f32.mrf.mxu0 }
 0x99f   :  { %9648 = vmatmul.bf16.gmra.mxu2 %v9539_v29  ;;  %9767 = vmatmul.bf16.vlgmr.msrb.gmra.mxu3 %v9686_v7  ;;  %v9678_v29 = vld [vmem:[#allocation2 + $0xc2] sm:$0xff] }
 0x9a2   :  { %v9033_v32 = vpop.f32.mrf.mxu2  ;;  %v9152_v46 = vpop.f32.mrf.mxu3 }
 0x9a3   :  { %v19907_v59 = vadd.f32 %v9033_v32, %v8898_v57  ;;  %v19910_v5 = vadd.f32 %v9152_v46, %v19787_v3  ;;  %v9675_v3 = vld [vmem:[#allocation2 + $0x72] sm:$0xff] }
 0x9a4   :  { %v9688_v35 = vpack.c.bf16 %v9675_v3, %v9674_v49  ;;  %v15381_v3 = vld [vmem:[%s20679_s4 + $0xe38] sm:$0xff]  ;;  %v19969_v49 = vpop.f32.mrf.mxu0 }
 0x9a5   :  { %10295 = vmatpush.bf16.msra.mxu2 %v15381_v3  ;;  %v15360_v3 = vld [vmem:[%s20679_s4 + $0xd90] sm:$0xff] }
 0x9aa   :  { %v9154_v34 = vpop.f32.mrf.mxu3 }
 0x9ab   :  { %v19913_v41 = vadd.f32 %v9154_v34, %v19795_v20  ;;  %v15371_v20 = vld [vmem:[%s20679_s4 + $0xde8] sm:$0xff] }
 0x9ac   :  { %10062 = vmatpush.bf16.msrb.mxu0 %v15371_v20  ;;  %v9680_v34 = vld [vmem:[#allocation2 + $0xe2] sm:$0xff] }
 0x9af   :  { %9772 = vmatmul.bf16.gmra.mxu3 %v9687_v45 }
 0x9b2   :  { %v9157_v61 = vpop.f32.mrf.mxu3 }
 0x9b3   :  { %v19919_v63 = vadd.f32 %v9157_v61, %v19801_v26  ;;  %v9677_v26 = vld [vmem:[#allocation2 + $0x92] sm:$0xff]  ;;  %v19959_v61 = vpop.f32.mrf.mxu1 }
 0x9b4   :  { %v9689_v57 = vpack.c.bf16 %v9677_v26, %v19815_v51  ;;  %v15379_v26 = vld [vmem:[%s20679_s4 + $0xe28] sm:$0xff] }
 0x9ba   :  { %v9159_v42 = vpop.f32.mrf.mxu3 }
 0x9bb   :  { %v19922_v0 = vadd.f32 %v9159_v42, %v19809_v23  ;;  %v15370_v23 = vld [vmem:[%s20679_s4 + $0xde0] sm:$0xff]  ;;  %v15365_v42 = vld [vmem:[%s20679_s4 + $0xdb8] sm:$0xff] }
 0x9bc   :  { %10063 = vmatpush.bf16.msrb.mxu0 %v15370_v23  ;;  %10157 = vmatpush.bf16.msra.mxu1 %v15365_v42  ;;  %v15389_v23 = vld [vmem:[%s20679_s4 + $0xe78] sm:$0xff]  ;;  %v15366_v42 = vld [vmem:[%s20679_s4 + $0xdc0] sm:$0xff] }
 0x9bd   :  { %10449 = vmatpush.bf16.msra.mxu3 %v15389_v23  ;;  %v15375_v23 = vld [vmem:[%s20679_s4 + $0xe08] sm:$0xff] }
 0x9bf   :  { %9777 = vmatmul.bf16.gmra.mxu3 %v9688_v35  ;;  %v15380_v35 = vld [vmem:[%s20679_s4 + $0xe30] sm:$0xff] }
 0x9c0   :  { %10296 = vmatpush.bf16.msra.mxu2 %v15380_v35  ;;  %v15386_v35 = vld [vmem:[%s20679_s4 + $0xe60] sm:$0xff] }
 0x9c2   :  { %v9162_v13 = vpop.f32.mrf.mxu3 }
 0x9c3   :  { %v19928_v30 = vadd.f32 %v9162_v13, %v19817_v55  ;;  %v9679_v55 = vld [vmem:[#allocation2 + $0xd2] sm:$0xff]  ;;  %v15367_v13 = vld [vmem:[%s20679_s4 + $0xdc8] sm:$0xff] }
 0x9c4   :  { %v9690_v7 = vpack.c.bf16 %v9679_v55, %v9678_v29  ;;  %10297 = vmatpush.bf16.msra.mxu2 %v15379_v26  ;;  %v15362_v55 = vld [vmem:[%s20679_s4 + $0xda0] sm:$0xff]  ;;  %v15359_v26 = vld [vmem:[%s20679_s4 + $0xd88] sm:$0xff] }
 0x9c5   :  { %v15378_v29 = vld [vmem:[%s20679_s4 + $0xe20] sm:$0xff] }
 0x9c8   :  { %10298 = vmatpush.bf16.msra.mxu2 %v15378_v29  ;;  %v15374_v29 = vld [vmem:[%s20679_s4 + $0xe00] sm:$0xff] }
 0x9ca   :  { %v9164_v31 = vpop.f32.mrf.mxu3 }
 0x9cb   :  { %v19931_v14 = vadd.f32 %v9164_v31, %v19828_v8  ;;  %v15369_v8 = vld [vmem:[%s20679_s4 + $0xdd8] sm:$0xff]  ;;  %v15363_v31 = vld [vmem:[%s20679_s4 + $0xda8] sm:$0xff] }
 0x9cc   :  { %10064 = vmatpush.bf16.msrb.mxu0 %v15369_v8  ;;  %v15388_v8 = vld [vmem:[%s20679_s4 + $0xe70] sm:$0xff] }
 0x9cd   :  { %10450 = vmatpush.bf16.msra.mxu3 %v15388_v8  ;;  %v15384_v8 = vld [vmem:[%s20679_s4 + $0xe50] sm:$0xff] }
 0x9cf   :  { %9782 = vmatmul.bf16.gmra.mxu3 %v9689_v57  ;;  %v19991_v57 = vpop.f32.mrf.mxu1 }
 0x9d2   :  { %v9167_v33 = vpop.f32.mrf.mxu3 }
 0x9d3   :  { %v19938_v36 = vadd.f32 %v9167_v33, %v19834_v53  ;;  %v9681_v53 = vld [vmem:[#allocation2 + $0xf2] sm:$0xff] }
 0x9d4   :  { %v9691_v37 = vpack.c.bf16 %v9681_v53, %v9680_v34  ;;  %v15377_v53 = vld [vmem:[%s20679_s4 + $0xe18] sm:$0xff]  ;;  %v15387_v34 = vld [vmem:[%s20679_s4 + $0xe68] sm:$0xff] }
 0x9d5   :  { %10299 = vmatpush.bf16.msra.mxu2 %v15377_v53  ;;  %10451 = vmatpush.bf16.msra.mxu3 %v15387_v34 }
 0x9d9   :  { %10452 = vmatpush.bf16.msra.mxu3 %v15386_v35  ;;  %v15397_v35 = vld [vmem:[%s20679_s4 + $0xeb8] sm:$0xff] }
 0x9da   :  { %v9169_v60 = vpop.f32.mrf.mxu3 }
 0x9db   :  { %v19941_v10 = vadd.f32 %v9169_v60, %v19844_v40  ;;  %v15368_v40 = vld [vmem:[%s20679_s4 + $0xdd0] sm:$0xff] }
 0x9dc   :  { %10065 = vmatpush.bf16.msrb.mxu0 %v15368_v40  ;;  %v9685_v40 = vld [vmem:[#allocation2 + $0x132] sm:$0xff] }
 0x9df   :  { %9787 = vmatmul.bf16.gmra.mxu3 %v9690_v7 }
 0x9e0   :  { %10066 = vmatpush.bf16.msrb.mxu0 %v15367_v13  ;;  %v9693_v13 = vpack.c.bf16 %v9685_v40, %v19891_v39  ;;  %v15383_v40 = vld [vmem:[%s20679_s4 + $0xe48] sm:$0xff] }
 0x9e2   :  { %v9172_v51 = vpop.f32.mrf.mxu3 }
 0x9e3   :  { %v19947_v32 = vadd.f32 %v9172_v51, %v19854_v18  ;;  %v19961_v18 = vpop.f32.mrf.mxu2  ;;  %v15361_v51 = vld [vmem:[%s20679_s4 + $0xd98] sm:$0xff] }
 0x9e4   :  { %10067 = vmatpush.bf16.msrb.mxu0 %v15366_v42 }
 0x9e8   :  { %10603 = vmatpush.bf16.msra.mxu0 %v15397_v35 }
 0x9ea   :  { %v19949_v46 = vpop.f32.mrf.mxu3 }
 0x9eb   :  { %v9614_v33 = vpop.f32.mrf.mxu2 }
 0x9ef   :  { %9792 = vmatmul.bf16.gmra.mxu3 %v9691_v37 }
 0x9f2   :  { %v9177_v47 = vpop.f32.mrf.mxu3 }
 0x9f3   :  { %v19957_v45 = vadd.f32 %v9177_v47, %v19874_v19  ;;  %v15364_v19 = vld [vmem:[%s20679_s4 + $0xdb0] sm:$0xff]  ;;  %v9616_v37 = vpop.f32.mrf.mxu2 }
 0x9f4   :  { %10158 = vmatpush.bf16.msra.mxu1 %v15364_v19  ;;  %v15376_v19 = vld [vmem:[%s20679_s4 + $0xe10] sm:$0xff] }
 0x9f5   :  { %10300 = vmatpush.bf16.msra.mxu2 %v15376_v19  ;;  %v15382_v19 = vld [vmem:[%s20679_s4 + $0xe40] sm:$0xff] }
 0x9f8   :  { %10159 = vmatpush.bf16.msra.mxu1 %v15363_v31 }
 0x9f9   :  { %10301 = vmatpush.bf16.msra.mxu2 %v15375_v23 }
 0x9fa   :  { %v19971_v20 = vpop.f32.mrf.mxu3 }
 0x9fb   :  { %v9619_v34 = vpop.f32.mrf.mxu2 }
 0x9fc   :  { %10160 = vmatpush.bf16.msra.mxu1 %v15362_v55  ;;  %v15358_v55 = vld [vmem:[%s20679_s4 + $0xd80] sm:$0xff] }
 0x9fd   :  { %10302 = vmatpush.bf16.msra.mxu2 %v15374_v29 }
 0x9ff   :  { %9797 = vmatmul.bf16.gmra.mxu3 %v19762_v22  ;;  %v9308_v22 = vpop.f32.mrf.mxu0 }
 0xa00   :  { %10161 = vmatpush.bf16.msra.mxu1 %v15361_v51 }
 0xa02   :  { %v9182_v60 = vpop.f32.mrf.mxu3 }
 0xa03   :  { %v20004_v7 = vadd.f32 %v9182_v60, %v19893_v27  ;;  %v9462_v27 = vpop.f32.mrf.mxu1  ;;  %v15385_v60 = vld [vmem:[%s20679_s4 + $0xe58] sm:$0xff] }
 0xa04   :  { %10162 = vmatpush.bf16.msra.mxu1 %v15360_v3  ;;  %10453 = vmatpush.bf16.msra.mxu3 %v15385_v60 }
 0xa07   :  { %v9311_v31 = vpop.f32.mrf.mxu0 }
 0xa08   :  { %10163 = vmatpush.bf16.msra.mxu1 %v15359_v26  ;;  %10454 = vmatpush.bf16.msra.mxu3 %v15384_v8  ;;  %v9621_v26 = vpop.f32.mrf.mxu2  ;;  %v20074_v8 = vld [vmem:[%s20680_s5 + $0xd] ss:$0 sm:$0xff] }
 0xa0a   :  { %v20015_v47 = vpop.f32.mrf.mxu3 }
 0xa0b   :  { %v9465_v51 = vpop.f32.mrf.mxu1 }
 0xa0c   :  { %10164 = vmatpush.bf16.msra.mxu1 %v15358_v55  ;;  %10455 = vmatpush.bf16.msra.mxu3 %v15383_v40 }
 0xa0f   :  { %9802 = vmatmul.bf16.gmra.mxu3 %v9693_v13  ;;  %v9313_v42 = vpop.f32.mrf.mxu0 }
 0xa10   :  { %10456 = vmatpush.bf16.msra.mxu3 %v15382_v19 }
 0xa12   :  { %v9187_v39 = vpop.f32.mrf.mxu3 }
 0xa13   :  { %v20049_v53 = vadd.f32 %v9187_v39, %v19907_v59  ;;  %v9346_v59 = vadd.f32 %v19969_v49, %v19910_v5  ;;  %v9467_v13 = vpop.f32.mrf.mxu1  ;;  %v20068_v39 = vld [vmem:[%s20680_s5 + $0xc] ss:$0 sm:$0xff]  ;;  %v9347_v5 = vadd.f32 %v9308_v22, %v19913_v41  ;;  %v9348_v41 = vadd.f32 %v9311_v31, %v19919_v63 }
 0xa15   :  { %v9500_v23 = vadd.f32 %v19991_v57, %v9346_v59  ;;  %v9501_v19 = vadd.f32 %v9462_v27, %v9347_v5  ;;  %v20078_v59 = vpop.f32.mrf.mxu2  ;;  %v15396_v5 = vld [vmem:[%s20679_s4 + $0xeb0] sm:$0xff] }
 0xa16   :  { %10604 = vmatpush.bf16.msra.mxu0 %v15396_v5 }
 0xa17   :  { %v9654_v60 = vadd.f32 %v9614_v33, %v9500_v23  ;;  %v9316_v55 = vpop.f32.mrf.mxu0  ;;  %v9655_v35 = vadd.f32 %v9616_v37, %v9501_v19  ;;  %v10206_v19 = vld [vmem:[#allocation2 + $0x2] sm:$0xff] }
 0xa1a   :  { %v20054_v3 = vpop.f32.mrf.mxu3 }
 0xa1b   :  { %v9470_v57 = vpop.f32.mrf.mxu1 }
 0xa22   :  { %v9768_v29 = vpop.f32.mrf.mxu3 }
 0xa23   :  { %v9808_v49 = vadd.f32 %v9768_v29, %v9654_v60  ;;  %v9318_v29 = vpop.f32.mrf.mxu0  ;;  %v9472_v31 = vpop.f32.mrf.mxu1 }
 0xa25   :  { %v9829_v40 = vmul.f32 %v20068_v39, %v9808_v49  ;;  %v9502_v49 = vadd.f32 %v9465_v51, %v9348_v41 }
 0xa27   :  { %v9850_v33 = vadd.f32 %v20074_v8, %v9829_v40  ;;  %v9656_v63 = vadd.f32 %v9619_v34, %v9502_v49 }
 0xa29   :  { %vm9866_vm0 = vcmp.gt.f32.partialorder %v9850_v33, 0.0  ;;  %v9882_v23 = vmul.f32 0.1, %v9850_v33 }
 0xa2a   :  { %v9770_v9 = vpop.f32.mrf.mxu3 }
 0xa2b   :  { %v20081_v22 = vsel %vm9866_vm0, %v9850_v33, %v9882_v23  ;;  %v9809_v60 = vadd.f32 %v9770_v9, %v9655_v35  ;;  %v9626_v33 = vpop.f32.mrf.mxu2 }
 0xa2c   :  { %9914 = vst [vmem:[#allocation2 + $0x11] sm:$0xff] %v20081_v22  ;;  %v9987_v27 = vpack.c.bf16 %v20081_v22, %v9971_v38  ;;  %v9349_v38 = vadd.f32 %v9313_v42, %v19922_v0 }
 0xa2d   :  { %v9830_v37 = vmul.f32 %v20068_v39, %v9809_v60 }
 0xa2e   :  { %10068 = vmatmul.bf16.vlgmr.msrb.gmra.mxu0 %v9987_v27  ;;  %v9321_v27 = vpop.f32.mrf.mxu0  ;;  %v9503_v0 = vadd.f32 %v9467_v13, %v9349_v38 }
 0xa2f   :  { %v9851_v40 = vadd.f32 %v20074_v8, %v9830_v37 }
 0xa30   :  { %v9657_v5 = vadd.f32 %v9621_v26, %v9503_v0  ;;  %v15395_v26 = vld [vmem:[%s20679_s4 + $0xea8] sm:$0xff] }
 0xa31   :  { %vm9867_vm2 = vcmp.gt.f32.partialorder %v9851_v40, 0.0  ;;  %v9883_v9 = vmul.f32 0.1, %v9851_v40  ;;  %10605 = vmatpush.bf16.msra.mxu0 %v15395_v26 }
 0xa32   :  { %v9773_v35 = vpop.f32.mrf.mxu3 }
 0xa33   :  { %v20091_v23 = vsel %vm9867_vm2, %v9851_v40, %v9883_v9  ;;  %v9810_v25 = vadd.f32 %v9773_v35, %v9656_v63  ;;  %v9931_v52 = vld [vmem:[#allocation2 + $0x10] sm:$0xff]  ;;  %v9350_v40 = vadd.f32 %v9316_v55, %v19928_v30  ;;  %v9475_v63 = vpop.f32.mrf.mxu1 }
 0xa34   :  { %v20093_v12 = vld [vmem:[#allocation2 + $0x12] sm:$0xff]  ;;  %9915 = vst [vmem:[#allocation2 + $0x21] sm:$0xff] %v20091_v23  ;;  %v9946_v51 = vpack.c.bf16 %v9931_v52, %v19821_v2 }
 0xa35   :  { %v10222_v34 = vpack.c.bf16 %v20093_v12, %v10206_v19  ;;  %v9831_v60 = vmul.f32 %v20068_v39, %v9810_v25  ;;  %v9629_v25 = vpop.f32.mrf.mxu2  ;;  %v9504_v38 = vadd.f32 %v9470_v57, %v9350_v40 }
 0xa36   :  { %10165 = vmatmul.bf16.vlgmr.msra.gmra.mxu1 %v9946_v51 }
 0xa37   :  { %10303 = vmatmul.bf16.vlgmr.msra.gmra.mxu2 %v10222_v34  ;;  %v9852_v42 = vadd.f32 %v20074_v8, %v9831_v60  ;;  %v9658_v60 = vadd.f32 %v20078_v59, %v9504_v38 }
 0xa39   :  { %vm9868_vm3 = vcmp.gt.f32.partialorder %v9852_v42, 0.0  ;;  %v9884_v37 = vmul.f32 0.1, %v9852_v42 }
 0xa3a   :  { %v9775_v49 = vpop.f32.mrf.mxu3 }
 0xa3b   :  { %v20103_v9 = vsel %vm9868_vm3, %v9852_v42, %v9884_v37  ;;  %v9811_v19 = vadd.f32 %v9775_v49, %v9657_v5  ;;  %v10361_v35 = vld [vmem:[#allocation2 + $0x20] sm:$0xff]  ;;  %v9351_v5 = vadd.f32 %v9318_v29, %v19931_v14 }
 0xa3c   :  { %v20105_v41 = vld [vmem:[#allocation2 + $0x22] sm:$0xff]  ;;  %9916 = vst [vmem:[#allocation2 + $0x31] sm:$0xff] %v20103_v9  ;;  %v10376_v51 = vpack.c.bf16 %v10361_v35, %v9931_v52  ;;  %v20110_v13 = vpack.c.bf16 %v20103_v9, %v20091_v23  ;;  %v9323_v52 = vpop.f32.mrf.mxu0 }
 0xa3d   :  { %v9832_v55 = vmul.f32 %v20068_v39, %v9811_v19  ;;  %v9631_v14 = vpop.f32.mrf.mxu2  ;;  %v9505_v29 = vadd.f32 %v9472_v31, %v9351_v5 }
 0xa3e   :  { %10457 = vmatmul.bf16.vlgmr.msra.gmra.mxu3 %v10376_v51  ;;  %10073 = vmatmul.bf16.gmra.mxu0 %v20110_v13  ;;  %v9477_v51 = vpop.f32.mrf.mxu1 }
 0xa3f   :  { %v9853_v34 = vadd.f32 %v20074_v8, %v9832_v55  ;;  %v9659_v38 = vadd.f32 %v9626_v33, %v9505_v29  ;;  %v15394_v33 = vld [vmem:[%s20679_s4 + $0xea0] sm:$0xff] }
 0xa40   :  { %10606 = vmatpush.bf16.msra.mxu0 %v15394_v33 }
 0xa41   :  { %vm9869_vm4 = vcmp.gt.f32.partialorder %v9853_v34, 0.0  ;;  %v9885_v0 = vmul.f32 0.1, %v9853_v34 }
 0xa42   :  { %v9778_v42 = vpop.f32.mrf.mxu3 }
 0xa43   :  { %v20122_v37 = vsel %vm9869_vm4, %v9853_v34, %v9885_v0  ;;  %v9812_v49 = vadd.f32 %v9778_v42, %v9658_v60  ;;  %v9933_v30 = vld [vmem:[#allocation2 + $0x30] sm:$0xff]  ;;  %v9352_v0 = vadd.f32 %v9321_v27, %v19938_v36 }
 0xa44   :  { %v20124_v19 = vld [vmem:[#allocation2 + $0x32] sm:$0xff]  ;;  %9917 = vst [vmem:[#allocation2 + $0x41] sm:$0xff] %v20122_v37  ;;  %v20127_v57 = vpack.c.bf16 %v9933_v30, %v10361_v35  ;;  %v9326_v34 = vpop.f32.mrf.mxu0 }
 0xa45   :  { %v10223_v40 = vpack.c.bf16 %v20124_v19, %v20105_v41  ;;  %v9833_v26 = vmul.f32 %v20068_v39, %v9812_v49  ;;  %v9506_v5 = vadd.f32 %v9475_v63, %v9352_v0 }
 0xa46   :  { %10170 = vmatmul.bf16.gmra.mxu1 %v20127_v57 }
 0xa47   :  { %10308 = vmatmul.bf16.gmra.mxu2 %v10223_v40  ;;  %v9854_v55 = vadd.f32 %v20074_v8, %v9833_v26  ;;  %v9480_v40 = vpop.f32.mrf.mxu1  ;;  %v9634_v26 = vpop.f32.mrf.mxu2  ;;  %v9660_v29 = vadd.f32 %v9629_v25, %v9506_v5  ;;  %v9354_v25 = vadd.f32 %v9326_v34, %v19947_v32 }
 0xa49   :  { %vm9870_vm5 = vcmp.gt.f32.partialorder %v9854_v55, 0.0  ;;  %v9886_v35 = vmul.f32 0.1, %v9854_v55 }
 0xa4a   :  { %v9780_v60 = vpop.f32.mrf.mxu3 }
 0xa4b   :  { %v20137_v42 = vsel %vm9870_vm5, %v9854_v55, %v9886_v35  ;;  %v9813_v59 = vadd.f32 %v9780_v60, %v9659_v38  ;;  %v10363_v62 = vld [vmem:[#allocation2 + $0x40] sm:$0xff]  ;;  %v9353_v35 = vadd.f32 %v9323_v52, %v19941_v10  ;;  %v8729_v10 = vadd.f32 %v19846_v11, %v19842_v58 }
 0xa4c   :  { %20840 = vst [vmem:[#allocation12_spill] sm:$0xff] %v20137_v42  ;;  %v20139_v6 = vld [vmem:[#allocation2 + $0x42] sm:$0xff]  ;;  %v10377_v49 = vpack.c.bf16 %v10363_v62, %v9933_v30  ;;  %v20144_v31 = vpack.c.bf16 %v20137_v42, %v20122_v37 }
 0xa4d   :  { %9918 = vst [vmem:[#allocation2 + $0x51] sm:$0xff] %v20137_v42  ;;  %v9834_v27 = vmul.f32 %v20068_v39, %v9813_v59  ;;  %v9507_v52 = vadd.f32 %v9477_v51, %v9353_v35  ;;  %v15393_v51 = vld [vmem:[%s20679_s4 + $0xe98] sm:$0xff]  ;;  %v9508_v35 = vadd.f32 %v9480_v40, %v9354_v25  ;;  %v8734_v25 = vadd.f32 %v19866_v15, %v19864_v50 }
 0xa4e   :  { %10462 = vmatmul.bf16.gmra.mxu3 %v10377_v49  ;;  %10078 = vmatmul.bf16.gmra.mxu0 %v20144_v31  ;;  %v9328_v49 = vpop.f32.mrf.mxu0 }
 0xa4f   :  { %v9855_v30 = vadd.f32 %v20074_v8, %v9834_v27  ;;  %v9661_v5 = vadd.f32 %v9631_v14, %v9507_v52  ;;  %10607 = vmatpush.bf16.msra.mxu0 %v15393_v51 }
 0xa51   :  { %vm9871_vm6 = vcmp.gt.f32.partialorder %v9855_v30, 0.0  ;;  %v9887_v55 = vmul.f32 0.1, %v9855_v30 }
 0xa52   :  { %v9783_v38 = vpop.f32.mrf.mxu3 }
 0xa53   :  { %v20155_v60 = vsel %vm9871_vm6, %v9855_v30, %v9887_v55  ;;  %v9814_v36 = vadd.f32 %v9783_v38, %v9660_v29  ;;  %v9636_v29 = vpop.f32.mrf.mxu2  ;;  %v8893_v38 = vadd.f32 %v19848_v48, %v8729_v10  ;;  %v9662_v10 = vadd.f32 %v9634_v26, %v9508_v35  ;;  %v9979_v35 = vld [vmem:[#allocation2 + $0xa1] sm:$0xff] }
 0xa54   :  { %v9935_v21 = vld [vmem:[#allocation2 + $0x50] sm:$0xff]  ;;  %9919 = vst [vmem:[#allocation2 + $0x61] sm:$0xff] %v20155_v60 }
 0xa55   :  { %v20157_v59 = vld [vmem:[#allocation2 + $0x52] sm:$0xff]  ;;  %v20160_v63 = vpack.c.bf16 %v9935_v21, %v10363_v62  ;;  %v9835_v33 = vmul.f32 %v20068_v39, %v9814_v36  ;;  %v9482_v62 = vpop.f32.mrf.mxu1  ;;  %v9047_v32 = vadd.f32 %v19862_v44, %v8893_v38 }
 0xa56   :  { %v10224_v0 = vpack.c.bf16 %v20157_v59, %v20139_v6  ;;  %v9331_v34 = vpop.f32.mrf.mxu0 }
 0xa57   :  { %10175 = vmatmul.bf16.gmra.mxu1 %v20160_v63  ;;  %v9856_v27 = vadd.f32 %v20074_v8, %v9835_v33 }
 0xa58   :  { %10313 = vmatmul.bf16.gmra.mxu2 %v10224_v0 }
 0xa59   :  { %vm9872_vm7 = vcmp.gt.f32.partialorder %v9856_v27, 0.0  ;;  %v9888_v30 = vmul.f32 0.1, %v9856_v27 }
 0xa5a   :  { %v9785_v55 = vpop.f32.mrf.mxu3 }
 0xa5b   :  { %v20173_v36 = vsel %vm9872_vm7, %v9856_v27, %v9888_v30  ;;  %v9815_v43 = vadd.f32 %v9785_v55, %v9661_v5  ;;  %v10365_v0 = vld [vmem:[#allocation2 + $0x60] sm:$0xff] }
 0xa5c   :  { %v20175_v42 = vld [vmem:[#allocation2 + $0x62] sm:$0xff]  ;;  %9920 = vst [vmem:[#allocation2 + $0x71] sm:$0xff] %v20173_v36  ;;  %v10378_v58 = vpack.c.bf16 %v10365_v0, %v9935_v21  ;;  %v20180_v11 = vpack.c.bf16 %v20173_v36, %v20155_v60  ;;  %v9201_v21 = vadd.f32 %v19949_v46, %v9047_v32 }
 0xa5d   :  { %v10686_v48 = vpack.c.bf16 %v20175_v42, %v20157_v59  ;;  %v9836_v14 = vmul.f32 %v20068_v39, %v9815_v43  ;;  %v9485_v30 = vpop.f32.mrf.mxu1 }
 0xa5e   :  { %10467 = vmatmul.bf16.gmra.mxu3 %v10378_v58  ;;  %10083 = vmatmul.bf16.gmra.mxu0 %v20180_v11  ;;  %v9355_v5 = vadd.f32 %v9328_v49, %v9201_v21  ;;  %v9639_v58 = vpop.f32.mrf.mxu2 }
 0xa5f   :  { %v9857_v33 = vadd.f32 %v20074_v8, %v9836_v14  ;;  %v9333_v14 = vpop.f32.mrf.mxu0 }
 0xa60   :  { %v9509_v51 = vadd.f32 %v9482_v62, %v9355_v5  ;;  %v15392_v62 = vld [vmem:[%s20679_s4 + $0xe90] sm:$0xff] }
 0xa61   :  { %vm9873_vm8 = vcmp.gt.f32.partialorder %v9857_v33, 0.0  ;;  %v9889_v52 = vmul.f32 0.1, %v9857_v33  ;;  %10608 = vmatpush.bf16.msra.mxu0 %v15392_v62 }
 0xa62   :  { %v9788_v27 = vpop.f32.mrf.mxu3 }
 0xa63   :  { %v20192_v55 = vsel %vm9873_vm8, %v9857_v33, %v9889_v52  ;;  %v9816_v44 = vadd.f32 %v9788_v27, %v9662_v10  ;;  %v9937_v43 = vld [vmem:[#allocation2 + $0x70] sm:$0xff]  ;;  %v8895_v10 = vadd.f32 %v19868_v16, %v8734_v25  ;;  %v9356_v52 = vadd.f32 %v9331_v34, %v19957_v45 }
 0xa64   :  { %v20194_v38 = vld [vmem:[#allocation2 + $0x72] sm:$0xff]  ;;  %9921 = vst [vmem:[#allocation2 + $0x81] sm:$0xff] %v20192_v55  ;;  %v20197_v46 = vpack.c.bf16 %v9937_v43, %v10365_v0  ;;  %v10533_v26 = vpack.c.bf16 %v20192_v55, %v20173_v36  ;;  %v9663_v0 = vadd.f32 %v9636_v29, %v9509_v51 }
 0xa65   :  { %v10225_v40 = vpack.c.bf16 %v20194_v38, %v20175_v42  ;;  %v9837_v49 = vmul.f32 %v20068_v39, %v9816_v44  ;;  %v9049_v29 = vadd.f32 %v19879_v24, %v8895_v10  ;;  %v9487_v16 = vpop.f32.mrf.mxu1  ;;  %v15424_v36 = vld [vmem:[%s20679_s4 + $0xf90] sm:$0xff] }
 0xa66   :  { %v9641_v34 = vpop.f32.mrf.mxu2 }
 0xa67   :  { %10180 = vmatmul.bf16.gmra.mxu1 %v20197_v46  ;;  %v9858_v32 = vadd.f32 %v20074_v8, %v9837_v49  ;;  %v9203_v5 = vadd.f32 %v19971_v20, %v9049_v29  ;;  %v9510_v49 = vadd.f32 %v9485_v30, %v9356_v52 }
 0xa68   :  { %10318 = vmatmul.bf16.gmra.mxu2 %v10225_v40 }
 0xa69   :  { %vm9874_vm9 = vcmp.gt.f32.partialorder %v9858_v32, 0.0  ;;  %v9890_v21 = vmul.f32 0.1, %v9858_v32 }
 0xa6a   :  { %v9790_v33 = vpop.f32.mrf.mxu3 }
 0xa6b   :  { %v20210_v27 = vsel %vm9874_vm9, %v9858_v32, %v9890_v21  ;;  %v9817_v44 = vadd.f32 %v9790_v33, %v9663_v0  ;;  %v20212_v40 = vld [vmem:[#allocation2 + $0x80] sm:$0xff]  ;;  %v9336_v0 = vpop.f32.mrf.mxu0 }
 0xa6c   :  { %9922 = vst [vmem:[#allocation2 + $0xb1] sm:$0xff] %v20210_v27  ;;  %v10379_v50 = vpack.c.bf16 %v20212_v40, %v9937_v43  ;;  %v9991_v15 = vpack.c.bf16 %v20210_v27, %v9979_v35  ;;  %v9664_v43 = vadd.f32 %v9639_v58, %v9510_v49  ;;  %v10214_v32 = vld [vmem:[#allocation2 + $0xa2] sm:$0xff]  ;;  %v9357_v35 = vadd.f32 %v9333_v14, %v9203_v5  ;;  %v15405_v14 = vld [vmem:[%s20679_s4 + $0xef8] sm:$0xff] }
 0xa6d   :  { %v9838_v45 = vmul.f32 %v20068_v39, %v9817_v44  ;;  %10757 = vmatpush.bf16.msrb.mxu1 %v15405_v14  ;;  %v15421_v14 = vld [vmem:[%s20679_s4 + $0xf78] sm:$0xff] }
 0xa6e   :  { %10472 = vmatmul.bf16.gmra.mxu3 %v10379_v50  ;;  %10088 = vmatmul.bf16.gmra.mxu0 %v9991_v15  ;;  %v15413_v50 = vld [vmem:[%s20679_s4 + $0xf38] sm:$0xff]  ;;  %v9490_v15 = vpop.f32.mrf.mxu1  ;;  %v9511_v62 = vadd.f32 %v9487_v16, %v9357_v35 }
 0xa6f   :  { %v9859_v25 = vadd.f32 %v20074_v8, %v9838_v45  ;;  %v9644_v45 = vpop.f32.mrf.mxu2  ;;  %10911 = vmatpush.bf16.msrb.mxu2 %v15413_v50  ;;  %11065 = vmatpush.bf16.msrb.mxu3 %v15421_v14  ;;  %v8744_v14 = vadd.f32 %v19954_v56, %v19901_v4  ;;  %v15408_v4 = vld [vmem:[%s20679_s4 + $0xf10] sm:$0xff]  ;;  %v15418_v56 = vld [vmem:[%s20679_s4 + $0xf60] sm:$0xff] }
 0xa70   :  { %v9665_v5 = vadd.f32 %v9641_v34, %v9511_v62 }
 0xa71   :  { %vm9875_vm10 = vcmp.gt.f32.partialorder %v9859_v25, 0.0  ;;  %v9891_v51 = vmul.f32 0.1, %v9859_v25 }
 0xa72   :  { %v9793_v21 = vpop.f32.mrf.mxu3 }
 0xa73   :  { %v20224_v24 = vsel %vm9875_vm10, %v9859_v25, %v9891_v51  ;;  %v9818_v33 = vadd.f32 %v9793_v21, %v9664_v43  ;;  %v9939_v10 = vld [vmem:[#allocation2 + $0xb0] sm:$0xff]  ;;  %v9338_v35 = vpop.f32.mrf.mxu0 }
 0xa74   :  { %v20226_v44 = vld [vmem:[#allocation2 + $0xb2] sm:$0xff]  ;;  %9923 = vst [vmem:[#allocation2 + $0xc1] sm:$0xff] %v20224_v24  ;;  %v9950_v20 = vpack.c.bf16 %v9939_v10, %v19821_v2  ;;  %v10534_v58 = vpack.c.bf16 %v20224_v24, %v20210_v27  ;;  %v8739_v2 = vadd.f32 %v19883_v1, %v19881_v17  ;;  %v9358_v1 = vadd.f32 %v9336_v0, %v20004_v7 }
 0xa75   :  { %v10226_v30 = vpack.c.bf16 %v20226_v44, %v10214_v32  ;;  %v9839_v52 = vmul.f32 %v20068_v39, %v9818_v33  ;;  %v15404_v43 = vld [vmem:[%s20679_s4 + $0xef0] sm:$0xff] }
 0xa76   :  { %v15412_v51 = vld [vmem:[%s20679_s4 + $0xf30] sm:$0xff]  ;;  %v8897_v17 = vadd.f32 %v19885_v54, %v8739_v2  ;;  %v15391_v54 = vld [vmem:[%s20679_s4 + $0xe88] sm:$0xff]  ;;  %10758 = vmatpush.bf16.msrb.mxu1 %v15404_v43  ;;  %v9492_v62 = vpop.f32.mrf.mxu1  ;;  %v15402_v43 = vld [vmem:[%s20679_s4 + $0xee0] sm:$0xff] }
 0xa77   :  { %10185 = vmatmul.bf16.gmra.mxu1 %v9950_v20  ;;  %v9860_v29 = vadd.f32 %v20074_v8, %v9839_v52  ;;  %10912 = vmatpush.bf16.msrb.mxu2 %v15412_v51  ;;  %v15411_v52 = vld [vmem:[%s20679_s4 + $0xf28] sm:$0xff] }
 0xa78   :  { %10323 = vmatmul.bf16.gmra.mxu2 %v10226_v30  ;;  %v9051_v0 = vadd.f32 %v19899_v28, %v8897_v17  ;;  %v9512_v28 = vadd.f32 %v9490_v15, %v9358_v1  ;;  %10609 = vmatpush.bf16.msra.mxu0 %v15391_v54  ;;  %v15420_v15 = vld [vmem:[%s20679_s4 + $0xf70] sm:$0xff] }
 0xa79   :  { %vm9876_vm11 = vcmp.gt.f32.partialorder %v9860_v29, 0.0  ;;  %v9892_v49 = vmul.f32 0.1, %v9860_v29  ;;  %11066 = vmatpush.bf16.msrb.mxu3 %v15420_v15 }
 0xa7a   :  { %v9795_v25 = vpop.f32.mrf.mxu3  ;;  %v9205_v50 = vadd.f32 %v20015_v47, %v9051_v0  ;;  %v15410_v47 = vld [vmem:[%s20679_s4 + $0xf20] sm:$0xff] }
 0xa7b   :  { %v20251_v16 = vsel %vm9876_vm11, %v9860_v29, %v9892_v49  ;;  %v9819_v32 = vadd.f32 %v9795_v25, %v9665_v5  ;;  %v10369_v21 = vld [vmem:[#allocation2 + $0xc0] sm:$0xff]  ;;  %10913 = vmatpush.bf16.msrb.mxu2 %v15411_v52  ;;  %v9666_v29 = vadd.f32 %v9644_v45, %v9512_v28  ;;  %v9646_v49 = vpop.f32.mrf.mxu2  ;;  %v15409_v52 = vld [vmem:[%s20679_s4 + $0xf18] sm:$0xff] }
 0xa7c   :  { %v20253_v34 = vld [vmem:[#allocation2 + $0xc2] sm:$0xff]  ;;  %9924 = vst [vmem:[#allocation2 + $0xd1] sm:$0xff] %v20251_v16  ;;  %v10380_v33 = vpack.c.bf16 %v10369_v21, %v9939_v10  ;;  %v20258_v20 = vpack.c.bf16 %v20251_v16, %v20224_v24  ;;  %v9359_v51 = vadd.f32 %v9338_v35, %v9205_v50 }
 0xa7d   :  { %v10688_v7 = vpack.c.bf16 %v20253_v34, %v20226_v44  ;;  %v9840_v30 = vmul.f32 %v20068_v39, %v9819_v32  ;;  %v15403_v10 = vld [vmem:[%s20679_s4 + $0xee8] sm:$0xff] }
 0xa7e   :  { %10477 = vmatmul.bf16.gmra.mxu3 %v10380_v33  ;;  %10093 = vmatmul.bf16.gmra.mxu0 %v20258_v20  ;;  %v9513_v50 = vadd.f32 %v9492_v62, %v9359_v51 }
 0xa7f   :  { %v9861_v2 = vadd.f32 %v20074_v8, %v9840_v30  ;;  %10759 = vmatpush.bf16.msrb.mxu1 %v15403_v10  ;;  %10914 = vmatpush.bf16.msrb.mxu2 %v15410_v47  ;;  %v9341_v30 = vpop.f32.mrf.mxu0  ;;  %v15401_v10 = vld [vmem:[%s20679_s4 + $0xed8] sm:$0xff] }
 0xa80   :  { %v9360_v47 = vadd.f32 %v9341_v30, %v20049_v53 }
 0xa81   :  { %vm9877_vm12 = vcmp.gt.f32.partialorder %v9861_v2, 0.0  ;;  %v9893_v5 = vmul.f32 0.1, %v9861_v2 }
 0xa82   :  { %v9798_v25 = vpop.f32.mrf.mxu3 }
 0xa83   :  { %v20288_v17 = vsel %vm9877_vm12, %v9861_v2, %v9893_v5  ;;  %v9820_v45 = vadd.f32 %v9798_v25, %v9666_v29  ;;  %v9941_v1 = vld [vmem:[#allocation2 + $0xd0] sm:$0xff]  ;;  %10760 = vmatpush.bf16.msrb.mxu1 %v15402_v43  ;;  %v15419_v2 = vld [vmem:[%s20679_s4 + $0xf68] sm:$0xff]  ;;  %v9667_v5 = vadd.f32 %v9646_v49, %v9513_v50  ;;  %10915 = vmatpush.bf16.msrb.mxu2 %v15409_v52 }
 0xa84   :  { %v20290_v32 = vld [vmem:[#allocation2 + $0xd2] sm:$0xff]  ;;  %9925 = vst [vmem:[#allocation2 + $0xe1] sm:$0xff] %v20288_v17  ;;  %v20293_v33 = vpack.c.bf16 %v9941_v1, %v10369_v21  ;;  %v10535_v0 = vpack.c.bf16 %v20288_v17, %v20251_v16  ;;  %v15390_v21 = vld [vmem:[%s20679_s4 + $0xe80] sm:$0xff]  ;;  %11067 = vmatpush.bf16.msrb.mxu3 %v15419_v2  ;;  %v8899_v43 = vadd.f32 %v19959_v61, %v8744_v14  ;;  %v15407_v52 = vld [vmem:[%s20679_s4 + $0xf08] sm:$0xff] }
 0xa85   :  { %v10227_v54 = vpack.c.bf16 %v20290_v32, %v20253_v34  ;;  %v9841_v35 = vmul.f32 %v20068_v39, %v9820_v45  ;;  %10610 = vmatpush.bf16.msra.mxu0 %v15390_v21  ;;  %v15400_v29 = vld [vmem:[%s20679_s4 + $0xed0] sm:$0xff]  ;;  %v15417_v14 = vld [vmem:[%s20679_s4 + $0xf58] sm:$0xff] }
 0xa86   :  { %v9053_v53 = vadd.f32 %v19961_v18, %v8899_v43 }
 0xa87   :  { %10190 = vmatmul.bf16.gmra.mxu1 %v20293_v33  ;;  %v9862_v28 = vadd.f32 %v20074_v8, %v9841_v35  ;;  %v9649_v35 = vpop.f32.mrf.mxu2  ;;  %10916 = vmatpush.bf16.msrb.mxu2 %v15408_v4  ;;  %v9343_v2 = vpop.f32.mrf.mxu0  ;;  %v15398_v4 = vld [vmem:[%s20679_s4 + $0xec0] sm:$0xff] }
 0xa88   :  { %10328 = vmatmul.bf16.gmra.mxu2 %v10227_v54  ;;  %10761 = vmatpush.bf16.msrb.mxu1 %v15401_v10  ;;  %v9495_v54 = vpop.f32.mrf.mxu1  ;;  %v9207_v18 = vadd.f32 %v20054_v3, %v9053_v53  ;;  %v15416_v3 = vld [vmem:[%s20679_s4 + $0xf50] sm:$0xff] }
 0xa89   :  { %vm9878_vm13 = vcmp.gt.f32.partialorder %v9862_v28, 0.0  ;;  %v9894_v25 = vmul.f32 0.1, %v9862_v28  ;;  %11068 = vmatpush.bf16.msrb.mxu3 %v15418_v56  ;;  %v9514_v50 = vadd.f32 %v9495_v54, %v9360_v47  ;;  %v15406_v56 = vld [vmem:[%s20679_s4 + $0xf00] sm:$0xff] }
 0xa8a   :  { %v9800_v62 = vpop.f32.mrf.mxu3 }
 0xa8b   :  { %v20327_v15 = vsel %vm9878_vm13, %v9862_v28, %v9894_v25  ;;  %v9821_v49 = vadd.f32 %v9800_v62, %v9667_v5  ;;  %v10371_v51 = vld [vmem:[#allocation2 + $0xe0] sm:$0xff]  ;;  %10917 = vmatpush.bf16.msrb.mxu2 %v15407_v52  ;;  %v9361_v62 = vadd.f32 %v9343_v2, %v9207_v18 }
 0xa8c   :  { %v20329_v45 = vld [vmem:[#allocation2 + $0xe2] sm:$0xff]  ;;  %9926 = vst [vmem:[#allocation2 + $0xf1] sm:$0xff] %v20327_v15  ;;  %v10381_v21 = vpack.c.bf16 %v10371_v51, %v9941_v1  ;;  %v20334_v10 = vpack.c.bf16 %v20327_v15, %v20288_v17  ;;  %10762 = vmatpush.bf16.msrb.mxu1 %v15400_v29  ;;  %v9668_v29 = vadd.f32 %v9649_v35, %v9514_v50 }
 0xa8d   :  { %v10689_v61 = vpack.c.bf16 %v20329_v45, %v20290_v32  ;;  %v9842_v30 = vmul.f32 %v20068_v39, %v9821_v49  ;;  %v15399_v1 = vld [vmem:[%s20679_s4 + $0xec8] sm:$0xff]  ;;  %11069 = vmatpush.bf16.msrb.mxu3 %v15417_v14 }
 0xa8e   :  { %10482 = vmatmul.bf16.gmra.mxu3 %v10381_v21  ;;  %10098 = vmatmul.bf16.gmra.mxu0 %v20334_v10  ;;  %v15415_v14 = vld [vmem:[%s20679_s4 + $0xf48] sm:$0xff] }
 0xa8f   :  { %v9863_v28 = vadd.f32 %v20074_v8, %v9842_v30  ;;  %10918 = vmatpush.bf16.msrb.mxu2 %v15406_v56  ;;  %v9651_v52 = vpop.f32.mrf.mxu2 }
 0xa90   :  { %10763 = vmatpush.bf16.msrb.mxu1 %v15399_v1  ;;  %v9497_v1 = vpop.f32.mrf.mxu1 }
 0xa91   :  { %vm9879_vm14 = vcmp.gt.f32.partialorder %v9863_v28, 0.0  ;;  %v9895_v5 = vmul.f32 0.1, %v9863_v28  ;;  %11070 = vmatpush.bf16.msrb.mxu3 %v15416_v3  ;;  %v9515_v18 = vadd.f32 %v9497_v1, %v9361_v62 }
 0xa92   :  { %v9803_v25 = vpop.f32.mrf.mxu3 }
 0xa93   :  { %v20361_v43 = vsel %vm9879_vm14, %v9863_v28, %v9895_v5  ;;  %v9822_v47 = vadd.f32 %v9803_v25, %v9668_v29  ;;  %v9943_v49 = vld [vmem:[#allocation2 + $0xf0] sm:$0xff]  ;;  %v9669_v28 = vadd.f32 %v9651_v52, %v9515_v18  ;;  %v15414_v5 = vld [vmem:[%s20679_s4 + $0xf40] sm:$0xff] }
 0xa94   :  { %v20363_v54 = vld [vmem:[#allocation2 + $0xf2] sm:$0xff]  ;;  %9927 = vst [vmem:[#allocation2 + $0x101] sm:$0xff] %v20361_v43  ;;  %v20366_v35 = vpack.c.bf16 %v9943_v49, %v10371_v51  ;;  %10764 = vmatpush.bf16.msrb.mxu1 %v15398_v4  ;;  %v10536_v53 = vpack.c.bf16 %v20361_v43, %v20327_v15 }
 0xa95   :  { %v20370_v21 = vpack.c.bf16 %v20363_v54, %v20329_v45  ;;  %v9843_v30 = vmul.f32 %v20068_v39, %v9822_v47  ;;  %v15429_v51 = vld [vmem:[%s20679_s4 + $0xfb8] sm:$0xff]  ;;  %11071 = vmatpush.bf16.msrb.mxu3 %v15415_v14 }
 0xa96   :  { %11219 = vmatpush.bf16.msrb.mxu0 %v15429_v51 }
 0xa97   :  { %10195 = vmatmul.bf16.gmra.mxu1 %v20366_v35  ;;  %v9864_v50 = vadd.f32 %v20074_v8, %v9843_v30 }
 0xa98   :  { %10333 = vmatmul.bf16.gmra.mxu2 %v20370_v21 }
 0xa99   :  { %vm9880_vm15 = vcmp.gt.f32.partialorder %v9864_v50, 0.0  ;;  %v9896_v2 = vmul.f32 0.1, %v9864_v50  ;;  %11072 = vmatpush.bf16.msrb.mxu3 %v15414_v5 }
 0xa9a   :  { %v9805_v29 = vpop.f32.mrf.mxu3 }
 0xa9b   :  { %v20387_v25 = vsel %vm9880_vm15, %v9864_v50, %v9896_v2  ;;  %v9823_v4 = vadd.f32 %v9805_v29, %v9669_v28  ;;  %v10373_v56 = vld [vmem:[#allocation2 + $0x100] sm:$0xff] }
 0xa9c   :  { %v20389_v3 = vld [vmem:[#allocation2 + $0x102] sm:$0xff]  ;;  %9928 = vst [vmem:[#allocation2 + $0x111] sm:$0xff] %v20387_v25  ;;  %v10382_v62 = vpack.c.bf16 %v10373_v56, %v9943_v49  ;;  %v20394_v47 = vpack.c.bf16 %v20387_v25, %v20361_v43 }
 0xa9d   :  { %v10690_v30 = vpack.c.bf16 %v20389_v3, %v20363_v54  ;;  %v9844_v1 = vmul.f32 %v20068_v39, %v9823_v4  ;;  %v20841_v4 = vpack.c.bf16 %v20091_v23, %v20081_v22  ;;  %v20843_v23 = vpack.c.bf16 %v20122_v37, %v20103_v9 }
 0xa9e   :  { %10487 = vmatmul.bf16.gmra.mxu3 %v10382_v62  ;;  %10103 = vmatmul.bf16.gmra.mxu0 %v20394_v47 }
 0xa9f   :  { %v9865_v52 = vadd.f32 %v20074_v8, %v9844_v1  ;;  %v15428_v8 = vld [vmem:[%s20679_s4 + $0xfb0] sm:$0xff] }
 0xaa0   :  { %11220 = vmatpush.bf16.msrb.mxu0 %v15428_v8 }
 0xaa1   :  { %vm9881_vm1 = vcmp.gt.f32.partialorder %v9865_v52, 0.0  ;;  %v9897_v51 = vmul.f32 0.1, %v9865_v52 }
 0xaa3   :  { %v20401_v14 = vsel %vm9881_vm1, %v9865_v52, %v9897_v51  ;;  %v9945_v49 = vld [vmem:[#allocation2 + $0x110] sm:$0xff]  ;;  %v20842_v52 = vpack.c.bf16 %v20105_v41, %v20093_v12  ;;  %v15427_v51 = vld [vmem:[%s20679_s4 + $0xfa8] sm:$0xff] }
 0xaa4   :  { %v20403_v18 = vld [vmem:[#allocation2 + $0x112] sm:$0xff]  ;;  %9929 = vst [vmem:[#allocation2 + $0x121] sm:$0xff] %v20401_v14  ;;  %v20406_v50 = vpack.c.bf16 %v9945_v49, %v10373_v56  ;;  %11221 = vmatpush.bf16.msrb.mxu0 %v15427_v51 }
 0xaa5   :  { %v20410_v39 = vpack.c.bf16 %v20403_v18, %v20389_v3 }
 0xaa7   :  { %10200 = vmatmul.bf16.gmra.mxu1 %v20406_v50 }
 0xaa8   :  { %10338 = vmatmul.bf16.gmra.mxu2 %v20410_v39 }
 0xaab   :  { %v20419_v2 = vld [vmem:[#allocation2 + $0x120] sm:$0xff]  ;;  %v10069_v29 = vpop.f32.mrf.mxu0 }
 0xaac   :  { %v10383_v5 = vpack.c.bf16 %v20419_v2, %v9945_v49  ;;  %v20527_v54 = vld [vmem:[#allocation2 + $0x122] sm:$0xff] }
 0xaae   :  { %10492 = vmatmul.bf16.gmra.mxu3 %v10383_v5  ;;  %10611 = vmatmul.bf16.vlgmr.msra.gmra.mxu0 %v20841_v4 }
 0xab3   :  { %v10166_v56 = vpop.f32.mrf.mxu1  ;;  %v10071_v62 = vpop.f32.mrf.mxu0 }
 0xab4   :  { %v10167_v1 = vadd.f32 %v10166_v56, %v10069_v29 }
 0xab7   :  { %10765 = vmatmul.bf16.vlgmr.msrb.gmra.mxu1 %v20842_v52 }
 0xab8   :  { %10919 = vmatmul.bf16.vlgmr.msrb.gmra.mxu2 %v20127_v57 }
 0xaba   :  { %v10304_v49 = vpop.f32.mrf.mxu2 }
 0xabb   :  { %v10344_v8 = vadd.f32 %v10304_v49, %v10167_v1  ;;  %v10168_v5 = vpop.f32.mrf.mxu1  ;;  %v10074_v28 = vpop.f32.mrf.mxu0  ;;  %v20844_v1 = vpack.c.bf16 %v20139_v6, %v20124_v19  ;;  %v20845_v6 = vld [vmem:[#allocation12_spill] sm:$0xff] }
 0xabc   :  { %v10169_v22 = vadd.f32 %v10168_v5, %v10071_v62  ;;  %v20846_v19 = vpack.c.bf16 %v20155_v60, %v20845_v6  ;;  %v20472_v6 = vld [vmem:[#allocation2] sm:$0xff] }
 0xabe   :  { %11073 = vmatmul.bf16.vlgmr.msrb.gmra.mxu3 %v20110_v13  ;;  %10616 = vmatmul.bf16.gmra.mxu0 %v20843_v23  ;;  %v15426_v13 = vld [vmem:[%s20679_s4 + $0xfa0] sm:$0xff] }
 0xabf   :  { %11222 = vmatpush.bf16.msrb.mxu0 %v15426_v13 }
 0xac1   :  { %v10458_v41 = vpop.f32.mrf.mxu3 }
 0xac2   :  { %v10306_v12 = vpop.f32.mrf.mxu2  ;;  %v20436_v57 = vadd.f32 %v10458_v41, %v10344_v8 }
 0xac3   :  { %v10345_v29 = vadd.f32 %v10306_v12, %v10169_v22  ;;  %v10171_v4 = vpop.f32.mrf.mxu1  ;;  %v10076_v56 = vpop.f32.mrf.mxu0 }
 0xac4   :  { %v10172_v52 = vadd.f32 %v10171_v4, %v10074_v28 }
 0xac7   :  { %10770 = vmatmul.bf16.gmra.mxu1 %v20844_v1 }
 0xac8   :  { %10924 = vmatmul.bf16.gmra.mxu2 %v20160_v63 }
 0xac9   :  { %v10460_v37 = vpop.f32.mrf.mxu3 }
 0xaca   :  { %v10309_v9 = vpop.f32.mrf.mxu2  ;;  %v20445_v51 = vadd.f32 %v10460_v37, %v10345_v29 }
 0xacb   :  { %v10346_v62 = vadd.f32 %v10309_v9, %v10172_v52  ;;  %v10173_v49 = vpop.f32.mrf.mxu1  ;;  %v10079_v8 = vpop.f32.mrf.mxu0 }
 0xacc   :  { %v10174_v5 = vadd.f32 %v10173_v49, %v10076_v56 }
 0xace   :  { %11078 = vmatmul.bf16.gmra.mxu3 %v20144_v31  ;;  %10621 = vmatmul.bf16.gmra.mxu0 %v20846_v19  ;;  %v15425_v31 = vld [vmem:[%s20679_s4 + $0xf98] sm:$0xff] }
 0xacf   :  { %11223 = vmatpush.bf16.msrb.mxu0 %v15425_v31 }
 0xad1   :  { %v10463_v28 = vpop.f32.mrf.mxu3 }
 0xad2   :  { %v10311_v63 = vpop.f32.mrf.mxu2  ;;  %v20451_v23 = vadd.f32 %v10463_v28, %v10346_v62 }
 0xad3   :  { %v10347_v22 = vadd.f32 %v10311_v63, %v10174_v5  ;;  %v10081_v41 = vpop.f32.mrf.mxu0  ;;  %11224 = vmatpush.bf16.msrb.mxu0 %v15424_v36  ;;  %v10983_v63 = vld [vmem:[#allocation2 + $0x91] sm:$0xff] }
 0xad4   :  { %v10176_v12 = vpop.f32.mrf.mxu1 }
 0xad5   :  { %v10177_v4 = vadd.f32 %v10176_v12, %v10079_v8 }
 0xad7   :  { %10775 = vmatmul.bf16.gmra.mxu1 %v10686_v48  ;;  %v20466_v48 = vld [vmem:[#allocation2 + $0x82] sm:$0xff] }
 0xad8   :  { %10929 = vmatmul.bf16.gmra.mxu2 %v20197_v46  ;;  %v10687_v5 = vpack.c.bf16 %v20466_v48, %v20194_v38 }
 0xad9   :  { %v10465_v29 = vpop.f32.mrf.mxu3 }
 0xada   :  { %v20460_v52 = vadd.f32 %v10465_v29, %v10347_v22 }
 0xadb   :  { %v10314_v60 = vpop.f32.mrf.mxu2  ;;  %v10084_v13 = vpop.f32.mrf.mxu0 }
 0xadc   :  { %v10348_v56 = vadd.f32 %v10314_v60, %v10177_v4  ;;  %v10178_v1 = vpop.f32.mrf.mxu1  ;;  %v10995_v4 = vpack.c.bf16 %v10983_v63, %v20192_v55  ;;  %v15423_v55 = vld [vmem:[%s20679_s4 + $0xf88] sm:$0xff] }
 0xadd   :  { %v10179_v9 = vadd.f32 %v10178_v1, %v10081_v41  ;;  %11225 = vmatpush.bf16.msrb.mxu0 %v15423_v55  ;;  %v10991_v55 = vld [vmem:[#allocation2 + $0x131] sm:$0xff] }
 0xade   :  { %11083 = vmatmul.bf16.gmra.mxu3 %v20180_v11  ;;  %10626 = vmatmul.bf16.gmra.mxu0 %v10533_v26  ;;  %v10841_v11 = vpack.c.bf16 %v20472_v6, %v20212_v40 }
 0xae1   :  { %v10468_v59 = vpop.f32.mrf.mxu3 }
 0xae2   :  { %v20468_v37 = vadd.f32 %v10468_v59, %v10348_v56 }
 0xae3   :  { %v10316_v42 = vpop.f32.mrf.mxu2  ;;  %v10086_v49 = vpop.f32.mrf.mxu0 }
 0xae4   :  { %v10349_v46 = vadd.f32 %v10316_v42, %v10179_v9  ;;  %v10181_v62 = vpop.f32.mrf.mxu1 }
 0xae5   :  { %v10182_v8 = vadd.f32 %v10181_v62, %v10084_v13 }
 0xae7   :  { %10780 = vmatmul.bf16.gmra.mxu1 %v10687_v5 }
 0xae8   :  { %10934 = vmatmul.bf16.gmra.mxu2 %v10841_v11 }
 0xae9   :  { %v10470_v19 = vpop.f32.mrf.mxu3 }
 0xaea   :  { %v20479_v22 = vadd.f32 %v10470_v19, %v10349_v46 }
 0xaeb   :  { %v10319_v26 = vpop.f32.mrf.mxu2  ;;  %v10089_v38 = vpop.f32.mrf.mxu0 }
 0xaec   :  { %v10350_v28 = vadd.f32 %v10319_v26, %v10182_v8  ;;  %v10183_v12 = vpop.f32.mrf.mxu1 }
 0xaed   :  { %v10184_v41 = vadd.f32 %v10183_v12, %v10086_v49 }
 0xaee   :  { %11088 = vmatmul.bf16.gmra.mxu3 %v10995_v4  ;;  %10631 = vmatmul.bf16.gmra.mxu0 %v10534_v58  ;;  %v20847_v4 = vpack.c.bf16 %v20401_v14, %v20387_v25 }
 0xaf1   :  { %v10473_v31 = vpop.f32.mrf.mxu3 }
 0xaf2   :  { %v20485_v29 = vadd.f32 %v10473_v31, %v10350_v28 }
 0xaf3   :  { %v10321_v40 = vpop.f32.mrf.mxu2  ;;  %v10091_v1 = vpop.f32.mrf.mxu0 }
 0xaf4   :  { %v10351_v60 = vadd.f32 %v10321_v40, %v10184_v41  ;;  %v10186_v56 = vpop.f32.mrf.mxu1 }
 0xaf5   :  { %v10187_v13 = vadd.f32 %v10186_v56, %v10089_v38 }
 0xaf7   :  { %10785 = vmatmul.bf16.gmra.mxu1 %v10688_v7 }
 0xaf8   :  { %10939 = vmatmul.bf16.gmra.mxu2 %v20293_v33 }
 0xaf9   :  { %v10475_v24 = vpop.f32.mrf.mxu3 }
 0xafa   :  { %v20494_v9 = vadd.f32 %v10475_v24, %v10351_v60 }
 0xafb   :  { %v10324_v27 = vpop.f32.mrf.mxu2  ;;  %v10094_v59 = vpop.f32.mrf.mxu0 }
 0xafc   :  { %v10352_v58 = vadd.f32 %v10324_v27, %v10187_v13  ;;  %v10188_v42 = vpop.f32.mrf.mxu1  ;;  %v11131_v27 = vld [vmem:[#allocation2 + $0x32] sm:$0xff] }
 0xafd   :  { %v10189_v46 = vadd.f32 %v10188_v42, %v10091_v1  ;;  %v10691_v1 = vpack.c.bf16 %v20527_v54, %v20403_v18 }
 0xafe   :  { %11093 = vmatmul.bf16.gmra.mxu3 %v20258_v20  ;;  %10636 = vmatmul.bf16.gmra.mxu0 %v10535_v0  ;;  %v15422_v20 = vld [vmem:[%s20679_s4 + $0xf80] sm:$0xff] }
 0xaff   :  { %11226 = vmatpush.bf16.msrb.mxu0 %v15422_v20 }
 0xb01   :  { %v10478_v34 = vpop.f32.mrf.mxu3 }
 0xb02   :  { %v20500_v33 = vadd.f32 %v10478_v34, %v10352_v58  ;;  %v10999_v34 = vpack.c.bf16 %v10991_v55, %v20401_v14 }
 0xb03   :  { %v10326_v44 = vpop.f32.mrf.mxu2  ;;  %v10096_v49 = vpop.f32.mrf.mxu0 }
 0xb04   :  { %v10353_v7 = vadd.f32 %v10326_v44, %v10189_v46  ;;  %v10191_v62 = vpop.f32.mrf.mxu1  ;;  %v11130_v46 = vld [vmem:[#allocation2 + $0x22] sm:$0xff] }
 0xb05   :  { %v10192_v8 = vadd.f32 %v10191_v62, %v10094_v59 }
 0xb07   :  { %10790 = vmatmul.bf16.gmra.mxu1 %v10689_v61 }
 0xb08   :  { %10944 = vmatmul.bf16.gmra.mxu2 %v20366_v35 }
 0xb09   :  { %v10480_v17 = vpop.f32.mrf.mxu3 }
 0xb0a   :  { %v20509_v5 = vadd.f32 %v10480_v17, %v10353_v7  ;;  %v11146_v7 = vpack.c.bf16 %v11131_v27, %v11130_v46 }
 0xb0b   :  { %v10329_v16 = vpop.f32.mrf.mxu2  ;;  %v10099_v36 = vpop.f32.mrf.mxu0 }
 0xb0c   :  { %v10354_v0 = vadd.f32 %v10329_v16, %v10192_v8  ;;  %v10193_v11 = vpop.f32.mrf.mxu1 }
 0xb0d   :  { %v10194_v26 = vadd.f32 %v10193_v11, %v10096_v49 }
 0xb0e   :  { %11098 = vmatmul.bf16.gmra.mxu3 %v20334_v10  ;;  %10641 = vmatmul.bf16.gmra.mxu0 %v10536_v53 }
 0xb11   :  { %v10483_v45 = vpop.f32.mrf.mxu3 }
 0xb12   :  { %v20515_v35 = vadd.f32 %v10483_v45, %v10354_v0  ;;  %v11132_v45 = vld [vmem:[#allocation2 + $0x42] sm:$0xff] }
 0xb13   :  { %v10331_v32 = vpop.f32.mrf.mxu2  ;;  %v10101_v63 = vpop.f32.mrf.mxu0 }
 0xb14   :  { %v10355_v61 = vadd.f32 %v10331_v32, %v10194_v26  ;;  %v10196_v19 = vpop.f32.mrf.mxu1 }
 0xb15   :  { %v10197_v28 = vadd.f32 %v10196_v19, %v10099_v36  ;;  %v11133_v36 = vld [vmem:[#allocation2 + $0x52] sm:$0xff] }
 0xb17   :  { %10795 = vmatmul.bf16.gmra.mxu1 %v10690_v30 }
 0xb18   :  { %10949 = vmatmul.bf16.gmra.mxu2 %v20406_v50 }
 0xb19   :  { %v10485_v10 = vpop.f32.mrf.mxu3 }
 0xb1a   :  { %v20521_v41 = vadd.f32 %v10485_v10, %v10355_v61 }
 0xb1b   :  { %v10334_v12 = vpop.f32.mrf.mxu2  ;;  %v10104_v43 = vpop.f32.mrf.mxu0 }
 0xb1c   :  { %v10356_v38 = vadd.f32 %v10334_v12, %v10197_v28  ;;  %v10198_v15 = vpop.f32.mrf.mxu1 }
 0xb1d   :  { %v10199_v53 = vadd.f32 %v10198_v15, %v10101_v63  ;;  %v11147_v63 = vpack.c.bf16 %v11133_v36, %v11132_v45 }
 0xb1e   :  { %11103 = vmatmul.bf16.gmra.mxu3 %v20394_v47  ;;  %10646 = vmatmul.bf16.gmra.mxu0 %v20847_v4  ;;  %v10845_v47 = vpack.c.bf16 %v20472_v6, %v20419_v2 }
 0xb21   :  { %v10488_v31 = vpop.f32.mrf.mxu3 }
 0xb22   :  { %v20529_v30 = vadd.f32 %v10488_v31, %v10356_v38  ;;  %v11135_v31 = vld [vmem:[#allocation2 + $0x72] sm:$0xff] }
 0xb23   :  { %v10336_v40 = vpop.f32.mrf.mxu2  ;;  %v10106_v60 = vpop.f32.mrf.mxu0 }
 0xb24   :  { %v10357_v3 = vadd.f32 %v10336_v40, %v10199_v53  ;;  %v10201_v50 = vpop.f32.mrf.mxu1 }
 0xb25   :  { %v10202_v56 = vadd.f32 %v10201_v50, %v10104_v43 }
 0xb27   :  { %10800 = vmatmul.bf16.gmra.mxu1 %v10691_v1 }
 0xb28   :  { %10954 = vmatmul.bf16.gmra.mxu2 %v10845_v47 }
 0xb29   :  { %v10490_v13 = vpop.f32.mrf.mxu3 }
 0xb2a   :  { %v20535_v58 = vadd.f32 %v10490_v13, %v10357_v3 }
 0xb2b   :  { %v10339_v25 = vpop.f32.mrf.mxu2  ;;  %v10612_v59 = vpop.f32.mrf.mxu0 }
 0xb2c   :  { %v10358_v24 = vadd.f32 %v10339_v25, %v10202_v56  ;;  %v10203_v42 = vpop.f32.mrf.mxu1  ;;  %v10652_v18 = vadd.f32 %v10612_v59, %v20436_v57  ;;  %v11134_v56 = vld [vmem:[#allocation2 + $0x62] sm:$0xff] }
 0xb2d   :  { %v10204_v44 = vadd.f32 %v10203_v42, %v10106_v60  ;;  %v11148_v25 = vpack.c.bf16 %v11135_v31, %v11134_v56 }
 0xb2e   :  { %11108 = vmatmul.bf16.gmra.mxu3 %v10999_v34  ;;  %11227 = vmatmul.bf16.vlgmr.msrb.gmra.mxu0 %v11146_v7 }
 0xb31   :  { %v10493_v6 = vpop.f32.mrf.mxu3 }
 0xb32   :  { %v20539_v49 = vadd.f32 %v10493_v6, %v10358_v24 }
 0xb33   :  { %v10341_v2 = vpop.f32.mrf.mxu2  ;;  %v10614_v20 = vpop.f32.mrf.mxu0 }
 0xb34   :  { %v10359_v62 = vadd.f32 %v10341_v2, %v10204_v44  ;;  %v10766_v8 = vpop.f32.mrf.mxu1  ;;  %v10653_v17 = vadd.f32 %v10614_v20, %v20445_v51 }
 0xb35   :  { %v10806_v16 = vadd.f32 %v10766_v8, %v10652_v18  ;;  %v11137_v18 = vld [vmem:[#allocation2 + $0x92] sm:$0xff] }
 0xb36   :  { %v11149_v20 = vpack.c.bf16 %v11137_v18, %v20466_v48  ;;  %v11138_v48 = vld [vmem:[#allocation2 + $0xc2] sm:$0xff] }
 0xb39   :  { %v10495_v0 = vpop.f32.mrf.mxu3 }
 0xb3a   :  { %v20542_v26 = vadd.f32 %v10495_v0, %v10359_v62 }
 0xb3b   :  { %v10920_v11 = vpop.f32.mrf.mxu2  ;;  %v10617_v32 = vpop.f32.mrf.mxu0 }
 0xb3c   :  { %v10960_v14 = vadd.f32 %v10920_v11, %v10806_v16  ;;  %v10768_v57 = vpop.f32.mrf.mxu1  ;;  %v10654_v19 = vadd.f32 %v10617_v32, %v20451_v23 }
 0xb3d   :  { %v10807_v61 = vadd.f32 %v10768_v57, %v10653_v17 }
 0xb3e   :  { %11232 = vmatmul.bf16.gmra.mxu0 %v11147_v63 }
 0xb41   :  { %v11074_v12 = vpop.f32.mrf.mxu3 }
 0xb42   :  { %v20545_v38 = vadd.f32 %v11074_v12, %v10960_v14 }
 0xb43   :  { %v10922_v28 = vpop.f32.mrf.mxu2  ;;  %v10619_v15 = vpop.f32.mrf.mxu0 }
 0xb44   :  { %v10961_v10 = vadd.f32 %v10922_v28, %v10807_v61  ;;  %v10771_v51 = vpop.f32.mrf.mxu1  ;;  %v10655_v53 = vadd.f32 %v10619_v15, %v20460_v52  ;;  %v11139_v61 = vld [vmem:[#allocation2 + $0xd2] sm:$0xff] }
 0xb45   :  { %v10808_v43 = vadd.f32 %v10771_v51, %v10654_v19  ;;  %v11150_v51 = vpack.c.bf16 %v11139_v61, %v11138_v48 }
 0xb49   :  { %v11076_v40 = vpop.f32.mrf.mxu3 }
 0xb4a   :  { %v20548_v50 = vadd.f32 %v11076_v40, %v10961_v10 }
 0xb4b   :  { %v10925_v4 = vpop.f32.mrf.mxu2  ;;  %v10622_v23 = vpop.f32.mrf.mxu0 }
 0xb4c   :  { %v10962_v3 = vadd.f32 %v10925_v4, %v10808_v43  ;;  %v10773_v60 = vpop.f32.mrf.mxu1  ;;  %v10656_v47 = vadd.f32 %v10622_v23, %v20468_v37 }
 0xb4d   :  { %v10809_v1 = vadd.f32 %v10773_v60, %v10655_v53 }
 0xb4e   :  { %11237 = vmatmul.bf16.gmra.mxu0 %v11148_v25 }
 0xb51   :  { %v11079_v55 = vpop.f32.mrf.mxu3 }
 0xb52   :  { %v20551_v24 = vadd.f32 %v11079_v55, %v10962_v3 }
 0xb53   :  { %v10927_v13 = vpop.f32.mrf.mxu2  ;;  %v10624_v42 = vpop.f32.mrf.mxu0 }
 0xb54   :  { %v10963_v27 = vadd.f32 %v10927_v13, %v10809_v1  ;;  %v10776_v52 = vpop.f32.mrf.mxu1  ;;  %v10657_v46 = vadd.f32 %v10624_v42, %v20479_v22  ;;  %v11145_v13 = vld [vmem:[#allocation2 + $0x132] sm:$0xff] }
 0xb55   :  { %v10810_v59 = vadd.f32 %v10776_v52, %v10656_v47 }
 0xb59   :  { %v11081_v34 = vpop.f32.mrf.mxu3 }
 0xb5a   :  { %v20554_v2 = vadd.f32 %v11081_v34, %v10963_v27 }
 0xb5b   :  { %v10930_v44 = vpop.f32.mrf.mxu2  ;;  %v10627_v37 = vpop.f32.mrf.mxu0 }
 0xb5c   :  { %v10964_v7 = vadd.f32 %v10930_v44, %v10810_v59  ;;  %v10778_v6 = vpop.f32.mrf.mxu1  ;;  %v10658_v8 = vadd.f32 %v10627_v37, %v20485_v29 }
 0xb5d   :  { %v10811_v62 = vadd.f32 %v10778_v6, %v10657_v46 }
 0xb5e   :  { %11242 = vmatmul.bf16.gmra.mxu0 %v11149_v20 }
 0xb61   :  { %v11084_v17 = vpop.f32.mrf.mxu3 }
 0xb62   :  { %v20558_v11 = vadd.f32 %v11084_v17, %v10964_v7 }
 0xb63   :  { %v10932_v16 = vpop.f32.mrf.mxu2  ;;  %v10629_v36 = vpop.f32.mrf.mxu0 }
 0xb64   :  { %v10965_v0 = vadd.f32 %v10932_v16, %v10811_v62  ;;  %v10781_v22 = vpop.f32.mrf.mxu1  ;;  %v10659_v57 = vadd.f32 %v10629_v36, %v20494_v9  ;;  %v20850_v16 = vld [vmem:[#allocation7_spill] sm:$0xff] }
 0xb65   :  { %v10812_v14 = vadd.f32 %v10781_v22, %v10658_v8 }
 0xb69   :  { %v11086_v45 = vpop.f32.mrf.mxu3 }
 0xb6a   :  { %v20561_v63 = vadd.f32 %v11086_v45, %v10965_v0  ;;  %v20851_v45 = vld [vmem:[#allocation8_spill] sm:$0xff] }
 0xb6b   :  { %v10935_v32 = vpop.f32.mrf.mxu2  ;;  %v10632_v28 = vpop.f32.mrf.mxu0 }
 0xb6c   :  { %v10966_v19 = vadd.f32 %v10935_v32, %v10812_v14  ;;  %v10783_v29 = vpop.f32.mrf.mxu1  ;;  %v20564_v10 = vadd.f32 %v10632_v28, %v20500_v33 }
 0xb6d   :  { %v10813_v12 = vadd.f32 %v10783_v29, %v10659_v57 }
 0xb6e   :  { %11247 = vmatmul.bf16.gmra.mxu0 %v11150_v51 }
 0xb71   :  { %v11089_v43 = vpop.f32.mrf.mxu3 }
 0xb72   :  { %v20566_v4 = vadd.f32 %v11089_v43, %v10966_v19 }
 0xb73   :  { %v10937_v15 = vpop.f32.mrf.mxu2  ;;  %v10634_v9 = vpop.f32.mrf.mxu0 }
 0xb74   :  { %v10967_v53 = vadd.f32 %v10937_v15, %v10813_v12  ;;  %v20569_v40 = vadd.f32 %v10634_v9, %v20509_v5  ;;  %v20852_v15 = vld [vmem:[#allocation9_spill] sm:$0xff] }
 0xb79   :  { %v11091_v31 = vpop.f32.mrf.mxu3 }
 0xb7a   :  { %v20571_v3 = vadd.f32 %v11091_v31, %v10967_v53 }
 0xb7b   :  { %v10637_v60 = vpop.f32.mrf.mxu0 }
 0xb7c   :  { %v20574_v23 = vadd.f32 %v10637_v60, %v20515_v35 }
 0xb7e   :  { %11252 = vmatmul.bf16.gmra.mxu0 %v20370_v21  ;;  %v11153_v21 = vpack.c.bf16 %v11145_v13, %v20527_v54  ;;  %v20605_v54 = vld [vmem:[%s20680_s5 + $0xf] ss:$0 sm:$0xff]  ;;  %v20853_v13 = vld [vmem:[#allocation10_spill] sm:$0xff] }
 0xb83   :  { %v10639_v33 = vpop.f32.mrf.mxu0 }
 0xb84   :  { %v20578_v56 = vadd.f32 %v10639_v33, %v20521_v41 }
 0xb8b   :  { %v10642_v1 = vpop.f32.mrf.mxu0 }
 0xb8c   :  { %v20581_v47 = vadd.f32 %v10642_v1, %v20529_v30  ;;  %v10786_v1 = vpop.f32.mrf.mxu1 }
 0xb8e   :  { %11257 = vmatmul.bf16.gmra.mxu0 %v20410_v39  ;;  %v20848_v39 = vld [vmem:[#allocation21_spill] sm:$0xff] }
 0xb93   :  { %v10644_v5 = vpop.f32.mrf.mxu0 }
 0xb94   :  { %v20585_v25 = vadd.f32 %v10644_v5, %v20535_v58  ;;  %v20599_v58 = vld [vmem:[%s20680_s5 + $0xe] ss:$0 sm:$0xff]  ;;  %s15510_s5 = smov [#allocation3]  }
 0xb95   :  { %s11436_s20 = sshll.u32 %s15510_s5, 4  ;;  %s11437_s20 = int_to_ptr.vmem [resolvable:$true] %s11436_s20 }
 0xb9b   :  { %v10647_v55 = vpop.f32.mrf.mxu0 }
 0xb9c   :  { %v20588_v35 = vadd.f32 %v10647_v55, %v20539_v49 }
 0xb9e   :  { %11262 = vmatmul.bf16.gmra.mxu0 %v11153_v21  ;;  %v10940_v21 = vpop.f32.mrf.mxu2 }
 0xba3   :  { %v10649_v41 = vpop.f32.mrf.mxu0 }
 0xba4   :  { %v20592_v27 = vadd.f32 %v10649_v41, %v20542_v26 }
 0xbab   :  { %v11228_v30 = vpop.f32.mrf.mxu0 }
 0xbac   :  { %v11268_v52 = vadd.f32 %v11228_v30, %v20545_v38  ;;  %v20849_v38 = vld [vmem:[#allocation6_spill] sm:$0xff]  ;;  %v11094_v30 = vpop.f32.mrf.mxu3 }
 0xbae   :  { %v11284_v42 = vadd.f32 %v11268_v52, %v20848_v39 }
 0xbb0   :  { %v11305_v49 = vmul.f32 %v20599_v58, %v11284_v42 }
 0xbb2   :  { %v11326_v46 = vadd.f32 %v20605_v54, %v11305_v49 }
 0xbb3   :  { %v11230_v59 = vpop.f32.mrf.mxu0 }
 0xbb4   :  { %v11269_v26 = vadd.f32 %v11230_v59, %v20548_v50  ;;  %v11358_v18 = vmul.f32 0.1, %v11326_v46  ;;  %vm11342_vm0 = vcmp.gt.f32.partialorder %v11326_v46, 0.0 }
 0xbb6   :  { %v11285_v44 = vadd.f32 %v11269_v26, %v20849_v38  ;;  %v11374_v8 = vsel %vm11342_vm0, %v11326_v46, %v11358_v18  ;;  %v20854_v26 = vld [vmem:[#allocation11_spill] sm:$0xff] }
 0xbb8   :  { %v11306_v34 = vmul.f32 %v20599_v58, %v11285_v44 }
 0xbba   :  { %v11327_v7 = vadd.f32 %v20605_v54, %v11306_v34  ;;  %v10942_v34 = vpop.f32.mrf.mxu2 }
 0xbbb   :  { %v11233_v6 = vpop.f32.mrf.mxu0 }
 0xbbc   :  { %vm11343_vm2 = vcmp.gt.f32.partialorder %v11327_v7, 0.0  ;;  %v11359_v37 = vmul.f32 0.1, %v11327_v7  ;;  %v11270_v62 = vadd.f32 %v11233_v6, %v20551_v24 }
 0xbbe   :  { %v11375_v20 = vsel %vm11343_vm2, %v11327_v7, %v11359_v37  ;;  %v11286_v17 = vadd.f32 %v11270_v62, %v20850_v16  ;;  %v11096_v7 = vpop.f32.mrf.mxu3  ;;  %vm11427_vm2 = vcmask 1041409  }
 0xbbf   :  { %v11390_v50 = vadd.f32 %v11375_v20, %v11374_v8  ;;  %v10814_v8 = vadd.f32 %v10786_v1, %v20564_v10 }
 0xbc0   :  { %v11307_v0 = vmul.f32 %v20599_v58, %v11286_v17 }
 0xbc2   :  { %v11328_v22 = vadd.f32 %v20605_v54, %v11307_v0 }
 0xbc3   :  { %v11235_v36 = vpop.f32.mrf.mxu0 }
 0xbc4   :  { %vm11344_vm3 = vcmp.gt.f32.partialorder %v11328_v22, 0.0  ;;  %v11360_v14 = vmul.f32 0.1, %v11328_v22  ;;  %v11271_v57 = vadd.f32 %v11235_v36, %v20554_v2 }
 0xbc6   :  { %v11376_v32 = vsel %vm11344_vm3, %v11328_v22, %v11360_v14  ;;  %v11287_v61 = vadd.f32 %v11271_v57, %v20851_v45  ;;  %v10945_v57 = vpop.f32.mrf.mxu2 }
 0xbc7   :  { %v11391_v19 = vadd.f32 %v11390_v50, %v11376_v32  ;;  %v10968_v50 = vadd.f32 %v10940_v21, %v10814_v8  ;;  %v20859_v8 = vld [vmem:[#allocation16_spill] sm:$0xff] }
 0xbc8   :  { %v11308_v24 = vmul.f32 %v20599_v58, %v11287_v61 }
 0xbc9   :  { %v11122_v36 = vadd.f32 %v11094_v30, %v10968_v50 }
 0xbca   :  { %v11329_v29 = vadd.f32 %v20605_v54, %v11308_v24  ;;  %v20856_v24 = vld [vmem:[#allocation22_spill] sm:$0xff] }
 0xbcb   :  { %v11238_v28 = vpop.f32.mrf.mxu0 }
 0xbcc   :  { %vm11345_vm4 = vcmp.gt.f32.partialorder %v11329_v29, 0.0  ;;  %v11361_v48 = vmul.f32 0.1, %v11329_v29  ;;  %v11272_v12 = vadd.f32 %v11238_v28, %v20558_v11 }
 0xbce   :  { %v11377_v51 = vsel %vm11345_vm4, %v11329_v29, %v11361_v48  ;;  %v11288_v43 = vadd.f32 %v11272_v12, %v20852_v15 }
 0xbcf   :  { %v11392_v53 = vadd.f32 %v11391_v19, %v11377_v51  ;;  %v11099_v19 = vpop.f32.mrf.mxu3 }
 0xbd0   :  { %v11309_v9 = vmul.f32 %v20599_v58, %v11288_v43 }
 0xbd2   :  { %v11330_v2 = vadd.f32 %v20605_v54, %v11309_v9  ;;  %v10947_v9 = vpop.f32.mrf.mxu2 }
 0xbd3   :  { %v11240_v31 = vpop.f32.mrf.mxu0 }
 0xbd4   :  { %vm11346_vm5 = vcmp.gt.f32.partialorder %v11330_v2, 0.0  ;;  %v11362_v60 = vmul.f32 0.1, %v11330_v2  ;;  %v11273_v33 = vadd.f32 %v11240_v31, %v20561_v63  ;;  %v10788_v63 = vpop.f32.mrf.mxu1 }
 0xbd6   :  { %v11378_v5 = vsel %vm11346_vm5, %v11330_v2, %v11362_v60  ;;  %v11289_v55 = vadd.f32 %v11273_v33, %v20853_v13  ;;  %v20857_v60 = vld [vmem:[#allocation14_spill] sm:$0xff] }
 0xbd7   :  { %v11393_v41 = vadd.f32 %v11392_v53, %v11378_v5 }
 0xbd8   :  { %v11310_v11 = vmul.f32 %v20599_v58, %v11289_v55 }
 0xbda   :  { %v11331_v52 = vadd.f32 %v20605_v54, %v11310_v11 }
 0xbdb   :  { %v11243_v39 = vpop.f32.mrf.mxu0 }
 0xbdc   :  { %vm11347_vm6 = vcmp.gt.f32.partialorder %v11331_v52, 0.0  ;;  %v11363_v42 = vmul.f32 0.1, %v11331_v52  ;;  %v11274_v49 = vadd.f32 %v11243_v39, %v20566_v4  ;;  %v20855_v4 = vld [vmem:[#allocation13_spill] sm:$0xff]  ;;  %v10791_v22 = vpop.f32.mrf.mxu1 }
 0xbdd   :  { %v10816_v2 = vadd.f32 %v10791_v22, %v20574_v23 }
 0xbde   :  { %v11379_v59 = vsel %vm11347_vm6, %v11331_v52, %v11363_v42  ;;  %v11290_v46 = vadd.f32 %v11274_v49, %v20854_v26  ;;  %v20858_v49 = vld [vmem:[#allocation15_spill] sm:$0xff]  ;;  %v10950_v26 = vpop.f32.mrf.mxu2 }
 0xbdf   :  { %v11394_v38 = vadd.f32 %v11393_v41, %v11379_v59  ;;  %v10970_v1 = vadd.f32 %v10945_v57, %v10816_v2 }
 0xbe0   :  { %v11311_v44 = vmul.f32 %v20599_v58, %v11290_v46 }
 0xbe1   :  { %v11124_v13 = vadd.f32 %v11099_v19, %v10970_v1  ;;  %v20860_v19 = vld [vmem:[#allocation17_spill] sm:$0xff] }
 0xbe2   :  { %v11332_v18 = vadd.f32 %v20605_v54, %v11311_v44 }
 0xbe3   :  { %v11245_v6 = vpop.f32.mrf.mxu0 }
 0xbe4   :  { %vm11348_vm7 = vcmp.gt.f32.partialorder %v11332_v18, 0.0  ;;  %v11364_v37 = vmul.f32 0.1, %v11332_v18  ;;  %v11275_v62 = vadd.f32 %v11245_v6, %v20571_v3  ;;  %v10815_v3 = vadd.f32 %v10788_v63, %v20569_v40  ;;  %v10793_v15 = vpop.f32.mrf.mxu1  ;;  %v11101_v40 = vpop.f32.mrf.mxu3 }
 0xbe5   :  { %v10817_v23 = vadd.f32 %v10793_v15, %v20578_v56 }
 0xbe6   :  { %v11380_v20 = vsel %vm11348_vm7, %v11332_v18, %v11364_v37  ;;  %v11291_v16 = vadd.f32 %v11275_v62, %v20855_v4  ;;  %v10969_v48 = vadd.f32 %v10942_v34, %v10815_v3 }
 0xbe7   :  { %v11395_v17 = vadd.f32 %v11394_v38, %v11380_v20  ;;  %v10971_v63 = vadd.f32 %v10947_v9, %v10817_v23 }
 0xbe8   :  { %v11312_v0 = vmul.f32 %v20599_v58, %v11291_v16  ;;  %v11123_v12 = vadd.f32 %v11096_v7, %v10969_v48 }
 0xbe9   :  { %v11125_v34 = vadd.f32 %v11101_v40, %v10971_v63  ;;  %v15509_v63 = vmov 64.0  }
 0xbea   :  { %v11333_v14 = vadd.f32 %v20605_v54, %v11312_v0  ;;  %v10952_v0 = vpop.f32.mrf.mxu2  ;;  %15473 = vrcp.f32 %v15509_v63 }
 0xbeb   :  { %v11248_v32 = vpop.f32.mrf.mxu0 }
 0xbec   :  { %vm11349_vm8 = vcmp.gt.f32.partialorder %v11333_v14, 0.0  ;;  %v11365_v45 = vmul.f32 0.1, %v11333_v14  ;;  %v11276_v61 = vadd.f32 %v11248_v32, %v11122_v36  ;;  %v10796_v52 = vpop.f32.mrf.mxu1  ;;  %v11104_v44 = vpop.f32.mrf.mxu3 }
 0xbed   :  { %v10818_v62 = vadd.f32 %v10796_v52, %v20581_v47 }
 0xbee   :  { %v11381_v10 = vsel %vm11349_vm8, %v11333_v14, %v11365_v45  ;;  %v11292_v29 = vadd.f32 %v11276_v61, %v20856_v24 }
 0xbef   :  { %v20639_v28 = vadd.f32 %v11395_v17, %v11381_v10  ;;  %v10972_v17 = vadd.f32 %v10950_v26, %v10818_v62 }
 0xbf0   :  { %v11313_v51 = vmul.f32 %v20599_v58, %v11292_v29 }
 0xbf1   :  { %v11126_v22 = vadd.f32 %v11104_v44, %v10972_v17 }
 0xbf2   :  { %v11334_v31 = vadd.f32 %v20605_v54, %v11313_v51  ;;  %v10955_v15 = vpop.f32.mrf.mxu2 }
 0xbf3   :  { %v11250_v43 = vpop.f32.mrf.mxu0 }
 0xbf4   :  { %v11277_v53 = vadd.f32 %v11250_v43, %v11123_v12  ;;  %v11366_v55 = vmul.f32 0.1, %v11334_v31  ;;  %vm11350_vm9 = vcmp.gt.f32.partialorder %v11334_v31, 0.0  ;;  %v10798_v4 = vpop.f32.mrf.mxu1  ;;  %v11106_v14 = vpop.f32.mrf.mxu3 }
 0xbf5   :  { %v10819_v61 = vadd.f32 %v10798_v4, %v20585_v25 }
 0xbf6   :  { %v11293_v33 = vadd.f32 %v11277_v53, %v20857_v60  ;;  %v11382_v39 = vsel %vm11350_vm9, %v11334_v31, %v11366_v55  ;;  %v20861_v60 = vld [vmem:[#allocation18_spill] sm:$0xff] }
 0xbf7   :  { %v10973_v24 = vadd.f32 %v10952_v0, %v10819_v61 }
 0xbf8   :  { %v11314_v5 = vmul.f32 %v20599_v58, %v11293_v33 }
 0xbf9   :  { %v11127_v12 = vadd.f32 %v11106_v14, %v10973_v24 }
 0xbfa   :  { %v11335_v21 = vadd.f32 %v20605_v54, %v11314_v5  ;;  %v10957_v52 = vpop.f32.mrf.mxu2 }
 0xbfb   :  { %v11253_v41 = vpop.f32.mrf.mxu0 }
 0xbfc   :  { %vm11351_vm10 = vcmp.gt.f32.partialorder %v11335_v21, 0.0  ;;  %v11367_v11 = vmul.f32 0.1, %v11335_v21  ;;  %v11278_v30 = vadd.f32 %v11253_v41, %v11124_v13  ;;  %v10801_v48 = vpop.f32.mrf.mxu1  ;;  %v11109_v2 = vpop.f32.mrf.mxu3 }
 0xbfd   :  { %v10820_v31 = vadd.f32 %v10801_v48, %v20588_v35  ;;  %v20862_v35 = vld [vmem:[#allocation19_spill] sm:$0xff] }
 0xbfe   :  { %v11383_v42 = vsel %vm11351_vm10, %v11335_v21, %v11367_v11  ;;  %v11294_v59 = vadd.f32 %v11278_v30, %v20858_v49 }
 0xbff   :  { %v11403_v46 = vadd.f32 %v11383_v42, %v11382_v39  ;;  %v10974_v1 = vadd.f32 %v10955_v15, %v10820_v31 }
 0xc00   :  { %v11315_v38 = vmul.f32 %v20599_v58, %v11294_v59 }
 0xc01   :  { %v11128_v13 = vadd.f32 %v11109_v2, %v10974_v1 }
 0xc02   :  { %v11336_v18 = vadd.f32 %v20605_v54, %v11315_v38 }
 0xc03   :  { %v11255_v7 = vpop.f32.mrf.mxu0 }
 0xc04   :  { %vm11352_vm11 = vcmp.gt.f32.partialorder %v11336_v18, 0.0  ;;  %v11368_v6 = vmul.f32 0.1, %v11336_v18  ;;  %v11279_v37 = vadd.f32 %v11255_v7, %v11125_v34  ;;  %v10803_v21 = vpop.f32.mrf.mxu1  ;;  %v11111_v49 = vpop.f32.mrf.mxu3 }
 0xc05   :  { %v10821_v23 = vadd.f32 %v10803_v21, %v20592_v27 }
 0xc06   :  { %v11384_v56 = vsel %vm11352_vm11, %v11336_v18, %v11368_v6  ;;  %v11295_v20 = vadd.f32 %v11279_v37, %v20859_v8  ;;  %v11397_v6 = vrot.slane %v20639_v28, 4  ;;  %v20863_v37 = vld [vmem:[#allocation20_spill] sm:$0xff] }
 0xc07   :  { %v11404_v16 = vadd.f32 %v11403_v46, %v11384_v56  ;;  %v10975_v26 = vadd.f32 %v10957_v52, %v10821_v23  ;;  %v15474_v56 = vpop.eup %15473 }
 0xc08   :  { %v11316_v50 = vmul.f32 %v20599_v58, %v11295_v20  ;;  %v11398_v4 = vadd.f32 %v11397_v6, %v20639_v28  ;;  %v11417_v17 = vmul.f32 64.0, %v15474_v56  ;;  %vm11421_vm0 = vweird.f32 %v15474_v56 }
 0xc09   :  { %v11129_v38 = vadd.f32 %v11111_v49, %v10975_v26 }
 0xc0a   :  { %v11337_v36 = vadd.f32 %v20605_v54, %v11316_v50  ;;  %v11399_v0 = vrot.slane %v11398_v4, 2 }
 0xc0b   :  { %v11258_v57 = vpop.f32.mrf.mxu0 }
 0xc0c   :  { %vm11353_vm12 = vcmp.gt.f32.partialorder %v11337_v36, 0.0  ;;  %v11369_v32 = vmul.f32 0.1, %v11337_v36  ;;  %v11280_v45 = vadd.f32 %v11258_v57, %v11126_v22 }
 0xc0e   :  { %v11385_v47 = vsel %vm11353_vm12, %v11337_v36, %v11369_v32  ;;  %v11296_v3 = vadd.f32 %v11280_v45, %v20860_v19  ;;  %v11418_v36 = vsub.f32 1.0, %v11417_v17  ;;  %v11400_v32 = vadd.f32 %v11399_v0, %v11398_v4 }
 0xc0f   :  { %v11405_v10 = vadd.f32 %v11404_v16, %v11385_v47 }
 0xc10   :  { %v11317_v29 = vmul.f32 %v20599_v58, %v11296_v3  ;;  %v11419_v45 = vmul.f32 %v15474_v56, %v11418_v36  ;;  %v11401_v47 = vrot.slane %v11400_v32, 1 }
 0xc12   :  { %v11338_v51 = vadd.f32 %v20605_v54, %v11317_v29  ;;  %v11420_v3 = vadd.f32 %v15474_v56, %v11419_v45 }
 0xc13   :  { %v11260_v43 = vpop.f32.mrf.mxu0 }
 0xc14   :  { %vm11354_vm13 = vcmp.gt.f32.partialorder %v11338_v51, 0.0  ;;  %v11370_v53 = vmul.f32 0.1, %v11338_v51  ;;  %v11281_v9 = vadd.f32 %v11260_v43, %v11127_v12  ;;  %v11422_v24 = vsel %vm11421_vm0, %v15474_v56, %v11420_v3 }
 0xc16   :  { %v11386_v25 = vsel %vm11354_vm13, %v11338_v51, %v11370_v53  ;;  %v11297_v33 = vadd.f32 %v11281_v9, %v20861_v60 }
 0xc17   :  { %v11406_v40 = vadd.f32 %v11405_v10, %v11386_v25 }
 0xc18   :  { %v11318_v5 = vmul.f32 %v20599_v58, %v11297_v33 }
 0xc1a   :  { %v11339_v55 = vadd.f32 %v20605_v54, %v11318_v5 }
 0xc1b   :  { %v11263_v41 = vpop.f32.mrf.mxu0 }
 0xc1c   :  { %vm11355_vm14 = vcmp.gt.f32.partialorder %v11339_v55, 0.0  ;;  %v11371_v11 = vmul.f32 0.1, %v11339_v55  ;;  %v11282_v30 = vadd.f32 %v11263_v41, %v11128_v13 }
 0xc1e   :  { %v11387_v39 = vsel %vm11355_vm14, %v11339_v55, %v11371_v11  ;;  %v11298_v42 = vadd.f32 %v11282_v30, %v20862_v35 }
 0xc1f   :  { %v11407_v59 = vadd.f32 %v11406_v40, %v11387_v39 }
 0xc20   :  { %v11319_v46 = vmul.f32 %v20599_v58, %v11298_v42 }
 0xc22   :  { %v11340_v44 = vadd.f32 %v20605_v54, %v11319_v46 }
 0xc23   :  { %v11265_v34 = vpop.f32.mrf.mxu0 }
 0xc24   :  { %vm11356_vm15 = vcmp.gt.f32.partialorder %v11340_v44, 0.0  ;;  %v11372_v18 = vmul.f32 0.1, %v11340_v44  ;;  %v11283_v7 = vadd.f32 %v11265_v34, %v11129_v38 }
 0xc26   :  { %v11388_v27 = vsel %vm11356_vm15, %v11340_v44, %v11372_v18  ;;  %v11299_v62 = vadd.f32 %v11283_v7, %v20863_v37 }
 0xc27   :  { %v11408_v8 = vadd.f32 %v11407_v59, %v11388_v27 }
 0xc28   :  { %v11320_v20 = vmul.f32 %v20599_v58, %v11299_v62  ;;  %v11402_v58 = vadd.f32 %v11401_v47, %v11400_v32 }
 0xc2a   :  { %v11341_v16 = vadd.f32 %v20605_v54, %v11320_v20  ;;  %v11423_v29 = vmul.f32 %v11422_v24, %v11402_v58 }
 0xc2c   :  { %vm11357_vm1 = vcmp.gt.f32.partialorder %v11341_v16, 0.0  ;;  %v11373_v50 = vmul.f32 0.1, %v11341_v16 }
 0xc2e   :  { %v11389_v22 = vsel %vm11357_vm1, %v11341_v16, %v11373_v50 }
 0xc2f   :  { %v11409_v14 = vadd.f32 %v11408_v8, %v11389_v22 }
 0xc31   :  { %v11410_v57 = vrot.slane %v11409_v14, 4 }
 0xc33   :  { %v11411_v61 = vadd.f32 %v11410_v57, %v11409_v14 }
 0xc35   :  { %v11412_v19 = vrot.slane %v11411_v61, 2 }
 0xc37   :  { %v11413_v10 = vadd.f32 %v11412_v19, %v11411_v61 }
 0xc39   :  { %v11414_v28 = vrot.slane %v11413_v10, 1 }
 0xc3b   :  { %v11415_v54 = vadd.f32 %v11414_v28, %v11413_v10 }
 0xc3d   :  { %v11424_v48 = vmul.f32 %v11422_v24, %v11415_v54 }
 0xc3f   :  { %v11428_v12 = vsel %vm11427_vm2, %v11424_v48, %v11423_v29 }
 0xc40   :  { %11430 = vst [vmem:[#allocation3] sm:$0x3] %v11428_v12 }
 0xc41   :  { %11441 = dma.vmem_to_hbm [thread:$0]  %s11437_s20, 32, %s11439_s22, [#allocation4]  }
 0xc42   :  { %15506 = dma.done.wait [#allocation4], 32  }
 0xc43   :  { %15507 = vsyncadd [#allocation4], 4294967264 }
 0xc44   :  { %11446 = vsyncpa [#allocation4], 1 }

</bundles_post_ra>
